<compile_context>
chip_gen: v6e
topology: v6e:2x2x1
jax: 0.10.0
libtpu: 0.0.40
codegen_flags: <defaults>
</compile_context>

<pallas_src>
import jax
import jax.numpy as jnp
import numpy as np
from jax.experimental import pallas as pl
from jax.experimental.pallas import tpu as pltpu

NEG_SLOPE = 0.01   # LeakyReLU default
LN_EPS = 1e-5      # LayerNorm default


def _leaky(v):
    return jnp.where(v > 0, v, NEG_SLOPE * v)


def make_gnn_kernel(num_layers, pool_scale):
    L = num_layers

    def kernel(
        # per-block (Gb graphs) tensors, leading block dim 1 over graph blocks
        x_ref, ea_ref, S_ref, D_ref, invdeg_ref,
        # resident constants
        P_ref, A_ref, B_ref,
        # resident per-layer weight stacks (full (L, ...) blocks)
        ln_g_ref, ln_b_ref, w1_ref, b1_ref, w2r_ref, b2r_ref, root_ref, cbias_ref,
        # resident head parameters
        dense_w_ref, dense_b_ref, out_w_ref, out_b_ref,
        # output
        o_ref,
    ):
        x = x_ref[0].astype(jnp.float32)        # [GbNg, d] f32
        ea = ea_ref[0]                          # [GbEg, d] bf16
        S = S_ref[0]                            # [GbEg, GbNg] bf16 0/1 gather
        D = D_ref[0]                            # [GbNg, GbEg] bf16 0/1 scatter
        invdeg = invdeg_ref[0]                  # [GbNg, 1] f32

        # Fully-static layer loop: all weights resident, static slices are free.
        for l in range(L):
            # ---- DeepGCN 'res+': LN -> LeakyReLU -> (dropout: identity) -> NNConv -> +x
            mu = jnp.mean(x, axis=-1, keepdims=True)
            var = jnp.mean((x - mu) * (x - mu), axis=-1, keepdims=True)
            h = (x - mu) * jax.lax.rsqrt(var + LN_EPS)
            h = h * ln_g_ref[l] + ln_b_ref[l]
            h = _leaky(h)
            h_bf = h.astype(jnp.bfloat16)

            # edge network hidden layer (MapE2NxN.linear1 + LeakyReLU)
            hid = _leaky(
                jnp.dot(ea, w1_ref[l], preferred_element_type=jnp.float32) + b1_ref[l]
            )                                                       # [GbEg, ffn] f32

            # gather source node features via block-diagonal one-hot matmul (MXU)
            x_src = jnp.dot(S, h_bf, preferred_element_type=jnp.float32)   # [GbEg, d]
            x_src_bf = x_src.astype(jnp.bfloat16)

            # Fused NNConv message (never materializes W = nn(edge_attr) of [E, d*d]):
            #   msg[e,o] = sum_{f,i} hid[e,f]*x_src[e,i]*w2[f, i*d+o] + sum_i x_src[e,i]*b2[i*d+o]
            #            = (z @ w2_r) + (x_src @ b2_r),  z[e, f*d+i] = hid[e,f]*x_src[e,i]
            hid_exp = jnp.dot(hid.astype(jnp.bfloat16), A_ref[...],
                              preferred_element_type=jnp.float32)   # [GbEg, ffn*d]
            xsrc_exp = jnp.dot(x_src_bf, B_ref[...],
                               preferred_element_type=jnp.float32)  # [GbEg, ffn*d]
            z = (hid_exp * xsrc_exp).astype(jnp.bfloat16)
            msg = jnp.dot(z, w2r_ref[l], preferred_element_type=jnp.float32)
            msg = msg + jnp.dot(x_src_bf, b2r_ref[l], preferred_element_type=jnp.float32)

            # mean scatter: 0/1 one-hot scatter on the MXU, f32 1/deg scale on the VPU
            agg = jnp.dot(D, msg.astype(jnp.bfloat16),
                          preferred_element_type=jnp.float32) * invdeg
            conv = agg + jnp.dot(h_bf, root_ref[l],
                                 preferred_element_type=jnp.float32) + cbias_ref[l]
            x = x + conv

        # ---- head: dense -> per-graph mean pool -> LeakyReLU -> (dropout: identity) -> output
        xd = jnp.dot(x.astype(jnp.bfloat16), dense_w_ref[...],
                     preferred_element_type=jnp.float32) + dense_b_ref[...]
        gpool = jnp.dot(P_ref[...], xd.astype(jnp.bfloat16),
                        preferred_element_type=jnp.float32) * pool_scale     # [Gb, d]
        gpool = _leaky(gpool)
        out = jnp.dot(gpool.astype(jnp.bfloat16), out_w_ref[...],
                      preferred_element_type=jnp.float32) + out_b_ref[...]   # [Gb, out]
        o_ref[0] = out.astype(o_ref.dtype)

    return kernel


def gnn_encoder_forward(x, edge_attr, src, dst, batch, num_graphs, params,
                        graphs_per_block=8):
    """Host-side glue (per-block block-diagonal gather/scatter/pool matrices, weight
    reshapes, bf16 casts) + the pallas_call.  Assumes nodes/edges are grouped
    contiguously per graph with uniform per-graph counts."""
    del batch  # implied by the contiguous per-graph grouping
    N, d = x.shape
    E = edge_attr.shape[0]
    G = num_graphs
    L, _, ffn = params["w1"].shape
    out_dim = params["out_w"].shape[1]
    Ng, Eg = N // G, E // G
    Gb = min(graphs_per_block, G)
    assert G % Gb == 0, "num_graphs must be divisible by graphs_per_block"
    nb = G // Gb
    GbNg, GbEg = Gb * Ng, Gb * Eg
    f32, bf16 = jnp.float32, jnp.bfloat16

    # block-diagonal gather / scatter one-hots, one block of Gb graphs per grid step
    node_off = (jnp.arange(nb, dtype=src.dtype) * GbNg)[:, None]
    src_local = src.reshape(nb, GbEg) - node_off
    dst_local = dst.reshape(nb, GbEg) - node_off
    S3 = jax.nn.one_hot(src_local, GbNg, dtype=bf16)                 # [nb, GbEg, GbNg]
    dst_oh = jax.nn.one_hot(dst_local, GbNg, dtype=f32)              # [nb, GbEg, GbNg]
    in_deg = dst_oh.sum(axis=1)                                      # [nb, GbNg]
    D3 = jnp.swapaxes(dst_oh, 1, 2).astype(bf16)                     # [nb, GbNg, GbEg] 0/1
    invdeg3 = (1.0 / jnp.maximum(in_deg, 1.0))[:, :, None].astype(f32)   # [nb, GbNg, 1]

    # per-graph mean-pool selector (0/1; identical for every block -> resident)
    Pmat = (jnp.arange(GbNg)[None, :] // Ng
            == jnp.arange(Gb)[:, None]).astype(bf16)                 # [Gb, GbNg]

    # constant one-hot Kronecker-expansion matrices for the fused message
    cols = jnp.arange(ffn * d)
    A_exp = (cols[None, :] // d == jnp.arange(ffn)[:, None]).astype(bf16)   # [ffn, ffn*d]
    B_exp = (cols[None, :] % d == jnp.arange(d)[:, None]).astype(bf16)      # [d, ffn*d]

    # weight reshapes so the message contraction is a single matmul:
    #   w2_r[l, f*d+i, o] = w2[l, f, i*d+o];  b2_r[l, i, o] = b2[l, 0, i*d+o]
    w2_r = params["w2"].reshape(L, ffn * d, d).astype(bf16)
    b2_r = params["b2"].reshape(L, d, d).astype(bf16)

    args = (
        x.reshape(nb, GbNg, d).astype(f32),
        edge_attr.reshape(nb, GbEg, d).astype(bf16),
        S3, D3, invdeg3,
        Pmat, A_exp, B_exp,
        params["ln_g"].astype(f32), params["ln_b"].astype(f32),
        params["w1"].astype(bf16), params["b1"].astype(f32),
        w2_r, b2_r,
        params["root"].astype(bf16), params["cbias"].astype(f32),
        params["dense_w"].astype(bf16), params["dense_b"].astype(f32),
        params["out_w"].astype(bf16), params["out_b"].astype(f32),
    )

    def resident(shape):                 # same block every grid step (DMA'd once)
        zeros = (0,) * len(shape)
        return pl.BlockSpec(shape, lambda g: zeros)

    def per_block(shape):                # indexed by the parallel graph-block axis
        zeros = (0,) * len(shape)
        return pl.BlockSpec((1,) + shape, lambda g: (g,) + zeros)

    in_specs = [
        per_block((GbNg, d)),        # x
        per_block((GbEg, d)),        # edge_attr
        per_block((GbEg, GbNg)),     # S (gather)
        per_block((GbNg, GbEg)),     # D (0/1 scatter)
        per_block((GbNg, 1)),        # 1 / in_degree (f32)
        resident((Gb, GbNg)),        # P (pool selector)
        resident((ffn, ffn * d)),    # A_exp
        resident((d, ffn * d)),      # B_exp
        resident((L, 1, d)),         # ln_g
        resident((L, 1, d)),         # ln_b
        resident((L, d, ffn)),       # w1
        resident((L, 1, ffn)),       # b1
        resident((L, ffn * d, d)),   # w2_r
        resident((L, d, d)),         # b2_r
        resident((L, d, d)),         # root
        resident((L, 1, d)),         # cbias
        resident((d, d)),            # dense_w
        resident((1, d)),            # dense_b
        resident((d, out_dim)),      # out_w
        resident((1, out_dim)),      # out_b
    ]
    out_spec = pl.BlockSpec((1, Gb, out_dim), lambda g: (g, 0, 0))

    kernel = make_gnn_kernel(L, 1.0 / Ng)
    out3 = pl.pallas_call(
        kernel,
        out_shape=jax.ShapeDtypeStruct((nb, Gb, out_dim), f32),
        grid=(nb,),
        in_specs=in_specs,
        out_specs=out_spec,
        compiler_params=pltpu.CompilerParams(
            dimension_semantics=("parallel",),
        ),
    )(*args)
    return out3.reshape(G, out_dim)


def reference_forward(x, edge_attr, src, dst, batch, num_graphs, params):
    """Pure-JAX f32 reference with real gather/scatter semantics (torch_geometric style)."""
    N, d = x.shape
    L = params["ln_g"].shape[0]
    ones_e = jnp.ones((src.shape[0],), jnp.float32)
    for l in range(L):
        mu = x.mean(-1, keepdims=True)
        var = ((x - mu) ** 2).mean(-1, keepdims=True)
        h = (x - mu) / jnp.sqrt(var + LN_EPS) * params["ln_g"][l, 0] + params["ln_b"][l, 0]
        h = _leaky(h)
        hid = _leaky(edge_attr @ params["w1"][l] + params["b1"][l, 0])
        W = (hid @ params["w2"][l] + params["b2"][l, 0]).reshape(-1, d, d)
        msg = jnp.einsum("ei,eio->eo", h[src], W)
        summ = jax.ops.segment_sum(msg, dst, num_segments=N)
        cnt = jax.ops.segment_sum(ones_e, dst, num_segments=N)
        agg = summ / jnp.maximum(cnt, 1.0)[:, None]
        conv = agg + h @ params["root"][l] + params["cbias"][l, 0]
        x = x + conv
    x = x @ params["dense_w"] + params["dense_b"][0]
    psum = jax.ops.segment_sum(x, batch, num_segments=num_graphs)
    pcnt = jax.ops.segment_sum(jnp.ones((N,), jnp.float32), batch, num_segments=num_graphs)
    g = _leaky(psum / pcnt[:, None])
    return g @ params["out_w"] + params["out_b"][0]


def make_params(key, num_layers, d, ffn, output_dim):
    ks = jax.random.split(key, 16)

    def w(k, shape, fan_in):
        return (jax.random.normal(k, shape, jnp.float32) / np.sqrt(fan_in)).astype(jnp.float32)

    L = num_layers
    return {
        "ln_g": jnp.ones((L, 1, d), jnp.float32) + 0.05 * jax.random.normal(ks[0], (L, 1, d)),
        "ln_b": 0.05 * jax.random.normal(ks[1], (L, 1, d)),
        "w1": w(ks[2], (L, d, ffn), d),
        "b1": 0.05 * jax.random.normal(ks[3], (L, 1, ffn)),
        "w2": w(ks[4], (L, ffn, d * d), ffn),
        "b2": 0.05 * jax.random.normal(ks[5], (L, 1, d * d)),
        "root": w(ks[6], (L, d, d), d),
        "cbias": 0.05 * jax.random.normal(ks[7], (L, 1, d)),
        "dense_w": w(ks[8], (d, d), d),
        "dense_b": 0.05 * jax.random.normal(ks[9], (1, d)),
        "out_w": w(ks[10], (d, output_dim), d),
        "out_b": 0.05 * jax.random.normal(ks[11], (1, output_dim)),
    }


if __name__ == "__main__":
    # 16 graphs of 16 nodes / 32 intra-graph edges each; 8 graphs per grid block
    # -> 128 node rows / 256 edge rows per block, 2 grid steps (even for v7x 2-TC).
    G = 16
    nodes_per_graph, edges_per_graph = 16, 32
    N, E = G * nodes_per_graph, G * edges_per_graph
    d_model, ffn_hidden, num_layers, output_dim = 8, 16, 3, 8

    key = jax.random.PRNGKey(0)
    k_x, k_ea, k_src, k_dst, k_p = jax.random.split(key, 5)

    x = jax.random.normal(k_x, (N, d_model), jnp.float32)
    edge_attr = jax.random.normal(k_ea, (E, d_model), jnp.float32)

    offs = (jnp.arange(G, dtype=jnp.int32) * nodes_per_graph)[:, None]
    src = (jax.random.randint(k_src, (G, edges_per_graph), 0, nodes_per_graph) + offs
           ).reshape(-1).astype(jnp.int32)
    dst = (jax.random.randint(k_dst, (G, edges_per_graph), 0, nodes_per_graph) + offs
           ).reshape(-1).astype(jnp.int32)
    batch = jnp.repeat(jnp.arange(G, dtype=jnp.int32), nodes_per_graph)

    params = make_params(k_p, num_layers, d_model, ffn_hidden, output_dim)

    out = jax.block_until_ready(
        gnn_encoder_forward(x, edge_attr, src, dst, batch, G, params, graphs_per_block=8))

    with jax.default_matmul_precision("highest"):
        ref = jax.block_until_ready(
            reference_forward(x, edge_attr, src, dst, batch, G, params))

    assert out.shape == (G, output_dim)
    assert np.all(np.isfinite(np.asarray(out)))
    # Kernel uses bf16 MXU operands (f32 accumulate) vs a full-f32 "highest" reference;
    # tolerance sized for bf16 rounding over 3 residual layers. Structural bugs are O(1).
    np.testing.assert_allclose(np.asarray(out), np.asarray(ref), rtol=5e-2, atol=1e-1)
    print("KERNEL_OK")
</pallas_src>

<mosaic_0001>
module attributes {stable_mosaic.version = 11 : i64} {
  func.func @kernel(%arg0: i32, %arg1: memref<1x128x8xf32, #tpu.memory_space<vmem>>, %arg2: memref<1x256x8xbf16, #tpu.memory_space<vmem>>, %arg3: memref<1x256x128xbf16, #tpu.memory_space<vmem>>, %arg4: memref<1x128x256xbf16, #tpu.memory_space<vmem>>, %arg5: memref<1x128x1xf32, #tpu.memory_space<vmem>>, %arg6: memref<8x128xbf16, #tpu.memory_space<vmem>>, %arg7: memref<16x128xbf16, #tpu.memory_space<vmem>>, %arg8: memref<8x128xbf16, #tpu.memory_space<vmem>>, %arg9: memref<3x1x8xf32, #tpu.memory_space<vmem>>, %arg10: memref<3x1x8xf32, #tpu.memory_space<vmem>>, %arg11: memref<3x8x16xbf16, #tpu.memory_space<vmem>>, %arg12: memref<3x1x16xf32, #tpu.memory_space<vmem>>, %arg13: memref<3x128x8xbf16, #tpu.memory_space<vmem>>, %arg14: memref<3x8x8xbf16, #tpu.memory_space<vmem>>, %arg15: memref<3x8x8xbf16, #tpu.memory_space<vmem>>, %arg16: memref<3x1x8xf32, #tpu.memory_space<vmem>>, %arg17: memref<8x8xbf16, #tpu.memory_space<vmem>>, %arg18: memref<1x8xf32, #tpu.memory_space<vmem>>, %arg19: memref<8x8xbf16, #tpu.memory_space<vmem>>, %arg20: memref<1x8xf32, #tpu.memory_space<vmem>>, %arg21: memref<1x8x8xf32, #tpu.memory_space<vmem>>) attributes {dimension_semantics = [#tpu.dimension_semantics<parallel>], iteration_bounds = array<i64: 2>, scalar_prefetch = 0 : i64, scratch_operands = 0 : i64, tpu.core_type = #tpu.core_type<tc>, window_params = [{transform_indices = @transform_0, window_bounds = array<i64: 1, 128, 8>}, {transform_indices = @transform_1, window_bounds = array<i64: 1, 256, 8>}, {transform_indices = @transform_2, window_bounds = array<i64: 1, 256, 128>}, {transform_indices = @transform_3, window_bounds = array<i64: 1, 128, 256>}, {transform_indices = @transform_4, window_bounds = array<i64: 1, 128, 1>}, {pipeline_mode = #tpu.pipeline_mode<synchronous>, transform_indices = @transform_5, window_bounds = array<i64: 8, 128>}, {pipeline_mode = #tpu.pipeline_mode<synchronous>, transform_indices = @transform_6, window_bounds = array<i64: 16, 128>}, {pipeline_mode = #tpu.pipeline_mode<synchronous>, transform_indices = @transform_7, window_bounds = array<i64: 8, 128>}, {pipeline_mode = #tpu.pipeline_mode<synchronous>, transform_indices = @transform_8, window_bounds = array<i64: 3, 1, 8>}, {pipeline_mode = #tpu.pipeline_mode<synchronous>, transform_indices = @transform_9, window_bounds = array<i64: 3, 1, 8>}, {pipeline_mode = #tpu.pipeline_mode<synchronous>, transform_indices = @transform_10, window_bounds = array<i64: 3, 8, 16>}, {pipeline_mode = #tpu.pipeline_mode<synchronous>, transform_indices = @transform_11, window_bounds = array<i64: 3, 1, 16>}, {pipeline_mode = #tpu.pipeline_mode<synchronous>, transform_indices = @transform_12, window_bounds = array<i64: 3, 128, 8>}, {pipeline_mode = #tpu.pipeline_mode<synchronous>, transform_indices = @transform_13, window_bounds = array<i64: 3, 8, 8>}, {pipeline_mode = #tpu.pipeline_mode<synchronous>, transform_indices = @transform_14, window_bounds = array<i64: 3, 8, 8>}, {pipeline_mode = #tpu.pipeline_mode<synchronous>, transform_indices = @transform_15, window_bounds = array<i64: 3, 1, 8>}, {pipeline_mode = #tpu.pipeline_mode<synchronous>, transform_indices = @transform_16, window_bounds = array<i64: 8, 8>}, {pipeline_mode = #tpu.pipeline_mode<synchronous>, transform_indices = @transform_17, window_bounds = array<i64: 1, 8>}, {pipeline_mode = #tpu.pipeline_mode<synchronous>, transform_indices = @transform_18, window_bounds = array<i64: 8, 8>}, {pipeline_mode = #tpu.pipeline_mode<synchronous>, transform_indices = @transform_19, window_bounds = array<i64: 1, 8>}, {transform_indices = @transform_20, window_bounds = array<i64: 1, 8, 8>}]} {
    %c0 = arith.constant 0 : index
    %c0_0 = arith.constant 0 : index
    %c0_1 = arith.constant 0 : index
    %0 = vector.load %arg1[%c0, %c0_0, %c0_1] : memref<1x128x8xf32, #tpu.memory_space<vmem>>, vector<1x128x8xf32>
    %1 = vector.shape_cast %0 : vector<1x128x8xf32> to vector<128x8xf32>
    %c0_2 = arith.constant 0 : index
    %c0_3 = arith.constant 0 : index
    %c0_4 = arith.constant 0 : index
    %2 = vector.load %arg2[%c0_2, %c0_3, %c0_4] : memref<1x256x8xbf16, #tpu.memory_space<vmem>>, vector<1x256x8xbf16>
    %3 = vector.shape_cast %2 : vector<1x256x8xbf16> to vector<256x8xbf16>
    %c0_5 = arith.constant 0 : index
    %c0_6 = arith.constant 0 : index
    %c0_7 = arith.constant 0 : index
    %4 = vector.load %arg3[%c0_5, %c0_6, %c0_7] : memref<1x256x128xbf16, #tpu.memory_space<vmem>>, vector<1x256x128xbf16>
    %5 = vector.shape_cast %4 : vector<1x256x128xbf16> to vector<256x128xbf16>
    %c0_8 = arith.constant 0 : index
    %c0_9 = arith.constant 0 : index
    %c0_10 = arith.constant 0 : index
    %6 = vector.load %arg4[%c0_8, %c0_9, %c0_10] : memref<1x128x256xbf16, #tpu.memory_space<vmem>>, vector<1x128x256xbf16>
    %7 = vector.shape_cast %6 : vector<1x128x256xbf16> to vector<128x256xbf16>
    %c0_11 = arith.constant 0 : index
    %c0_12 = arith.constant 0 : index
    %c0_13 = arith.constant 0 : index
    %8 = vector.load %arg5[%c0_11, %c0_12, %c0_13] : memref<1x128x1xf32, #tpu.memory_space<vmem>>, vector<1x128x1xf32>
    %9 = vector.shape_cast %8 : vector<1x128x1xf32> to vector<128x1xf32>
    %cst = arith.constant dense<0.000000e+00> : vector<128xf32>
    %10 = vector.multi_reduction <add>, %1, %cst [1] : vector<128x8xf32> to vector<128xf32>
    %11 = vector.shape_cast %10 : vector<128xf32> to vector<128x1xf32>
    %cst_14 = arith.constant 8.000000e+00 : f32
    %12 = vector.broadcast %cst_14 : f32 to vector<128x1xf32>
    %13 = arith.divf %11, %12 : vector<128x1xf32>
    %14 = vector.broadcast %13 : vector<128x1xf32> to vector<128x8xf32>
    %15 = arith.subf %1, %14 : vector<128x8xf32>
    %16 = vector.broadcast %13 : vector<128x1xf32> to vector<128x8xf32>
    %17 = arith.subf %1, %16 : vector<128x8xf32>
    %18 = arith.mulf %15, %17 : vector<128x8xf32>
    %cst_15 = arith.constant dense<0.000000e+00> : vector<128xf32>
    %19 = vector.multi_reduction <add>, %18, %cst_15 [1] : vector<128x8xf32> to vector<128xf32>
    %20 = vector.shape_cast %19 : vector<128xf32> to vector<128x1xf32>
    %cst_16 = arith.constant 8.000000e+00 : f32
    %21 = vector.broadcast %cst_16 : f32 to vector<128x1xf32>
    %22 = arith.divf %20, %21 : vector<128x1xf32>
    %23 = vector.broadcast %13 : vector<128x1xf32> to vector<128x8xf32>
    %24 = arith.subf %1, %23 : vector<128x8xf32>
    %cst_17 = arith.constant 9.99999974E-6 : f32
    %25 = vector.broadcast %cst_17 : f32 to vector<128x1xf32>
    %26 = arith.addf %22, %25 : vector<128x1xf32>
    %27 = math.rsqrt %26 : vector<128x1xf32>
    %28 = vector.broadcast %27 : vector<128x1xf32> to vector<128x8xf32>
    %29 = arith.mulf %24, %28 : vector<128x8xf32>
    %c0_18 = arith.constant 0 : index
    %c0_19 = arith.constant 0 : index
    %c0_20 = arith.constant 0 : index
    %30 = vector.load %arg9[%c0_18, %c0_19, %c0_20] : memref<3x1x8xf32, #tpu.memory_space<vmem>>, vector<1x1x8xf32>
    %31 = vector.shape_cast %30 : vector<1x1x8xf32> to vector<1x8xf32>
    %32 = vector.broadcast %31 : vector<1x8xf32> to vector<128x8xf32>
    %33 = arith.mulf %29, %32 : vector<128x8xf32>
    %c0_21 = arith.constant 0 : index
    %c0_22 = arith.constant 0 : index
    %c0_23 = arith.constant 0 : index
    %34 = vector.load %arg10[%c0_21, %c0_22, %c0_23] : memref<3x1x8xf32, #tpu.memory_space<vmem>>, vector<1x1x8xf32>
    %35 = vector.shape_cast %34 : vector<1x1x8xf32> to vector<1x8xf32>
    %36 = vector.broadcast %35 : vector<1x8xf32> to vector<128x8xf32>
    %37 = arith.addf %33, %36 : vector<128x8xf32>
    %cst_24 = arith.constant 0.000000e+00 : f32
    %38 = vector.broadcast %cst_24 : f32 to vector<128x8xf32>
    %39 = arith.cmpf ogt, %37, %38 : vector<128x8xf32>
    %cst_25 = arith.constant 0.00999999977 : f32
    %40 = vector.broadcast %cst_25 : f32 to vector<128x8xf32>
    %41 = arith.mulf %40, %37 : vector<128x8xf32>
    %42 = arith.select %39, %37, %41 : vector<128x8xi1>, vector<128x8xf32>
    %43 = arith.truncf %42 : vector<128x8xf32> to vector<128x8xbf16>
    %c0_26 = arith.constant 0 : index
    %c0_27 = arith.constant 0 : index
    %c0_28 = arith.constant 0 : index
    %44 = vector.load %arg11[%c0_26, %c0_27, %c0_28] : memref<3x8x16xbf16, #tpu.memory_space<vmem>>, vector<1x8x16xbf16>
    %45 = vector.shape_cast %44 : vector<1x8x16xbf16> to vector<8x16xbf16>
    %cst_29 = arith.constant dense<0.000000e+00> : vector<256x16xf32>
    %46 = tpu.matmul %3, %45, %cst_29 {dimension_numbers = #tpu.dot_dimension_numbers<[1], [0], [0], [1], [0, 0, 1, 1], [], []>} : vector<256x8xbf16>, vector<8x16xbf16>, vector<256x16xf32> -> vector<256x16xf32>
    %c0_30 = arith.constant 0 : index
    %c0_31 = arith.constant 0 : index
    %c0_32 = arith.constant 0 : index
    %47 = vector.load %arg12[%c0_30, %c0_31, %c0_32] : memref<3x1x16xf32, #tpu.memory_space<vmem>>, vector<1x1x16xf32>
    %48 = vector.shape_cast %47 : vector<1x1x16xf32> to vector<1x16xf32>
    %49 = vector.broadcast %48 : vector<1x16xf32> to vector<256x16xf32>
    %50 = arith.addf %46, %49 : vector<256x16xf32>
    %cst_33 = arith.constant 0.000000e+00 : f32
    %51 = vector.broadcast %cst_33 : f32 to vector<256x16xf32>
    %52 = arith.cmpf ogt, %50, %51 : vector<256x16xf32>
    %cst_34 = arith.constant 0.00999999977 : f32
    %53 = vector.broadcast %cst_34 : f32 to vector<256x16xf32>
    %54 = arith.mulf %53, %50 : vector<256x16xf32>
    %55 = arith.select %52, %50, %54 : vector<256x16xi1>, vector<256x16xf32>
    %cst_35 = arith.constant dense<0.000000e+00> : vector<256x8xf32>
    %56 = tpu.matmul %5, %43, %cst_35 {dimension_numbers = #tpu.dot_dimension_numbers<[1], [0], [0], [1], [0, 0, 1, 1], [], []>} : vector<256x128xbf16>, vector<128x8xbf16>, vector<256x8xf32> -> vector<256x8xf32>
    %57 = arith.truncf %56 : vector<256x8xf32> to vector<256x8xbf16>
    %58 = arith.truncf %55 : vector<256x16xf32> to vector<256x16xbf16>
    %c0_36 = arith.constant 0 : index
    %c0_37 = arith.constant 0 : index
    %59 = vector.load %arg7[%c0_36, %c0_37] : memref<16x128xbf16, #tpu.memory_space<vmem>>, vector<16x128xbf16>
    %cst_38 = arith.constant dense<0.000000e+00> : vector<256x128xf32>
    %60 = tpu.matmul %58, %59, %cst_38 {dimension_numbers = #tpu.dot_dimension_numbers<[1], [0], [0], [1], [0, 0, 1, 1], [], []>} : vector<256x16xbf16>, vector<16x128xbf16>, vector<256x128xf32> -> vector<256x128xf32>
    %c0_39 = arith.constant 0 : index
    %c0_40 = arith.constant 0 : index
    %61 = vector.load %arg8[%c0_39, %c0_40] : memref<8x128xbf16, #tpu.memory_space<vmem>>, vector<8x128xbf16>
    %cst_41 = arith.constant dense<0.000000e+00> : vector<256x128xf32>
    %62 = tpu.matmul %57, %61, %cst_41 {dimension_numbers = #tpu.dot_dimension_numbers<[1], [0], [0], [1], [0, 0, 1, 1], [], []>} : vector<256x8xbf16>, vector<8x128xbf16>, vector<256x128xf32> -> vector<256x128xf32>
    %63 = arith.mulf %60, %62 : vector<256x128xf32>
    %64 = arith.truncf %63 : vector<256x128xf32> to vector<256x128xbf16>
    %c0_42 = arith.constant 0 : index
    %c0_43 = arith.constant 0 : index
    %c0_44 = arith.constant 0 : index
    %65 = vector.load %arg13[%c0_42, %c0_43, %c0_44] : memref<3x128x8xbf16, #tpu.memory_space<vmem>>, vector<1x128x8xbf16>
    %66 = vector.shape_cast %65 : vector<1x128x8xbf16> to vector<128x8xbf16>
    %cst_45 = arith.constant dense<0.000000e+00> : vector<256x8xf32>
    %67 = tpu.matmul %64, %66, %cst_45 {dimension_numbers = #tpu.dot_dimension_numbers<[1], [0], [0], [1], [0, 0, 1, 1], [], []>} : vector<256x128xbf16>, vector<128x8xbf16>, vector<256x8xf32> -> vector<256x8xf32>
    %c0_46 = arith.constant 0 : index
    %c0_47 = arith.constant 0 : index
    %c0_48 = arith.constant 0 : index
    %68 = vector.load %arg14[%c0_46, %c0_47, %c0_48] : memref<3x8x8xbf16, #tpu.memory_space<vmem>>, vector<1x8x8xbf16>
    %69 = vector.shape_cast %68 : vector<1x8x8xbf16> to vector<8x8xbf16>
    %cst_49 = arith.constant dense<0.000000e+00> : vector<256x8xf32>
    %70 = tpu.matmul %57, %69, %cst_49 {dimension_numbers = #tpu.dot_dimension_numbers<[1], [0], [0], [1], [0, 0, 1, 1], [], []>} : vector<256x8xbf16>, vector<8x8xbf16>, vector<256x8xf32> -> vector<256x8xf32>
    %71 = arith.addf %67, %70 : vector<256x8xf32>
    %72 = arith.truncf %71 : vector<256x8xf32> to vector<256x8xbf16>
    %cst_50 = arith.constant dense<0.000000e+00> : vector<128x8xf32>
    %73 = tpu.matmul %7, %72, %cst_50 {dimension_numbers = #tpu.dot_dimension_numbers<[1], [0], [0], [1], [0, 0, 1, 1], [], []>} : vector<128x256xbf16>, vector<256x8xbf16>, vector<128x8xf32> -> vector<128x8xf32>
    %74 = vector.broadcast %9 : vector<128x1xf32> to vector<128x8xf32>
    %75 = arith.mulf %73, %74 : vector<128x8xf32>
    %c0_51 = arith.constant 0 : index
    %c0_52 = arith.constant 0 : index
    %c0_53 = arith.constant 0 : index
    %76 = vector.load %arg15[%c0_51, %c0_52, %c0_53] : memref<3x8x8xbf16, #tpu.memory_space<vmem>>, vector<1x8x8xbf16>
    %77 = vector.shape_cast %76 : vector<1x8x8xbf16> to vector<8x8xbf16>
    %cst_54 = arith.constant dense<0.000000e+00> : vector<128x8xf32>
    %78 = tpu.matmul %43, %77, %cst_54 {dimension_numbers = #tpu.dot_dimension_numbers<[1], [0], [0], [1], [0, 0, 1, 1], [], []>} : vector<128x8xbf16>, vector<8x8xbf16>, vector<128x8xf32> -> vector<128x8xf32>
    %79 = arith.addf %75, %78 : vector<128x8xf32>
    %c0_55 = arith.constant 0 : index
    %c0_56 = arith.constant 0 : index
    %c0_57 = arith.constant 0 : index
    %80 = vector.load %arg16[%c0_55, %c0_56, %c0_57] : memref<3x1x8xf32, #tpu.memory_space<vmem>>, vector<1x1x8xf32>
    %81 = vector.shape_cast %80 : vector<1x1x8xf32> to vector<1x8xf32>
    %82 = vector.broadcast %81 : vector<1x8xf32> to vector<128x8xf32>
    %83 = arith.addf %79, %82 : vector<128x8xf32>
    %84 = arith.addf %1, %83 : vector<128x8xf32>
    %cst_58 = arith.constant dense<0.000000e+00> : vector<128xf32>
    %85 = vector.multi_reduction <add>, %84, %cst_58 [1] : vector<128x8xf32> to vector<128xf32>
    %86 = vector.shape_cast %85 : vector<128xf32> to vector<128x1xf32>
    %cst_59 = arith.constant 8.000000e+00 : f32
    %87 = vector.broadcast %cst_59 : f32 to vector<128x1xf32>
    %88 = arith.divf %86, %87 : vector<128x1xf32>
    %89 = vector.broadcast %88 : vector<128x1xf32> to vector<128x8xf32>
    %90 = arith.subf %84, %89 : vector<128x8xf32>
    %91 = vector.broadcast %88 : vector<128x1xf32> to vector<128x8xf32>
    %92 = arith.subf %84, %91 : vector<128x8xf32>
    %93 = arith.mulf %90, %92 : vector<128x8xf32>
    %cst_60 = arith.constant dense<0.000000e+00> : vector<128xf32>
    %94 = vector.multi_reduction <add>, %93, %cst_60 [1] : vector<128x8xf32> to vector<128xf32>
    %95 = vector.shape_cast %94 : vector<128xf32> to vector<128x1xf32>
    %cst_61 = arith.constant 8.000000e+00 : f32
    %96 = vector.broadcast %cst_61 : f32 to vector<128x1xf32>
    %97 = arith.divf %95, %96 : vector<128x1xf32>
    %98 = vector.broadcast %88 : vector<128x1xf32> to vector<128x8xf32>
    %99 = arith.subf %84, %98 : vector<128x8xf32>
    %cst_62 = arith.constant 9.99999974E-6 : f32
    %100 = vector.broadcast %cst_62 : f32 to vector<128x1xf32>
    %101 = arith.addf %97, %100 : vector<128x1xf32>
    %102 = math.rsqrt %101 : vector<128x1xf32>
    %103 = vector.broadcast %102 : vector<128x1xf32> to vector<128x8xf32>
    %104 = arith.mulf %99, %103 : vector<128x8xf32>
    %c1 = arith.constant 1 : index
    %c0_63 = arith.constant 0 : index
    %c0_64 = arith.constant 0 : index
    %105 = vector.load %arg9[%c1, %c0_63, %c0_64] : memref<3x1x8xf32, #tpu.memory_space<vmem>>, vector<1x1x8xf32>
    %106 = vector.shape_cast %105 : vector<1x1x8xf32> to vector<1x8xf32>
    %107 = vector.broadcast %106 : vector<1x8xf32> to vector<128x8xf32>
    %108 = arith.mulf %104, %107 : vector<128x8xf32>
    %c1_65 = arith.constant 1 : index
    %c0_66 = arith.constant 0 : index
    %c0_67 = arith.constant 0 : index
    %109 = vector.load %arg10[%c1_65, %c0_66, %c0_67] : memref<3x1x8xf32, #tpu.memory_space<vmem>>, vector<1x1x8xf32>
    %110 = vector.shape_cast %109 : vector<1x1x8xf32> to vector<1x8xf32>
    %111 = vector.broadcast %110 : vector<1x8xf32> to vector<128x8xf32>
    %112 = arith.addf %108, %111 : vector<128x8xf32>
    %cst_68 = arith.constant 0.000000e+00 : f32
    %113 = vector.broadcast %cst_68 : f32 to vector<128x8xf32>
    %114 = arith.cmpf ogt, %112, %113 : vector<128x8xf32>
    %cst_69 = arith.constant 0.00999999977 : f32
    %115 = vector.broadcast %cst_69 : f32 to vector<128x8xf32>
    %116 = arith.mulf %115, %112 : vector<128x8xf32>
    %117 = arith.select %114, %112, %116 : vector<128x8xi1>, vector<128x8xf32>
    %118 = arith.truncf %117 : vector<128x8xf32> to vector<128x8xbf16>
    %c1_70 = arith.constant 1 : index
    %c0_71 = arith.constant 0 : index
    %c0_72 = arith.constant 0 : index
    %119 = vector.load %arg11[%c1_70, %c0_71, %c0_72] : memref<3x8x16xbf16, #tpu.memory_space<vmem>>, vector<1x8x16xbf16>
    %120 = vector.shape_cast %119 : vector<1x8x16xbf16> to vector<8x16xbf16>
    %cst_73 = arith.constant dense<0.000000e+00> : vector<256x16xf32>
    %121 = tpu.matmul %3, %120, %cst_73 {dimension_numbers = #tpu.dot_dimension_numbers<[1], [0], [0], [1], [0, 0, 1, 1], [], []>} : vector<256x8xbf16>, vector<8x16xbf16>, vector<256x16xf32> -> vector<256x16xf32>
    %c1_74 = arith.constant 1 : index
    %c0_75 = arith.constant 0 : index
    %c0_76 = arith.constant 0 : index
    %122 = vector.load %arg12[%c1_74, %c0_75, %c0_76] : memref<3x1x16xf32, #tpu.memory_space<vmem>>, vector<1x1x16xf32>
    %123 = vector.shape_cast %122 : vector<1x1x16xf32> to vector<1x16xf32>
    %124 = vector.broadcast %123 : vector<1x16xf32> to vector<256x16xf32>
    %125 = arith.addf %121, %124 : vector<256x16xf32>
    %cst_77 = arith.constant 0.000000e+00 : f32
    %126 = vector.broadcast %cst_77 : f32 to vector<256x16xf32>
    %127 = arith.cmpf ogt, %125, %126 : vector<256x16xf32>
    %cst_78 = arith.constant 0.00999999977 : f32
    %128 = vector.broadcast %cst_78 : f32 to vector<256x16xf32>
    %129 = arith.mulf %128, %125 : vector<256x16xf32>
    %130 = arith.select %127, %125, %129 : vector<256x16xi1>, vector<256x16xf32>
    %cst_79 = arith.constant dense<0.000000e+00> : vector<256x8xf32>
    %131 = tpu.matmul %5, %118, %cst_79 {dimension_numbers = #tpu.dot_dimension_numbers<[1], [0], [0], [1], [0, 0, 1, 1], [], []>} : vector<256x128xbf16>, vector<128x8xbf16>, vector<256x8xf32> -> vector<256x8xf32>
    %132 = arith.truncf %131 : vector<256x8xf32> to vector<256x8xbf16>
    %133 = arith.truncf %130 : vector<256x16xf32> to vector<256x16xbf16>
    %c0_80 = arith.constant 0 : index
    %c0_81 = arith.constant 0 : index
    %134 = vector.load %arg7[%c0_80, %c0_81] : memref<16x128xbf16, #tpu.memory_space<vmem>>, vector<16x128xbf16>
    %cst_82 = arith.constant dense<0.000000e+00> : vector<256x128xf32>
    %135 = tpu.matmul %133, %134, %cst_82 {dimension_numbers = #tpu.dot_dimension_numbers<[1], [0], [0], [1], [0, 0, 1, 1], [], []>} : vector<256x16xbf16>, vector<16x128xbf16>, vector<256x128xf32> -> vector<256x128xf32>
    %c0_83 = arith.constant 0 : index
    %c0_84 = arith.constant 0 : index
    %136 = vector.load %arg8[%c0_83, %c0_84] : memref<8x128xbf16, #tpu.memory_space<vmem>>, vector<8x128xbf16>
    %cst_85 = arith.constant dense<0.000000e+00> : vector<256x128xf32>
    %137 = tpu.matmul %132, %136, %cst_85 {dimension_numbers = #tpu.dot_dimension_numbers<[1], [0], [0], [1], [0, 0, 1, 1], [], []>} : vector<256x8xbf16>, vector<8x128xbf16>, vector<256x128xf32> -> vector<256x128xf32>
    %138 = arith.mulf %135, %137 : vector<256x128xf32>
    %139 = arith.truncf %138 : vector<256x128xf32> to vector<256x128xbf16>
    %c1_86 = arith.constant 1 : index
    %c0_87 = arith.constant 0 : index
    %c0_88 = arith.constant 0 : index
    %140 = vector.load %arg13[%c1_86, %c0_87, %c0_88] : memref<3x128x8xbf16, #tpu.memory_space<vmem>>, vector<1x128x8xbf16>
    %141 = vector.shape_cast %140 : vector<1x128x8xbf16> to vector<128x8xbf16>
    %cst_89 = arith.constant dense<0.000000e+00> : vector<256x8xf32>
    %142 = tpu.matmul %139, %141, %cst_89 {dimension_numbers = #tpu.dot_dimension_numbers<[1], [0], [0], [1], [0, 0, 1, 1], [], []>} : vector<256x128xbf16>, vector<128x8xbf16>, vector<256x8xf32> -> vector<256x8xf32>
    %c1_90 = arith.constant 1 : index
    %c0_91 = arith.constant 0 : index
    %c0_92 = arith.constant 0 : index
    %143 = vector.load %arg14[%c1_90, %c0_91, %c0_92] : memref<3x8x8xbf16, #tpu.memory_space<vmem>>, vector<1x8x8xbf16>
    %144 = vector.shape_cast %143 : vector<1x8x8xbf16> to vector<8x8xbf16>
    %cst_93 = arith.constant dense<0.000000e+00> : vector<256x8xf32>
    %145 = tpu.matmul %132, %144, %cst_93 {dimension_numbers = #tpu.dot_dimension_numbers<[1], [0], [0], [1], [0, 0, 1, 1], [], []>} : vector<256x8xbf16>, vector<8x8xbf16>, vector<256x8xf32> -> vector<256x8xf32>
    %146 = arith.addf %142, %145 : vector<256x8xf32>
    %147 = arith.truncf %146 : vector<256x8xf32> to vector<256x8xbf16>
    %cst_94 = arith.constant dense<0.000000e+00> : vector<128x8xf32>
    %148 = tpu.matmul %7, %147, %cst_94 {dimension_numbers = #tpu.dot_dimension_numbers<[1], [0], [0], [1], [0, 0, 1, 1], [], []>} : vector<128x256xbf16>, vector<256x8xbf16>, vector<128x8xf32> -> vector<128x8xf32>
    %149 = vector.broadcast %9 : vector<128x1xf32> to vector<128x8xf32>
    %150 = arith.mulf %148, %149 : vector<128x8xf32>
    %c1_95 = arith.constant 1 : index
    %c0_96 = arith.constant 0 : index
    %c0_97 = arith.constant 0 : index
    %151 = vector.load %arg15[%c1_95, %c0_96, %c0_97] : memref<3x8x8xbf16, #tpu.memory_space<vmem>>, vector<1x8x8xbf16>
    %152 = vector.shape_cast %151 : vector<1x8x8xbf16> to vector<8x8xbf16>
    %cst_98 = arith.constant dense<0.000000e+00> : vector<128x8xf32>
    %153 = tpu.matmul %118, %152, %cst_98 {dimension_numbers = #tpu.dot_dimension_numbers<[1], [0], [0], [1], [0, 0, 1, 1], [], []>} : vector<128x8xbf16>, vector<8x8xbf16>, vector<128x8xf32> -> vector<128x8xf32>
    %154 = arith.addf %150, %153 : vector<128x8xf32>
    %c1_99 = arith.constant 1 : index
    %c0_100 = arith.constant 0 : index
    %c0_101 = arith.constant 0 : index
    %155 = vector.load %arg16[%c1_99, %c0_100, %c0_101] : memref<3x1x8xf32, #tpu.memory_space<vmem>>, vector<1x1x8xf32>
    %156 = vector.shape_cast %155 : vector<1x1x8xf32> to vector<1x8xf32>
    %157 = vector.broadcast %156 : vector<1x8xf32> to vector<128x8xf32>
    %158 = arith.addf %154, %157 : vector<128x8xf32>
    %159 = arith.addf %84, %158 : vector<128x8xf32>
    %cst_102 = arith.constant dense<0.000000e+00> : vector<128xf32>
    %160 = vector.multi_reduction <add>, %159, %cst_102 [1] : vector<128x8xf32> to vector<128xf32>
    %161 = vector.shape_cast %160 : vector<128xf32> to vector<128x1xf32>
    %cst_103 = arith.constant 8.000000e+00 : f32
    %162 = vector.broadcast %cst_103 : f32 to vector<128x1xf32>
    %163 = arith.divf %161, %162 : vector<128x1xf32>
    %164 = vector.broadcast %163 : vector<128x1xf32> to vector<128x8xf32>
    %165 = arith.subf %159, %164 : vector<128x8xf32>
    %166 = vector.broadcast %163 : vector<128x1xf32> to vector<128x8xf32>
    %167 = arith.subf %159, %166 : vector<128x8xf32>
    %168 = arith.mulf %165, %167 : vector<128x8xf32>
    %cst_104 = arith.constant dense<0.000000e+00> : vector<128xf32>
    %169 = vector.multi_reduction <add>, %168, %cst_104 [1] : vector<128x8xf32> to vector<128xf32>
    %170 = vector.shape_cast %169 : vector<128xf32> to vector<128x1xf32>
    %cst_105 = arith.constant 8.000000e+00 : f32
    %171 = vector.broadcast %cst_105 : f32 to vector<128x1xf32>
    %172 = arith.divf %170, %171 : vector<128x1xf32>
    %173 = vector.broadcast %163 : vector<128x1xf32> to vector<128x8xf32>
    %174 = arith.subf %159, %173 : vector<128x8xf32>
    %cst_106 = arith.constant 9.99999974E-6 : f32
    %175 = vector.broadcast %cst_106 : f32 to vector<128x1xf32>
    %176 = arith.addf %172, %175 : vector<128x1xf32>
    %177 = math.rsqrt %176 : vector<128x1xf32>
    %178 = vector.broadcast %177 : vector<128x1xf32> to vector<128x8xf32>
    %179 = arith.mulf %174, %178 : vector<128x8xf32>
    %c2 = arith.constant 2 : index
    %c0_107 = arith.constant 0 : index
    %c0_108 = arith.constant 0 : index
    %180 = vector.load %arg9[%c2, %c0_107, %c0_108] : memref<3x1x8xf32, #tpu.memory_space<vmem>>, vector<1x1x8xf32>
    %181 = vector.shape_cast %180 : vector<1x1x8xf32> to vector<1x8xf32>
    %182 = vector.broadcast %181 : vector<1x8xf32> to vector<128x8xf32>
    %183 = arith.mulf %179, %182 : vector<128x8xf32>
    %c2_109 = arith.constant 2 : index
    %c0_110 = arith.constant 0 : index
    %c0_111 = arith.constant 0 : index
    %184 = vector.load %arg10[%c2_109, %c0_110, %c0_111] : memref<3x1x8xf32, #tpu.memory_space<vmem>>, vector<1x1x8xf32>
    %185 = vector.shape_cast %184 : vector<1x1x8xf32> to vector<1x8xf32>
    %186 = vector.broadcast %185 : vector<1x8xf32> to vector<128x8xf32>
    %187 = arith.addf %183, %186 : vector<128x8xf32>
    %cst_112 = arith.constant 0.000000e+00 : f32
    %188 = vector.broadcast %cst_112 : f32 to vector<128x8xf32>
    %189 = arith.cmpf ogt, %187, %188 : vector<128x8xf32>
    %cst_113 = arith.constant 0.00999999977 : f32
    %190 = vector.broadcast %cst_113 : f32 to vector<128x8xf32>
    %191 = arith.mulf %190, %187 : vector<128x8xf32>
    %192 = arith.select %189, %187, %191 : vector<128x8xi1>, vector<128x8xf32>
    %193 = arith.truncf %192 : vector<128x8xf32> to vector<128x8xbf16>
    %c2_114 = arith.constant 2 : index
    %c0_115 = arith.constant 0 : index
    %c0_116 = arith.constant 0 : index
    %194 = vector.load %arg11[%c2_114, %c0_115, %c0_116] : memref<3x8x16xbf16, #tpu.memory_space<vmem>>, vector<1x8x16xbf16>
    %195 = vector.shape_cast %194 : vector<1x8x16xbf16> to vector<8x16xbf16>
    %cst_117 = arith.constant dense<0.000000e+00> : vector<256x16xf32>
    %196 = tpu.matmul %3, %195, %cst_117 {dimension_numbers = #tpu.dot_dimension_numbers<[1], [0], [0], [1], [0, 0, 1, 1], [], []>} : vector<256x8xbf16>, vector<8x16xbf16>, vector<256x16xf32> -> vector<256x16xf32>
    %c2_118 = arith.constant 2 : index
    %c0_119 = arith.constant 0 : index
    %c0_120 = arith.constant 0 : index
    %197 = vector.load %arg12[%c2_118, %c0_119, %c0_120] : memref<3x1x16xf32, #tpu.memory_space<vmem>>, vector<1x1x16xf32>
    %198 = vector.shape_cast %197 : vector<1x1x16xf32> to vector<1x16xf32>
    %199 = vector.broadcast %198 : vector<1x16xf32> to vector<256x16xf32>
    %200 = arith.addf %196, %199 : vector<256x16xf32>
    %cst_121 = arith.constant 0.000000e+00 : f32
    %201 = vector.broadcast %cst_121 : f32 to vector<256x16xf32>
    %202 = arith.cmpf ogt, %200, %201 : vector<256x16xf32>
    %cst_122 = arith.constant 0.00999999977 : f32
    %203 = vector.broadcast %cst_122 : f32 to vector<256x16xf32>
    %204 = arith.mulf %203, %200 : vector<256x16xf32>
    %205 = arith.select %202, %200, %204 : vector<256x16xi1>, vector<256x16xf32>
    %cst_123 = arith.constant dense<0.000000e+00> : vector<256x8xf32>
    %206 = tpu.matmul %5, %193, %cst_123 {dimension_numbers = #tpu.dot_dimension_numbers<[1], [0], [0], [1], [0, 0, 1, 1], [], []>} : vector<256x128xbf16>, vector<128x8xbf16>, vector<256x8xf32> -> vector<256x8xf32>
    %207 = arith.truncf %206 : vector<256x8xf32> to vector<256x8xbf16>
    %208 = arith.truncf %205 : vector<256x16xf32> to vector<256x16xbf16>
    %c0_124 = arith.constant 0 : index
    %c0_125 = arith.constant 0 : index
    %209 = vector.load %arg7[%c0_124, %c0_125] : memref<16x128xbf16, #tpu.memory_space<vmem>>, vector<16x128xbf16>
    %cst_126 = arith.constant dense<0.000000e+00> : vector<256x128xf32>
    %210 = tpu.matmul %208, %209, %cst_126 {dimension_numbers = #tpu.dot_dimension_numbers<[1], [0], [0], [1], [0, 0, 1, 1], [], []>} : vector<256x16xbf16>, vector<16x128xbf16>, vector<256x128xf32> -> vector<256x128xf32>
    %c0_127 = arith.constant 0 : index
    %c0_128 = arith.constant 0 : index
    %211 = vector.load %arg8[%c0_127, %c0_128] : memref<8x128xbf16, #tpu.memory_space<vmem>>, vector<8x128xbf16>
    %cst_129 = arith.constant dense<0.000000e+00> : vector<256x128xf32>
    %212 = tpu.matmul %207, %211, %cst_129 {dimension_numbers = #tpu.dot_dimension_numbers<[1], [0], [0], [1], [0, 0, 1, 1], [], []>} : vector<256x8xbf16>, vector<8x128xbf16>, vector<256x128xf32> -> vector<256x128xf32>
    %213 = arith.mulf %210, %212 : vector<256x128xf32>
    %214 = arith.truncf %213 : vector<256x128xf32> to vector<256x128xbf16>
    %c2_130 = arith.constant 2 : index
    %c0_131 = arith.constant 0 : index
    %c0_132 = arith.constant 0 : index
    %215 = vector.load %arg13[%c2_130, %c0_131, %c0_132] : memref<3x128x8xbf16, #tpu.memory_space<vmem>>, vector<1x128x8xbf16>
    %216 = vector.shape_cast %215 : vector<1x128x8xbf16> to vector<128x8xbf16>
    %cst_133 = arith.constant dense<0.000000e+00> : vector<256x8xf32>
    %217 = tpu.matmul %214, %216, %cst_133 {dimension_numbers = #tpu.dot_dimension_numbers<[1], [0], [0], [1], [0, 0, 1, 1], [], []>} : vector<256x128xbf16>, vector<128x8xbf16>, vector<256x8xf32> -> vector<256x8xf32>
    %c2_134 = arith.constant 2 : index
    %c0_135 = arith.constant 0 : index
    %c0_136 = arith.constant 0 : index
    %218 = vector.load %arg14[%c2_134, %c0_135, %c0_136] : memref<3x8x8xbf16, #tpu.memory_space<vmem>>, vector<1x8x8xbf16>
    %219 = vector.shape_cast %218 : vector<1x8x8xbf16> to vector<8x8xbf16>
    %cst_137 = arith.constant dense<0.000000e+00> : vector<256x8xf32>
    %220 = tpu.matmul %207, %219, %cst_137 {dimension_numbers = #tpu.dot_dimension_numbers<[1], [0], [0], [1], [0, 0, 1, 1], [], []>} : vector<256x8xbf16>, vector<8x8xbf16>, vector<256x8xf32> -> vector<256x8xf32>
    %221 = arith.addf %217, %220 : vector<256x8xf32>
    %222 = arith.truncf %221 : vector<256x8xf32> to vector<256x8xbf16>
    %cst_138 = arith.constant dense<0.000000e+00> : vector<128x8xf32>
    %223 = tpu.matmul %7, %222, %cst_138 {dimension_numbers = #tpu.dot_dimension_numbers<[1], [0], [0], [1], [0, 0, 1, 1], [], []>} : vector<128x256xbf16>, vector<256x8xbf16>, vector<128x8xf32> -> vector<128x8xf32>
    %224 = vector.broadcast %9 : vector<128x1xf32> to vector<128x8xf32>
    %225 = arith.mulf %223, %224 : vector<128x8xf32>
    %c2_139 = arith.constant 2 : index
    %c0_140 = arith.constant 0 : index
    %c0_141 = arith.constant 0 : index
    %226 = vector.load %arg15[%c2_139, %c0_140, %c0_141] : memref<3x8x8xbf16, #tpu.memory_space<vmem>>, vector<1x8x8xbf16>
    %227 = vector.shape_cast %226 : vector<1x8x8xbf16> to vector<8x8xbf16>
    %cst_142 = arith.constant dense<0.000000e+00> : vector<128x8xf32>
    %228 = tpu.matmul %193, %227, %cst_142 {dimension_numbers = #tpu.dot_dimension_numbers<[1], [0], [0], [1], [0, 0, 1, 1], [], []>} : vector<128x8xbf16>, vector<8x8xbf16>, vector<128x8xf32> -> vector<128x8xf32>
    %229 = arith.addf %225, %228 : vector<128x8xf32>
    %c2_143 = arith.constant 2 : index
    %c0_144 = arith.constant 0 : index
    %c0_145 = arith.constant 0 : index
    %230 = vector.load %arg16[%c2_143, %c0_144, %c0_145] : memref<3x1x8xf32, #tpu.memory_space<vmem>>, vector<1x1x8xf32>
    %231 = vector.shape_cast %230 : vector<1x1x8xf32> to vector<1x8xf32>
    %232 = vector.broadcast %231 : vector<1x8xf32> to vector<128x8xf32>
    %233 = arith.addf %229, %232 : vector<128x8xf32>
    %234 = arith.addf %159, %233 : vector<128x8xf32>
    %235 = arith.truncf %234 : vector<128x8xf32> to vector<128x8xbf16>
    %c0_146 = arith.constant 0 : index
    %c0_147 = arith.constant 0 : index
    %236 = vector.load %arg17[%c0_146, %c0_147] : memref<8x8xbf16, #tpu.memory_space<vmem>>, vector<8x8xbf16>
    %cst_148 = arith.constant dense<0.000000e+00> : vector<128x8xf32>
    %237 = tpu.matmul %235, %236, %cst_148 {dimension_numbers = #tpu.dot_dimension_numbers<[1], [0], [0], [1], [0, 0, 1, 1], [], []>} : vector<128x8xbf16>, vector<8x8xbf16>, vector<128x8xf32> -> vector<128x8xf32>
    %c0_149 = arith.constant 0 : index
    %c0_150 = arith.constant 0 : index
    %238 = vector.load %arg18[%c0_149, %c0_150] : memref<1x8xf32, #tpu.memory_space<vmem>>, vector<1x8xf32>
    %239 = vector.broadcast %238 : vector<1x8xf32> to vector<128x8xf32>
    %240 = arith.addf %237, %239 : vector<128x8xf32>
    %c0_151 = arith.constant 0 : index
    %c0_152 = arith.constant 0 : index
    %241 = vector.load %arg6[%c0_151, %c0_152] : memref<8x128xbf16, #tpu.memory_space<vmem>>, vector<8x128xbf16>
    %242 = arith.truncf %240 : vector<128x8xf32> to vector<128x8xbf16>
    %cst_153 = arith.constant dense<0.000000e+00> : vector<8x8xf32>
    %243 = tpu.matmul %241, %242, %cst_153 {dimension_numbers = #tpu.dot_dimension_numbers<[1], [0], [0], [1], [0, 0, 1, 1], [], []>} : vector<8x128xbf16>, vector<128x8xbf16>, vector<8x8xf32> -> vector<8x8xf32>
    %cst_154 = arith.constant 6.250000e-02 : f32
    %244 = vector.broadcast %cst_154 : f32 to vector<8x8xf32>
    %245 = arith.mulf %243, %244 : vector<8x8xf32>
    %cst_155 = arith.constant 0.000000e+00 : f32
    %246 = vector.broadcast %cst_155 : f32 to vector<8x8xf32>
    %247 = arith.cmpf ogt, %245, %246 : vector<8x8xf32>
    %cst_156 = arith.constant 0.00999999977 : f32
    %248 = vector.broadcast %cst_156 : f32 to vector<8x8xf32>
    %249 = arith.mulf %248, %245 : vector<8x8xf32>
    %250 = arith.select %247, %245, %249 : vector<8x8xi1>, vector<8x8xf32>
    %251 = arith.truncf %250 : vector<8x8xf32> to vector<8x8xbf16>
    %c0_157 = arith.constant 0 : index
    %c0_158 = arith.constant 0 : index
    %252 = vector.load %arg19[%c0_157, %c0_158] : memref<8x8xbf16, #tpu.memory_space<vmem>>, vector<8x8xbf16>
    %cst_159 = arith.constant dense<0.000000e+00> : vector<8x8xf32>
    %253 = tpu.matmul %251, %252, %cst_159 {dimension_numbers = #tpu.dot_dimension_numbers<[1], [0], [0], [1], [0, 0, 1, 1], [], []>} : vector<8x8xbf16>, vector<8x8xbf16>, vector<8x8xf32> -> vector<8x8xf32>
    %c0_160 = arith.constant 0 : index
    %c0_161 = arith.constant 0 : index
    %254 = vector.load %arg20[%c0_160, %c0_161] : memref<1x8xf32, #tpu.memory_space<vmem>>, vector<1x8xf32>
    %255 = vector.broadcast %254 : vector<1x8xf32> to vector<8x8xf32>
    %256 = arith.addf %253, %255 : vector<8x8xf32>
    %c0_162 = arith.constant 0 : index
    %c0_163 = arith.constant 0 : index
    %c0_164 = arith.constant 0 : index
    %257 = vector.load %arg21[%c0_162, %c0_163, %c0_164] : memref<1x8x8xf32, #tpu.memory_space<vmem>>, vector<1x8x8xf32>
    %258 = vector.shape_cast %257 : vector<1x8x8xf32> to vector<8x8xf32>
    %259 = vector.shape_cast %256 : vector<8x8xf32> to vector<1x8x8xf32>
    tpu.vector_store %arg21[%c0_162, %c0_163, %c0_164], %259 {strides = array<i32>} : memref<1x8x8xf32, #tpu.memory_space<vmem>>, vector<1x8x8xf32>,
    return
  }
  func.func @transform_0(%arg0: i32) -> (i32, i32, i32) {
    %c0_i32 = arith.constant 0 : i32
    %c0_i32_0 = arith.constant 0 : i32
    %c0_i32_1 = arith.constant 0 : i32
    return %arg0, %c0_i32, %c0_i32_0 : i32, i32, i32
  }
  func.func @transform_1(%arg0: i32) -> (i32, i32, i32) {
    %c0_i32 = arith.constant 0 : i32
    %c0_i32_0 = arith.constant 0 : i32
    %c0_i32_1 = arith.constant 0 : i32
    return %arg0, %c0_i32, %c0_i32_0 : i32, i32, i32
  }
  func.func @transform_2(%arg0: i32) -> (i32, i32, i32) {
    %c0_i32 = arith.constant 0 : i32
    %c0_i32_0 = arith.constant 0 : i32
    %c0_i32_1 = arith.constant 0 : i32
    return %arg0, %c0_i32, %c0_i32_0 : i32, i32, i32
  }
  func.func @transform_3(%arg0: i32) -> (i32, i32, i32) {
    %c0_i32 = arith.constant 0 : i32
    %c0_i32_0 = arith.constant 0 : i32
    %c0_i32_1 = arith.constant 0 : i32
    return %arg0, %c0_i32, %c0_i32_0 : i32, i32, i32
  }
  func.func @transform_4(%arg0: i32) -> (i32, i32, i32) {
    %c0_i32 = arith.constant 0 : i32
    %c0_i32_0 = arith.constant 0 : i32
    %c0_i32_1 = arith.constant 0 : i32
    return %arg0, %c0_i32, %c0_i32_0 : i32, i32, i32
  }
  func.func @transform_5(%arg0: i32) -> (i32, i32) {
    %c0_i32 = arith.constant 0 : i32
    %c0_i32_0 = arith.constant 0 : i32
    %c0_i32_1 = arith.constant 0 : i32
    return %c0_i32, %c0_i32_0 : i32, i32
  }
  func.func @transform_6(%arg0: i32) -> (i32, i32) {
    %c0_i32 = arith.constant 0 : i32
    %c0_i32_0 = arith.constant 0 : i32
    %c0_i32_1 = arith.constant 0 : i32
    return %c0_i32, %c0_i32_0 : i32, i32
  }
  func.func @transform_7(%arg0: i32) -> (i32, i32) {
    %c0_i32 = arith.constant 0 : i32
    %c0_i32_0 = arith.constant 0 : i32
    %c0_i32_1 = arith.constant 0 : i32
    return %c0_i32, %c0_i32_0 : i32, i32
  }
  func.func @transform_8(%arg0: i32) -> (i32, i32, i32) {
    %c0_i32 = arith.constant 0 : i32
    %c0_i32_0 = arith.constant 0 : i32
    %c0_i32_1 = arith.constant 0 : i32
    %c0_i32_2 = arith.constant 0 : i32
    return %c0_i32, %c0_i32_0, %c0_i32_1 : i32, i32, i32
  }
  func.func @transform_9(%arg0: i32) -> (i32, i32, i32) {
    %c0_i32 = arith.constant 0 : i32
    %c0_i32_0 = arith.constant 0 : i32
    %c0_i32_1 = arith.constant 0 : i32
    %c0_i32_2 = arith.constant 0 : i32
    return %c0_i32, %c0_i32_0, %c0_i32_1 : i32, i32, i32
  }
  func.func @transform_10(%arg0: i32) -> (i32, i32, i32) {
    %c0_i32 = arith.constant 0 : i32
    %c0_i32_0 = arith.constant 0 : i32
    %c0_i32_1 = arith.constant 0 : i32
    %c0_i32_2 = arith.constant 0 : i32
    return %c0_i32, %c0_i32_0, %c0_i32_1 : i32, i32, i32
  }
  func.func @transform_11(%arg0: i32) -> (i32, i32, i32) {
    %c0_i32 = arith.constant 0 : i32
    %c0_i32_0 = arith.constant 0 : i32
    %c0_i32_1 = arith.constant 0 : i32
    %c0_i32_2 = arith.constant 0 : i32
    return %c0_i32, %c0_i32_0, %c0_i32_1 : i32, i32, i32
  }
  func.func @transform_12(%arg0: i32) -> (i32, i32, i32) {
    %c0_i32 = arith.constant 0 : i32
    %c0_i32_0 = arith.constant 0 : i32
    %c0_i32_1 = arith.constant 0 : i32
    %c0_i32_2 = arith.constant 0 : i32
    return %c0_i32, %c0_i32_0, %c0_i32_1 : i32, i32, i32
  }
  func.func @transform_13(%arg0: i32) -> (i32, i32, i32) {
    %c0_i32 = arith.constant 0 : i32
    %c0_i32_0 = arith.constant 0 : i32
    %c0_i32_1 = arith.constant 0 : i32
    %c0_i32_2 = arith.constant 0 : i32
    return %c0_i32, %c0_i32_0, %c0_i32_1 : i32, i32, i32
  }
  func.func @transform_14(%arg0: i32) -> (i32, i32, i32) {
    %c0_i32 = arith.constant 0 : i32
    %c0_i32_0 = arith.constant 0 : i32
    %c0_i32_1 = arith.constant 0 : i32
    %c0_i32_2 = arith.constant 0 : i32
    return %c0_i32, %c0_i32_0, %c0_i32_1 : i32, i32, i32
  }
  func.func @transform_15(%arg0: i32) -> (i32, i32, i32) {
    %c0_i32 = arith.constant 0 : i32
    %c0_i32_0 = arith.constant 0 : i32
    %c0_i32_1 = arith.constant 0 : i32
    %c0_i32_2 = arith.constant 0 : i32
    return %c0_i32, %c0_i32_0, %c0_i32_1 : i32, i32, i32
  }
  func.func @transform_16(%arg0: i32) -> (i32, i32) {
    %c0_i32 = arith.constant 0 : i32
    %c0_i32_0 = arith.constant 0 : i32
    %c0_i32_1 = arith.constant 0 : i32
    return %c0_i32, %c0_i32_0 : i32, i32
  }
  func.func @transform_17(%arg0: i32) -> (i32, i32) {
    %c0_i32 = arith.constant 0 : i32
    %c0_i32_0 = arith.constant 0 : i32
    %c0_i32_1 = arith.constant 0 : i32
    return %c0_i32, %c0_i32_0 : i32, i32
  }
  func.func @transform_18(%arg0: i32) -> (i32, i32) {
    %c0_i32 = arith.constant 0 : i32
    %c0_i32_0 = arith.constant 0 : i32
    %c0_i32_1 = arith.constant 0 : i32
    return %c0_i32, %c0_i32_0 : i32, i32
  }
  func.func @transform_19(%arg0: i32) -> (i32, i32) {
    %c0_i32 = arith.constant 0 : i32
    %c0_i32_0 = arith.constant 0 : i32
    %c0_i32_1 = arith.constant 0 : i32
    return %c0_i32, %c0_i32_0 : i32, i32
  }
  func.func @transform_20(%arg0: i32) -> (i32, i32, i32) {
    %c0_i32 = arith.constant 0 : i32
    %c0_i32_0 = arith.constant 0 : i32
    %c0_i32_1 = arith.constant 0 : i32
    return %arg0, %c0_i32, %c0_i32_0 : i32, i32, i32
  }
}

</mosaic_0001>

<bundles_post_ra>
// kernel: tpu_custom_call.1
= control target key start
LH: loop header
LB: loop body
LE: loop exit
PB: predicated region body
PF: predicated region fallthrough
CT: control target
= control target key end

     0   :  { %s12019_s0 = inlined_call_operand.vmem [shape: f32[2,128,8], index: 0, kind: input, shape index: {}]   ;;  %s12020_s1 = inlined_call_operand.vmem [shape: bf16[2,256,8], index: 1, kind: input, shape index: {}]   ;;  %s12021_s2 = inlined_call_operand.vmem [shape: bf16[2,256,128], index: 2, kind: input, shape index: {}]   ;;  %s12022_s3 = inlined_call_operand.vmem [shape: bf16[2,128,256], index: 3, kind: input, shape index: {}]   ;;  %s12023_s4 = inlined_call_operand.vmem [shape: f32[2,128,1], index: 4, kind: input, shape index: {}]   ;;  %s12024_s5 = inlined_call_operand.vmem [shape: bf16[8,128], index: 5, kind: input, shape index: {}]   ;;  %s12025_s6 = inlined_call_operand.vmem [shape: bf16[16,128], index: 6, kind: input, shape index: {}]   ;;  %s12026_s7 = inlined_call_operand.vmem [shape: bf16[8,128], index: 7, kind: input, shape index: {}]   ;;  %s12027_s8 = inlined_call_operand.vmem [shape: f32[3,1,8], index: 8, kind: input, shape index: {}]   ;;  %s12028_s9 = inlined_call_operand.vmem [shape: f32[3,1,8], index: 9, kind: input, shape index: {}]   ;;  %s12029_s10 = inlined_call_operand.vmem [shape: bf16[3,8,16], index: 10, kind: input, shape index: {}]   ;;  %s12030_s11 = inlined_call_operand.vmem [shape: f32[3,1,16], index: 11, kind: input, shape index: {}]   ;;  %s12031_s12 = inlined_call_operand.vmem [shape: bf16[3,128,8], index: 12, kind: input, shape index: {}]   ;;  %s12032_s13 = inlined_call_operand.vmem [shape: bf16[3,8,8], index: 13, kind: input, shape index: {}]   ;;  %s12033_s14 = inlined_call_operand.vmem [shape: bf16[3,8,8], index: 14, kind: input, shape index: {}]   ;;  %s12034_s15 = inlined_call_operand.vmem [shape: f32[3,1,8], index: 15, kind: input, shape index: {}]   ;;  %s12035_s16 = inlined_call_operand.vmem [shape: bf16[8,8], index: 16, kind: input, shape index: {}]   ;;  %s12036_s17 = inlined_call_operand.vmem [shape: f32[1,8], index: 17, kind: input, shape index: {}]   ;;  %s12037_s18 = inlined_call_operand.vmem [shape: bf16[8,8], index: 18, kind: input, shape index: {}]   ;;  %s12038_s19 = inlined_call_operand.vmem [shape: f32[1,8], index: 19, kind: input, shape index: {}]   ;;  %s12039_s20 = inlined_call_operand.hbm [shape: f32[2,8,8], index: 20, kind: output, shape index: {}]  }
   0x1   :  { %12120 = sst [smem:[#allocation53_spill]] %s12019_s0 }
   0x2   :  { %12121 = sst [smem:[#allocation54_spill]] %s12020_s1 }
   0x3   :  { %12122 = sst [smem:[#allocation55_spill]] %s12021_s2 }
   0x4   :  { %12123 = sst [smem:[#allocation56_spill]] %s12022_s3 }
   0x5   :  { %12124 = sst [smem:[#allocation57_spill]] %s12023_s4 }
   0x6   :  { %25 = vsyncpa [#allocation3], 0 }
   0x7   :  { %27 = vsyncpa [#allocation3 + $0x1], 0  ;;  %s9699_s1 = smov 0   ;;  %s9701_s22 = smov 0  }
   0x8   :  { %s9703_s23 = smov 0   ;;  %s9705_s24 = smov 0  }
   0x9 LB: > { %12125 = sst [smem:[#allocation5_spill]] %s9576_s1  ;;  %s9720_s2 = sadd.s32 4294967295, %s9588_s24   ;;  %s9588_s24 = sphi %s9705_s24, %s12306_s24   ;;  %s9584_s23 = sphi %s9703_s23, %s12308_s23   ;;  %s9580_s22 = sphi %s9701_s22, %s12310_s22   ;;  %s9576_s1 = sphi %s9699_s1, %s12309_s1  }
   0xa   : > { %12126 = sst [smem:[#allocation6_spill]] %s9584_s23  ;;  %s7415_s25 = sadd.s32 4294967294, %s9588_s24  }
   0xb   : > { %12127 = sst [smem:[#allocation7_spill]] %s9588_s24  ;;  %s9724_s3 = sadd.s32 1, %s9588_s24  }
   0xc   : > { %12128 = sst [smem:[#allocation8_spill]] %s9724_s3  ;;  %s485_s26 = sadd.s32 1, %s9584_s23 }
   0xd   : > { %s482_s27 = ssub.s32 %s9588_s24, %s9724_s3  ;;  %p495_p0 = scmp.ne.s32.totalorder %s9584_s23, %s9580_s22 }
   0xe   : > { %p483_p1 = scmp.eq.s32.totalorder %s482_s27, 0  ;;  %p496_p2 = scmp.eq.s32.totalorder %s9720_s2, 1 }
   0xf   : > { %p501_p3 = scmp.ne.s32.totalorder %s9580_s22, %s9576_s1  ;;  %p502_p4 = scmp.eq.s32.totalorder %s7415_s25, 1 }
  0x10   : > { %s9735_s28 = scalar_select %p483_p1, %s9584_s23, %s485_s26  }
  0x11   : > { %p9737_p5 = por %p496_p2, %p495_p0  ;;  %p9741_p6 = por %p502_p4, %p501_p3 }
  0x12   : > { %12129 = sst [smem:[#allocation9_spill]] %s9735_s28  ;;  %p7418_p7 = scmp.ge.s32.totalorder %s9588_s24, 1 }
  0x13   : > { %s12131_s29 = scalar_select %p9741_p6, 1, 0 }
  0x14   : > { %p605_p8 = scmp.lt.s32.totalorder %s9588_s24, 3 }
  0x15   : > { %12132 = sst [smem:[#allocation10_spill]] %s12131_s29 }
  0x16   : > { %p606_p9 = pnand %p7418_p7, %p605_p8 }
  0x18   : > { %609 = sbr.rel (%p606_p9) target bundleno = 4604 (0x11fc), region = 100 }
  0x1d   : > { %p683_p10 = scmp.lt.s32.totalorder %s9720_s2, 1  ;;  %vm821_vm0 = vcmask 64512   ;;  %s12133_s26 = sld [smem:[#allocation53_spill]]  ;;  %v1133_v32 = vld [vmem:[%s12029_s10] sm:$0xf]  ;;  %vm1269_vm1 = vcmask 1043456  }
  0x1e   : > { %s12134_s25 = sld [smem:[#allocation54_spill]]  ;;  %9178 = vmatprep.subr.msk.bf16.mxu0 %vm1269_vm1, %v1133_v32  ;;  %v1271_v34 = vsel %vm1269_vm1, %v1133_v32, 0  ;;  %vm1827_vm6 = vcmask 130048  }
  0x1f   : > { %s684_s30 = scalar_select %p683_p10, %s9720_s2, 1  ;;  %8385 = vmatpush3.bf16.msra.mxu0 %v1271_v34 }
  0x20   : > { %s12139_s29 = sld [smem:[#allocation56_spill]] }
  0x21   : > { %s9749_s0 = sshll.u32 %s684_s30, 7  ;;  %s12140_s23 = sld [smem:[#allocation57_spill]] }
  0x23   : > { %s9755_s27 = scalar_lea.vmem %s12133_s26, %s9749_s0 }
  0x24   : > { %v9758_v0 = vld [vmem:[%s9755_s27 + $0x70] sm:$0xff]  ;;  %v9761_v1 = vld [vmem:[%s9755_s27 + $0x78] sm:$0xff]  ;;  %v721_v2 = vld [vmem:[%s9755_s27 + $0x60] sm:$0xff]  ;;  %s9810_s26 = scalar_lea.vmem %s12134_s25, %s9749_s0  ;;  %s12135_s25 = sld [smem:[#allocation55_spill]] }
  0x25   : > { %v864_v3 = vsel %vm821_vm0, %v9758_v0, 0.0  ;;  %v858_v4 = vsel %vm821_vm0, %v721_v2, 0.0  ;;  %v9768_v5 = vld [vmem:[%s9755_s27 + $0x68] sm:$0xff]  ;;  %v9771_v6 = vld [vmem:[%s9755_s27 + $0x50] sm:$0xff]  ;;  %v9774_v7 = vld [vmem:[%s9755_s27 + $0x58] sm:$0xff]  ;;  %v867_v8 = vsel %vm821_vm0, %v9761_v1, 0.0 }
  0x26   : > { %865 = vadd.xlane.f32.xlu0 %v864_v3  ;;  %859 = vadd.xlane.f32.xlu1 %v858_v4  ;;  %v861_v9 = vsel %vm821_vm0, %v9768_v5, 0.0  ;;  %v852_v10 = vsel %vm821_vm0, %v9771_v6, 0.0  ;;  %v9783_v11 = vld [vmem:[%s9755_s27 + $0x40] sm:$0xff]  ;;  %v9786_v12 = vld [vmem:[%s9755_s27 + $0x48] sm:$0xff]  ;;  %v9789_v13 = vld [vmem:[%s9755_s27 + $0x30] sm:$0xff]  ;;  %v855_v14 = vsel %vm821_vm0, %v9774_v7, 0.0  ;;  %s10248_s30 = scalar_lea.vmem %s12139_s29, %s9749_s0 }
  0x27   : > { %v846_v15 = vsel %vm821_vm0, %v9783_v11, 0.0  ;;  %v849_v16 = vsel %vm821_vm0, %v9786_v12, 0.0  ;;  %v9798_v17 = vld [vmem:[%s9755_s27 + $0x38] sm:$0xff]  ;;  %v9801_v18 = vld [vmem:[%s9755_s27 + $0x20] sm:$0xff]  ;;  %v9804_v19 = vld [vmem:[%s9755_s27 + $0x28] sm:$0xff]  ;;  %v840_v20 = vsel %vm821_vm0, %v9789_v13, 0.0  ;;  %s10271_s3 = scalar_lea.vmem %s12140_s23, %s9749_s0 }
  0x28   : > { %v843_v21 = vsel %vm821_vm0, %v9798_v17, 0.0  ;;  %v834_v22 = vsel %vm821_vm0, %v9801_v18, 0.0  ;;  %v9819_v23 = vld [vmem:[%s9755_s27 + $0x10] sm:$0xff]  ;;  %v9822_v24 = vld [vmem:[%s9755_s27 + $0x18] sm:$0xff]  ;;  %v9825_v25 = vld [vmem:[%s9755_s27] sm:$0xff]  ;;  %v837_v26 = vsel %vm821_vm0, %v9804_v19, 0.0 }
  0x29   : > { %v828_v27 = vsel %vm821_vm0, %v9819_v23, 0.0  ;;  %v831_v28 = vsel %vm821_vm0, %v9822_v24, 0.0  ;;  %v9834_v29 = vld [vmem:[%s9755_s27 + $0x8] sm:$0xff]  ;;  %v822_v30 = vsel %vm821_vm0, %v9825_v25, 0.0  ;;  %v9235_v33 = vld [vmem:[%s9810_s26] sm:$0xff]   ;;  %s680_s23 = sand.u32 1, %s9580_s22  }
  0x2a   : > { %868 = vadd.xlane.f32.xlu0 %v867_v8  ;;  %862 = vadd.xlane.f32.xlu1 %v861_v9  ;;  %v825_v31 = vsel %vm821_vm0, %v9834_v29, 0.0  ;;  %s9844_s28 = scalar_lea.vmem %s12135_s25, %s9749_s0  ;;  %v9236_v35 = vld [vmem:[%s9810_s26 + $0x8] sm:$0xff]   ;;  %s7295_s21 = scalar_lea.sflag [#allocation3], %s680_s23 }
  0x2b   : > { %8386 = vmatprep.mubr.msk.bf16.mxu0 %vm821_vm0, %v9235_v33  ;;  %s9593_s25 = smov [#allocation2]  }
  0x2c   : > { %8387 = vmatmul.mubr.msk.bf16.vlgmr.msra.gmra.mxu0 %vm821_vm0, %v9236_v35 }
  0x2e   : > { %853 = vadd.xlane.f32.xlu0 %v852_v10  ;;  %856 = vadd.xlane.f32.xlu1 %v855_v14 }
  0x32   : > { %847 = vadd.xlane.f32.xlu0 %v846_v15  ;;  %850 = vadd.xlane.f32.xlu1 %v849_v16 }
  0x36   : > { %841 = vadd.xlane.f32.xlu0 %v840_v20  ;;  %844 = vadd.xlane.f32.xlu1 %v843_v21  ;;  %v9237_v21 = vld [vmem:[%s9810_s26 + $0x10] sm:$0xff]  }
  0x37   : > { %8390 = vmatprep.mubr.msk.bf16.mxu0 %vm821_vm0, %v9237_v21 }
  0x3a   : > { %835 = vadd.xlane.f32.xlu0 %v834_v22  ;;  %838 = vadd.xlane.f32.xlu1 %v837_v26 }
  0x3e   : > { %829 = vadd.xlane.f32.xlu0 %v828_v27  ;;  %832 = vadd.xlane.f32.xlu1 %v831_v28 }
  0x42   : > { %823 = vadd.xlane.f32.xlu0 %v822_v30  ;;  %826 = vadd.xlane.f32.xlu1 %v825_v31 }
  0xaf   : > { %v866_v36 = vpop.xlane.xlu0 %865  ;;  %v860_v37 = vpop.xlane.xlu1 %859 }
  0xb0   : > { %v885_v38 = vmul.f32 0.125, %v866_v36  ;;  %v883_v39 = vmul.f32 0.125, %v860_v37 }
  0xb2   : > { %v9856_v40 = vsub.f32 %v9758_v0, %v885_v38  ;;  %v9858_v41 = vsub.f32 %v721_v2, %v883_v39 }
  0xb3   : > { %v869_v42 = vpop.xlane.xlu0 %868  ;;  %v863_v43 = vpop.xlane.xlu1 %862 }
  0xb4   : > { %v886_v44 = vmul.f32 0.125, %v869_v42  ;;  %v884_v45 = vmul.f32 0.125, %v863_v43  ;;  %v917_v46 = vmul.f32 %v9856_v40, %v9856_v40  ;;  %v915_v47 = vmul.f32 %v9858_v41, %v9858_v41 }
  0xb6   : > { %v9865_v48 = vsub.f32 %v9761_v1, %v886_v44  ;;  %v9868_v49 = vsub.f32 %v9768_v5, %v884_v45  ;;  %v961_v50 = vsel %vm821_vm0, %v917_v46, 0.0  ;;  %v955_v53 = vsel %vm821_vm0, %v915_v47, 0.0 }
  0xb7   : > { %v854_v51 = vpop.xlane.xlu0 %853  ;;  %962 = vadd.xlane.f32.xlu0 %v961_v50  ;;  %v857_v52 = vpop.xlane.xlu1 %856  ;;  %v9239_v50 = vld [vmem:[%s9810_s26 + $0x20] sm:$0xff]  }
  0xb8   : > { %v881_v54 = vmul.f32 0.125, %v854_v51  ;;  %v882_v55 = vmul.f32 0.125, %v857_v52  ;;  %v918_v56 = vmul.f32 %v9865_v48, %v9865_v48  ;;  %v916_v57 = vmul.f32 %v9868_v49, %v9868_v49 }
  0xba   : > { %v9877_v58 = vsub.f32 %v9771_v6, %v881_v54  ;;  %v9880_v59 = vsub.f32 %v9774_v7, %v882_v55  ;;  %v964_v60 = vsel %vm821_vm0, %v918_v56, 0.0  ;;  %v958_v63 = vsel %vm821_vm0, %v916_v57, 0.0 }
  0xbb   : > { %v848_v61 = vpop.xlane.xlu0 %847  ;;  %965 = vadd.xlane.f32.xlu1 %v964_v60  ;;  %956 = vadd.xlane.f32.xlu0 %v955_v53  ;;  %v851_v62 = vpop.xlane.xlu1 %850 }
  0xbc   : > { %v879_v0 = vmul.f32 0.125, %v848_v61  ;;  %v880_v1 = vmul.f32 0.125, %v851_v62  ;;  %v913_v2 = vmul.f32 %v9877_v58, %v9877_v58  ;;  %v914_v3 = vmul.f32 %v9880_v59, %v9880_v59  ;;  %v9241_v61 = vld [vmem:[%s9810_s26 + $0x30] sm:$0xff]  }
  0xbe   : > { %v9889_v4 = vsub.f32 %v9783_v11, %v879_v0  ;;  %v9892_v5 = vsub.f32 %v9786_v12, %v880_v1  ;;  %v949_v6 = vsel %vm821_vm0, %v913_v2, 0.0  ;;  %v952_v9 = vsel %vm821_vm0, %v914_v3, 0.0  ;;  %v9243_v0 = vld [vmem:[%s9810_s26 + $0x40] sm:$0xff]   ;;  %v9244_v1 = vld [vmem:[%s9810_s26 + $0x48] sm:$0xff]   ;;  %v9245_v2 = vld [vmem:[%s9810_s26 + $0x50] sm:$0xff]  }
  0xbf   : > { %v842_v7 = vpop.xlane.xlu0 %841  ;;  %959 = vadd.xlane.f32.xlu1 %v958_v63  ;;  %950 = vadd.xlane.f32.xlu0 %v949_v6  ;;  %v845_v8 = vpop.xlane.xlu1 %844  ;;  %v9242_v63 = vld [vmem:[%s9810_s26 + $0x38] sm:$0xff]   ;;  %v9247_v6 = vld [vmem:[%s9810_s26 + $0x60] sm:$0xff]  }
  0xc0   : > { %v877_v10 = vmul.f32 0.125, %v842_v7  ;;  %v878_v14 = vmul.f32 0.125, %v845_v8  ;;  %v911_v15 = vmul.f32 %v9889_v4, %v9889_v4  ;;  %v912_v11 = vmul.f32 %v9892_v5, %v9892_v5  ;;  %v9246_v3 = vld [vmem:[%s9810_s26 + $0x58] sm:$0xff]   ;;  %v9248_v7 = vld [vmem:[%s9810_s26 + $0x68] sm:$0xff]   ;;  %v9249_v8 = vld [vmem:[%s9810_s26 + $0x70] sm:$0xff]  }
  0xc2   : > { %v9901_v12 = vsub.f32 %v9789_v13, %v877_v10  ;;  %v9904_v16 = vsub.f32 %v9798_v17, %v878_v14  ;;  %v943_v20 = vsel %vm821_vm0, %v911_v15, 0.0  ;;  %v946_v27 = vsel %vm821_vm0, %v912_v11, 0.0  ;;  %v9238_v17 = vld [vmem:[%s9810_s26 + $0x18] sm:$0xff]   ;;  %v9251_v10 = vld [vmem:[%s9844_s28] sm:$0xff]  }
  0xc3   : > { %v836_v22 = vpop.xlane.xlu0 %835  ;;  %953 = vadd.xlane.f32.xlu1 %v952_v9  ;;  %944 = vadd.xlane.f32.xlu0 %v943_v20  ;;  %v839_v26 = vpop.xlane.xlu1 %838  ;;  %v9250_v9 = vld [vmem:[%s9810_s26 + $0x78] sm:$0xff]   ;;  %v9982_v15 = vld [vmem:[%s12030_s11] ss:$0 sm:$0xff] }
  0xc4   : > { %v875_v28 = vmul.f32 0.125, %v836_v22  ;;  %v876_v30 = vmul.f32 0.125, %v839_v26  ;;  %v909_v31 = vmul.f32 %v9901_v12, %v9901_v12  ;;  %v910_v13 = vmul.f32 %v9904_v16, %v9904_v16  ;;  %8391 = vmatmul.mubr.msk.bf16.gmra.mxu0 %vm821_vm0, %v9238_v17  ;;  %8434 = vmatprep.mubr.bf16.mxu1 %v9251_v10  ;;  %v9267_v11 = vld [vmem:[%s12025_s6] sm:$0xff]  }
  0xc5   : > { %8394 = vmatprep.mubr.msk.bf16.mxu0 %vm821_vm0, %v9239_v50  ;;  %8466 = vmatprep.subr.bf16.mxu0 %v9267_v11 }
  0xc6   : > { %v9916_v32 = vsub.f32 %v9801_v18, %v875_v28  ;;  %v9919_v33 = vsub.f32 %v9804_v19, %v876_v30  ;;  %v937_v34 = vsel %vm821_vm0, %v909_v31, 0.0  ;;  %v940_v37 = vsel %vm821_vm0, %v910_v13, 0.0  ;;  %8467 = vmatpush3.bf16.msra.mxu0 %v9267_v11 }
  0xc7   : > { %v830_v35 = vpop.xlane.xlu0 %829  ;;  %947 = vadd.xlane.f32.xlu1 %v946_v27  ;;  %938 = vadd.xlane.f32.xlu0 %v937_v34  ;;  %v833_v36 = vpop.xlane.xlu1 %832 }
  0xc8   : > { %v873_v38 = vmul.f32 0.125, %v830_v35  ;;  %v874_v39 = vmul.f32 0.125, %v833_v36  ;;  %v907_v18 = vmul.f32 %v9916_v32, %v9916_v32  ;;  %v908_v19 = vmul.f32 %v9919_v33, %v9919_v33 }
  0xca   : > { %v9929_v42 = vsub.f32 %v9819_v23, %v873_v38  ;;  %v9932_v43 = vsub.f32 %v9822_v24, %v874_v39  ;;  %v931_v44 = vsel %vm821_vm0, %v907_v18, 0.0  ;;  %v934_v46 = vsel %vm821_vm0, %v908_v19, 0.0  ;;  %v9240_v24 = vld [vmem:[%s9810_s26 + $0x28] sm:$0xff]  }
  0xcb   : > { %941 = vadd.xlane.f32.xlu1 %v940_v37  ;;  %932 = vadd.xlane.f32.xlu0 %v931_v44  ;;  %v824_v45 = vpop.xlane.xlu0 %823  ;;  %v827_v47 = vpop.xlane.xlu1 %826 }
  0xcc   : > { %v871_v51 = vmul.f32 0.125, %v824_v45  ;;  %v872_v52 = vmul.f32 0.125, %v827_v47  ;;  %v905_v53 = vmul.f32 %v9929_v42, %v9929_v42  ;;  %v906_v23 = vmul.f32 %v9932_v43, %v9932_v43  ;;  %8395 = vmatmul.mubr.msk.bf16.gmra.mxu0 %vm821_vm0, %v9240_v24 }
  0xcd   : > { %8398 = vmatprep.mubr.msk.bf16.mxu0 %vm821_vm0, %v9241_v61 }
  0xce   : > { %v9944_v54 = vsub.f32 %v9825_v25, %v871_v51  ;;  %v9947_v55 = vsub.f32 %v9834_v29, %v872_v52  ;;  %v925_v56 = vsel %vm821_vm0, %v905_v53, 0.0  ;;  %v928_v57 = vsel %vm821_vm0, %v906_v23, 0.0 }
  0xcf   : > { %935 = vadd.xlane.f32.xlu1 %v934_v46  ;;  %926 = vadd.xlane.f32.xlu0 %v925_v56 }
  0xd0   : > { %v903_v60 = vmul.f32 %v9944_v54, %v9944_v54  ;;  %v904_v25 = vmul.f32 %v9947_v55, %v9947_v55 }
  0xd2   : > { %v919_v29 = vsel %vm821_vm0, %v903_v60, 0.0  ;;  %v922_v62 = vsel %vm821_vm0, %v904_v25, 0.0 }
  0xd3   : > { %929 = vadd.xlane.f32.xlu1 %v928_v57  ;;  %920 = vadd.xlane.f32.xlu0 %v919_v29 }
  0xd4   : > { %8399 = vmatmul.mubr.msk.bf16.gmra.mxu0 %vm821_vm0, %v9242_v63 }
  0xd5   : > { %8402 = vmatprep.mubr.msk.bf16.mxu0 %vm821_vm0, %v9243_v0 }
  0xd7   : > { %923 = vadd.xlane.f32.xlu1 %v922_v62 }
  0xdc   : > { %8403 = vmatmul.mubr.msk.bf16.gmra.mxu0 %vm821_vm0, %v9244_v1 }
  0xdd   : > { %8406 = vmatprep.mubr.msk.bf16.mxu0 %vm821_vm0, %v9245_v2 }
  0xe4   : > { %8407 = vmatmul.mubr.msk.bf16.gmra.mxu0 %vm821_vm0, %v9246_v3 }
  0xe5   : > { %8410 = vmatprep.mubr.msk.bf16.mxu0 %vm821_vm0, %v9247_v6 }
  0xec   : > { %8411 = vmatmul.mubr.msk.bf16.gmra.mxu0 %vm821_vm0, %v9248_v7  ;;  %v8388_v14 = vpop.f32.mrf.mxu0 }
  0xed   : > { %8414 = vmatprep.mubr.msk.bf16.mxu0 %vm821_vm0, %v9249_v8  ;;  %v1316_v20 = vadd.f32 %v8388_v14, %v9982_v15 }
  0xee   : > { %v1307_v21 = vpop.f32.mrf.mxu0 }
  0xef   : > { %v1308_v22 = vadd.f32 %v9982_v15, %v1307_v21  ;;  %v1468_v26 = vmul.f32 0.01, %v1316_v20  ;;  %vm1436_vm2 = vcmp.gt.f32.partialorder %v1316_v20, 0.0 }
  0xf0   : > { %v8389_v27 = vpop.f32.mrf.mxu0 }
  0xf1   : > { %v1466_v30 = vmul.f32 0.01, %v1308_v22  ;;  %v1319_v31 = vadd.f32 %v8389_v27, %v9982_v15  ;;  %vm1434_vm3 = vcmp.gt.f32.partialorder %v1308_v22, 0.0  ;;  %v1500_v37 = vsel %vm1436_vm2, %v1316_v20, %v1468_v26 }
  0xf2   : > { %v1310_v17 = vpop.f32.mrf.mxu0 }
  0xf3   : > { %vm1437_vm4 = vcmp.gt.f32.partialorder %v1319_v31, 0.0  ;;  %v1469_v34 = vmul.f32 0.01, %v1319_v31  ;;  %v1311_v35 = vadd.f32 %v9982_v15, %v1310_v17  ;;  %v1498_v18 = vsel %vm1434_vm3, %v1308_v22, %v1466_v30  ;;  %v10002_v22 = vld [vmem:[%s12028_s9] ss:$0 sm:$0xff] }
  0xf4   : > { %8415 = vmatmul.mubr.msk.bf16.gmra.mxu0 %vm821_vm0, %v9250_v9  ;;  %v9996_v9 = vld [vmem:[%s12027_s8] ss:$0 sm:$0xff] }
  0xf5   : > { %v1501_v19 = vsel %vm1437_vm4, %v1319_v31, %v1469_v34  ;;  %vm1435_vm5 = vcmp.gt.f32.partialorder %v1311_v35, 0.0  ;;  %v1467_v44 = vmul.f32 0.01, %v1311_v35 }
  0xf6   : > { %v1804_v47 = vpack.c.bf16 %v1501_v19, %v1500_v37 }
  0xf7   : > { %v1499_v50 = vsel %vm1435_vm5, %v1311_v35, %v1467_v44 }
  0xf8   : > { %v1803_v53 = vpack.c.bf16 %v1499_v50, %v1498_v18 }
  0xfa   : > { %8468 = vmatprep.mubr.msk.bf16.mxu0 %vm1827_vm6, %v1803_v53 }
  0xfc   : > { %8469 = vmatmul.mubr.msk.bf16.vlgmr.msra.gmra.mxu0 %vm1827_vm6, %v1804_v47 }
 0x140   : > { %v963_v28 = vpop.xlane.xlu0 %962 }
 0x141   : > { %v981_v13 = vmul.f32 0.125, %v963_v28 }
 0x143   : > { %v997_v36 = vadd.f32 1e-05, %v981_v13 }
 0x144   : > { %v966_v38 = vpop.xlane.xlu1 %965  ;;  %v957_v39 = vpop.xlane.xlu0 %956 }
 0x145   : > { %9316 = vrsqrt.f32 %v997_v36  ;;  %v982_v45 = vmul.f32 0.125, %v966_v38  ;;  %v979_v46 = vmul.f32 0.125, %v957_v39 }
 0x147   : > { %v998_v51 = vadd.f32 1e-05, %v982_v45  ;;  %v995_v52 = vadd.f32 1e-05, %v979_v46 }
 0x148   : > { %v960_v23 = vpop.xlane.xlu1 %959  ;;  %v951_v24 = vpop.xlane.xlu0 %950 }
 0x149   : > { %9318 = vrsqrt.f32 %v998_v51  ;;  %v980_v56 = vmul.f32 0.125, %v960_v23  ;;  %v977_v57 = vmul.f32 0.125, %v951_v24 }
 0x14a   : > { %9320 = vrsqrt.f32 %v995_v52 }
 0x14b   : > { %v996_v60 = vadd.f32 1e-05, %v980_v56  ;;  %v993_v25 = vadd.f32 1e-05, %v977_v57 }
 0x14c   : > { %v954_v29 = vpop.xlane.xlu1 %953  ;;  %v945_v61 = vpop.xlane.xlu0 %944 }
 0x14d   : > { %9322 = vrsqrt.f32 %v996_v60  ;;  %v978_v62 = vmul.f32 0.125, %v954_v29  ;;  %v975_v63 = vmul.f32 0.125, %v945_v61 }
 0x14e   : > { %9324 = vrsqrt.f32 %v993_v25 }
 0x14f   : > { %v994_v0 = vadd.f32 1e-05, %v978_v62  ;;  %v991_v1 = vadd.f32 1e-05, %v975_v63 }
 0x150   : > { %v948_v2 = vpop.xlane.xlu1 %947  ;;  %v939_v3 = vpop.xlane.xlu0 %938 }
 0x151   : > { %9326 = vrsqrt.f32 %v994_v0  ;;  %v976_v6 = vmul.f32 0.125, %v948_v2  ;;  %v973_v7 = vmul.f32 0.125, %v939_v3 }
 0x152   : > { %v9317_v8 = vpop.eup %9316  ;;  %9328 = vrsqrt.f32 %v991_v1 }
 0x153   : > { %v992_v10 = vadd.f32 1e-05, %v976_v6  ;;  %v989_v14 = vadd.f32 1e-05, %v973_v7  ;;  %v1029_v11 = vmul.f32 %v9317_v8, %v9856_v40 }
 0x154   : > { %v942_v20 = vpop.xlane.xlu1 %941  ;;  %v933_v21 = vpop.xlane.xlu0 %932 }
 0x155   : > { %9330 = vrsqrt.f32 %v992_v10  ;;  %v974_v26 = vmul.f32 0.125, %v942_v20  ;;  %v971_v27 = vmul.f32 0.125, %v933_v21  ;;  %v1052_v28 = vmul.f32 %v9996_v9, %v1029_v11 }
 0x156   : > { %v9319_v30 = vpop.eup %9318  ;;  %9332 = vrsqrt.f32 %v989_v14 }
 0x157   : > { %v9321_v31 = vpop.eup %9320  ;;  %v990_v13 = vadd.f32 1e-05, %v974_v26  ;;  %v987_v17 = vadd.f32 1e-05, %v971_v27  ;;  %v1030_v34 = vmul.f32 %v9319_v30, %v9865_v48  ;;  %v1075_v40 = vadd.f32 %v10002_v22, %v1052_v28 }
 0x158   : > { %v936_v35 = vpop.xlane.xlu1 %935  ;;  %v927_v36 = vpop.xlane.xlu0 %926  ;;  %v1027_v37 = vmul.f32 %v9321_v31, %v9858_v41 }
 0x159   : > { %9334 = vrsqrt.f32 %v990_v13  ;;  %v972_v38 = vmul.f32 0.125, %v936_v35  ;;  %v969_v39 = vmul.f32 0.125, %v927_v36  ;;  %v1053_v18 = vmul.f32 %v9996_v9, %v1030_v34 }
 0x15a   : > { %v9323_v19 = vpop.eup %9322  ;;  %9336 = vrsqrt.f32 %v987_v17  ;;  %vm1091_vm7 = vcmp.gt.f32.partialorder %v1075_v40, 0.0  ;;  %v1107_v44 = vmul.f32 0.01, %v1075_v40  ;;  %v1050_v45 = vmul.f32 %v9996_v9, %v1027_v37 }
 0x15b   : > { %v9325_v46 = vpop.eup %9324  ;;  %v988_v47 = vadd.f32 1e-05, %v972_v38  ;;  %v985_v48 = vadd.f32 1e-05, %v969_v39  ;;  %v1076_v50 = vadd.f32 %v10002_v22, %v1053_v18  ;;  %v1028_v51 = vmul.f32 %v9323_v19, %v9868_v49 }
 0x15c   : > { %v930_v52 = vpop.xlane.xlu1 %929  ;;  %v921_v41 = vpop.xlane.xlu0 %920  ;;  %v1073_v53 = vadd.f32 %v10002_v22, %v1050_v45  ;;  %v1025_v23 = vmul.f32 %v9325_v46, %v9877_v58  ;;  %v1123_v25 = vsel %vm1091_vm7, %v1075_v40, %v1107_v44 }
 0x15d   : > { %9338 = vrsqrt.f32 %v988_v47  ;;  %v970_v24 = vmul.f32 0.125, %v930_v52  ;;  %v967_v56 = vmul.f32 0.125, %v921_v41  ;;  %vm1092_vm8 = vcmp.gt.f32.partialorder %v1076_v50, 0.0 }
 0x15e   : > { %v9327_v57 = vpop.eup %9326  ;;  %9340 = vrsqrt.f32 %v985_v48  ;;  %v1108_v60 = vmul.f32 0.01, %v1076_v50  ;;  %v1051_v29 = vmul.f32 %v9996_v9, %v1028_v51  ;;  %v1105_v63 = vmul.f32 0.01, %v1073_v53 }
 0x15f   : > { %v9329_v61 = vpop.eup %9328  ;;  %v986_v62 = vadd.f32 1e-05, %v970_v24  ;;  %v983_v49 = vadd.f32 1e-05, %v967_v56  ;;  %v1026_v0 = vmul.f32 %v9327_v57, %v9880_v59  ;;  %v1048_v3 = vmul.f32 %v9996_v9, %v1025_v23 }
 0x160   : > { %v924_v1 = vpop.xlane.xlu1 %923  ;;  %v1124_v2 = vsel %vm1092_vm8, %v1076_v50, %v1108_v60  ;;  %v1074_v58 = vadd.f32 %v10002_v22, %v1051_v29  ;;  %v1023_v6 = vmul.f32 %v9329_v61, %v9889_v4  ;;  %vm1089_vm9 = vcmp.gt.f32.partialorder %v1073_v53, 0.0 }
 0x161   : > { %9342 = vrsqrt.f32 %v986_v62  ;;  %v968_v7 = vmul.f32 0.125, %v924_v1  ;;  %v10020_v8 = vpack.c.bf16 %v1124_v2, %v1123_v25  ;;  %v1049_v11 = vmul.f32 %v9996_v9, %v1026_v0 }
 0x162   : > { %v9331_v10 = vpop.eup %9330  ;;  %9344 = vrsqrt.f32 %v983_v49  ;;  %vm1090_vm10 = vcmp.gt.f32.partialorder %v1074_v58, 0.0  ;;  %v1106_v14 = vmul.f32 0.01, %v1074_v58  ;;  %v1071_v21 = vadd.f32 %v10002_v22, %v1048_v3 }
 0x163   : > { %v9333_v59 = vpop.eup %9332  ;;  %v984_v20 = vadd.f32 1e-05, %v968_v7  ;;  %8418 = vmatprep.subr.bf16.mxu1 %v10020_v8  ;;  %v1024_v26 = vmul.f32 %v9331_v10, %v9892_v5  ;;  %v1046_v4 = vmul.f32 %v9996_v9, %v1023_v6  ;;  %v1121_v27 = vsel %vm1089_vm9, %v1073_v53, %v1105_v63 }
 0x164   : > { %8419 = vmatpush3.bf16.msra.mxu1 %v10020_v8  ;;  %v1122_v28 = vsel %vm1090_vm10, %v1074_v58, %v1106_v14  ;;  %v1072_v30 = vadd.f32 %v10002_v22, %v1049_v11  ;;  %v1021_v31 = vmul.f32 %v9333_v59, %v9901_v12  ;;  %vm1087_vm11 = vcmp.gt.f32.partialorder %v1071_v21, 0.0 }
 0x165   : > { %9346 = vrsqrt.f32 %v984_v20  ;;  %v10030_v13 = vpack.c.bf16 %v1122_v28, %v1121_v27  ;;  %v1103_v17 = vmul.f32 0.01, %v1071_v21  ;;  %v1047_v5 = vmul.f32 %v9996_v9, %v1024_v26 }
 0x166   : > { %v9335_v34 = vpop.eup %9334  ;;  %vm1088_vm12 = vcmp.gt.f32.partialorder %v1072_v30, 0.0  ;;  %v1104_v40 = vmul.f32 0.01, %v1072_v30  ;;  %v1069_v35 = vadd.f32 %v10002_v22, %v1046_v4  ;;  %v1044_v12 = vmul.f32 %v9996_v9, %v1021_v31 }
 0x167   : > { %v9337_v36 = vpop.eup %9336  ;;  %8420 = vmatprep.subr.bf16.mxu1 %v10030_v13  ;;  %v1119_v37 = vsel %vm1087_vm11, %v1071_v21, %v1103_v17  ;;  %v1022_v38 = vmul.f32 %v9335_v34, %v9904_v16  ;;  %v1070_v18 = vadd.f32 %v10002_v22, %v1047_v5  ;;  %v2037_v5 = vld [vmem:[%s12026_s7] sm:$0xf] }
 0x168   : > { %8421 = vmatpush3.bf16.msra.mxu1 %v10030_v13  ;;  %v1120_v39 = vsel %vm1088_vm12, %v1072_v30, %v1104_v40  ;;  %vm1085_vm13 = vcmp.gt.f32.partialorder %v1069_v35, 0.0  ;;  %v1101_v19 = vmul.f32 0.01, %v1069_v35  ;;  %v1067_v46 = vadd.f32 %v10002_v22, %v1044_v12 }
 0x169   : > { %v10039_v44 = vpack.c.bf16 %v1120_v39, %v1119_v37  ;;  %v1045_v45 = vmul.f32 %v9996_v9, %v1022_v38  ;;  %v1019_v47 = vmul.f32 %v9337_v36, %v9916_v32  ;;  %vm1086_vm14 = vcmp.gt.f32.partialorder %v1070_v18, 0.0  ;;  %v9254_v38 = vld [vmem:[%s9844_s28 + $0x18] sm:$0xff]   ;;  %v9255_v39 = vld [vmem:[%s9844_s28 + $0x20] sm:$0xff]  }
 0x16a   : > { %v9339_v48 = vpop.eup %9338  ;;  %v1102_v16 = vmul.f32 0.01, %v1070_v18  ;;  %v1117_v51 = vsel %vm1085_vm13, %v1069_v35, %v1101_v19  ;;  %v1099_v41 = vmul.f32 0.01, %v1067_v46  ;;  %vm1083_vm15 = vcmp.gt.f32.partialorder %v1067_v46, 0.0  ;;  %v9253_v35 = vld [vmem:[%s9844_s28 + $0x10] sm:$0xff]  }
 0x16b   : > { %v9341_v50 = vpop.eup %9340  ;;  %8422 = vmatprep.subr.bf16.mxu1 %v10039_v44  ;;  %v1068_v52 = vadd.f32 %v10002_v22, %v1045_v45  ;;  %v1020_v53 = vmul.f32 %v9339_v48, %v9919_v33  ;;  %v1042_v24 = vmul.f32 %v9996_v9, %v1019_v47  ;;  %v10091_v36 = vsel %vm1269_vm1, %v2037_v5, 0 }
 0x16c   : > { %8423 = vmatpush3.bf16.msra.mxu1 %v10039_v44  ;;  %v1118_v23 = vsel %vm1086_vm14, %v1070_v18, %v1102_v16  ;;  %v1017_v32 = vmul.f32 %v9341_v50, %v9929_v42  ;;  %v1115_v62 = vsel %vm1083_vm15, %v1067_v46, %v1099_v41  ;;  %12136 = vst [vmem:[#allocation11_spill] sm:$0xff] %v10091_v36 }
 0x16d   : > { %v10050_v56 = vpack.c.bf16 %v1118_v23, %v1117_v51  ;;  %vm1084_vm2 = vcmp.gt.f32.partialorder %v1068_v52, 0.0  ;;  %v1100_v57 = vmul.f32 0.01, %v1068_v52  ;;  %v1043_v25 = vmul.f32 %v9996_v9, %v1020_v53  ;;  %v9256_v23 = vld [vmem:[%s9844_s28 + $0x28] sm:$0xff]  }
 0x16e   : > { %v9343_v60 = vpop.eup %9342  ;;  %v1065_v29 = vadd.f32 %v10002_v22, %v1042_v24  ;;  %v1040_v61 = vmul.f32 %v9996_v9, %v1017_v32 }
 0x16f   : > { %v9345_v33 = vpop.eup %9344  ;;  %8424 = vmatprep.subr.bf16.mxu1 %v10050_v56  ;;  %v1116_v49 = vsel %vm1084_vm2, %v1068_v52, %v1100_v57  ;;  %v1018_v63 = vmul.f32 %v9343_v60, %v9932_v43  ;;  %v1066_v0 = vadd.f32 %v10002_v22, %v1043_v25  ;;  %v9257_v60 = vld [vmem:[%s9844_s28 + $0x30] sm:$0xff]  }
 0x170   : > { %8425 = vmatpush3.bf16.msra.mxu1 %v10050_v56  ;;  %v10058_v42 = vpack.c.bf16 %v1116_v49, %v1115_v62  ;;  %v1097_v1 = vmul.f32 0.01, %v1065_v29  ;;  %vm1081_vm3 = vcmp.gt.f32.partialorder %v1065_v29, 0.0  ;;  %v1063_v58 = vadd.f32 %v10002_v22, %v1040_v61 }
 0x171   : > { %v1041_v2 = vmul.f32 %v9996_v9, %v1018_v63  ;;  %v1015_v3 = vmul.f32 %v9345_v33, %v9944_v54  ;;  %vm1082_vm4 = vcmp.gt.f32.partialorder %v1066_v0, 0.0  ;;  %v1098_v7 = vmul.f32 0.01, %v1066_v0 }
 0x172   : > { %v9347_v6 = vpop.eup %9346  ;;  %8426 = vmatprep.subr.bf16.mxu1 %v10058_v42  ;;  %v1095_v10 = vmul.f32 0.01, %v1063_v58  ;;  %v1113_v11 = vsel %vm1081_vm3, %v1065_v29, %v1097_v1  ;;  %vm1079_vm5 = vcmp.gt.f32.partialorder %v1063_v58, 0.0 }
 0x173   : > { %v1064_v43 = vadd.f32 %v10002_v22, %v1041_v2  ;;  %v1016_v14 = vmul.f32 %v9347_v6, %v9947_v55  ;;  %v1114_v59 = vsel %vm1082_vm4, %v1066_v0, %v1098_v7  ;;  %v1038_v20 = vmul.f32 %v9996_v9, %v1015_v3 }
 0x174   : > { %8427 = vmatpush3.bf16.msra.mxu1 %v10058_v42  ;;  %v10069_v21 = vpack.c.bf16 %v1114_v59, %v1113_v11  ;;  %v1111_v27 = vsel %vm1079_vm5, %v1063_v58, %v1095_v10  ;;  %v9258_v10 = vld [vmem:[%s9844_s28 + $0x38] sm:$0xff]  }
 0x175   : > { %vm1080_vm7 = vcmp.gt.f32.partialorder %v1064_v43, 0.0  ;;  %v1096_v54 = vmul.f32 0.01, %v1064_v43  ;;  %v1039_v26 = vmul.f32 %v9996_v9, %v1016_v14  ;;  %v1061_v4 = vadd.f32 %v10002_v22, %v1038_v20  ;;  %v9259_v20 = vld [vmem:[%s9844_s28 + $0x40] sm:$0xff]  }
 0x176   : > { %8428 = vmatprep.subr.bf16.mxu1 %v10069_v21 }
 0x177   : > { %v1112_v55 = vsel %vm1080_vm7, %v1064_v43, %v1096_v54  ;;  %v1062_v30 = vadd.f32 %v10002_v22, %v1039_v26  ;;  %v1093_v31 = vmul.f32 0.01, %v1061_v4  ;;  %vm1077_vm8 = vcmp.gt.f32.partialorder %v1061_v4, 0.0  ;;  %v9252_v22 = vld [vmem:[%s9844_s28 + $0x8] sm:$0xff]  }
 0x178   : > { %8429 = vmatpush3.bf16.msra.mxu1 %v10069_v21  ;;  %v10075_v28 = vpack.c.bf16 %v1112_v55, %v1111_v27 }
 0x179   : > { %vm1078_vm9 = vcmp.gt.f32.partialorder %v1062_v30, 0.0  ;;  %v1094_v9 = vmul.f32 0.01, %v1062_v30  ;;  %v1109_v17 = vsel %vm1077_vm8, %v1061_v4, %v1093_v31 }
 0x17a   : > { %8430 = vmatprep.subr.bf16.mxu1 %v10075_v28 }
 0x17b   : > { %v1110_v34 = vsel %vm1078_vm9, %v1062_v30, %v1094_v9 }
 0x17c   : > { %8431 = vmatpush3.bf16.msra.mxu1 %v10075_v28  ;;  %v10080_v40 = vpack.c.bf16 %v1110_v34, %v1109_v17 }
 0x17e   : > { %8432 = vmatprep.subr.bf16.mxu1 %v10080_v40 }
 0x180   : > { %8433 = vmatpush3.bf16.msra.mxu1 %v10080_v40 }
 0x181   : > { %9179 = vmatprep.subr.msk.bf16.mxu1 %vm1269_vm1, %v2037_v5 }
 0x183   : > { %8435 = vmatmul.mubr.bf16.vlgmr.msra.gmra.mxu1 %v9252_v22 }
 0x184   : > { %8438 = vmatprep.mubr.bf16.mxu1 %v9253_v35  ;;  %8501 = vmatpush3.bf16.msra.mxu1 %v10091_v36  ;;  %v8392_v37 = vpop.f32.mrf.mxu0 }
 0x185   : > { %v1332_v12 = vadd.f32 %v8392_v37, %v9982_v15 }
 0x186   : > { %v1323_v18 = vpop.f32.mrf.mxu0 }
 0x187   : > { %v1324_v19 = vadd.f32 %v9982_v15, %v1323_v18  ;;  %v1472_v45 = vmul.f32 0.01, %v1332_v12  ;;  %vm1440_vm10 = vcmp.gt.f32.partialorder %v1332_v12, 0.0 }
 0x188   : > { %v8393_v46 = vpop.f32.mrf.mxu0 }
 0x189   : > { %vm1438_vm11 = vcmp.gt.f32.partialorder %v1324_v19, 0.0  ;;  %v1470_v47 = vmul.f32 0.01, %v1324_v19  ;;  %v1335_v48 = vadd.f32 %v8393_v46, %v9982_v15  ;;  %v1504_v52 = vsel %vm1440_vm10, %v1332_v12, %v1472_v45  ;;  %v9260_v12 = vld [vmem:[%s9844_s28 + $0x48] sm:$0xff]   ;;  %v9261_v45 = vld [vmem:[%s9844_s28 + $0x50] sm:$0xff]  }
 0x18a   : > { %v1326_v16 = vpop.f32.mrf.mxu0 }
 0x18b   : > { %8439 = vmatmul.mubr.bf16.gmra.mxu1 %v9254_v38  ;;  %vm1441_vm12 = vcmp.gt.f32.partialorder %v1335_v48, 0.0  ;;  %v1473_v50 = vmul.f32 0.01, %v1335_v48  ;;  %v1327_v51 = vadd.f32 %v9982_v15, %v1326_v16  ;;  %v1502_v41 = vsel %vm1438_vm11, %v1324_v19, %v1470_v47 }
 0x18c   : > { %8442 = vmatprep.mubr.bf16.mxu1 %v9255_v39  ;;  %v8396_v53 = vpop.f32.mrf.mxu0 }
 0x18d   : > { %v1505_v24 = vsel %vm1441_vm12, %v1335_v48, %v1473_v50  ;;  %vm1439_vm13 = vcmp.gt.f32.partialorder %v1327_v51, 0.0  ;;  %v1471_v32 = vmul.f32 0.01, %v1327_v51  ;;  %v1348_v57 = vadd.f32 %v8396_v53, %v9982_v15 }
 0x18e   : > { %v1339_v25 = vpop.f32.mrf.mxu0  ;;  %v1806_v29 = vpack.c.bf16 %v1505_v24, %v1504_v52 }
 0x18f   : > { %v1503_v61 = vsel %vm1439_vm13, %v1327_v51, %v1471_v32  ;;  %v1340_v33 = vadd.f32 %v9982_v15, %v1339_v25  ;;  %v1476_v49 = vmul.f32 0.01, %v1348_v57  ;;  %vm1444_vm14 = vcmp.gt.f32.partialorder %v1348_v57, 0.0 }
 0x190   : > { %v1805_v62 = vpack.c.bf16 %v1503_v61, %v1502_v41  ;;  %v8397_v63 = vpop.f32.mrf.mxu0 }
 0x191   : > { %vm1442_vm15 = vcmp.gt.f32.partialorder %v1340_v33, 0.0  ;;  %v1474_v0 = vmul.f32 0.01, %v1340_v33  ;;  %v1351_v1 = vadd.f32 %v8397_v63, %v9982_v15  ;;  %v1508_v6 = vsel %vm1444_vm14, %v1348_v57, %v1476_v49  ;;  %v9263_v49 = vld [vmem:[%s9844_s28 + $0x60] sm:$0xff]  }
 0x192   : > { %v1342_v2 = vpop.f32.mrf.mxu0  ;;  %8472 = vmatprep.mubr.msk.bf16.mxu0 %vm1827_vm6, %v1805_v62 }
 0x193   : > { %8443 = vmatmul.mubr.bf16.gmra.mxu1 %v9256_v23  ;;  %vm1445_vm2 = vcmp.gt.f32.partialorder %v1351_v1, 0.0  ;;  %v1477_v58 = vmul.f32 0.01, %v1351_v1  ;;  %v1343_v3 = vadd.f32 %v9982_v15, %v1342_v2  ;;  %8473 = vmatmul.mubr.msk.bf16.gmra.mxu0 %vm1827_vm6, %v1806_v29  ;;  %v1506_v7 = vsel %vm1442_vm15, %v1340_v33, %v1474_v0  ;;  %v9262_v29 = vld [vmem:[%s9844_s28 + $0x58] sm:$0xff]  }
 0x194   : > { %8446 = vmatprep.mubr.bf16.mxu1 %v9257_v60  ;;  %v8400_v43 = vpop.f32.mrf.mxu0 }
 0x195   : > { %v1509_v14 = vsel %vm1445_vm2, %v1351_v1, %v1477_v58  ;;  %vm1443_vm3 = vcmp.gt.f32.partialorder %v1343_v3, 0.0  ;;  %v1475_v11 = vmul.f32 0.01, %v1343_v3  ;;  %v1364_v59 = vadd.f32 %v8400_v43, %v9982_v15 }
 0x196   : > { %v1355_v54 = vpop.f32.mrf.mxu0  ;;  %v1808_v26 = vpack.c.bf16 %v1509_v14, %v1508_v6 }
 0x197   : > { %v1507_v4 = vsel %vm1443_vm3, %v1343_v3, %v1475_v11  ;;  %v1356_v27 = vadd.f32 %v9982_v15, %v1355_v54  ;;  %v1480_v30 = vmul.f32 0.01, %v1364_v59  ;;  %vm1448_vm4 = vcmp.gt.f32.partialorder %v1364_v59, 0.0 }
 0x198   : > { %v1807_v55 = vpack.c.bf16 %v1507_v4, %v1506_v7  ;;  %v8401_v31 = vpop.f32.mrf.mxu0 }
 0x199   : > { %vm1446_vm5 = vcmp.gt.f32.partialorder %v1356_v27, 0.0  ;;  %v1478_v9 = vmul.f32 0.01, %v1356_v27  ;;  %v1367_v17 = vadd.f32 %v8401_v31, %v9982_v15  ;;  %v1512_v35 = vsel %vm1448_vm4, %v1364_v59, %v1480_v30 }
 0x19a   : > { %v1358_v34 = vpop.f32.mrf.mxu0  ;;  %8476 = vmatprep.mubr.msk.bf16.mxu0 %vm1827_vm6, %v1807_v55  ;;  %v9265_v55 = vld [vmem:[%s9844_s28 + $0x70] sm:$0xff]  }
 0x19b   : > { %8447 = vmatmul.mubr.bf16.gmra.mxu1 %v9258_v10  ;;  %vm1449_vm7 = vcmp.gt.f32.partialorder %v1367_v17, 0.0  ;;  %v1481_v5 = vmul.f32 0.01, %v1367_v17  ;;  %v1359_v22 = vadd.f32 %v9982_v15, %v1358_v34  ;;  %8477 = vmatmul.mubr.msk.bf16.gmra.mxu0 %vm1827_vm6, %v1808_v26  ;;  %v1510_v37 = vsel %vm1446_vm5, %v1356_v27, %v1478_v9 }
 0x19c   : > { %8450 = vmatprep.mubr.bf16.mxu1 %v9259_v20  ;;  %v8404_v38 = vpop.f32.mrf.mxu0  ;;  %v9264_v20 = vld [vmem:[%s9844_s28 + $0x68] sm:$0xff]  }
 0x19d   : > { %v1513_v39 = vsel %vm1449_vm7, %v1367_v17, %v1481_v5  ;;  %vm1447_vm8 = vcmp.gt.f32.partialorder %v1359_v22, 0.0  ;;  %v1479_v18 = vmul.f32 0.01, %v1359_v22  ;;  %v1380_v19 = vadd.f32 %v8404_v38, %v9982_v15 }
 0x19e   : > { %v1371_v46 = vpop.f32.mrf.mxu0  ;;  %v1810_v47 = vpack.c.bf16 %v1513_v39, %v1512_v35 }
 0x19f   : > { %v1511_v48 = vsel %vm1447_vm8, %v1359_v22, %v1479_v18  ;;  %v1372_v16 = vadd.f32 %v9982_v15, %v1371_v46  ;;  %v1484_v51 = vmul.f32 0.01, %v1380_v19  ;;  %vm1452_vm9 = vcmp.gt.f32.partialorder %v1380_v19, 0.0 }
 0x1a0   : > { %v1809_v50 = vpack.c.bf16 %v1511_v48, %v1510_v37  ;;  %v8405_v52 = vpop.f32.mrf.mxu0 }
 0x1a1   : > { %vm1450_vm10 = vcmp.gt.f32.partialorder %v1372_v16, 0.0  ;;  %v1482_v41 = vmul.f32 0.01, %v1372_v16  ;;  %v1383_v53 = vadd.f32 %v8405_v52, %v9982_v15  ;;  %v1516_v57 = vsel %vm1452_vm9, %v1380_v19, %v1484_v51  ;;  %v9266_v19 = vld [vmem:[%s9844_s28 + $0x78] sm:$0xff]  }
 0x1a2   : > { %v1374_v23 = vpop.f32.mrf.mxu0  ;;  %8480 = vmatprep.mubr.msk.bf16.mxu0 %vm1827_vm6, %v1809_v50 }
 0x1a3   : > { %8451 = vmatmul.mubr.bf16.gmra.mxu1 %v9260_v12  ;;  %vm1453_vm11 = vcmp.gt.f32.partialorder %v1383_v53, 0.0  ;;  %v1485_v24 = vmul.f32 0.01, %v1383_v53  ;;  %v1375_v32 = vadd.f32 %v9982_v15, %v1374_v23  ;;  %8481 = vmatmul.mubr.msk.bf16.gmra.mxu0 %vm1827_vm6, %v1810_v47  ;;  %v1514_v60 = vsel %vm1450_vm10, %v1372_v16, %v1482_v41 }
 0x1a4   : > { %8454 = vmatprep.mubr.bf16.mxu1 %v9261_v45  ;;  %v8408_v25 = vpop.f32.mrf.mxu0 }
 0x1a5   : > { %v1517_v61 = vsel %vm1453_vm11, %v1383_v53, %v1485_v24  ;;  %vm1451_vm12 = vcmp.gt.f32.partialorder %v1375_v32, 0.0  ;;  %v1483_v33 = vmul.f32 0.01, %v1375_v32  ;;  %v1396_v62 = vadd.f32 %v8408_v25, %v9982_v15 }
 0x1a6   : > { %v1387_v63 = vpop.f32.mrf.mxu0  ;;  %v1812_v0 = vpack.c.bf16 %v1517_v61, %v1516_v57 }
 0x1a7   : > { %v1515_v1 = vsel %vm1451_vm12, %v1375_v32, %v1483_v33  ;;  %v1388_v2 = vadd.f32 %v9982_v15, %v1387_v63  ;;  %v1488_v3 = vmul.f32 0.01, %v1396_v62  ;;  %vm1456_vm13 = vcmp.gt.f32.partialorder %v1396_v62, 0.0 }
 0x1a8   : > { %v1811_v58 = vpack.c.bf16 %v1515_v1, %v1514_v60  ;;  %v8409_v6 = vpop.f32.mrf.mxu0 }
 0x1a9   : > { %v1486_v7 = vmul.f32 0.01, %v1388_v2  ;;  %v1399_v43 = vadd.f32 %v8409_v6, %v9982_v15  ;;  %vm1454_vm14 = vcmp.gt.f32.partialorder %v1388_v2, 0.0  ;;  %v1520_v59 = vsel %vm1456_vm13, %v1396_v62, %v1488_v3  ;;  %v9268_v3 = vld [vmem:[%s12031_s12 + $0x38] sm:$0xff]  }
 0x1aa   : > { %v1390_v10 = vpop.f32.mrf.mxu0  ;;  %8484 = vmatprep.mubr.msk.bf16.mxu0 %vm1827_vm6, %v1811_v58  ;;  %v2314_v58 = vld [vmem:[%s12032_s13] sm:$0xf]  ;;  %8568 = vmatprep.subr.bf16.mxu1 %v9268_v3 }
 0x1ab   : > { %8455 = vmatmul.mubr.bf16.gmra.mxu1 %v9262_v29  ;;  %vm1457_vm15 = vcmp.gt.f32.partialorder %v1399_v43, 0.0  ;;  %v1489_v14 = vmul.f32 0.01, %v1399_v43  ;;  %v1391_v11 = vadd.f32 %v9982_v15, %v1390_v10  ;;  %8485 = vmatmul.mubr.msk.bf16.gmra.mxu0 %vm1827_vm6, %v1812_v0  ;;  %v1518_v54 = vsel %vm1454_vm14, %v1388_v2, %v1486_v7 }
 0x1ac   : > { %8458 = vmatprep.mubr.bf16.mxu1 %v9263_v49  ;;  %v8412_v27 = vpop.f32.mrf.mxu0  ;;  %9180 = vmatprep.subr.msk.bf16.mxu0 %vm1269_vm1, %v2314_v58 }
 0x1ad   : > { %v1521_v26 = vsel %vm1457_vm15, %v1399_v43, %v1489_v14  ;;  %vm1455_vm2 = vcmp.gt.f32.partialorder %v1391_v11, 0.0  ;;  %v1487_v4 = vmul.f32 0.01, %v1391_v11  ;;  %v1412_v30 = vadd.f32 %v8412_v27, %v9982_v15 }
 0x1ae   : > { %v1814_v31 = vpack.c.bf16 %v1521_v26, %v1520_v59  ;;  %v1403_v17 = vpop.f32.mrf.mxu0 }
 0x1af   : > { %v1519_v9 = vsel %vm1455_vm2, %v1391_v11, %v1487_v4  ;;  %v1404_v5 = vadd.f32 %v9982_v15, %v1403_v17  ;;  %v1492_v22 = vmul.f32 0.01, %v1412_v30  ;;  %vm1460_vm3 = vcmp.gt.f32.partialorder %v1412_v30, 0.0  ;;  %v9270_v4 = vld [vmem:[%s12031_s12 + $0x28] sm:$0xff]  }
 0x1b0   : > { %v1813_v34 = vpack.c.bf16 %v1519_v9, %v1518_v54  ;;  %v8413_v35 = vpop.f32.mrf.mxu0  ;;  %v9271_v9 = vld [vmem:[%s12031_s12 + $0x20] sm:$0xff]  }
 0x1b1   : > { %vm1458_vm4 = vcmp.gt.f32.partialorder %v1404_v5, 0.0  ;;  %v1490_v37 = vmul.f32 0.01, %v1404_v5  ;;  %v1415_v38 = vadd.f32 %v8413_v35, %v9982_v15  ;;  %v1524_v45 = vsel %vm1460_vm3, %v1412_v30, %v1492_v22 }
 0x1b2   : > { %8488 = vmatprep.mubr.msk.bf16.mxu0 %vm1827_vm6, %v1813_v34  ;;  %v1406_v12 = vpop.f32.mrf.mxu0 }
 0x1b3   : > { %8459 = vmatmul.mubr.bf16.gmra.mxu1 %v9264_v20  ;;  %8489 = vmatmul.mubr.msk.bf16.gmra.mxu0 %vm1827_vm6, %v1814_v31  ;;  %vm1461_vm5 = vcmp.gt.f32.partialorder %v1415_v38, 0.0  ;;  %v1493_v39 = vmul.f32 0.01, %v1415_v38  ;;  %v1407_v18 = vadd.f32 %v9982_v15, %v1406_v12  ;;  %v1522_v46 = vsel %vm1458_vm4, %v1404_v5, %v1490_v37  ;;  %v9269_v20 = vld [vmem:[%s12031_s12 + $0x30] sm:$0xff]   ;;  %v9272_v5 = vld [vmem:[%s12031_s12 + $0x18] sm:$0xff]  }
 0x1b4   : > { %8462 = vmatprep.mubr.bf16.mxu1 %v9265_v55  ;;  %v8416_v47 = vpop.f32.mrf.mxu0 }
 0x1b5   : > { %v1525_v48 = vsel %vm1461_vm5, %v1415_v38, %v1493_v39  ;;  %vm1459_vm7 = vcmp.gt.f32.partialorder %v1407_v18, 0.0  ;;  %v1491_v16 = vmul.f32 0.01, %v1407_v18  ;;  %v1428_v50 = vadd.f32 %v8416_v47, %v9982_v15 }
 0x1b6   : > { %v1419_v51 = vpop.f32.mrf.mxu0  ;;  %v1816_v52 = vpack.c.bf16 %v1525_v48, %v1524_v45 }
 0x1b7   : > { %v1523_v41 = vsel %vm1459_vm7, %v1407_v18, %v1491_v16  ;;  %v1420_v53 = vadd.f32 %v9982_v15, %v1419_v51  ;;  %v1496_v24 = vmul.f32 0.01, %v1428_v50  ;;  %vm1464_vm8 = vcmp.gt.f32.partialorder %v1428_v50, 0.0 }
 0x1b8   : > { %v1815_v23 = vpack.c.bf16 %v1523_v41, %v1522_v46  ;;  %v8417_v32 = vpop.f32.mrf.mxu0 }
 0x1b9   : > { %v1494_v57 = vmul.f32 0.01, %v1420_v53  ;;  %v1431_v60 = vadd.f32 %v8417_v32, %v9982_v15  ;;  %vm1462_vm9 = vcmp.gt.f32.partialorder %v1420_v53, 0.0  ;;  %v1528_v33 = vsel %vm1464_vm8, %v1428_v50, %v1496_v24 }
 0x1ba   : > { %v1422_v25 = vpop.f32.mrf.mxu0  ;;  %8492 = vmatprep.mubr.msk.bf16.mxu0 %vm1827_vm6, %v1815_v23 }
 0x1bb   : > { %8463 = vmatmul.mubr.bf16.gmra.mxu1 %v9266_v19  ;;  %vm1465_vm10 = vcmp.gt.f32.partialorder %v1431_v60, 0.0  ;;  %v1497_v29 = vmul.f32 0.01, %v1431_v60  ;;  %v1423_v61 = vadd.f32 %v9982_v15, %v1422_v25  ;;  %8493 = vmatmul.mubr.msk.bf16.gmra.mxu0 %vm1827_vm6, %v1816_v52  ;;  %v1526_v62 = vsel %vm1462_vm9, %v1420_v53, %v1494_v57 }
 0x1bc   : > { %v2316_v15 = vsel %vm1269_vm1, %v2314_v58, 0  ;;  %v9273_v58 = vld [vmem:[%s12031_s12 + $0x10] sm:$0xff]  }
 0x1bd   : > { %v1529_v49 = vsel %vm1465_vm10, %v1431_v60, %v1497_v29  ;;  %vm1463_vm11 = vcmp.gt.f32.partialorder %v1423_v61, 0.0  ;;  %v1495_v63 = vmul.f32 0.01, %v1423_v61  ;;  %8535 = vmatpush3.bf16.msra.mxu0 %v2316_v15  ;;  %v9274_v15 = vld [vmem:[%s12031_s12 + $0x8] sm:$0xff]  }
 0x1be   : > { %v1818_v0 = vpack.c.bf16 %v1529_v49, %v1528_v33 }
 0x1bf   : > { %v1527_v1 = vsel %vm1463_vm11, %v1423_v61, %v1495_v63 }
 0x1c0   : > { %v1817_v2 = vpack.c.bf16 %v1527_v1, %v1526_v62 }
 0x1c2   : > { %8496 = vmatprep.mubr.msk.bf16.mxu0 %vm1827_vm6, %v1817_v2 }
 0x1c3   : > { %8497 = vmatmul.mubr.msk.bf16.gmra.mxu0 %vm1827_vm6, %v1818_v0 }
 0x243   : > { %v8436_v6 = vpop.f32.mrf.mxu1 }
 0x245   : > { %v1660_v7 = vpop.f32.mrf.mxu1 }
 0x247   : > { %v8437_v43 = vpop.f32.mrf.mxu1 }
 0x248   : > { %v1788_v11 = vpack.c.bf16 %v8437_v43, %v8436_v6  ;;  %v8470_v6 = vpop.f32.mrf.mxu0 }
 0x249   : > { %v1663_v10 = vpop.f32.mrf.mxu1 }
 0x24a   : > { %v1787_v14 = vpack.c.bf16 %v1663_v10, %v1660_v7  ;;  %v2977_v7 = vld [vmem:[%s12033_s14] sm:$0xf]  ;;  %v1910_v43 = vpop.f32.mrf.mxu0 }
 0x24b   : > { %v8440_v59 = vpop.f32.mrf.mxu1 }
 0x24c   : > { %8502 = vmatprep.mubr.msk.bf16.mxu1 %vm821_vm0, %v1787_v14  ;;  %8536 = vmatprep.mubr.msk.bf16.mxu0 %vm821_vm0, %v1787_v14  ;;  %v8471_v10 = vpop.f32.mrf.mxu0 }
 0x24d   : > { %v1676_v54 = vpop.f32.mrf.mxu1  ;;  %8503 = vmatmul.mubr.msk.bf16.vlgmr.msra.gmra.mxu1 %vm821_vm0, %v1788_v11  ;;  %8537 = vmatmul.mubr.msk.bf16.vlgmr.msra.gmra.mxu0 %vm821_vm0, %v1788_v11 }
 0x24e   : > { %8569 = vmatpush3.bf16.msra.mxu1 %v9268_v3  ;;  %v9275_v3 = vld [vmem:[%s12031_s12] sm:$0xff]   ;;  %v1913_v14 = vpop.f32.mrf.mxu0 }
 0x24f   : > { %v8441_v26 = vpop.f32.mrf.mxu1  ;;  %8570 = vmatprep.subr.bf16.mxu1 %v9269_v20 }
 0x250   : > { %v1790_v30 = vpack.c.bf16 %v8441_v26, %v8440_v59 }
 0x251   : > { %v1679_v27 = vpop.f32.mrf.mxu1 }
 0x252   : > { %v1789_v55 = vpack.c.bf16 %v1679_v27, %v1676_v54  ;;  %8571 = vmatpush3.bf16.msra.mxu1 %v9269_v20 }
 0x253   : > { %v8444_v31 = vpop.f32.mrf.mxu1  ;;  %8572 = vmatprep.subr.bf16.mxu1 %v9270_v4  ;;  %v8474_v11 = vpop.f32.mrf.mxu0 }
 0x254   : > { %8506 = vmatprep.mubr.msk.bf16.mxu1 %vm821_vm0, %v1789_v55  ;;  %8540 = vmatprep.mubr.msk.bf16.mxu0 %vm821_vm0, %v1789_v55 }
 0x255   : > { %v1692_v17 = vpop.f32.mrf.mxu1  ;;  %8507 = vmatmul.mubr.msk.bf16.gmra.mxu1 %vm821_vm0, %v1790_v30  ;;  %8541 = vmatmul.mubr.msk.bf16.gmra.mxu0 %vm821_vm0, %v1790_v30  ;;  %v1926_v59 = vpop.f32.mrf.mxu0 }
 0x256   : > { %8573 = vmatpush3.bf16.msra.mxu1 %v9270_v4 }
 0x257   : > { %v8445_v34 = vpop.f32.mrf.mxu1  ;;  %8574 = vmatprep.subr.bf16.mxu1 %v9271_v9  ;;  %v8475_v20 = vpop.f32.mrf.mxu0 }
 0x258   : > { %v1792_v37 = vpack.c.bf16 %v8445_v34, %v8444_v31 }
 0x259   : > { %v1695_v22 = vpop.f32.mrf.mxu1  ;;  %v1929_v54 = vpop.f32.mrf.mxu0 }
 0x25a   : > { %v1791_v35 = vpack.c.bf16 %v1695_v22, %v1692_v17  ;;  %8575 = vmatpush3.bf16.msra.mxu1 %v9271_v9 }
 0x25b   : > { %v8448_v38 = vpop.f32.mrf.mxu1  ;;  %8576 = vmatprep.subr.bf16.mxu1 %v9272_v5  ;;  %v8478_v26 = vpop.f32.mrf.mxu0 }
 0x25c   : > { %8510 = vmatprep.mubr.msk.bf16.mxu1 %vm821_vm0, %v1791_v35  ;;  %8544 = vmatprep.mubr.msk.bf16.mxu0 %vm821_vm0, %v1791_v35 }
 0x25d   : > { %v1708_v12 = vpop.f32.mrf.mxu1  ;;  %8511 = vmatmul.mubr.msk.bf16.gmra.mxu1 %vm821_vm0, %v1792_v37  ;;  %8545 = vmatmul.mubr.msk.bf16.gmra.mxu0 %vm821_vm0, %v1792_v37  ;;  %v1942_v4 = vpop.f32.mrf.mxu0 }
 0x25e   : > { %8577 = vmatpush3.bf16.msra.mxu1 %v9272_v5 }
 0x25f   : > { %v8449_v39 = vpop.f32.mrf.mxu1  ;;  %8578 = vmatprep.subr.bf16.mxu1 %v9273_v58  ;;  %v8479_v27 = vpop.f32.mrf.mxu0 }
 0x260   : > { %v1794_v45 = vpack.c.bf16 %v8449_v39, %v8448_v38 }
 0x261   : > { %v1711_v18 = vpop.f32.mrf.mxu1  ;;  %v1945_v55 = vpop.f32.mrf.mxu0 }
 0x262   : > { %v1793_v19 = vpack.c.bf16 %v1711_v18, %v1708_v12  ;;  %8579 = vmatpush3.bf16.msra.mxu1 %v9273_v58 }
 0x263   : > { %v8452_v46 = vpop.f32.mrf.mxu1  ;;  %8580 = vmatprep.subr.bf16.mxu1 %v9274_v15  ;;  %v8482_v30 = vpop.f32.mrf.mxu0 }
 0x264   : > { %8514 = vmatprep.mubr.msk.bf16.mxu1 %vm821_vm0, %v1793_v19  ;;  %8548 = vmatprep.mubr.msk.bf16.mxu0 %vm821_vm0, %v1793_v19 }
 0x265   : > { %v1724_v47 = vpop.f32.mrf.mxu1  ;;  %8515 = vmatmul.mubr.msk.bf16.gmra.mxu1 %vm821_vm0, %v1794_v45  ;;  %8549 = vmatmul.mubr.msk.bf16.gmra.mxu0 %vm821_vm0, %v1794_v45  ;;  %v1958_v31 = vpop.f32.mrf.mxu0 }
 0x266   : > { %8581 = vmatpush3.bf16.msra.mxu1 %v9274_v15 }
 0x267   : > { %v8453_v48 = vpop.f32.mrf.mxu1  ;;  %8582 = vmatprep.subr.bf16.mxu1 %v9275_v3  ;;  %v8483_v9 = vpop.f32.mrf.mxu0 }
 0x268   : > { %v1796_v51 = vpack.c.bf16 %v8453_v48, %v8452_v46 }
 0x269   : > { %v1727_v16 = vpop.f32.mrf.mxu1  ;;  %v1961_v17 = vpop.f32.mrf.mxu0 }
 0x26a   : > { %v1795_v50 = vpack.c.bf16 %v1727_v16, %v1724_v47  ;;  %8583 = vmatpush3.bf16.msra.mxu1 %v9275_v3 }
 0x26b   : > { %v8456_v52 = vpop.f32.mrf.mxu1  ;;  %9181 = vmatprep.subr.msk.bf16.mxu1 %vm1269_vm1, %v2977_v7  ;;  %v10214_v5 = vpop.f32.mrf.mxu0 }
 0x26c   : > { %8518 = vmatprep.mubr.msk.bf16.mxu1 %vm821_vm0, %v1795_v50  ;;  %8552 = vmatprep.mubr.msk.bf16.mxu0 %vm821_vm0, %v1795_v50  ;;  %v3003_v50 = vsel %vm1269_vm1, %v2977_v7, 0 }
 0x26d   : > { %v1740_v41 = vpop.f32.mrf.mxu1  ;;  %8519 = vmatmul.mubr.msk.bf16.gmra.mxu1 %vm821_vm0, %v1796_v51  ;;  %8553 = vmatmul.mubr.msk.bf16.gmra.mxu0 %vm821_vm0, %v1796_v51  ;;  %v1974_v37 = vpop.f32.mrf.mxu0 }
 0x26f   : > { %v8457_v53 = vpop.f32.mrf.mxu1  ;;  %v8487_v47 = vpop.f32.mrf.mxu0 }
 0x270   : > { %v1798_v32 = vpack.c.bf16 %v8457_v53, %v8456_v52 }
 0x271   : > { %v1743_v23 = vpop.f32.mrf.mxu1  ;;  %v1977_v52 = vpop.f32.mrf.mxu0 }
 0x272   : > { %v1797_v24 = vpack.c.bf16 %v1743_v23, %v1740_v41 }
 0x273   : > { %v8460_v57 = vpop.f32.mrf.mxu1 }
 0x274   : > { %8522 = vmatprep.mubr.msk.bf16.mxu1 %vm821_vm0, %v1797_v24  ;;  %8556 = vmatprep.mubr.msk.bf16.mxu0 %vm821_vm0, %v1797_v24 }
 0x275   : > { %v1756_v60 = vpop.f32.mrf.mxu1  ;;  %8523 = vmatmul.mubr.msk.bf16.gmra.mxu1 %vm821_vm0, %v1798_v32  ;;  %8557 = vmatmul.mubr.msk.bf16.gmra.mxu0 %vm821_vm0, %v1798_v32 }
 0x277   : > { %v8461_v25 = vpop.f32.mrf.mxu1 }
 0x278   : > { %v1800_v33 = vpack.c.bf16 %v8461_v25, %v8460_v57  ;;  %v8490_v25 = vpop.f32.mrf.mxu0 }
 0x279   : > { %v1759_v29 = vpop.f32.mrf.mxu1 }
 0x27a   : > { %v1799_v61 = vpack.c.bf16 %v1759_v29, %v1756_v60 }
 0x27b   : > { %v8464_v62 = vpop.f32.mrf.mxu1 }
 0x27c   : > { %8526 = vmatprep.mubr.msk.bf16.mxu1 %vm821_vm0, %v1799_v61  ;;  %8560 = vmatprep.mubr.msk.bf16.mxu0 %vm821_vm0, %v1799_v61 }
 0x27d   : > { %v1772_v49 = vpop.f32.mrf.mxu1  ;;  %8527 = vmatmul.mubr.msk.bf16.gmra.mxu1 %vm821_vm0, %v1800_v33  ;;  %8561 = vmatmul.mubr.msk.bf16.gmra.mxu0 %vm821_vm0, %v1800_v33 }
 0x27f   : > { %v8465_v63 = vpop.f32.mrf.mxu1 }
 0x280   : > { %v1802_v2 = vpack.c.bf16 %v8465_v63, %v8464_v62  ;;  %v1990_v62 = vpop.f32.mrf.mxu0 }
 0x281   : > { %v1775_v0 = vpop.f32.mrf.mxu1 }
 0x282   : > { %v1801_v1 = vpack.c.bf16 %v1775_v0, %v1772_v49  ;;  %v8491_v3 = vpop.f32.mrf.mxu0 }
 0x284   : > { %8530 = vmatprep.mubr.msk.bf16.mxu1 %vm821_vm0, %v1801_v1  ;;  %8564 = vmatprep.mubr.msk.bf16.mxu0 %vm821_vm0, %v1801_v1 }
 0x285   : > { %8531 = vmatmul.mubr.msk.bf16.gmra.mxu1 %vm821_vm0, %v1802_v2  ;;  %8565 = vmatmul.mubr.msk.bf16.gmra.mxu0 %vm821_vm0, %v1802_v2 }
 0x30d   : > { %v8504_v34 = vpop.f32.mrf.mxu1 }
 0x30e   : > { %v2252_v19 = vmul.f32 %v8504_v34, %v8470_v6 }
 0x30f   : > { %v2123_v22 = vpop.f32.mrf.mxu1 }
 0x310   : > { %v2250_v39 = vmul.f32 %v2123_v22, %v1910_v43 }
 0x311   : > { %v8505_v35 = vpop.f32.mrf.mxu1 }
 0x312   : > { %v2253_v38 = vmul.f32 %v8505_v35, %v8471_v10  ;;  %v1993_v10 = vpop.f32.mrf.mxu0 }
 0x313   : > { %v2126_v12 = vpop.f32.mrf.mxu1 }
 0x314   : > { %v2251_v18 = vmul.f32 %v2126_v12, %v1913_v14  ;;  %v2283_v48 = vpack.c.bf16 %v2253_v38, %v2252_v19  ;;  %v8494_v22 = vpop.f32.mrf.mxu0 }
 0x315   : > { %v8508_v45 = vpop.f32.mrf.mxu1 }
 0x316   : > { %v2282_v46 = vpack.c.bf16 %v2251_v18, %v2250_v39  ;;  %v2256_v32 = vmul.f32 %v8508_v45, %v8474_v11  ;;  %v2006_v35 = vpop.f32.mrf.mxu0 }
 0x317   : > { %v2139_v16 = vpop.f32.mrf.mxu1 }
 0x318   : > { %8584 = vmatprep.mubr.bf16.mxu1 %v2282_v46  ;;  %v2254_v23 = vmul.f32 %v2139_v16, %v1926_v59 }
 0x319   : > { %v8509_v51 = vpop.f32.mrf.mxu1  ;;  %8585 = vmatmul.mubr.bf16.vlgmr.msra.gmra.mxu1 %v2283_v48 }
 0x31a   : > { %8617 = vmatpush3.bf16.msra.mxu1 %v3003_v50  ;;  %v2257_v41 = vmul.f32 %v8509_v51, %v8475_v20 }
 0x31b   : > { %v2142_v53 = vpop.f32.mrf.mxu1 }
 0x31c   : > { %v2255_v24 = vmul.f32 %v2142_v53, %v1929_v54  ;;  %v2285_v29 = vpack.c.bf16 %v2257_v41, %v2256_v32 }
 0x31d   : > { %v8512_v57 = vpop.f32.mrf.mxu1 }
 0x31e   : > { %v2284_v60 = vpack.c.bf16 %v2255_v24, %v2254_v23  ;;  %v2260_v2 = vmul.f32 %v8512_v57, %v8478_v26 }
 0x31f   : > { %v2155_v61 = vpop.f32.mrf.mxu1 }
 0x320   : > { %8588 = vmatprep.mubr.bf16.mxu1 %v2284_v60  ;;  %v2258_v0 = vmul.f32 %v2155_v61, %v1942_v4 }
 0x321   : > { %v8513_v33 = vpop.f32.mrf.mxu1  ;;  %8589 = vmatmul.mubr.bf16.gmra.mxu1 %v2285_v29 }
 0x322   : > { %v2261_v49 = vmul.f32 %v8513_v33, %v8479_v27 }
 0x323   : > { %v2158_v63 = vpop.f32.mrf.mxu1 }
 0x324   : > { %v2259_v1 = vmul.f32 %v2158_v63, %v1945_v55  ;;  %v2287_v6 = vpack.c.bf16 %v2261_v49, %v2260_v2 }
 0x325   : > { %v8516_v58 = vpop.f32.mrf.mxu1 }
 0x326   : > { %v2286_v15 = vpack.c.bf16 %v2259_v1, %v2258_v0  ;;  %v2264_v54 = vmul.f32 %v8516_v58, %v8482_v30 }
 0x327   : > { %v2171_v7 = vpop.f32.mrf.mxu1 }
 0x328   : > { %8592 = vmatprep.mubr.bf16.mxu1 %v2286_v15  ;;  %v2262_v59 = vmul.f32 %v2171_v7, %v1958_v31  ;;  %v8495_v31 = vpop.f32.mrf.mxu0 }
 0x329   : > { %v8517_v43 = vpop.f32.mrf.mxu1  ;;  %8593 = vmatmul.mubr.bf16.gmra.mxu1 %v2287_v6 }
 0x32a   : > { %v2265_v14 = vmul.f32 %v8517_v43, %v8483_v9  ;;  %v2009_v48 = vpop.f32.mrf.mxu0 }
 0x32b   : > { %v2174_v11 = vpop.f32.mrf.mxu1 }
 0x32c   : > { %v2263_v20 = vmul.f32 %v2174_v11, %v1961_v17  ;;  %v2289_v4 = vpack.c.bf16 %v2265_v14, %v2264_v54 }
 0x32d   : > { %v8520_v34 = vpop.f32.mrf.mxu1 }
 0x32e   : > { %v2288_v27 = vpack.c.bf16 %v2263_v20, %v2262_v59  ;;  %v2268_v19 = vmul.f32 %v8520_v34, %v10214_v5 }
 0x32f   : > { %v2187_v55 = vpop.f32.mrf.mxu1 }
 0x330   : > { %8596 = vmatprep.mubr.bf16.mxu1 %v2288_v27  ;;  %v2266_v39 = vmul.f32 %v2187_v55, %v1974_v37  ;;  %v8498_v37 = vpop.f32.mrf.mxu0  ;;  %v9590_v55 = vmov 0  }
 0x331   : > { %v8521_v26 = vpop.f32.mrf.mxu1  ;;  %8597 = vmatmul.mubr.bf16.gmra.mxu1 %v2289_v4  ;;  %9234 = vset.pattern.permute.xlu1 %v9590_v55 }
 0x332   : > { %v2269_v38 = vmul.f32 %v8521_v26, %v8487_v47  ;;  %v2022_v32 = vpop.f32.mrf.mxu0  ;;  %9233 = vset.pattern.permute.xlu0 %v9590_v55  ;;  %v806_v55 = vld [vmem:[%s10271_s3 + $0x8] sm:$0xff] }
 0x333   : > { %v2190_v12 = vpop.f32.mrf.mxu1 }
 0x334   : > { %v2267_v18 = vmul.f32 %v2190_v12, %v1977_v52  ;;  %v2291_v17 = vpack.c.bf16 %v2269_v38, %v2268_v19  ;;  %v8499_v0 = vpop.f32.mrf.mxu0  ;;  %v817_v19 = vld [vmem:[%s10271_s3 + $0x60] sm:$0xff] }
 0x335   : > { %v8524_v9 = vpop.f32.mrf.mxu1 }
 0x336   : > { %v2290_v45 = vpack.c.bf16 %v2267_v18, %v2266_v39  ;;  %v2272_v53 = vmul.f32 %v8524_v9, %v8490_v25  ;;  %v2025_v2 = vpop.f32.mrf.mxu0  ;;  %v820_v39 = vld [vmem:[%s10271_s3 + $0x78] sm:$0xff] }
 0x337   : > { %v2203_v30 = vpop.f32.mrf.mxu1  ;;  %2958 = vperm.xlu1 %9234, %v820_v39   ;;  %v805_v39 = vld [vmem:[%s10271_s3] sm:$0xff] }
 0x338   : > { %8600 = vmatprep.mubr.bf16.mxu1 %v2290_v45  ;;  %v2270_v51 = vmul.f32 %v2203_v30, %v1990_v62 }
 0x339   : > { %v8525_v46 = vpop.f32.mrf.mxu1  ;;  %8601 = vmatmul.mubr.bf16.gmra.mxu1 %v2291_v17 }
 0x33a   : > { %v2273_v16 = vmul.f32 %v8525_v46, %v8491_v3 }
 0x33b   : > { %v2206_v50 = vpop.f32.mrf.mxu1  ;;  %2943 = vperm.xlu1 %9234, %v817_v19  }
 0x33c   : > { %v2271_v41 = vmul.f32 %v2206_v50, %v1993_v10  ;;  %v2293_v52 = vpack.c.bf16 %v2273_v16, %v2272_v53 }
 0x33d   : > { %v8528_v47 = vpop.f32.mrf.mxu1 }
 0x33e   : > { %v2292_v23 = vpack.c.bf16 %v2271_v41, %v2270_v51  ;;  %v2276_v33 = vmul.f32 %v8528_v47, %v8494_v22  ;;  %v815_v41 = vld [vmem:[%s10271_s3 + $0x50] sm:$0xff] }
 0x33f   : > { %v2219_v24 = vpop.f32.mrf.mxu1 }
 0x340   : > { %8604 = vmatprep.mubr.bf16.mxu1 %v2292_v23  ;;  %v2274_v29 = vmul.f32 %v2219_v24, %v2006_v35 }
 0x341   : > { %v8529_v5 = vpop.f32.mrf.mxu1  ;;  %8605 = vmatmul.mubr.bf16.gmra.mxu1 %v2293_v52 }
 0x342   : > { %v2277_v57 = vmul.f32 %v8529_v5, %v8495_v31  ;;  %v816_v5 = vld [vmem:[%s10271_s3 + $0x58] sm:$0xff] }
 0x343   : > { %v2222_v60 = vpop.f32.mrf.mxu1 }
 0x344   : > { %v2275_v61 = vmul.f32 %v2222_v60, %v2009_v48  ;;  %v2295_v62 = vpack.c.bf16 %v2277_v57, %v2276_v33  ;;  %v818_v48 = vld [vmem:[%s10271_s3 + $0x68] sm:$0xff] }
 0x345   : > { %v8532_v49 = vpop.f32.mrf.mxu1  ;;  %2948 = vperm.xlu1 %9234, %v818_v48  }
 0x346   : > { %v2294_v63 = vpack.c.bf16 %v2275_v61, %v2274_v29  ;;  %v2280_v7 = vmul.f32 %v8532_v49, %v8498_v37  ;;  %v813_v29 = vld [vmem:[%s10271_s3 + $0x40] sm:$0xff] }
 0x347   : > { %v2235_v1 = vpop.f32.mrf.mxu1 }
 0x348   : > { %8608 = vmatprep.mubr.bf16.mxu1 %v2294_v63  ;;  %v2278_v3 = vmul.f32 %v2235_v1, %v2022_v32  ;;  %v814_v63 = vld [vmem:[%s10271_s3 + $0x48] sm:$0xff] }
 0x349   : > { %v8533_v25 = vpop.f32.mrf.mxu1  ;;  %8609 = vmatmul.mubr.bf16.gmra.mxu1 %v2295_v62  ;;  %2933 = vperm.xlu1 %9234, %v815_v41  }
 0x34a   : > { %v2281_v58 = vmul.f32 %v8533_v25, %v8499_v0  ;;  %v819_v0 = vld [vmem:[%s10271_s3 + $0x70] sm:$0xff]  ;;  %v812_v25 = vld [vmem:[%s10271_s3 + $0x38] sm:$0xff] }
 0x34b   : > { %v2238_v15 = vpop.f32.mrf.mxu1  ;;  %2953 = vperm.xlu0 %9233, %v819_v0  }
 0x34c   : > { %v2279_v6 = vmul.f32 %v2238_v15, %v2025_v2  ;;  %v2297_v10 = vpack.c.bf16 %v2281_v58, %v2280_v7  ;;  %v811_v58 = vld [vmem:[%s10271_s3 + $0x30] sm:$0xff] }
 0x34d   : > { %2938 = vperm.xlu1 %9234, %v816_v5  }
 0x34e   : > { %v2296_v43 = vpack.c.bf16 %v2279_v6, %v2278_v3  ;;  %v810_v6 = vld [vmem:[%s10271_s3 + $0x28] sm:$0xff] }
 0x34f   : > { %2918 = vperm.xlu0 %9233, %v812_v25  }
 0x350   : > { %8612 = vmatprep.mubr.bf16.mxu1 %v2296_v43  ;;  %v809_v43 = vld [vmem:[%s10271_s3 + $0x20] sm:$0xff] }
 0x351   : > { %8613 = vmatmul.mubr.bf16.gmra.mxu1 %v2297_v10  ;;  %2923 = vperm.xlu1 %9234, %v813_v29  }
 0x352   : > { %8618 = vmatprep.mubr.msk.bf16.mxu1 %vm821_vm0, %v10080_v40 }
 0x353   : > { %2908 = vperm.xlu0 %9233, %v810_v6  }
 0x355   : > { %2928 = vperm.xlu1 %9234, %v814_v63  }
 0x359   : > { %8619 = vmatmul.mubr.msk.bf16.vlgmr.msra.gmra.mxu1 %vm821_vm0, %v10075_v28  ;;  %v9412_v28 = vld [vmem:[%s9810_s26] sm:$0xff]   ;;  %2913 = vperm.xlu1 %9234, %v811_v58  }
 0x35a   : > { %8622 = vmatprep.mubr.msk.bf16.mxu1 %vm821_vm0, %v10069_v21  ;;  %v8538_v21 = vpop.f32.mrf.mxu0 }
 0x35c   : > { %v10236_v40 = vpop.f32.mrf.mxu0 }
 0x35d   : > { %12137 = vst [vmem:[#allocation12_spill] sm:$0xff] %v10236_v40  ;;  %2903 = vperm.xlu1 %9234, %v809_v43  }
 0x35e   : > { %v8539_v14 = vpop.f32.mrf.mxu0 }
 0x361   : > { %8623 = vmatmul.mubr.msk.bf16.gmra.mxu1 %vm821_vm0, %v10058_v42  ;;  %v10238_v42 = vpop.f32.mrf.mxu0 }
 0x362   : > { %8626 = vmatprep.mubr.msk.bf16.mxu1 %vm821_vm0, %v10050_v56  ;;  %12138 = vst [vmem:[#allocation13_spill] sm:$0xff] %v10238_v42 }
 0x363   : > { %v8542_v11 = vpop.f32.mrf.mxu0 }
 0x365   : > { %v10240_v56 = vpop.f32.mrf.mxu0 }
 0x367   : > { %v8543_v59 = vpop.f32.mrf.mxu0 }
 0x369   : > { %8627 = vmatmul.mubr.msk.bf16.gmra.mxu1 %vm821_vm0, %v10039_v44  ;;  %v10242_v44 = vpop.f32.mrf.mxu0 }
 0x36a   : > { %8630 = vmatprep.mubr.msk.bf16.mxu1 %vm821_vm0, %v10030_v13 }
 0x36b   : > { %v10251_v13 = vpop.f32.mrf.mxu0 }
 0x36d   : > { %v10253_v20 = vpop.f32.mrf.mxu0 }
 0x36f   : > { %v10255_v54 = vpop.f32.mrf.mxu0 }
 0x371   : > { %8631 = vmatmul.mubr.msk.bf16.gmra.mxu1 %vm821_vm0, %v10020_v8  ;;  %v9278_v8 = vld [vmem:[%s10248_s30 + $0x4] ss:$8 sps:$4 sm:$0xff]   ;;  %v10257_v34 = vpop.f32.mrf.mxu0 }
 0x372   : > { %8636 = vmatprep.mubr.msk.bf16.mxu1 %vm821_vm0, %v9412_v28  ;;  %2816 = vmatprep.mubr.bf16.mxu0 %v9278_v8 }
 0x373   : > { %v10259_v27 = vpop.f32.mrf.mxu0 }
 0x375   : > { %v10261_v22 = vpop.f32.mrf.mxu0 }
 0x377   : > { %v10263_v4 = vpop.f32.mrf.mxu0 }
 0x379   : > { %v10265_v26 = vpop.f32.mrf.mxu0 }
 0x37b   : > { %v10273_v38 = vpop.f32.mrf.mxu0 }
 0x37d   : > { %v10283_v31 = vpop.f32.mrf.mxu0 }
 0x37e   : > { %12144 = vst [vmem:[#allocation17_spill] sm:$0xff] %v10283_v31 }
 0x37f   : > { %v10290_v16 = vpop.f32.mrf.mxu0 }
 0x381   : > { %v10299_v23 = vpop.f32.mrf.mxu0 }
 0x383   : > { %v10308_v32 = vpop.f32.mrf.mxu0 }
 0x385   : > { %v10315_v61 = vpop.f32.mrf.mxu0 }
 0x387   : > { %v10321_v62 = vpop.f32.mrf.mxu0 }
 0x389   : > { %v10325_v15 = vpop.f32.mrf.mxu0 }
 0x38b   : > { %v8562_v10 = vpop.f32.mrf.mxu0 }
 0x3d9   : > { %v8586_v35 = vpop.f32.mrf.mxu1 }
 0x3da   : > { %v10279_v9 = vadd.f32 %v8586_v35, %v8538_v21  ;;  %v808_v21 = vld [vmem:[%s10271_s3 + $0x18] sm:$0xff] }
 0x3db   : > { %v10275_v12 = vpop.f32.mrf.mxu1  ;;  %2898 = vperm.xlu0 %9233, %v808_v21  }
 0x3dc   : > { %12141 = vst [vmem:[#allocation14_spill] sm:$0xff] %v10275_v12  ;;  %12142 = vst [vmem:[#allocation15_spill] sm:$0xff] %v10279_v9 }
 0x3dd   : > { %v8587_v18 = vpop.f32.mrf.mxu1 }
 0x3de   : > { %v10281_v45 = vadd.f32 %v8587_v18, %v8539_v14 }
 0x3df   : > { %v10285_v17 = vpop.f32.mrf.mxu1  ;;  %2888 = vperm.xlu0 %9233, %v806_v55  }
 0x3e0   : > { %12143 = vst [vmem:[#allocation16_spill] sm:$0xff] %v10281_v45  ;;  %12145 = vst [vmem:[#allocation18_spill] sm:$0xff] %v10285_v17 }
 0x3e1   : > { %v8590_v46 = vpop.f32.mrf.mxu1 }
 0x3e2   : > { %v10295_v53 = vadd.f32 %v8590_v46, %v8542_v11  ;;  %v807_v11 = vld [vmem:[%s10271_s3 + $0x10] sm:$0xff]  ;;  %s7419_s3 = sshll.u32 %s680_s23, 3 }
 0x3e3   : > { %v10292_v50 = vpop.f32.mrf.mxu1  ;;  %2893 = vperm.xlu1 %9234, %v807_v11   ;;  %s682_s24 = scalar_lea.vmem [#allocation2], %s7419_s3  ;;  %s9532_s3 = sshll.u32 %s9593_s25, 4  ;;  %s9533_s3 = int_to_ptr.vmem [resolvable:$false] %s9532_s3 }
 0x3e4   : > { %s7308_s29 = sshll.u32 %s682_s24, 4  ;;  %s9534_s0 = scalar_lea.vmem %s9533_s3, 256  ;;  %s11979_s29 = int_to_ptr.vmem [resolvable:$true] %s7308_s29 }
 0x3e5   : > { %v8591_v51 = vpop.f32.mrf.mxu1  ;;  %p9535_p0 = scmp.lt.s32.totalorder %s11979_s29, %s9533_s3 }
 0x3e6   : > { %v10297_v47 = vadd.f32 %v8591_v51, %v8543_v59  ;;  %v2448_v59 = vpop.f32.mrf.mxu0 }
 0x3e7   : > { %v10301_v37 = vpop.f32.mrf.mxu1  ;;  %2883 = vperm.xlu1 %9234, %v805_v39  }
 0x3e8   : > { %v8563_v18 = vpop.f32.mrf.mxu0 }
 0x3e9   : > { %v10305_v24 = vpop.f32.mrf.mxu1 }
 0x3ea   : > { %v2451_v48 = vpop.f32.mrf.mxu0 }
 0x3eb   : > { %v10310_v57 = vpop.f32.mrf.mxu1 }
 0x3ec   : > { %v8566_v5 = vpop.f32.mrf.mxu0 }
 0x3ed   : > { %v10312_v60 = vpop.f32.mrf.mxu1 }
 0x3ee   : > { %v2464_v0 = vpop.f32.mrf.mxu0 }
 0x3ef   : > { %v10317_v33 = vpop.f32.mrf.mxu1 }
 0x3f0   : > { %v8567_v6 = vpop.f32.mrf.mxu0 }
 0x3f1   : > { %v8598_v49 = vpop.f32.mrf.mxu1 }
 0x3f2   : > { %v2467_v36 = vpop.f32.mrf.mxu0  ;;  %v2618_v55 = vadd.f32 %v8598_v49, %v10259_v27 }
 0x3f3   : > { %v2609_v1 = vpop.f32.mrf.mxu1 }
 0x3f4   : > { %v2610_v31 = vadd.f32 %v2609_v1, %v10261_v22  ;;  %v12154_v1 = vld [vmem:[#allocation16_spill] sm:$0xff] }
 0x3f5   : > { %v8599_v2 = vpop.f32.mrf.mxu1 }
 0x3f6   : > { %v2621_v21 = vadd.f32 %v8599_v2, %v10263_v4  ;;  %v2605_v2 = vadd.f32 %v10312_v60, %v10255_v54 }
 0x3f7   : > { %v2612_v3 = vpop.f32.mrf.mxu1 }
 0x3f8   : > { %v2695_v40 = vpack.c.bf16 %v2621_v21, %v2618_v55  ;;  %v2613_v17 = vadd.f32 %v2612_v3, %v10265_v26 }
 0x3f9   : > { %v10328_v7 = vpop.f32.mrf.mxu1 }
 0x3fb   : > { %v10331_v28 = vpop.f32.mrf.mxu1 }
 0x3fc   : > { %12146 = vst [vmem:[#allocation19_spill] sm:$0xff] %v10331_v28 }
 0x3fd   : > { %v10334_v14 = vpop.f32.mrf.mxu1 }
 0x3ff   : > { %v10337_v8 = vpop.f32.mrf.mxu1 }
 0x401   : > { %v8606_v35 = vpop.f32.mrf.mxu1 }
 0x403   : > { %v2641_v19 = vpop.f32.mrf.mxu1 }
 0x405   : > { %v8607_v46 = vpop.f32.mrf.mxu1 }
 0x407   : > { %v2644_v51 = vpop.f32.mrf.mxu1 }
 0x409   : > { %v8610_v41 = vpop.f32.mrf.mxu1 }
 0x40a   : > { %v2666_v4 = vadd.f32 %v8610_v41, %v8562_v10  ;;  %v9279_v10 = vld [vmem:[%s10248_s30 + $0x14] ss:$8 sps:$4 sm:$0xff]   ;;  %v9294_v41 = vld [vmem:[%s10248_s30 + $0x60] ss:$8 sps:$4 sm:$0xff]  }
 0x40b   : > { %v2657_v29 = vpop.f32.mrf.mxu1 }
 0x40d   : > { %v8611_v63 = vpop.f32.mrf.mxu1 }
 0x40e   : > { %v2669_v42 = vadd.f32 %v8611_v63, %v8563_v18  ;;  %v9290_v18 = vld [vmem:[%s10248_s30 + $0x44] ss:$8 sps:$4 sm:$0xff]   ;;  %v9297_v63 = vld [vmem:[%s10248_s30 + $0x70] ss:$8 sps:$4 sm:$0xff]  }
 0x40f   : > { %v2660_v25 = vpop.f32.mrf.mxu1 }
 0x410   : > { %v2701_v27 = vpack.c.bf16 %v2669_v42, %v2666_v4  ;;  %v2661_v49 = vadd.f32 %v2660_v25, %v2451_v48  ;;  %v2650_v42 = vadd.f32 %v8606_v35, %v10308_v32  ;;  %v2634_v32 = vadd.f32 %v10328_v7, %v10273_v38  ;;  %v9276_v7 = vld [vmem:[%s10248_s30] ss:$8 sps:$4 sm:$0xff]   ;;  %v9287_v35 = vld [vmem:[%s10248_s30 + $0x30] ss:$8 sps:$4 sm:$0xff]  }
 0x411   : > { %v8614_v58 = vpop.f32.mrf.mxu1  ;;  %v9291_v48 = vld [vmem:[%s10248_s30 + $0x50] ss:$8 sps:$4 sm:$0xff]  }
 0x412   : > { %v2682_v30 = vadd.f32 %v8614_v58, %v8566_v5  ;;  %v2694_v5 = vpack.c.bf16 %v2613_v17, %v2610_v31  ;;  %v2642_v31 = vadd.f32 %v2641_v19, %v10315_v61  ;;  %v2637_v17 = vadd.f32 %v10334_v14, %v10290_v16  ;;  %v12148_v16 = vld [vmem:[#allocation17_spill] sm:$0xff]  ;;  %v12152_v61 = vld [vmem:[#allocation12_spill] sm:$0xff] }
 0x413   : > { %v2673_v43 = vpop.f32.mrf.mxu1  ;;  %v9282_v14 = vld [vmem:[%s10248_s30 + $0x24] ss:$8 sps:$4 sm:$0xff]   ;;  %v9288_v19 = vld [vmem:[%s10248_s30 + $0x40] ss:$8 sps:$4 sm:$0xff]  }
 0x414   : > { %v2674_v9 = vadd.f32 %v2673_v43, %v2464_v0  ;;  %v2697_v60 = vpack.c.bf16 %v2637_v17, %v2634_v32  ;;  %v9413_v0 = vld [vmem:[%s9844_s28] sm:$0xff]  }
 0x415   : > { %v8615_v11 = vpop.f32.mrf.mxu1 }
 0x416   : > { %v2685_v52 = vadd.f32 %v8615_v11, %v8567_v6 }
 0x417   : > { %v2676_v39 = vpop.f32.mrf.mxu1 }
 0x418   : > { %v2703_v45 = vpack.c.bf16 %v2685_v52, %v2682_v30  ;;  %v2677_v12 = vadd.f32 %v2676_v39, %v2467_v36  ;;  %v2602_v36 = vadd.f32 %v10305_v24, %v10251_v13  ;;  %v2658_v30 = vadd.f32 %v2657_v29, %v2448_v59  ;;  %v9284_v59 = vld [vmem:[%s10248_s30 + $0x20] ss:$8 sps:$4 sm:$0xff]   ;;  %v9299_v29 = vld [vmem:[%s10248_s30 + $0x74] ss:$8 sps:$4 sm:$0xff]  }
 0x419   : > { %v2645_v13 = vadd.f32 %v2644_v51, %v10325_v15  ;;  %v12147_v24 = vpack.c.bf16 %v10297_v47, %v10295_v53  ;;  %v12150_v53 = vld [vmem:[#allocation13_spill] sm:$0xff]  ;;  %v12151_v47 = vld [vmem:[#allocation18_spill] sm:$0xff]  ;;  %v12155_v15 = vld [vmem:[#allocation15_spill] sm:$0xff]  ;;  %v10395_v25 = vpop.f32.mrf.mxu1 }
 0x41a   : > { %v2702_v28 = vpack.c.bf16 %v2677_v12, %v2674_v9  ;;  %7913 = vmatprep.subr.bf16.mxu0 %v2703_v45  ;;  %v2693_v26 = vpack.c.bf16 %v2605_v2, %v2602_v36  ;;  %v2597_v12 = vadd.f32 %v10317_v33, %v10257_v34  ;;  %v2700_v22 = vpack.c.bf16 %v2661_v49, %v2658_v30  ;;  %v12153_v33 = vld [vmem:[#allocation14_spill] sm:$0xff] }
 0x41b   : > { %7914 = vmatpush3.bf16.msra.mxu0 %v2695_v40  ;;  %v2653_v40 = vadd.f32 %v8607_v46, %v10321_v62  ;;  %v2594_v9 = vadd.f32 %v10310_v57, %v10253_v20  ;;  %v2581_v34 = vadd.f32 %v10301_v37, %v10242_v44  ;;  %v2698_v52 = vpack.c.bf16 %v2645_v13, %v2642_v31  ;;  %v9293_v46 = vld [vmem:[%s10248_s30 + $0x54] ss:$8 sps:$4 sm:$0xff]   ;;  %v9296_v51 = vld [vmem:[%s10248_s30 + $0x64] ss:$8 sps:$4 sm:$0xff]   ;;  %v10397_v43 = vpop.f32.mrf.mxu1 }
 0x41c   : > { %7915 = vmatprep.subr.bf16.mxu0 %v2702_v28  ;;  %v2578_v20 = vadd.f32 %v10292_v50, %v10240_v56  ;;  %v2629_v44 = vadd.f32 %v10337_v8, %v10299_v23  ;;  %v12149_v56 = vld [vmem:[#allocation19_spill] sm:$0xff]  ;;  %v2565_v37 = vadd.f32 %v12151_v47, %v12150_v53  ;;  %v2562_v62 = vadd.f32 %v12153_v33, %v12152_v61 }
 0x41d   : > { %v2692_v54 = vpack.c.bf16 %v2597_v12, %v2594_v9  ;;  %v2699_v45 = vpack.c.bf16 %v2653_v40, %v2650_v42  ;;  %v2626_v50 = vadd.f32 %v12149_v56, %v12148_v16  ;;  %v12156_v3 = vpack.c.bf16 %v12154_v1, %v12155_v15  ;;  %v9281_v28 = vld [vmem:[%s10248_s30 + $0x10] ss:$8 sps:$4 sm:$0xff]   ;;  %v9285_v8 = vld [vmem:[%s10248_s30 + $0x34] ss:$8 sps:$4 sm:$0xff]   ;;  %v10405_v39 = vpop.f32.mrf.mxu1  ;;  %v10421_v9 = vpop.permute.xlu1 %2958 }
 0x41e   : > { %v2690_v57 = vpack.c.bf16 %v2581_v34, %v2578_v20  ;;  %v2688_v23 = vpack.c.bf16 %v2565_v37, %v2562_v62  ;;  %12157 = vst [vmem:[#allocation17_spill] sm:$0xff] %v10421_v9 }
 0x41f   : > { %7916 = vmatpush3.bf16.msra.mxu0 %v2694_v5  ;;  %v2696_v38 = vpack.c.bf16 %v2629_v44, %v2626_v50  ;;  %v10407_v5 = vpop.f32.mrf.mxu1 }
 0x420   : > { %7917 = vmatprep.subr.bf16.mxu0 %v2701_v27 }
 0x421   : > { %v10415_v30 = vpop.f32.mrf.mxu1  ;;  %v10431_v31 = vpop.permute.xlu1 %2943 }
 0x422   : > { %12158 = vst [vmem:[#allocation19_spill] sm:$0xff] %v10431_v31 }
 0x423   : > { %7918 = vmatpush3.bf16.msra.mxu0 %v2693_v26  ;;  %v10417_v40 = vpop.f32.mrf.mxu1 }
 0x424   : > { %7919 = vmatprep.subr.bf16.mxu0 %v2700_v22 }
 0x425   : > { %v10437_v32 = vpop.permute.xlu1 %2948 }
 0x426   : > { %12159 = vst [vmem:[#allocation13_spill] sm:$0xff] %v10437_v32 }
 0x427   : > { %7920 = vmatpush3.bf16.msra.mxu0 %v2692_v54 }
 0x428   : > { %7921 = vmatprep.subr.bf16.mxu0 %v2699_v45  ;;  %v10427_v45 = vpop.f32.mrf.mxu1 }
 0x429   : > { %v10441_v56 = vpop.permute.xlu1 %2933 }
 0x42a   : > { %v10433_v17 = vpop.f32.mrf.mxu1  ;;  %12160 = vst [vmem:[#allocation18_spill] sm:$0xff] %v10441_v56 }
 0x42b   : > { %7922 = vmatpush3.bf16.msra.mxu0 %v12147_v24 }
 0x42c   : > { %7923 = vmatprep.subr.bf16.mxu0 %v2698_v52  ;;  %v10435_v24 = vpop.f32.mrf.mxu1 }
 0x42d   : > { %v10443_v61 = vpop.permute.xlu1 %2938 }
 0x42e   : > { %v10439_v44 = vpop.f32.mrf.mxu1  ;;  %12161 = vst [vmem:[#allocation12_spill] sm:$0xff] %v10443_v61 }
 0x42f   : > { %7924 = vmatpush3.bf16.msra.mxu0 %v2690_v57 }
 0x430   : > { %7925 = vmatprep.subr.bf16.mxu0 %v2697_v60  ;;  %v8629_v53 = vpop.f32.mrf.mxu1 }
 0x433   : > { %7926 = vmatpush3.bf16.msra.mxu0 %v12156_v3  ;;  %v10445_v3 = vpop.permute.xlu1 %2923 }
 0x434   : > { %7927 = vmatprep.subr.bf16.mxu0 %v2696_v38  ;;  %v3074_v38 = vpop.f32.mrf.mxu1  ;;  %12162 = vst [vmem:[#allocation14_spill] sm:$0xff] %v10445_v3 }
 0x436   : > { %v8632_v1 = vpop.f32.mrf.mxu1 }
 0x437   : > { %7928 = vmatpush3.bf16.msra.mxu0 %v2688_v23 }
 0x43a   : > { %2817 = vmatmul.mubr.bf16.vlgmr.msra.gmra.mxu0 %v9276_v7  ;;  %v3087_v7 = vpop.f32.mrf.mxu1 }
 0x43b   : > { %2824 = vmatprep.mubr.bf16.mxu0 %v9279_v10  ;;  %v10447_v10 = vpop.permute.xlu0 %2953 }
 0x43c   : > { %12163 = vst [vmem:[#allocation16_spill] sm:$0xff] %v10447_v10 }
 0x442   : > { %2825 = vmatmul.mubr.bf16.gmra.mxu0 %v9281_v28 }
 0x443   : > { %2832 = vmatprep.mubr.bf16.mxu0 %v9282_v14 }
 0x44a   : > { %2833 = vmatmul.mubr.bf16.gmra.mxu0 %v9284_v59  ;;  %v8633_v59 = vpop.f32.mrf.mxu1 }
 0x44b   : > { %2840 = vmatprep.mubr.bf16.mxu0 %v9285_v8 }
 0x452   : > { %2841 = vmatmul.mubr.bf16.gmra.mxu0 %v9287_v35  ;;  %v10449_v35 = vpop.permute.xlu1 %2928 }
 0x453   : > { %2848 = vmatprep.mubr.bf16.mxu0 %v9290_v18  ;;  %12164 = vst [vmem:[#allocation15_spill] sm:$0xff] %v10449_v35 }
 0x45a   : > { %2849 = vmatmul.mubr.bf16.gmra.mxu0 %v9288_v19 }
 0x45b   : > { %2856 = vmatprep.mubr.bf16.mxu0 %v9293_v46 }
 0x462   : > { %2857 = vmatmul.mubr.bf16.gmra.mxu0 %v9291_v48 }
 0x463   : > { %2864 = vmatprep.mubr.bf16.mxu0 %v9296_v51  ;;  %v10452_v51 = vpop.permute.xlu0 %2918 }
 0x464   : > { %12165 = vst [vmem:[#allocation20_spill] sm:$0xff] %v10452_v51 }
 0x46a   : > { %2865 = vmatmul.mubr.bf16.gmra.mxu0 %v9294_v41 }
 0x46b   : > { %2872 = vmatprep.mubr.bf16.mxu0 %v9299_v29 }
 0x472   : > { %2873 = vmatmul.mubr.bf16.gmra.mxu0 %v9297_v63  ;;  %v3090_v63 = vpop.f32.mrf.mxu1 }
 0x473   : > { %8684 = vmatprep.mubr.bf16.mxu0 %v9413_v0 }
 0x4fa   : > { %v7929_v58 = vpop.f32.mrf.mxu0 }
 0x4fc   : > { %v7930_v6 = vpop.f32.mrf.mxu0 }
 0x4fd   : > { %v10399_v21 = vadd.f32 %v7930_v6, %v7929_v58 }
 0x4fe   : > { %v10401_v11 = vpop.f32.mrf.mxu0 }
 0x500   : > { %v10403_v55 = vpop.f32.mrf.mxu0 }
 0x502   : > { %v7935_v4 = vpop.f32.mrf.mxu0 }
 0x504   : > { %v7936_v2 = vpop.f32.mrf.mxu0 }
 0x505   : > { %v10409_v27 = vadd.f32 %v7936_v2, %v7935_v4 }
 0x506   : > { %v10411_v49 = vpop.f32.mrf.mxu0 }
 0x508   : > { %v10413_v36 = vpop.f32.mrf.mxu0 }
 0x50a   : > { %v7941_v26 = vpop.f32.mrf.mxu0 }
 0x50c   : > { %v7942_v12 = vpop.f32.mrf.mxu0 }
 0x50d   : > { %v10419_v22 = vadd.f32 %v7942_v12, %v7941_v26 }
 0x50e   : > { %v10423_v42 = vpop.f32.mrf.mxu0 }
 0x510   : > { %v10425_v54 = vpop.f32.mrf.mxu0 }
 0x512   : > { %v10429_v13 = vpop.f32.mrf.mxu0 }
 0x514   : > { %v7948_v34 = vpop.f32.mrf.mxu0 }
 0x516   : > { %v7950_v52 = vpop.f32.mrf.mxu0 }
 0x518   : > { %v7951_v20 = vpop.f32.mrf.mxu0 }
 0x51a   : > { %v7953_v57 = vpop.f32.mrf.mxu0 }
 0x51c   : > { %v7954_v60 = vpop.f32.mrf.mxu0 }
 0x51e   : > { %v7956_v16 = vpop.f32.mrf.mxu0 }
 0x520   : > { %v7957_v50 = vpop.f32.mrf.mxu0 }
 0x521   : > { %v7958_v0 = vadd.f32 %v7957_v50, %v7956_v16  ;;  %v10464_v16 = vld [vmem:[%s12034_s15] ss:$0 sm:$0xff]  ;;  %v7955_v50 = vadd.f32 %v7954_v60, %v7953_v57 }
 0x522   : > { %v7959_v47 = vpop.f32.mrf.mxu0 }
 0x524   : > { %v7960_v37 = vpop.f32.mrf.mxu0 }
 0x525   : > { %v7961_v58 = vadd.f32 %v7960_v37, %v7959_v47  ;;  %v2970_v47 = vmul.f32 %v7958_v0, %v10449_v35 }
 0x526   : > { %v7962_v33 = vpop.f32.mrf.mxu0 }
 0x527   : > { %v2971_v37 = vmul.f32 %v7961_v58, %v10441_v56 }
 0x528   : > { %v7963_v62 = vpop.f32.mrf.mxu0 }
 0x529   : > { %v7964_v18 = vadd.f32 %v7963_v62, %v7962_v33  ;;  %v10457_v33 = vpop.permute.xlu1 %2913 }
 0x52a   : > { %v7965_v15 = vpop.f32.mrf.mxu0  ;;  %12166 = vst [vmem:[#allocation21_spill] sm:$0xff] %v10457_v33 }
 0x52b   : > { %v2972_v6 = vmul.f32 %v7964_v18, %v10443_v61 }
 0x52c   : > { %v7966_v23 = vpop.f32.mrf.mxu0 }
 0x52d   : > { %v7967_v46 = vadd.f32 %v7966_v23, %v7965_v15  ;;  %v7952_v15 = vadd.f32 %v7951_v20, %v7950_v52 }
 0x52e   : > { %v7968_v28 = vpop.f32.mrf.mxu0 }
 0x52f   : > { %v2973_v2 = vmul.f32 %v7967_v46, %v10431_v31  ;;  %v7949_v46 = vadd.f32 %v7948_v34, %v10429_v13  ;;  %v2968_v57 = vmul.f32 %v7952_v15, %v10452_v51  ;;  %v9415_v34 = vld [vmem:[%s9755_s27 + $0x68] sm:$0xff] }
 0x530   : > { %v7969_v14 = vpop.f32.mrf.mxu0 }
 0x531   : > { %v7970_v8 = vadd.f32 %v7969_v14, %v7968_v28  ;;  %v10459_v14 = vpop.permute.xlu0 %2908  ;;  %v3114_v18 = vadd.f32 %v3087_v7, %v2973_v2  ;;  %v2969_v7 = vmul.f32 %v7955_v50, %v10445_v3  ;;  %v9418_v50 = vld [vmem:[%s9755_s27 + $0x58] sm:$0xff] }
 0x532   : > { %v7971_v19 = vpop.f32.mrf.mxu0  ;;  %12167 = vst [vmem:[#allocation22_spill] sm:$0xff] %v10459_v14 }
 0x533   : > { %v2974_v48 = vmul.f32 %v7970_v8, %v10437_v32  ;;  %v3113_v8 = vadd.f32 %v8629_v53, %v2972_v6  ;;  %v10478_v53 = vpop.permute.xlu1 %2903  ;;  %v2967_v6 = vmul.f32 %v7949_v46, %v10457_v33 }
 0x534   : > { %v7972_v41 = vpop.f32.mrf.mxu0  ;;  %12169 = vst [vmem:[#allocation24_spill] sm:$0xff] %v10478_v53 }
 0x535   : > { %v7973_v29 = vadd.f32 %v7972_v41, %v7971_v19  ;;  %v3115_v26 = vadd.f32 %v3090_v63, %v2974_v48  ;;  %v9414_v48 = vld [vmem:[%s9755_s27 + $0x70] sm:$0xff]  ;;  %v3112_v63 = vadd.f32 %v10435_v24, %v2971_v37  ;;  %v3136_v0 = vadd.f32 %v10464_v16, %v3113_v8  ;;  %v10490_v58 = vpop.permute.xlu0 %2898 }
 0x536   : > { %v7974_v4 = vpop.f32.mrf.mxu0  ;;  %12171 = vst [vmem:[#allocation26_spill] sm:$0xff] %v10490_v58  ;;  %v7940_v24 = vadd.f32 %v10413_v36, %v10411_v49  ;;  %v9417_v36 = vld [vmem:[%s9755_s27 + $0x60] sm:$0xff]  ;;  %v2965_v8 = vmul.f32 %v10419_v22, %v10478_v53  ;;  %v9420_v22 = vld [vmem:[%s9755_s27 + $0x48] sm:$0xff] }
 0x537   : > { %v2975_v12 = vmul.f32 %v7973_v29, %v10447_v10  ;;  %v3138_v20 = vadd.f32 %v10464_v16, %v3115_v26  ;;  %v3111_v29 = vadd.f32 %v3074_v38, %v2970_v47  ;;  %v3109_v26 = vadd.f32 %v10427_v45, %v2968_v57  ;;  %v10513_v45 = vpop.permute.xlu1 %2893 }
 0x538   : > { %v7975_v62 = vpop.f32.mrf.mxu0  ;;  %v10511_v47 = vadd.f32 %v9418_v50, %v3136_v0  ;;  %12175 = vst [vmem:[#allocation30_spill] sm:$0xff] %v10513_v45  ;;  %v2964_v37 = vmul.f32 %v7940_v24, %v10490_v58 }
 0x539   : > { %v3116_v23 = vadd.f32 %v8632_v1, %v2975_v12  ;;  %v7976_v28 = vadd.f32 %v7975_v62, %v7974_v4  ;;  %v7946_v1 = vadd.f32 %v10425_v54, %v10423_v42  ;;  %v3137_v42 = vadd.f32 %v10464_v16, %v3114_v18  ;;  %v9416_v4 = vld [vmem:[%s9755_s27 + $0x78] sm:$0xff]  ;;  %v10520_v18 = vpop.permute.xlu0 %2888 }
 0x53a   : > { %v3110_v12 = vadd.f32 %v10439_v44, %v2969_v7  ;;  %v3135_v62 = vadd.f32 %v10464_v16, %v3112_v63  ;;  %v3134_v15 = vadd.f32 %v10464_v16, %v3111_v29  ;;  %12174 = vst [vmem:[#allocation29_spill] sm:$0xff] %v10511_v47  ;;  %v7934_v44 = vadd.f32 %v10403_v55, %v10401_v11  ;;  %v9419_v55 = vld [vmem:[%s9755_s27 + $0x50] sm:$0xff] }
 0x53b   : > { %v3139_v19 = vadd.f32 %v10464_v16, %v3116_v23  ;;  %v2976_v52 = vmul.f32 %v7976_v28, %v10421_v9  ;;  %v2966_v38 = vmul.f32 %v7946_v1, %v10459_v14  ;;  %v10508_v28 = vadd.f32 %v9417_v36, %v3137_v42  ;;  %12176 = vst [vmem:[#allocation31_spill] sm:$0xff] %v10520_v18 }
 0x53c   : > { %v3132_v1 = vadd.f32 %v10464_v16, %v3109_v26  ;;  %v3190_v11 = vsel %vm821_vm0, %v10511_v47, 0.0  ;;  %v10531_v57 = vadd.f32 %v9419_v55, %v3135_v62  ;;  %v3105_v7 = vadd.f32 %v10405_v39, %v2964_v37  ;;  %v9423_v62 = vld [vmem:[%s9755_s27 + $0x30] sm:$0xff] }
 0x53d   : > { %v3117_v60 = vadd.f32 %v8633_v59, %v2976_v52  ;;  %v10476_v41 = vadd.f32 %v9414_v48, %v3139_v19  ;;  %v10488_v59 = vadd.f32 %v9415_v34, %v3138_v20  ;;  %12173 = vst [vmem:[#allocation28_spill] sm:$0xff] %v10508_v28  ;;  %v3107_v19 = vadd.f32 %v10433_v17, %v2966_v38  ;;  %v10539_v48 = vpop.permute.xlu1 %2883  ;;  %v9422_v34 = vld [vmem:[%s9755_s27 + $0x38] sm:$0xff] }
 0x53e   : > { %v3108_v52 = vadd.f32 %v10415_v30, %v2967_v6  ;;  %v3133_v20 = vadd.f32 %v10464_v16, %v3110_v12  ;;  %v3193_v46 = vsel %vm821_vm0, %v10508_v28, 0.0  ;;  %12177 = vst [vmem:[#allocation32_spill] sm:$0xff] %v10531_v57  ;;  %v2962_v30 = vmul.f32 %v7934_v44, %v10520_v18  ;;  %12179 = vst [vmem:[#allocation34_spill] sm:$0xff] %v10539_v48  ;;  %v9425_v44 = vld [vmem:[%s9755_s27 + $0x20] sm:$0xff] }
 0x53f   : > { %12168 = vst [vmem:[#allocation23_spill] sm:$0xff] %v10476_v41  ;;  %v3199_v54 = vsel %vm821_vm0, %v10476_v41, 0.0  ;;  %v3140_v13 = vadd.f32 %v10464_v16, %v3117_v60  ;;  %12170 = vst [vmem:[#allocation25_spill] sm:$0xff] %v10488_v59  ;;  %v3196_v49 = vsel %vm821_vm0, %v10488_v59, 0.0  ;;  %v10534_v60 = vadd.f32 %v9420_v22, %v3134_v15 }
 0x540   : > { %3200 = vadd.xlane.f32.xlu1 %v3199_v54  ;;  %v2963_v17 = vmul.f32 %v10409_v27, %v10513_v45  ;;  %v3106_v29 = vadd.f32 %v10417_v40, %v2965_v8  ;;  %v3131_v63 = vadd.f32 %v10464_v16, %v3108_v52  ;;  %v3130_v0 = vadd.f32 %v10464_v16, %v3107_v19  ;;  %v9426_v8 = vld [vmem:[%s9755_s27 + $0x18] sm:$0xff] }
 0x541   : > { %v10497_v2 = vadd.f32 %v9416_v4, %v3140_v13  ;;  %12178 = vst [vmem:[#allocation33_spill] sm:$0xff] %v10534_v60  ;;  %v3187_v42 = vsel %vm821_vm0, %v10531_v57, 0.0  ;;  %v3184_v54 = vsel %vm821_vm0, %v10534_v60, 0.0  ;;  %v9421_v13 = vld [vmem:[%s9755_s27 + $0x40] sm:$0xff]  ;;  %v10553_v24 = vadd.f32 %v9422_v34, %v3132_v1  ;;  %v9427_v1 = vld [vmem:[%s9755_s27 + $0x10] sm:$0xff] }
 0x542   : > { %v10550_v27 = vadd.f32 %v9421_v13, %v3133_v20  ;;  %v2961_v39 = vmul.f32 %v10399_v21, %v10539_v48  ;;  %v3103_v40 = vadd.f32 %v10407_v5, %v2962_v30  ;;  %v3104_v38 = vadd.f32 %v10395_v25, %v2963_v17  ;;  %v9424_v21 = vld [vmem:[%s9755_s27 + $0x28] sm:$0xff]  ;;  %v9429_v30 = vld [vmem:[%s9755_s27] sm:$0xff]  ;;  %v9433_v13 = vld [vmem:[%s9810_s26 + $0x18] sm:$0xff]  }
 0x543   : > { %12172 = vst [vmem:[#allocation27_spill] sm:$0xff] %v10497_v2  ;;  %v3202_v23 = vsel %vm821_vm0, %v10497_v2, 0.0  ;;  %12181 = vst [vmem:[#allocation36_spill] sm:$0xff] %v10553_v24  ;;  %v3129_v6 = vadd.f32 %v10464_v16, %v3106_v29  ;;  %v3128_v4 = vadd.f32 %v10464_v16, %v3105_v7  ;;  %v3178_v12 = vsel %vm821_vm0, %v10553_v24, 0.0  ;;  %v7567_v29 = vld [vmem:[%s12029_s10 + $0x4] sm:$0xf] }
 0x544   : > { %3203 = vadd.xlane.f32.xlu0 %v3202_v23  ;;  %3197 = vadd.xlane.f32.xlu1 %v3196_v49  ;;  %12180 = vst [vmem:[#allocation35_spill] sm:$0xff] %v10550_v27  ;;  %v3181_v26 = vsel %vm821_vm0, %v10550_v27, 0.0  ;;  %v10566_v15 = vadd.f32 %v9423_v62, %v3131_v63  ;;  %v10569_v23 = vadd.f32 %v9424_v21, %v3130_v0  ;;  %v3480_v63 = vsel %vm1269_vm1, %v7567_v29, 0  ;;  %v9430_v0 = vld [vmem:[%s12025_s6] sm:$0xff]   ;;  %v9443_v21 = vld [vmem:[%s9810_s26 + $0x68] sm:$0xff]  }
 0x545   : > { %v3102_v25 = vadd.f32 %v10397_v43, %v2961_v39  ;;  %v3127_v5 = vadd.f32 %v10464_v16, %v3104_v38  ;;  %v3126_v49 = vadd.f32 %v10464_v16, %v3103_v40  ;;  %v10579_v37 = vadd.f32 %v9425_v44, %v3129_v6  ;;  %9182 = vmatprep.subr.msk.bf16.mxu1 %vm1269_vm1, %v7567_v29  ;;  %v9434_v34 = vld [vmem:[%s9810_s26 + $0x20] sm:$0xff]   ;;  %v9435_v39 = vld [vmem:[%s9810_s26 + $0x28] sm:$0xff]   ;;  %v9436_v40 = vld [vmem:[%s9810_s26 + $0x30] sm:$0xff]  }
 0x546   : > { %12182 = vst [vmem:[#allocation37_spill] sm:$0xff] %v10566_v15  ;;  %12183 = vst [vmem:[#allocation38_spill] sm:$0xff] %v10569_v23  ;;  %v3175_v36 = vsel %vm821_vm0, %v10566_v15, 0.0  ;;  %v3172_v50 = vsel %vm821_vm0, %v10569_v23, 0.0  ;;  %v10582_v19 = vadd.f32 %v9426_v8, %v3128_v4  ;;  %8635 = vmatpush3.bf16.msra.mxu1 %v3480_v63  ;;  %v9437_v38 = vld [vmem:[%s9810_s26 + $0x38] sm:$0xff]   ;;  %v9438_v6 = vld [vmem:[%s9810_s26 + $0x40] sm:$0xff]  }
 0x547   : > { %12184 = vst [vmem:[#allocation39_spill] sm:$0xff] %v10579_v37  ;;  %v3125_v43 = vadd.f32 %v10464_v16, %v3102_v25  ;;  %v3169_v52 = vsel %vm821_vm0, %v10579_v37, 0.0  ;;  %8716 = vmatprep.subr.bf16.mxu1 %v9430_v0  ;;  %v9439_v4 = vld [vmem:[%s9810_s26 + $0x48] sm:$0xff]   ;;  %v9442_v62 = vld [vmem:[%s9810_s26 + $0x60] sm:$0xff]   ;;  %v9444_v25 = vld [vmem:[%s9810_s26 + $0x70] sm:$0xff]  }
 0x548   : > { %3194 = vadd.xlane.f32.xlu0 %v3193_v46  ;;  %3191 = vadd.xlane.f32.xlu1 %v3190_v11  ;;  %12185 = vst [vmem:[#allocation40_spill] sm:$0xff] %v10582_v19  ;;  %v3166_v20 = vsel %vm821_vm0, %v10582_v19, 0.0  ;;  %v10590_v46 = vadd.f32 %v9427_v1, %v3127_v5  ;;  %v9428_v11 = vld [vmem:[%s9755_s27 + $0x8] sm:$0xff]  ;;  %v9445_v5 = vld [vmem:[%s9810_s26 + $0x78] sm:$0xff]  }
 0x549   : > { %v10593_v55 = vadd.f32 %v9428_v11, %v3126_v49  ;;  %v10600_v17 = vadd.f32 %v9429_v30, %v3125_v43 }
 0x54a   : > { %12186 = vst [vmem:[#allocation41_spill] sm:$0xff] %v10590_v46  ;;  %v3163_v22 = vsel %vm821_vm0, %v10590_v46, 0.0 }
 0x54b   : > { %12187 = vst [vmem:[#allocation42_spill] sm:$0xff] %v10593_v55  ;;  %v3160_v16 = vsel %vm821_vm0, %v10593_v55, 0.0  ;;  %12188 = vst [vmem:[#allocation43_spill] sm:$0xff] %v10600_v17  ;;  %v3157_v7 = vsel %vm821_vm0, %v10600_v17, 0.0 }
 0x54c   : > { %3188 = vadd.xlane.f32.xlu0 %v3187_v42  ;;  %3185 = vadd.xlane.f32.xlu1 %v3184_v54  ;;  %v9431_v42 = vld [vmem:[%s9810_s26 + $0x8] sm:$0xff]   ;;  %v9432_v54 = vld [vmem:[%s9810_s26 + $0x10] sm:$0xff]  }
 0x54d   : > { %8637 = vmatmul.mubr.msk.bf16.vlgmr.msra.gmra.mxu1 %vm821_vm0, %v9431_v42 }
 0x54e   : > { %8640 = vmatprep.mubr.msk.bf16.mxu1 %vm821_vm0, %v9432_v54  ;;  %8717 = vmatpush3.bf16.msra.mxu1 %v9430_v0 }
 0x550   : > { %3182 = vadd.xlane.f32.xlu0 %v3181_v26  ;;  %3179 = vadd.xlane.f32.xlu1 %v3178_v12  ;;  %v9440_v26 = vld [vmem:[%s9810_s26 + $0x50] sm:$0xff]   ;;  %v9441_v12 = vld [vmem:[%s9810_s26 + $0x58] sm:$0xff]  }
 0x554   : > { %3176 = vadd.xlane.f32.xlu0 %v3175_v36  ;;  %3173 = vadd.xlane.f32.xlu1 %v3172_v50 }
 0x555   : > { %8641 = vmatmul.mubr.msk.bf16.gmra.mxu1 %vm821_vm0, %v9433_v13 }
 0x556   : > { %8644 = vmatprep.mubr.msk.bf16.mxu1 %vm821_vm0, %v9434_v34 }
 0x558   : > { %3170 = vadd.xlane.f32.xlu0 %v3169_v52  ;;  %3167 = vadd.xlane.f32.xlu1 %v3166_v20 }
 0x55c   : > { %3164 = vadd.xlane.f32.xlu0 %v3163_v22  ;;  %3161 = vadd.xlane.f32.xlu1 %v3160_v16 }
 0x55d   : > { %8645 = vmatmul.mubr.msk.bf16.gmra.mxu1 %vm821_vm0, %v9435_v39 }
 0x55e   : > { %8648 = vmatprep.mubr.msk.bf16.mxu1 %vm821_vm0, %v9436_v40 }
 0x560   : > { %3158 = vadd.xlane.f32.xlu0 %v3157_v7 }
 0x565   : > { %8649 = vmatmul.mubr.msk.bf16.gmra.mxu1 %vm821_vm0, %v9437_v38 }
 0x566   : > { %8652 = vmatprep.mubr.msk.bf16.mxu1 %vm821_vm0, %v9438_v6 }
 0x56d   : > { %8653 = vmatmul.mubr.msk.bf16.gmra.mxu1 %vm821_vm0, %v9439_v4 }
 0x56e   : > { %8656 = vmatprep.mubr.msk.bf16.mxu1 %vm821_vm0, %v9440_v26 }
 0x575   : > { %8657 = vmatmul.mubr.msk.bf16.gmra.mxu1 %vm821_vm0, %v9441_v12 }
 0x576   : > { %8660 = vmatprep.mubr.msk.bf16.mxu1 %vm821_vm0, %v9442_v62 }
 0x57d   : > { %8661 = vmatmul.mubr.msk.bf16.gmra.mxu1 %vm821_vm0, %v9443_v21 }
 0x57e   : > { %8664 = vmatprep.mubr.msk.bf16.mxu1 %vm821_vm0, %v9444_v25 }
 0x585   : > { %8665 = vmatmul.mubr.msk.bf16.gmra.mxu1 %vm821_vm0, %v9445_v5 }
 0x5c9   : > { %v3201_v49 = vpop.xlane.xlu1 %3200 }
 0x5ca   : > { %v3219_v36 = vmul.f32 0.125, %v3201_v49 }
 0x5cc   : > { %v10643_v50 = vsub.f32 %v10476_v41, %v3219_v36 }
 0x5cd   : > { %v3198_v44 = vpop.xlane.xlu1 %3197  ;;  %v3204_v8 = vpop.xlane.xlu0 %3203 }
 0x5ce   : > { %v3218_v43 = vmul.f32 0.125, %v3198_v44  ;;  %v3220_v52 = vmul.f32 0.125, %v3204_v8  ;;  %v3251_v20 = vmul.f32 %v10643_v50, %v10643_v50 }
 0x5d0   : > { %v10648_v1 = vsub.f32 %v10488_v59, %v3218_v43  ;;  %v10651_v11 = vsub.f32 %v10497_v2, %v3220_v52  ;;  %v3295_v22 = vsel %vm821_vm0, %v3251_v20, 0.0 }
 0x5d1   : > { %3296 = vadd.xlane.f32.xlu0 %v3295_v22  ;;  %v3192_v16 = vpop.xlane.xlu1 %3191  ;;  %v3195_v30 = vpop.xlane.xlu0 %3194 }
 0x5d2   : > { %v3216_v7 = vmul.f32 0.125, %v3192_v16  ;;  %v3217_v29 = vmul.f32 0.125, %v3195_v30  ;;  %v3252_v63 = vmul.f32 %v10651_v11, %v10651_v11  ;;  %v3250_v0 = vmul.f32 %v10648_v1, %v10648_v1 }
 0x5d4   : > { %v10659_v42 = vsub.f32 %v10511_v47, %v3216_v7  ;;  %v10662_v54 = vsub.f32 %v10508_v28, %v3217_v29  ;;  %v3298_v13 = vsel %vm821_vm0, %v3252_v63, 0.0  ;;  %v3292_v4 = vsel %vm821_vm0, %v3250_v0, 0.0 }
 0x5d5   : > { %v3186_v34 = vpop.xlane.xlu1 %3185  ;;  %3299 = vadd.xlane.f32.xlu1 %v3298_v13  ;;  %v3189_v39 = vpop.xlane.xlu0 %3188 }
 0x5d6   : > { %v3214_v40 = vmul.f32 0.125, %v3186_v34  ;;  %v3215_v38 = vmul.f32 0.125, %v3189_v39  ;;  %v3249_v6 = vmul.f32 %v10662_v54, %v10662_v54  ;;  %v3248_v21 = vmul.f32 %v10659_v42, %v10659_v42 }
 0x5d8   : > { %v10669_v26 = vsub.f32 %v10534_v60, %v3214_v40  ;;  %v10672_v12 = vsub.f32 %v10531_v57, %v3215_v38  ;;  %v3289_v62 = vsel %vm821_vm0, %v3249_v6, 0.0  ;;  %v3286_v20 = vsel %vm821_vm0, %v3248_v21, 0.0 }
 0x5d9   : > { %v3180_v25 = vpop.xlane.xlu1 %3179  ;;  %3293 = vadd.xlane.f32.xlu1 %v3292_v4  ;;  %3290 = vadd.xlane.f32.xlu0 %v3289_v62  ;;  %v3183_v5 = vpop.xlane.xlu0 %3182 }
 0x5da   : > { %v3212_v49 = vmul.f32 0.125, %v3180_v25  ;;  %v3213_v36 = vmul.f32 0.125, %v3183_v5  ;;  %v3247_v44 = vmul.f32 %v10672_v12, %v10672_v12  ;;  %v3246_v8 = vmul.f32 %v10669_v26, %v10669_v26 }
 0x5dc   : > { %v10682_v43 = vsub.f32 %v10553_v24, %v3212_v49  ;;  %v10685_v52 = vsub.f32 %v10550_v27, %v3213_v36  ;;  %v3283_v22 = vsel %vm821_vm0, %v3247_v44, 0.0  ;;  %v3280_v0 = vsel %vm821_vm0, %v3246_v8, 0.0 }
 0x5dd   : > { %v3174_v16 = vpop.xlane.xlu1 %3173  ;;  %3287 = vadd.xlane.f32.xlu1 %v3286_v20  ;;  %3284 = vadd.xlane.f32.xlu0 %v3283_v22  ;;  %v3177_v30 = vpop.xlane.xlu0 %3176 }
 0x5de   : > { %v3210_v7 = vmul.f32 0.125, %v3174_v16  ;;  %v3211_v29 = vmul.f32 0.125, %v3177_v30  ;;  %v3245_v63 = vmul.f32 %v10685_v52, %v10685_v52  ;;  %v3244_v40 = vmul.f32 %v10682_v43, %v10682_v43 }
 0x5e0   : > { %v10693_v13 = vsub.f32 %v10569_v23, %v3210_v7  ;;  %v10696_v34 = vsub.f32 %v10566_v15, %v3211_v29  ;;  %v3277_v39 = vsel %vm821_vm0, %v3245_v63, 0.0  ;;  %v3274_v36 = vsel %vm821_vm0, %v3244_v40, 0.0 }
 0x5e1   : > { %v3168_v38 = vpop.xlane.xlu1 %3167  ;;  %3281 = vadd.xlane.f32.xlu1 %v3280_v0  ;;  %3278 = vadd.xlane.f32.xlu0 %v3277_v39  ;;  %v3171_v6 = vpop.xlane.xlu0 %3170 }
 0x5e2   : > { %v3208_v4 = vmul.f32 0.125, %v3168_v38  ;;  %v3209_v62 = vmul.f32 0.125, %v3171_v6  ;;  %v3243_v21 = vmul.f32 %v10696_v34, %v10696_v34  ;;  %v3242_v25 = vmul.f32 %v10693_v13, %v10693_v13 }
 0x5e4   : > { %v10706_v5 = vsub.f32 %v10582_v19, %v3208_v4  ;;  %v10709_v49 = vsub.f32 %v10579_v37, %v3209_v62  ;;  %v3271_v44 = vsel %vm821_vm0, %v3243_v21, 0.0  ;;  %v3268_v7 = vsel %vm821_vm0, %v3242_v25, 0.0 }
 0x5e5   : > { %v3162_v8 = vpop.xlane.xlu1 %3161  ;;  %3275 = vadd.xlane.f32.xlu1 %v3274_v36  ;;  %3272 = vadd.xlane.f32.xlu0 %v3271_v44  ;;  %v3165_v20 = vpop.xlane.xlu0 %3164 }
 0x5e6   : > { %v3206_v22 = vmul.f32 0.125, %v3162_v8  ;;  %v3207_v16 = vmul.f32 0.125, %v3165_v20  ;;  %v3241_v30 = vmul.f32 %v10709_v49, %v10709_v49  ;;  %v3240_v39 = vmul.f32 %v10706_v5, %v10706_v5 }
 0x5e8   : > { %v10717_v29 = vsub.f32 %v10593_v55, %v3206_v22  ;;  %v10720_v63 = vsub.f32 %v10590_v46, %v3207_v16  ;;  %v3265_v0 = vsel %vm821_vm0, %v3241_v30, 0.0  ;;  %v3262_v62 = vsel %vm821_vm0, %v3240_v39, 0.0  ;;  %v10741_v22 = vld [vmem:[%s12030_s11 + $0x1] ss:$0 sm:$0xff] }
 0x5e9   : > { %3269 = vadd.xlane.f32.xlu1 %v3268_v7  ;;  %3266 = vadd.xlane.f32.xlu0 %v3265_v0  ;;  %v3159_v40 = vpop.xlane.xlu0 %3158 }
 0x5ea   : > { %v3205_v38 = vmul.f32 0.125, %v3159_v40  ;;  %v3239_v6 = vmul.f32 %v10720_v63, %v10720_v63  ;;  %v3238_v25 = vmul.f32 %v10717_v29, %v10717_v29 }
 0x5ec   : > { %v10728_v4 = vsub.f32 %v10600_v17, %v3205_v38  ;;  %v3259_v21 = vsel %vm821_vm0, %v3239_v6, 0.0  ;;  %v3256_v44 = vsel %vm821_vm0, %v3238_v25, 0.0 }
 0x5ed   : > { %3263 = vadd.xlane.f32.xlu1 %v3262_v62  ;;  %3260 = vadd.xlane.f32.xlu0 %v3259_v21 }
 0x5ee   : > { %v3237_v36 = vmul.f32 %v10728_v4, %v10728_v4 }
 0x5f0   : > { %v3253_v8 = vsel %vm821_vm0, %v3237_v36, 0.0 }
 0x5f1   : > { %3257 = vadd.xlane.f32.xlu1 %v3256_v44  ;;  %3254 = vadd.xlane.f32.xlu0 %v3253_v8 }
 0x60d   : > { %v8638_v20 = vpop.f32.mrf.mxu1 }
 0x60e   : > { %v3525_v16 = vadd.f32 %v8638_v20, %v10741_v22 }
 0x60f   : > { %v3516_v30 = vpop.f32.mrf.mxu1 }
 0x610   : > { %v3677_v0 = vmul.f32 0.01, %v3525_v16  ;;  %v3517_v39 = vadd.f32 %v10741_v22, %v3516_v30  ;;  %vm3645_vm12 = vcmp.gt.f32.partialorder %v3525_v16, 0.0 }
 0x611   : > { %v8639_v38 = vpop.f32.mrf.mxu1 }
 0x612   : > { %vm3643_vm13 = vcmp.gt.f32.partialorder %v3517_v39, 0.0  ;;  %v3675_v6 = vmul.f32 0.01, %v3517_v39  ;;  %v3528_v62 = vadd.f32 %v8639_v38, %v10741_v22  ;;  %v3709_v44 = vsel %vm3645_vm12, %v3525_v16, %v3677_v0 }
 0x613   : > { %v3519_v25 = vpop.f32.mrf.mxu1 }
 0x614   : > { %vm3646_vm14 = vcmp.gt.f32.partialorder %v3528_v62, 0.0  ;;  %v3678_v8 = vmul.f32 0.01, %v3528_v62  ;;  %v3520_v20 = vadd.f32 %v10741_v22, %v3519_v25  ;;  %v3707_v19 = vsel %vm3643_vm13, %v3517_v39, %v3675_v6 }
 0x615   : > { %v8642_v17 = vpop.f32.mrf.mxu1 }
 0x616   : > { %v3710_v30 = vsel %vm3646_vm14, %v3528_v62, %v3678_v8  ;;  %vm3644_vm15 = vcmp.gt.f32.partialorder %v3520_v20, 0.0  ;;  %v3541_v23 = vadd.f32 %v8642_v17, %v10741_v22 }
 0x617   : > { %v3917_v24 = vpack.c.bf16 %v3710_v30, %v3709_v44  ;;  %v3532_v38 = vpop.f32.mrf.mxu1 }
 0x618   : > { %vm3649_vm2 = vcmp.gt.f32.partialorder %v3541_v23, 0.0  ;;  %v3681_v16 = vmul.f32 0.01, %v3541_v23  ;;  %v3533_v0 = vadd.f32 %v10741_v22, %v3532_v38 }
 0x619   : > { %v8643_v6 = vpop.f32.mrf.mxu1 }
 0x61a   : > { %vm3647_vm3 = vcmp.gt.f32.partialorder %v3533_v0, 0.0  ;;  %v3679_v62 = vmul.f32 0.01, %v3533_v0  ;;  %v3713_v30 = vsel %vm3649_vm2, %v3541_v23, %v3681_v16 }
 0x61b   : > { %v3535_v44 = vpop.f32.mrf.mxu1 }
 0x61d   : > { %v8646_v38 = vpop.f32.mrf.mxu1 }
 0x61e   : > { %v3557_v23 = vadd.f32 %v8646_v38, %v10741_v22 }
 0x61f   : > { %v3548_v16 = vpop.f32.mrf.mxu1 }
 0x620   : > { %vm3653_vm7 = vcmp.gt.f32.partialorder %v3557_v23, 0.0 }
 0x65a   : > { %v3297_v7 = vpop.xlane.xlu0 %3296 }
 0x65b   : > { %v3315_v40 = vmul.f32 0.125, %v3297_v7  ;;  %v3676_v7 = vmul.f32 0.01, %v3520_v20 }
 0x65d   : > { %v3331_v21 = vadd.f32 1e-05, %v3315_v40  ;;  %v3708_v18 = vsel %vm3644_vm15, %v3520_v20, %v3676_v7 }
 0x65e   : > { %v3300_v36 = vpop.xlane.xlu1 %3299  ;;  %v3916_v39 = vpack.c.bf16 %v3708_v18, %v3707_v19  ;;  %v3711_v19 = vsel %vm3647_vm3, %v3533_v0, %v3679_v62  ;;  %v8647_v62 = vpop.f32.mrf.mxu1 }
 0x65f   : > { %9348 = vrsqrt.f32 %v3331_v21  ;;  %v3316_v55 = vmul.f32 0.125, %v3300_v36  ;;  %v3544_v36 = vadd.f32 %v8643_v6, %v10741_v22  ;;  %v3560_v38 = vadd.f32 %v8647_v62, %v10741_v22 }
 0x660   : > { %8718 = vmatprep.mubr.msk.bf16.mxu1 %vm1827_vm6, %v3916_v39 }
 0x661   : > { %v3332_v46 = vadd.f32 1e-05, %v3316_v55  ;;  %vm3650_vm4 = vcmp.gt.f32.partialorder %v3544_v36, 0.0  ;;  %v3682_v7 = vmul.f32 0.01, %v3544_v36  ;;  %8719 = vmatmul.mubr.msk.bf16.vlgmr.msra.gmra.mxu1 %vm1827_vm6, %v3917_v24  ;;  %v3549_v24 = vadd.f32 %v10741_v22, %v3548_v16 }
 0x662   : > { %v3294_v40 = vpop.xlane.xlu1 %3293  ;;  %v3291_v37 = vpop.xlane.xlu0 %3290  ;;  %vm3654_vm9 = vcmp.gt.f32.partialorder %v3560_v38, 0.0 }
 0x663   : > { %9350 = vrsqrt.f32 %v3332_v46  ;;  %v3314_v21 = vmul.f32 0.125, %v3294_v40  ;;  %v3313_v25 = vmul.f32 0.125, %v3291_v37  ;;  %v3536_v46 = vadd.f32 %v10741_v22, %v3535_v44 }
 0x664   : > { %v3714_v40 = vsel %vm3650_vm4, %v3544_v36, %v3682_v7  ;;  %v10760_v36 = vld [vmem:[%s12027_s8 + $0x1] ss:$0 sm:$0xff]  ;;  %vm3651_vm8 = vcmp.gt.f32.partialorder %v3549_v24, 0.0 }
 0x665   : > { %v3330_v17 = vadd.f32 1e-05, %v3314_v21  ;;  %v3329_v55 = vadd.f32 1e-05, %v3313_v25  ;;  %vm3648_vm5 = vcmp.gt.f32.partialorder %v3536_v46, 0.0  ;;  %v3919_v44 = vpack.c.bf16 %v3714_v40, %v3713_v30 }
 0x666   : > { %v3288_v8 = vpop.xlane.xlu1 %3287  ;;  %v3285_v20 = vpop.xlane.xlu0 %3284  ;;  %v3680_v21 = vmul.f32 0.01, %v3536_v46 }
 0x667   : > { %9352 = vrsqrt.f32 %v3330_v17  ;;  %v3312_v18 = vmul.f32 0.125, %v3288_v8  ;;  %v3311_v37 = vmul.f32 0.125, %v3285_v20  ;;  %v3685_v20 = vmul.f32 0.01, %v3557_v23 }
 0x668   : > { %9354 = vrsqrt.f32 %v3329_v55  ;;  %v3712_v15 = vsel %vm3648_vm5, %v3536_v46, %v3680_v21  ;;  %v3551_v46 = vpop.f32.mrf.mxu1 }
 0x669   : > { %v3328_v25 = vadd.f32 1e-05, %v3312_v18  ;;  %v3327_v39 = vadd.f32 1e-05, %v3311_v37  ;;  %v3918_v0 = vpack.c.bf16 %v3712_v15, %v3711_v19  ;;  %v10767_v15 = vld [vmem:[%s12028_s9 + $0x1] ss:$0 sm:$0xff]  ;;  %v3552_v40 = vadd.f32 %v10741_v22, %v3551_v46 }
 0x66a   : > { %v3282_v6 = vpop.xlane.xlu1 %3281  ;;  %v3279_v60 = vpop.xlane.xlu0 %3278  ;;  %v3683_v19 = vmul.f32 0.01, %v3549_v24 }
 0x66b   : > { %9356 = vrsqrt.f32 %v3328_v25  ;;  %v3310_v17 = vmul.f32 0.125, %v3282_v6  ;;  %v3309_v8 = vmul.f32 0.125, %v3279_v60  ;;  %8722 = vmatprep.mubr.msk.bf16.mxu1 %vm1827_vm6, %v3918_v0  ;;  %v10774_v6 = vsel %vm3653_vm7, %v3557_v23, %v3685_v20 }
 0x66c   : > { %v9349_v55 = vpop.eup %9348  ;;  %9358 = vrsqrt.f32 %v3327_v39  ;;  %8723 = vmatmul.mubr.msk.bf16.gmra.mxu1 %vm1827_vm6, %v3919_v44  ;;  %v8650_v39 = vpop.f32.mrf.mxu1  ;;  %vm3652_vm10 = vcmp.gt.f32.partialorder %v3552_v40, 0.0 }
 0x66d   : > { %v3326_v7 = vadd.f32 1e-05, %v3310_v17  ;;  %v3325_v18 = vadd.f32 1e-05, %v3309_v8  ;;  %v3363_v30 = vmul.f32 %v9349_v55, %v10643_v50  ;;  %v3686_v17 = vmul.f32 0.01, %v3560_v38 }
 0x66e   : > { %v3276_v37 = vpop.xlane.xlu1 %3275  ;;  %v3273_v60 = vpop.xlane.xlu0 %3272 }
 0x66f   : > { %9360 = vrsqrt.f32 %v3326_v7  ;;  %v3308_v50 = vmul.f32 0.125, %v3276_v37  ;;  %v3307_v21 = vmul.f32 0.125, %v3273_v60  ;;  %v3387_v25 = vmul.f32 %v10760_v36, %v3363_v30  ;;  %v10778_v44 = vpop.f32.mrf.mxu1 }
 0x670   : > { %v9351_v16 = vpop.eup %9350  ;;  %9362 = vrsqrt.f32 %v3325_v18  ;;  %v3715_v30 = vsel %vm3651_vm8, %v3549_v24, %v3683_v19  ;;  %v3718_v37 = vsel %vm3654_vm9, %v3560_v38, %v3686_v17  ;;  %v3684_v18 = vmul.f32 0.01, %v3552_v40 }
 0x671   : > { %v3324_v8 = vadd.f32 1e-05, %v3308_v50  ;;  %v3323_v0 = vadd.f32 1e-05, %v3307_v21  ;;  %v3364_v62 = vmul.f32 %v9351_v16, %v10651_v11  ;;  %v3411_v55 = vadd.f32 %v10767_v15, %v3387_v25  ;;  %v10782_v50 = vpop.f32.mrf.mxu1 }
 0x672   : > { %v3270_v7 = vpop.xlane.xlu1 %3269  ;;  %v3267_v46 = vpop.xlane.xlu0 %3266  ;;  %v10785_v25 = vadd.f32 %v8650_v39, %v10741_v22  ;;  %v3716_v48 = vsel %vm3652_vm10, %v3552_v40, %v3684_v18 }
 0x673   : > { %9364 = vrsqrt.f32 %v3324_v8  ;;  %v3306_v23 = vmul.f32 0.125, %v3270_v7  ;;  %v3305_v20 = vmul.f32 0.125, %v3267_v46  ;;  %v3388_v60 = vmul.f32 %v10760_v36, %v3364_v62  ;;  %v10789_v17 = vpop.f32.mrf.mxu1 }
 0x674   : > { %v9353_v21 = vpop.eup %9352  ;;  %9366 = vrsqrt.f32 %v3323_v0  ;;  %vm3427_vm11 = vcmp.gt.f32.partialorder %v3411_v55, 0.0  ;;  %v3443_v11 = vmul.f32 0.01, %v3411_v55  ;;  %v3921_v0 = vpack.c.bf16 %v3718_v37, %v10774_v6 }
 0x675   : > { %v9355_v16 = vpop.eup %9354  ;;  %v3322_v58 = vadd.f32 1e-05, %v3306_v23  ;;  %v3321_v24 = vadd.f32 1e-05, %v3305_v20  ;;  %v3412_v19 = vadd.f32 %v10767_v15, %v3388_v60  ;;  %v3362_v38 = vmul.f32 %v9353_v21, %v10648_v1  ;;  %v10794_v23 = vpop.f32.mrf.mxu1 }
 0x676   : > { %v3264_v8 = vpop.xlane.xlu1 %3263  ;;  %v3261_v62 = vpop.xlane.xlu0 %3260  ;;  %v3459_v7 = vsel %vm3427_vm11, %v3411_v55, %v3443_v11  ;;  %v3361_v46 = vmul.f32 %v9355_v16, %v10662_v54  ;;  %v3920_v37 = vpack.c.bf16 %v3716_v48, %v3715_v30  ;;  %vm3657_vm15 = vcmp.gt.f32.partialorder %v10785_v25, 0.0 }
 0x677   : > { %9368 = vrsqrt.f32 %v3322_v58  ;;  %v3304_v39 = vmul.f32 0.125, %v3264_v8  ;;  %v3303_v47 = vmul.f32 0.125, %v3261_v62  ;;  %vm3428_vm12 = vcmp.gt.f32.partialorder %v3412_v19, 0.0  ;;  %v10799_v40 = vpop.f32.mrf.mxu1 }
 0x678   : > { %v9357_v20 = vpop.eup %9356  ;;  %9370 = vrsqrt.f32 %v3321_v24  ;;  %v3444_v1 = vmul.f32 0.01, %v3412_v19  ;;  %v3385_v60 = vmul.f32 %v10760_v36, %v3361_v46  ;;  %v3386_v21 = vmul.f32 %v10760_v36, %v3362_v38  ;;  %8726 = vmatprep.mubr.msk.bf16.mxu1 %vm1827_vm6, %v3920_v37 }
 0x679   : > { %v9359_v55 = vpop.eup %9358  ;;  %v3320_v11 = vadd.f32 1e-05, %v3304_v39  ;;  %v3319_v54 = vadd.f32 1e-05, %v3303_v47  ;;  %v3360_v6 = vmul.f32 %v9357_v20, %v10659_v42  ;;  %v10807_v47 = vpop.f32.mrf.mxu1  ;;  %8727 = vmatmul.mubr.msk.bf16.gmra.mxu1 %vm1827_vm6, %v3921_v0 }
 0x67a   : > { %v3258_v58 = vpop.xlane.xlu1 %3257  ;;  %v3255_v18 = vpop.xlane.xlu0 %3254  ;;  %v3460_v16 = vsel %vm3428_vm12, %v3412_v19, %v3444_v1  ;;  %v3409_v8 = vadd.f32 %v10767_v15, %v3385_v60  ;;  %v3410_v24 = vadd.f32 %v10767_v15, %v3386_v21  ;;  %v3359_v62 = vmul.f32 %v9359_v55, %v10672_v12 }
 0x67b   : > { %9372 = vrsqrt.f32 %v3320_v11  ;;  %v3302_v46 = vmul.f32 0.125, %v3258_v58  ;;  %v3301_v38 = vmul.f32 0.125, %v3255_v18  ;;  %v10804_v27 = vpack.c.bf16 %v3460_v16, %v3459_v7  ;;  %v10812_v20 = vpop.f32.mrf.mxu1 }
 0x67c   : > { %v9361_v48 = vpop.eup %9360  ;;  %9374 = vrsqrt.f32 %v3319_v54  ;;  %vm3425_vm13 = vcmp.gt.f32.partialorder %v3409_v8, 0.0  ;;  %vm3426_vm14 = vcmp.gt.f32.partialorder %v3410_v24, 0.0  ;;  %v3441_v42 = vmul.f32 0.01, %v3409_v8 }
 0x67d   : > { %v9363_v30 = vpop.eup %9362  ;;  %v3318_v19 = vadd.f32 1e-05, %v3302_v46  ;;  %v3317_v39 = vadd.f32 1e-05, %v3301_v38  ;;  %8668 = vmatprep.subr.bf16.mxu0 %v10804_v27  ;;  %v3442_v12 = vmul.f32 0.01, %v3410_v24  ;;  %v3383_v7 = vmul.f32 %v10760_v36, %v3359_v62  ;;  %v10821_v54 = vpop.f32.mrf.mxu1 }
 0x67e   : > { %8669 = vmatpush3.bf16.msra.mxu0 %v10804_v27  ;;  %v3457_v1 = vsel %vm3425_vm13, %v3409_v8, %v3441_v42  ;;  %v3384_v60 = vmul.f32 %v10760_v36, %v3360_v6  ;;  %v3357_v21 = vmul.f32 %v9363_v30, %v10685_v52  ;;  %v3358_v55 = vmul.f32 %v9361_v48, %v10669_v26 }
 0x67f   : > { %9376 = vrsqrt.f32 %v3318_v19  ;;  %v3458_v0 = vsel %vm3426_vm14, %v3410_v24, %v3442_v12  ;;  %v3407_v11 = vadd.f32 %v10767_v15, %v3383_v7  ;;  %v10829_v24 = vpop.f32.mrf.mxu1  ;;  %v3689_v19 = vmul.f32 0.01, %v10785_v25 }
 0x680   : > { %v9365_v37 = vpop.eup %9364  ;;  %9378 = vrsqrt.f32 %v3317_v39  ;;  %v10823_v58 = vpack.c.bf16 %v3458_v0, %v3457_v1  ;;  %v3408_v18 = vadd.f32 %v10767_v15, %v3384_v60  ;;  %v3381_v6 = vmul.f32 %v10760_v36, %v3357_v21 }
 0x681   : > { %v9367_v52 = vpop.eup %9366  ;;  %vm3423_vm2 = vcmp.gt.f32.partialorder %v3407_v11, 0.0  ;;  %v3439_v26 = vmul.f32 0.01, %v3407_v11  ;;  %v3382_v16 = vmul.f32 %v10760_v36, %v3358_v55  ;;  %v3356_v8 = vmul.f32 %v9365_v37, %v10682_v43  ;;  %v10838_v43 = vpop.f32.mrf.mxu1 }
 0x682   : > { %8670 = vmatprep.subr.bf16.mxu0 %v10823_v58  ;;  %vm3424_vm3 = vcmp.gt.f32.partialorder %v3408_v18, 0.0  ;;  %v3440_v62 = vmul.f32 0.01, %v3408_v18  ;;  %v3405_v46 = vadd.f32 %v10767_v15, %v3381_v6  ;;  %v3355_v38 = vmul.f32 %v9367_v52, %v10696_v34 }
 0x683   : > { %8671 = vmatpush3.bf16.msra.mxu0 %v10823_v58  ;;  %v3455_v48 = vsel %vm3423_vm2, %v3407_v11, %v3439_v26  ;;  %v3406_v42 = vadd.f32 %v10767_v15, %v3382_v16  ;;  %v3380_v30 = vmul.f32 %v10760_v36, %v3356_v8  ;;  %v10844_v0 = vpop.f32.mrf.mxu1  ;;  %v10852_v16 = vadd.f32 %v10741_v22, %v10778_v44 }
 0x684   : > { %v9369_v39 = vpop.eup %9368  ;;  %v3456_v12 = vsel %vm3424_vm3, %v3408_v18, %v3440_v62  ;;  %vm3421_vm4 = vcmp.gt.f32.partialorder %v3405_v46, 0.0  ;;  %v3437_v7 = vmul.f32 0.01, %v3405_v46  ;;  %v3379_v1 = vmul.f32 %v10760_v36, %v3355_v38 }
 0x685   : > { %v9371_v60 = vpop.eup %9370  ;;  %v10841_v21 = vpack.c.bf16 %v3456_v12, %v3455_v48  ;;  %vm3422_vm5 = vcmp.gt.f32.partialorder %v3406_v42, 0.0  ;;  %v3438_v34 = vmul.f32 0.01, %v3406_v42  ;;  %v3404_v55 = vadd.f32 %v10767_v15, %v3380_v30  ;;  %v10854_v8 = vpop.f32.mrf.mxu1 }
 0x686   : > { %v3453_v11 = vsel %vm3421_vm4, %v3405_v46, %v3437_v7  ;;  %v3403_v37 = vadd.f32 %v10767_v15, %v3379_v1  ;;  %v3353_v6 = vmul.f32 %v9371_v60, %v10709_v49  ;;  %v3354_v18 = vmul.f32 %v9369_v39, %v10693_v13 }
 0x687   : > { %8672 = vmatprep.subr.bf16.mxu0 %v10841_v21  ;;  %v3454_v52 = vsel %vm3422_vm5, %v3406_v42, %v3438_v34  ;;  %vm3420_vm7 = vcmp.gt.f32.partialorder %v3404_v55, 0.0  ;;  %v3436_v26 = vmul.f32 0.01, %v3404_v55  ;;  %v10865_v44 = vsel %vm3657_vm15, %v10785_v25, %v3689_v19  ;;  %v10871_v1 = vpop.f32.mrf.mxu1 }
 0x688   : > { %v9373_v62 = vpop.eup %9372  ;;  %8673 = vmatpush3.bf16.msra.mxu0 %v10841_v21  ;;  %v10857_v46 = vpack.c.bf16 %v3454_v52, %v3453_v11  ;;  %vm3419_vm8 = vcmp.gt.f32.partialorder %v3403_v37, 0.0  ;;  %v3435_v49 = vmul.f32 0.01, %v3403_v37  ;;  %v3377_v13 = vmul.f32 %v10760_v36, %v3353_v6 }
 0x689   : > { %v9375_v38 = vpop.eup %9374  ;;  %v3452_v48 = vsel %vm3420_vm7, %v3404_v55, %v3436_v26  ;;  %v3378_v42 = vmul.f32 %v10760_v36, %v3354_v18  ;;  %v3352_v30 = vmul.f32 %v9373_v62, %v10706_v5  ;;  %vm3655_vm9 = vcmp.gt.f32.partialorder %v10852_v16, 0.0 }
 0x68a   : > { %8674 = vmatprep.subr.bf16.mxu0 %v10857_v46  ;;  %v3451_v39 = vsel %vm3419_vm8, %v3403_v37, %v3435_v49  ;;  %v3401_v12 = vadd.f32 %v10767_v15, %v3377_v13  ;;  %v3351_v7 = vmul.f32 %v9375_v38, %v10720_v63  ;;  %v3576_v25 = vadd.f32 %v10782_v50, %v10741_v22  ;;  %v10887_v49 = vpop.f32.mrf.mxu1 }
 0x68b   : > { %v10873_v60 = vpack.c.bf16 %v3452_v48, %v3451_v39  ;;  %v3402_v5 = vadd.f32 %v10767_v15, %v3378_v42  ;;  %v3376_v34 = vmul.f32 %v10760_v36, %v3352_v30  ;;  %v3687_v11 = vmul.f32 0.01, %v10852_v16 }
 0x68c   : > { %v9377_v19 = vpop.eup %9376  ;;  %8675 = vmatpush3.bf16.msra.mxu0 %v10857_v46  ;;  %vm3417_vm10 = vcmp.gt.f32.partialorder %v3401_v12, 0.0  ;;  %v3433_v55 = vmul.f32 0.01, %v3401_v12  ;;  %v3375_v63 = vmul.f32 %v10760_v36, %v3351_v7  ;;  %vm3658_vm12 = vcmp.gt.f32.partialorder %v3576_v25, 0.0 }
 0x68d   : > { %v9379_v37 = vpop.eup %9378  ;;  %8676 = vmatprep.subr.bf16.mxu0 %v10873_v60  ;;  %vm3418_vm11 = vcmp.gt.f32.partialorder %v3402_v5, 0.0  ;;  %v3434_v6 = vmul.f32 0.01, %v3402_v5  ;;  %v3400_v18 = vadd.f32 %v10767_v15, %v3376_v34  ;;  %v3350_v52 = vmul.f32 %v9377_v19, %v10717_v29 }
 0x68e   : > { %v3449_v26 = vsel %vm3417_vm10, %v3401_v12, %v3433_v55  ;;  %v3399_v50 = vadd.f32 %v10767_v15, %v3375_v63  ;;  %v3349_v62 = vmul.f32 %v9379_v37, %v10728_v4  ;;  %v3690_v4 = vmul.f32 0.01, %v3576_v25  ;;  %v3615_v63 = vpop.f32.mrf.mxu1 }
 0x68f   : > { %v3450_v13 = vsel %vm3418_vm11, %v3402_v5, %v3434_v6  ;;  %vm3416_vm13 = vcmp.gt.f32.partialorder %v3400_v18, 0.0  ;;  %v3432_v38 = vmul.f32 0.01, %v3400_v18  ;;  %v3374_v48 = vmul.f32 %v10760_v36, %v3350_v52 }
 0x690   : > { %8677 = vmatpush3.bf16.msra.mxu0 %v10873_v60  ;;  %v10891_v42 = vpack.c.bf16 %v3450_v13, %v3449_v26  ;;  %vm3415_vm14 = vcmp.gt.f32.partialorder %v3399_v50, 0.0  ;;  %v3431_v30 = vmul.f32 0.01, %v3399_v50  ;;  %v3373_v29 = vmul.f32 %v10760_v36, %v3349_v62 }
 0x691   : > { %v3448_v39 = vsel %vm3416_vm13, %v3400_v18, %v3432_v38  ;;  %v3398_v12 = vadd.f32 %v10767_v15, %v3374_v48  ;;  %v3568_v7 = vadd.f32 %v10741_v22, %v10789_v17  ;;  %v3589_v19 = vadd.f32 %v10794_v23, %v10741_v22 }
 0x692   : > { %8678 = vmatprep.subr.bf16.mxu0 %v10891_v42  ;;  %v3447_v5 = vsel %vm3415_vm14, %v3399_v50, %v3431_v30  ;;  %v3397_v34 = vadd.f32 %v10767_v15, %v3373_v29  ;;  %v3581_v55 = vadd.f32 %v10741_v22, %v10799_v40  ;;  %v3722_v6 = vsel %vm3658_vm12, %v3576_v25, %v3690_v4  ;;  %v10914_v50 = vpop.f32.mrf.mxu1 }
 0x693   : > { %v10903_v36 = vpack.c.bf16 %v3448_v39, %v3447_v5  ;;  %vm3414_vm15 = vcmp.gt.f32.partialorder %v3398_v12, 0.0  ;;  %v3430_v37 = vmul.f32 0.01, %v3398_v12  ;;  %vm3656_vm3 = vcmp.gt.f32.partialorder %v3568_v7, 0.0 }
 0x694   : > { %8679 = vmatpush3.bf16.msra.mxu0 %v10891_v42  ;;  %vm3413_vm2 = vcmp.gt.f32.partialorder %v3397_v34, 0.0  ;;  %v3429_v17 = vmul.f32 0.01, %v3397_v34  ;;  %v3719_v23 = vsel %vm3655_vm9, %v10852_v16, %v3687_v11  ;;  %v3923_v40 = vpack.c.bf16 %v3722_v6, %v10865_v44  ;;  %v9447_v6 = vld [vmem:[%s9844_s28 + $0x8] sm:$0xff]  }
 0x695   : > { %8680 = vmatprep.subr.bf16.mxu0 %v10903_v36  ;;  %v3446_v15 = vsel %vm3414_vm15, %v3398_v12, %v3430_v37  ;;  %v3688_v18 = vmul.f32 0.01, %v3568_v7  ;;  %vm3659_vm4 = vcmp.gt.f32.partialorder %v3581_v55, 0.0  ;;  %v3691_v26 = vmul.f32 0.01, %v3581_v55 }
 0x696   : > { %v3445_v52 = vsel %vm3413_vm2, %v3397_v34, %v3429_v17  ;;  %v3592_v25 = vadd.f32 %v10807_v47, %v10741_v22  ;;  %v3693_v38 = vmul.f32 0.01, %v3589_v19  ;;  %v3584_v48 = vadd.f32 %v10741_v22, %v10812_v20  ;;  %v3628_v20 = vpop.f32.mrf.mxu1 }
 0x697   : > { %v10916_v62 = vpack.c.bf16 %v3446_v15, %v3445_v52  ;;  %v3720_v13 = vsel %vm3656_vm3, %v3568_v7, %v3688_v18  ;;  %vm3661_vm5 = vcmp.gt.f32.partialorder %v3589_v19, 0.0  ;;  %v3723_v11 = vsel %vm3659_vm4, %v3581_v55, %v3691_v26  ;;  %v12189_v26 = vld [vmem:[#allocation11_spill] sm:$0xff] }
 0x698   : > { %8681 = vmatpush3.bf16.msra.mxu0 %v10903_v36  ;;  %v3922_v16 = vpack.c.bf16 %v3720_v13, %v3719_v23  ;;  %vm3662_vm7 = vcmp.gt.f32.partialorder %v3592_v25, 0.0  ;;  %v3694_v44 = vmul.f32 0.01, %v3592_v25  ;;  %vm3660_vm8 = vcmp.gt.f32.partialorder %v3584_v48, 0.0  ;;  %v8667_v37 = vpop.f32.mrf.mxu1  ;;  %v9448_v23 = vld [vmem:[%s9844_s28 + $0x10] sm:$0xff]  }
 0x699   : > { %8682 = vmatprep.subr.bf16.mxu0 %v10916_v62  ;;  %v3692_v47 = vmul.f32 0.01, %v3584_v48  ;;  %v3597_v30 = vadd.f32 %v10741_v22, %v10829_v24  ;;  %v3600_v29 = vadd.f32 %v10741_v22, %v10844_v0  ;;  %v3725_v39 = vsel %vm3661_vm5, %v3589_v19, %v3693_v38  ;;  %v9446_v19 = vld [vmem:[%s12026_s7] sm:$0xf] }
 0x69a   : > { %8730 = vmatprep.mubr.msk.bf16.mxu1 %vm1827_vm6, %v3922_v16  ;;  %v3726_v12 = vsel %vm3662_vm7, %v3592_v25, %v3694_v44  ;;  %v3605_v7 = vadd.f32 %v10821_v54, %v10741_v22  ;;  %v3608_v34 = vadd.f32 %v10838_v43, %v10741_v22  ;;  %v3613_v54 = vadd.f32 %v10741_v22, %v10871_v1  ;;  %v3631_v13 = vpop.f32.mrf.mxu1 }
 0x69b   : > { %v3724_v4 = vsel %vm3660_vm8, %v3584_v48, %v3692_v47  ;;  %8731 = vmatmul.mubr.msk.bf16.gmra.mxu1 %vm1827_vm6, %v3923_v40  ;;  %vm3663_vm9 = vcmp.gt.f32.partialorder %v3597_v30, 0.0  ;;  %v3695_v24 = vmul.f32 0.01, %v3597_v30  ;;  %vm3664_vm10 = vcmp.gt.f32.partialorder %v3600_v29, 0.0 }
 0x69c   : > { %8683 = vmatpush3.bf16.msra.mxu0 %v10916_v62  ;;  %v3924_v5 = vpack.c.bf16 %v3724_v4, %v3723_v11  ;;  %v3696_v0 = vmul.f32 0.01, %v3600_v29  ;;  %v3925_v17 = vpack.c.bf16 %v3726_v12, %v3725_v39  ;;  %v3616_v43 = vadd.f32 %v10741_v22, %v3615_v63  ;;  %v9450_v12 = vld [vmem:[%s9844_s28 + $0x20] sm:$0xff]  }
 0x69d   : > { %9183 = vmatprep.subr.msk.bf16.mxu0 %vm1269_vm1, %v9446_v19  ;;  %v3727_v55 = vsel %vm3663_vm9, %v3597_v30, %v3695_v24  ;;  %v3697_v40 = vmul.f32 0.01, %v3605_v7  ;;  %v3698_v18 = vmul.f32 0.01, %v3608_v34  ;;  %vm3665_vm11 = vcmp.gt.f32.partialorder %v3605_v7, 0.0 }
 0x69e   : > { %8734 = vmatprep.mubr.msk.bf16.mxu1 %vm1827_vm6, %v3924_v5  ;;  %v3728_v15 = vsel %vm3664_vm10, %v3600_v29, %v3696_v0  ;;  %vm3666_vm12 = vcmp.gt.f32.partialorder %v3608_v34, 0.0  ;;  %v3699_v25 = vmul.f32 0.01, %v3613_v54  ;;  %vm3667_vm13 = vcmp.gt.f32.partialorder %v3613_v54, 0.0  ;;  %v9449_v29 = vld [vmem:[%s9844_s28 + $0x18] sm:$0xff]  }
 0x69f   : > { %8685 = vmatmul.mubr.bf16.vlgmr.msra.gmra.mxu0 %v9447_v6  ;;  %v3926_v52 = vpack.c.bf16 %v3728_v15, %v3727_v55  ;;  %vm3668_vm14 = vcmp.gt.f32.partialorder %v3616_v43, 0.0  ;;  %v3700_v1 = vmul.f32 0.01, %v3616_v43  ;;  %v3729_v38 = vsel %vm3665_vm11, %v3605_v7, %v3697_v40 }
 0x6a0   : > { %8688 = vmatprep.mubr.bf16.mxu0 %v9448_v23  ;;  %8751 = vmatpush3.bf16.msra.mxu0 %v12189_v26  ;;  %v3730_v63 = vsel %vm3666_vm12, %v3608_v34, %v3698_v18  ;;  %v3621_v48 = vadd.f32 %v10854_v8, %v10741_v22  ;;  %v3624_v16 = vadd.f32 %v10887_v49, %v10741_v22  ;;  %v9454_v18 = vld [vmem:[%s9844_s28 + $0x40] sm:$0xff]  }
 0x6a1   : > { %v3731_v44 = vsel %vm3667_vm13, %v3613_v54, %v3699_v25  ;;  %v3732_v11 = vsel %vm3668_vm14, %v3616_v43, %v3700_v1  ;;  %v3629_v47 = vadd.f32 %v10741_v22, %v3628_v20  ;;  %v3632_v30 = vadd.f32 %v10741_v22, %v3631_v13  ;;  %v9451_v54 = vld [vmem:[%s9844_s28 + $0x28] sm:$0xff]   ;;  %v9456_v25 = vld [vmem:[%s9844_s28 + $0x50] sm:$0xff]   ;;  %v9457_v1 = vld [vmem:[%s9844_s28 + $0x58] sm:$0xff]  }
 0x6a2   : > { %v3927_v39 = vpack.c.bf16 %v3730_v63, %v3729_v38  ;;  %v3701_v4 = vmul.f32 0.01, %v3621_v48  ;;  %v3702_v7 = vmul.f32 0.01, %v3624_v16  ;;  %v3928_v8 = vpack.c.bf16 %v3732_v11, %v3731_v44  ;;  %v9458_v13 = vld [vmem:[%s9844_s28 + $0x60] sm:$0xff]   ;;  %v9459_v38 = vld [vmem:[%s9844_s28 + $0x68] sm:$0xff]  }
 0x6a3   : > { %8735 = vmatmul.mubr.msk.bf16.gmra.mxu1 %vm1827_vm6, %v3925_v17  ;;  %vm3669_vm15 = vcmp.gt.f32.partialorder %v3621_v48, 0.0  ;;  %vm3670_vm2 = vcmp.gt.f32.partialorder %v3624_v16, 0.0  ;;  %v3703_v49 = vmul.f32 0.01, %v3629_v47  ;;  %v3704_v5 = vmul.f32 0.01, %v3632_v30 }
 0x6a4   : > { %8738 = vmatprep.mubr.msk.bf16.mxu1 %vm1827_vm6, %v3926_v52  ;;  %vm3671_vm3 = vcmp.gt.f32.partialorder %v3629_v47, 0.0  ;;  %vm3672_vm4 = vcmp.gt.f32.partialorder %v3632_v30, 0.0  ;;  %v3733_v20 = vsel %vm3669_vm15, %v3621_v48, %v3701_v4  ;;  %v3734_v24 = vsel %vm3670_vm2, %v3624_v16, %v3702_v7  ;;  %v9452_v17 = vld [vmem:[%s9844_s28 + $0x30] sm:$0xff]   ;;  %v9455_v52 = vld [vmem:[%s9844_s28 + $0x48] sm:$0xff]   ;;  %v9461_v48 = vld [vmem:[%s9844_s28 + $0x78] sm:$0xff]  }
 0x6a5   : > { %v3637_v34 = vadd.f32 %v10914_v50, %v10741_v22  ;;  %v3640_v0 = vadd.f32 %v8667_v37, %v10741_v22  ;;  %v3735_v19 = vsel %vm3671_vm3, %v3629_v47, %v3703_v49  ;;  %v3736_v55 = vsel %vm3672_vm4, %v3632_v30, %v3704_v5  ;;  %v9453_v37 = vld [vmem:[%s9844_s28 + $0x38] sm:$0xff]   ;;  %v9460_v63 = vld [vmem:[%s9844_s28 + $0x70] sm:$0xff]   ;;  %v7634_v16 = vld [vmem:[%s12032_s13 + $0x4] sm:$0xf] }
 0x6a6   : > { %v3929_v6 = vpack.c.bf16 %v3734_v24, %v3733_v20  ;;  %v3930_v23 = vpack.c.bf16 %v3736_v55, %v3735_v19  ;;  %9184 = vmatprep.subr.msk.bf16.mxu1 %vm1269_vm1, %v7634_v16  ;;  %v4418_v44 = vsel %vm1269_vm1, %v7634_v16, 0  ;;  %v9300_v11 = vld [vmem:[%s12031_s12 + $0x78] sm:$0xff]   ;;  %v9302_v20 = vld [vmem:[%s12031_s12 + $0x68] sm:$0xff]   ;;  %v9303_v55 = vld [vmem:[%s12031_s12 + $0x60] sm:$0xff]  }
 0x6a7   : > { %8689 = vmatmul.mubr.bf16.gmra.mxu0 %v9449_v29  ;;  %v3705_v15 = vmul.f32 0.01, %v3637_v34  ;;  %v3706_v43 = vmul.f32 0.01, %v3640_v0  ;;  %vm3673_vm5 = vcmp.gt.f32.partialorder %v3637_v34, 0.0  ;;  %vm3674_vm7 = vcmp.gt.f32.partialorder %v3640_v0, 0.0  ;;  %8785 = vmatpush3.bf16.msra.mxu1 %v4418_v44 }
 0x6a8   : > { %8692 = vmatprep.mubr.bf16.mxu0 %v9450_v12  ;;  %8818 = vmatprep.subr.bf16.mxu0 %v9300_v11 }
 0x6a9   : > { %v3737_v22 = vsel %vm3673_vm5, %v3637_v34, %v3705_v15  ;;  %v3738_v50 = vsel %vm3674_vm7, %v3640_v0, %v3706_v43 }
 0x6aa   : > { %v3931_v40 = vpack.c.bf16 %v3738_v50, %v3737_v22 }
 0x6ab   : > { %8739 = vmatmul.mubr.msk.bf16.gmra.mxu1 %vm1827_vm6, %v3927_v39 }
 0x6ac   : > { %8742 = vmatprep.mubr.msk.bf16.mxu1 %vm1827_vm6, %v3928_v8  ;;  %v9301_v8 = vld [vmem:[%s12031_s12 + $0x70] sm:$0xff]  }
 0x6af   : > { %8693 = vmatmul.mubr.bf16.gmra.mxu0 %v9451_v54 }
 0x6b0   : > { %8696 = vmatprep.mubr.bf16.mxu0 %v9452_v17  ;;  %v9304_v17 = vld [vmem:[%s12031_s12 + $0x58] sm:$0xff]  }
 0x6b3   : > { %8743 = vmatmul.mubr.msk.bf16.gmra.mxu1 %vm1827_vm6, %v3929_v6 }
 0x6b4   : > { %8746 = vmatprep.mubr.msk.bf16.mxu1 %vm1827_vm6, %v3930_v23 }
 0x6b7   : > { %8697 = vmatmul.mubr.bf16.gmra.mxu0 %v9453_v37 }
 0x6b8   : > { %8700 = vmatprep.mubr.bf16.mxu0 %v9454_v18 }
 0x6bb   : > { %8747 = vmatmul.mubr.msk.bf16.gmra.mxu1 %vm1827_vm6, %v3931_v40 }
 0x6bf   : > { %8701 = vmatmul.mubr.bf16.gmra.mxu0 %v9455_v52 }
 0x6c0   : > { %8704 = vmatprep.mubr.bf16.mxu0 %v9456_v25 }
 0x6c7   : > { %8705 = vmatmul.mubr.bf16.gmra.mxu0 %v9457_v1 }
 0x6c8   : > { %8708 = vmatprep.mubr.bf16.mxu0 %v9458_v13 }
 0x6cf   : > { %8709 = vmatmul.mubr.bf16.gmra.mxu0 %v9459_v38 }
 0x6d0   : > { %8712 = vmatprep.mubr.bf16.mxu0 %v9460_v63 }
 0x6d7   : > { %8713 = vmatmul.mubr.bf16.gmra.mxu0 %v9461_v48 }
 0x75f   : > { %v8686_v47 = vpop.f32.mrf.mxu0 }
 0x761   : > { %v3773_v30 = vpop.f32.mrf.mxu0 }
 0x763   : > { %v8687_v29 = vpop.f32.mrf.mxu0 }
 0x764   : > { %v3901_v4 = vpack.c.bf16 %v8687_v29, %v8686_v47 }
 0x765   : > { %v3776_v39 = vpop.f32.mrf.mxu0 }
 0x766   : > { %v3900_v12 = vpack.c.bf16 %v3776_v39, %v3773_v30 }
 0x767   : > { %v8690_v7 = vpop.f32.mrf.mxu0 }
 0x768   : > { %8752 = vmatprep.mubr.msk.bf16.mxu0 %vm821_vm0, %v3900_v12  ;;  %8786 = vmatprep.mubr.msk.bf16.mxu1 %vm821_vm0, %v3900_v12 }
 0x769   : > { %v3789_v49 = vpop.f32.mrf.mxu0  ;;  %8753 = vmatmul.mubr.msk.bf16.vlgmr.msra.gmra.mxu0 %vm821_vm0, %v3901_v4  ;;  %8787 = vmatmul.mubr.msk.bf16.vlgmr.msra.gmra.mxu1 %vm821_vm0, %v3901_v4 }
 0x76a   : > { %8819 = vmatpush3.bf16.msra.mxu0 %v9300_v11 }
 0x76b   : > { %v8691_v5 = vpop.f32.mrf.mxu0  ;;  %8820 = vmatprep.subr.bf16.mxu0 %v9301_v8 }
 0x76c   : > { %v3903_v0 = vpack.c.bf16 %v8691_v5, %v8690_v7 }
 0x76d   : > { %v3792_v24 = vpop.f32.mrf.mxu0 }
 0x76e   : > { %v3902_v34 = vpack.c.bf16 %v3792_v24, %v3789_v49  ;;  %8821 = vmatpush3.bf16.msra.mxu0 %v9301_v8 }
 0x76f   : > { %v8694_v19 = vpop.f32.mrf.mxu0  ;;  %8822 = vmatprep.subr.bf16.mxu0 %v9302_v20 }
 0x770   : > { %8756 = vmatprep.mubr.msk.bf16.mxu0 %vm821_vm0, %v3902_v34  ;;  %8790 = vmatprep.mubr.msk.bf16.mxu1 %vm821_vm0, %v3902_v34 }
 0x771   : > { %v3805_v54 = vpop.f32.mrf.mxu0  ;;  %8757 = vmatmul.mubr.msk.bf16.gmra.mxu0 %vm821_vm0, %v3903_v0  ;;  %8791 = vmatmul.mubr.msk.bf16.gmra.mxu1 %vm821_vm0, %v3903_v0 }
 0x772   : > { %8823 = vmatpush3.bf16.msra.mxu0 %v9302_v20 }
 0x773   : > { %v8695_v6 = vpop.f32.mrf.mxu0  ;;  %8824 = vmatprep.subr.bf16.mxu0 %v9303_v55 }
 0x774   : > { %v3905_v23 = vpack.c.bf16 %v8695_v6, %v8694_v19  ;;  %v9306_v6 = vld [vmem:[%s12031_s12 + $0x48] sm:$0xff]  }
 0x775   : > { %v3808_v15 = vpop.f32.mrf.mxu0 }
 0x776   : > { %v3904_v43 = vpack.c.bf16 %v3808_v15, %v3805_v54  ;;  %8825 = vmatpush3.bf16.msra.mxu0 %v9303_v55  ;;  %v9462_v55 = vld [vmem:[%s10248_s30 + $0x4] ss:$8 sps:$4 sm:$0xff]   ;;  %v9305_v54 = vld [vmem:[%s12031_s12 + $0x50] sm:$0xff]   ;;  %v8720_v15 = vpop.f32.mrf.mxu1 }
 0x777   : > { %v8698_v22 = vpop.f32.mrf.mxu0  ;;  %8826 = vmatprep.subr.bf16.mxu0 %v9304_v17 }
 0x778   : > { %8760 = vmatprep.mubr.msk.bf16.mxu0 %vm821_vm0, %v3904_v43  ;;  %8794 = vmatprep.mubr.msk.bf16.mxu1 %vm821_vm0, %v3904_v43  ;;  %v7659_v43 = vld [vmem:[%s12033_s14 + $0x4] sm:$0xf] }
 0x779   : > { %v3821_v50 = vpop.f32.mrf.mxu0  ;;  %8761 = vmatmul.mubr.msk.bf16.gmra.mxu0 %vm821_vm0, %v3905_v23  ;;  %8795 = vmatmul.mubr.msk.bf16.gmra.mxu1 %vm821_vm0, %v3905_v23  ;;  %v4014_v23 = vpop.f32.mrf.mxu1 }
 0x77a   : > { %8827 = vmatpush3.bf16.msra.mxu0 %v9304_v17  ;;  %v9307_v17 = vld [vmem:[%s12031_s12 + $0x40] sm:$0xff]  }
 0x77b   : > { %v8699_v37 = vpop.f32.mrf.mxu0  ;;  %8828 = vmatprep.subr.bf16.mxu0 %v9305_v54 }
 0x77c   : > { %v3907_v52 = vpack.c.bf16 %v8699_v37, %v8698_v22  ;;  %v8721_v22 = vpop.f32.mrf.mxu1 }
 0x77d   : > { %v3824_v40 = vpop.f32.mrf.mxu0 }
 0x77e   : > { %v3906_v18 = vpack.c.bf16 %v3824_v40, %v3821_v50  ;;  %8829 = vmatpush3.bf16.msra.mxu0 %v9305_v54  ;;  %v4017_v50 = vpop.f32.mrf.mxu1 }
 0x77f   : > { %v8702_v25 = vpop.f32.mrf.mxu0  ;;  %8830 = vmatprep.subr.bf16.mxu0 %v9306_v6 }
 0x780   : > { %8764 = vmatprep.mubr.msk.bf16.mxu0 %vm821_vm0, %v3906_v18  ;;  %8798 = vmatprep.mubr.msk.bf16.mxu1 %vm821_vm0, %v3906_v18  ;;  %v8724_v37 = vpop.f32.mrf.mxu1 }
 0x781   : > { %v3837_v1 = vpop.f32.mrf.mxu0  ;;  %8765 = vmatmul.mubr.msk.bf16.gmra.mxu0 %vm821_vm0, %v3907_v52  ;;  %8799 = vmatmul.mubr.msk.bf16.gmra.mxu1 %vm821_vm0, %v3907_v52 }
 0x782   : > { %8831 = vmatpush3.bf16.msra.mxu0 %v9306_v6  ;;  %v4030_v40 = vpop.f32.mrf.mxu1 }
 0x783   : > { %v8703_v13 = vpop.f32.mrf.mxu0  ;;  %8832 = vmatprep.subr.bf16.mxu0 %v9307_v17 }
 0x784   : > { %v3909_v48 = vpack.c.bf16 %v8703_v13, %v8702_v25  ;;  %v8725_v18 = vpop.f32.mrf.mxu1 }
 0x785   : > { %v3840_v38 = vpop.f32.mrf.mxu0 }
 0x786   : > { %v3908_v63 = vpack.c.bf16 %v3840_v38, %v3837_v1  ;;  %8833 = vmatpush3.bf16.msra.mxu0 %v9307_v17  ;;  %v4033_v52 = vpop.f32.mrf.mxu1 }
 0x787   : > { %v8706_v16 = vpop.f32.mrf.mxu0  ;;  %9185 = vmatprep.subr.msk.bf16.mxu0 %vm1269_vm1, %v7659_v43 }
 0x788   : > { %8768 = vmatprep.mubr.msk.bf16.mxu0 %vm821_vm0, %v3908_v63  ;;  %8802 = vmatprep.mubr.msk.bf16.mxu1 %vm821_vm0, %v3908_v63  ;;  %v8728_v25 = vpop.f32.mrf.mxu1 }
 0x789   : > { %v3853_v44 = vpop.f32.mrf.mxu0  ;;  %8769 = vmatmul.mubr.msk.bf16.gmra.mxu0 %vm821_vm0, %v3909_v48  ;;  %8803 = vmatmul.mubr.msk.bf16.gmra.mxu1 %vm821_vm0, %v3909_v48 }
 0x78a   : > { %v4046_v1 = vpop.f32.mrf.mxu1 }
 0x78b   : > { %v8707_v11 = vpop.f32.mrf.mxu0 }
 0x78c   : > { %v3911_v29 = vpack.c.bf16 %v8707_v11, %v8706_v16  ;;  %v8729_v13 = vpop.f32.mrf.mxu1 }
 0x78d   : > { %v3856_v47 = vpop.f32.mrf.mxu0 }
 0x78e   : > { %v3910_v30 = vpack.c.bf16 %v3856_v47, %v3853_v44  ;;  %v4049_v38 = vpop.f32.mrf.mxu1 }
 0x78f   : > { %v8710_v39 = vpop.f32.mrf.mxu0 }
 0x790   : > { %8772 = vmatprep.mubr.msk.bf16.mxu0 %vm821_vm0, %v3910_v30  ;;  %8806 = vmatprep.mubr.msk.bf16.mxu1 %vm821_vm0, %v3910_v30  ;;  %v8732_v63 = vpop.f32.mrf.mxu1 }
 0x791   : > { %v3869_v12 = vpop.f32.mrf.mxu0  ;;  %8773 = vmatmul.mubr.msk.bf16.gmra.mxu0 %vm821_vm0, %v3911_v29  ;;  %8807 = vmatmul.mubr.msk.bf16.gmra.mxu1 %vm821_vm0, %v3911_v29 }
 0x792   : > { %v4062_v48 = vpop.f32.mrf.mxu1 }
 0x793   : > { %v8711_v4 = vpop.f32.mrf.mxu0 }
 0x794   : > { %v3913_v49 = vpack.c.bf16 %v8711_v4, %v8710_v39  ;;  %v8733_v16 = vpop.f32.mrf.mxu1 }
 0x795   : > { %v3872_v7 = vpop.f32.mrf.mxu0 }
 0x796   : > { %v3912_v8 = vpack.c.bf16 %v3872_v7, %v3869_v12  ;;  %v4065_v44 = vpop.f32.mrf.mxu1 }
 0x797   : > { %v8714_v5 = vpop.f32.mrf.mxu0 }
 0x798   : > { %8776 = vmatprep.mubr.msk.bf16.mxu0 %vm821_vm0, %v3912_v8  ;;  %8810 = vmatprep.mubr.msk.bf16.mxu1 %vm821_vm0, %v3912_v8  ;;  %v11039_v47 = vpop.f32.mrf.mxu1 }
 0x799   : > { %v3885_v20 = vpop.f32.mrf.mxu0  ;;  %8777 = vmatmul.mubr.msk.bf16.gmra.mxu0 %vm821_vm0, %v3913_v49  ;;  %8811 = vmatmul.mubr.msk.bf16.gmra.mxu1 %vm821_vm0, %v3913_v49 }
 0x79a   : > { %v4078_v39 = vpop.f32.mrf.mxu1 }
 0x79b   : > { %v8715_v24 = vpop.f32.mrf.mxu0 }
 0x79c   : > { %v3915_v19 = vpack.c.bf16 %v8715_v24, %v8714_v5  ;;  %v8737_v24 = vpop.f32.mrf.mxu1 }
 0x79d   : > { %v3888_v34 = vpop.f32.mrf.mxu0 }
 0x79e   : > { %v3914_v0 = vpack.c.bf16 %v3888_v34, %v3885_v20  ;;  %v4081_v54 = vpop.f32.mrf.mxu1 }
 0x7a0   : > { %8780 = vmatprep.mubr.msk.bf16.mxu0 %vm821_vm0, %v3914_v0  ;;  %8814 = vmatprep.mubr.msk.bf16.mxu1 %vm821_vm0, %v3914_v0 }
 0x7a1   : > { %8781 = vmatmul.mubr.msk.bf16.gmra.mxu0 %vm821_vm0, %v3915_v19  ;;  %8815 = vmatmul.mubr.msk.bf16.gmra.mxu1 %vm821_vm0, %v3915_v19  ;;  %v4946_v19 = vsel %vm1269_vm1, %v7659_v43, 0 }
 0x7a2   : > { %4838 = vmatprep.mubr.bf16.mxu1 %v9462_v55 }
 0x829   : > { %v8754_v11 = vpop.f32.mrf.mxu0 }
 0x82a   : > { %v4352_v49 = vmul.f32 %v8754_v11, %v8720_v15  ;;  %v8740_v15 = vpop.f32.mrf.mxu1 }
 0x82b   : > { %v4223_v30 = vpop.f32.mrf.mxu0 }
 0x82c   : > { %v4350_v7 = vmul.f32 %v4223_v30, %v4014_v23 }
 0x82d   : > { %v8755_v29 = vpop.f32.mrf.mxu0 }
 0x82e   : > { %v4353_v12 = vmul.f32 %v8755_v29, %v8721_v22 }
 0x82f   : > { %v4226_v4 = vpop.f32.mrf.mxu0 }
 0x830   : > { %v4351_v8 = vmul.f32 %v4226_v4, %v4017_v50  ;;  %v4383_v34 = vpack.c.bf16 %v4353_v12, %v4352_v49  ;;  %v4094_v4 = vpop.f32.mrf.mxu1 }
 0x831   : > { %v8758_v5 = vpop.f32.mrf.mxu0 }
 0x832   : > { %v4382_v20 = vpack.c.bf16 %v4351_v8, %v4350_v7  ;;  %v4356_v29 = vmul.f32 %v8758_v5, %v8724_v37 }
 0x833   : > { %v4239_v0 = vpop.f32.mrf.mxu0 }
 0x834   : > { %8834 = vmatprep.mubr.bf16.mxu0 %v4382_v20  ;;  %v4354_v26 = vmul.f32 %v4239_v0, %v4030_v40 }
 0x835   : > { %v8759_v55 = vpop.f32.mrf.mxu0  ;;  %8835 = vmatmul.mubr.bf16.vlgmr.msra.gmra.mxu0 %v4383_v34 }
 0x836   : > { %8867 = vmatpush3.bf16.msra.mxu0 %v4946_v19  ;;  %v4357_v6 = vmul.f32 %v8759_v55, %v8725_v18  ;;  %v8741_v19 = vpop.f32.mrf.mxu1 }
 0x837   : > { %v4242_v17 = vpop.f32.mrf.mxu0 }
 0x838   : > { %v4355_v22 = vmul.f32 %v4242_v17, %v4033_v52  ;;  %v4385_v11 = vpack.c.bf16 %v4357_v6, %v4356_v29 }
 0x839   : > { %v8762_v23 = vpop.f32.mrf.mxu0 }
 0x83a   : > { %v4384_v50 = vpack.c.bf16 %v4355_v22, %v4354_v26  ;;  %v4360_v20 = vmul.f32 %v8762_v23, %v8728_v25  ;;  %v4097_v26 = vpop.f32.mrf.mxu1 }
 0x83b   : > { %v4255_v30 = vpop.f32.mrf.mxu0 }
 0x83c   : > { %8838 = vmatprep.mubr.bf16.mxu0 %v4384_v50  ;;  %v4358_v8 = vmul.f32 %v4255_v30, %v4046_v1  ;;  %v8744_v29 = vpop.f32.mrf.mxu1 }
 0x83d   : > { %v8763_v12 = vpop.f32.mrf.mxu0  ;;  %8839 = vmatmul.mubr.bf16.gmra.mxu0 %v4385_v11 }
 0x83e   : > { %v4361_v43 = vmul.f32 %v8763_v12, %v8729_v13  ;;  %v4110_v23 = vpop.f32.mrf.mxu1 }
 0x83f   : > { %v4258_v7 = vpop.f32.mrf.mxu0 }
 0x840   : > { %v4359_v49 = vmul.f32 %v4258_v7, %v4049_v38  ;;  %v4387_v40 = vpack.c.bf16 %v4361_v43, %v4360_v20 }
 0x841   : > { %v8766_v34 = vpop.f32.mrf.mxu0 }
 0x842   : > { %v4386_v18 = vpack.c.bf16 %v4359_v49, %v4358_v8  ;;  %v4364_v17 = vmul.f32 %v8766_v34, %v8732_v63 }
 0x843   : > { %v4271_v52 = vpop.f32.mrf.mxu0 }
 0x844   : > { %8842 = vmatprep.mubr.bf16.mxu0 %v4386_v18  ;;  %v4362_v55 = vmul.f32 %v4271_v52, %v4062_v48  ;;  %v8745_v48 = vpop.f32.mrf.mxu1 }
 0x845   : > { %v8767_v37 = vpop.f32.mrf.mxu0  ;;  %8843 = vmatmul.mubr.bf16.gmra.mxu0 %v4387_v40 }
 0x846   : > { %v4365_v5 = vmul.f32 %v8767_v37, %v8733_v16  ;;  %v4113_v49 = vpop.f32.mrf.mxu1 }
 0x847   : > { %v4274_v0 = vpop.f32.mrf.mxu0 }
 0x848   : > { %v4363_v6 = vmul.f32 %v4274_v0, %v4065_v44  ;;  %v4389_v1 = vpack.c.bf16 %v4365_v5, %v4364_v17 }
 0x849   : > { %v8770_v22 = vpop.f32.mrf.mxu0 }
 0x84a   : > { %v4388_v13 = vpack.c.bf16 %v4363_v6, %v4362_v55  ;;  %v4368_v43 = vmul.f32 %v8770_v22, %v11039_v47 }
 0x84b   : > { %v4287_v38 = vpop.f32.mrf.mxu0 }
 0x84c   : > { %8846 = vmatprep.mubr.bf16.mxu0 %v4388_v13  ;;  %v4366_v30 = vmul.f32 %v4287_v38, %v4078_v39  ;;  %v8748_v39 = vpop.f32.mrf.mxu1 }
 0x84d   : > { %v8771_v25 = vpop.f32.mrf.mxu0  ;;  %8847 = vmatmul.mubr.bf16.gmra.mxu0 %v4389_v1 }
 0x84e   : > { %v4369_v50 = vmul.f32 %v8771_v25, %v8737_v24  ;;  %v4126_v0 = vpop.f32.mrf.mxu1 }
 0x84f   : > { %v4290_v11 = vpop.f32.mrf.mxu0 }
 0x850   : > { %v4367_v12 = vmul.f32 %v4290_v11, %v4081_v54  ;;  %v4391_v44 = vpack.c.bf16 %v4369_v50, %v4368_v43  ;;  %v8749_v38 = vpop.f32.mrf.mxu1 }
 0x851   : > { %v8774_v16 = vpop.f32.mrf.mxu0 }
 0x852   : > { %v4390_v7 = vpack.c.bf16 %v4367_v12, %v4366_v30  ;;  %v4372_v52 = vmul.f32 %v8774_v16, %v8740_v15  ;;  %v4129_v25 = vpop.f32.mrf.mxu1 }
 0x853   : > { %v4303_v63 = vpop.f32.mrf.mxu0 }
 0x854   : > { %8850 = vmatprep.mubr.bf16.mxu0 %v4390_v7  ;;  %v4370_v18 = vmul.f32 %v4303_v63, %v4094_v4 }
 0x855   : > { %v8775_v8 = vpop.f32.mrf.mxu0  ;;  %8851 = vmatmul.mubr.bf16.gmra.mxu0 %v4391_v44 }
 0x856   : > { %v4373_v20 = vmul.f32 %v8775_v8, %v8741_v19 }
 0x857   : > { %v4306_v34 = vpop.f32.mrf.mxu0 }
 0x858   : > { %v4371_v40 = vmul.f32 %v4306_v34, %v4097_v26  ;;  %v4393_v54 = vpack.c.bf16 %v4373_v20, %v4372_v52 }
 0x859   : > { %v8778_v24 = vpop.f32.mrf.mxu0 }
 0x85a   : > { %v4392_v37 = vpack.c.bf16 %v4371_v40, %v4370_v18  ;;  %v4376_v13 = vmul.f32 %v8778_v24, %v8744_v29 }
 0x85b   : > { %v4319_v5 = vpop.f32.mrf.mxu0 }
 0x85c   : > { %8854 = vmatprep.mubr.bf16.mxu0 %v4392_v37  ;;  %v4374_v17 = vmul.f32 %v4319_v5, %v4110_v23 }
 0x85d   : > { %v8779_v47 = vpop.f32.mrf.mxu0  ;;  %8855 = vmatmul.mubr.bf16.gmra.mxu0 %v4393_v54 }
 0x85e   : > { %v4377_v55 = vmul.f32 %v8779_v47, %v8745_v48 }
 0x85f   : > { %v4322_v6 = vpop.f32.mrf.mxu0 }
 0x860   : > { %v4375_v22 = vmul.f32 %v4322_v6, %v4113_v49  ;;  %v4395_v4 = vpack.c.bf16 %v4377_v55, %v4376_v13 }
 0x861   : > { %v8782_v1 = vpop.f32.mrf.mxu0 }
 0x862   : > { %v4394_v19 = vpack.c.bf16 %v4375_v22, %v4374_v17  ;;  %v4380_v43 = vmul.f32 %v8782_v1, %v8748_v39 }
 0x863   : > { %v4335_v26 = vpop.f32.mrf.mxu0 }
 0x864   : > { %8858 = vmatprep.mubr.bf16.mxu0 %v4394_v19  ;;  %v4378_v30 = vmul.f32 %v4335_v26, %v4126_v0 }
 0x865   : > { %v8783_v15 = vpop.f32.mrf.mxu0  ;;  %8859 = vmatmul.mubr.bf16.gmra.mxu0 %v4395_v4 }
 0x866   : > { %v4381_v50 = vmul.f32 %v8783_v15, %v8749_v38 }
 0x867   : > { %v4338_v11 = vpop.f32.mrf.mxu0 }
 0x868   : > { %v4379_v12 = vmul.f32 %v4338_v11, %v4129_v25  ;;  %v4397_v7 = vpack.c.bf16 %v4381_v50, %v4380_v43 }
 0x86a   : > { %v4396_v16 = vpack.c.bf16 %v4379_v12, %v4378_v30 }
 0x86c   : > { %8862 = vmatprep.mubr.bf16.mxu0 %v4396_v16 }
 0x86d   : > { %8863 = vmatmul.mubr.bf16.gmra.mxu0 %v4397_v7 }
 0x86e   : > { %8868 = vmatprep.mubr.msk.bf16.mxu0 %vm821_vm0, %v10916_v62  ;;  %v9463_v62 = vld [vmem:[%s9810_s26] sm:$0xff]  }
 0x875   : > { %8869 = vmatmul.mubr.msk.bf16.vlgmr.msra.gmra.mxu0 %vm821_vm0, %v10903_v36  ;;  %v8788_v36 = vpop.f32.mrf.mxu1 }
 0x876   : > { %8872 = vmatprep.mubr.msk.bf16.mxu0 %vm821_vm0, %v10891_v42 }
 0x877   : > { %v11061_v42 = vpop.f32.mrf.mxu1 }
 0x878   : > { %12190 = vst [vmem:[#allocation44_spill] sm:$0xff] %v11061_v42 }
 0x879   : > { %v8789_v29 = vpop.f32.mrf.mxu1 }
 0x87d   : > { %8873 = vmatmul.mubr.msk.bf16.gmra.mxu0 %vm821_vm0, %v10873_v60  ;;  %v11063_v60 = vpop.f32.mrf.mxu1 }
 0x87e   : > { %8876 = vmatprep.mubr.msk.bf16.mxu0 %vm821_vm0, %v10857_v46  ;;  %12191 = vst [vmem:[#allocation45_spill] sm:$0xff] %v11063_v60 }
 0x87f   : > { %v8792_v23 = vpop.f32.mrf.mxu1 }
 0x881   : > { %v11065_v46 = vpop.f32.mrf.mxu1 }
 0x883   : > { %v8793_v48 = vpop.f32.mrf.mxu1 }
 0x885   : > { %8877 = vmatmul.mubr.msk.bf16.gmra.mxu0 %vm821_vm0, %v10841_v21  ;;  %v11067_v21 = vpop.f32.mrf.mxu1 }
 0x886   : > { %8880 = vmatprep.mubr.msk.bf16.mxu0 %vm821_vm0, %v10823_v58 }
 0x887   : > { %v11069_v44 = vpop.f32.mrf.mxu1 }
 0x889   : > { %v11071_v58 = vpop.f32.mrf.mxu1 }
 0x88d   : > { %8881 = vmatmul.mubr.msk.bf16.gmra.mxu0 %vm821_vm0, %v10804_v27  ;;  %v11073_v27 = vpop.f32.mrf.mxu1 }
 0x88e   : > { %8886 = vmatprep.mubr.msk.bf16.mxu0 %vm821_vm0, %v9463_v62 }
 0x88f   : > { %v11075_v63 = vpop.f32.mrf.mxu1 }
 0x891   : > { %v8800_v8 = vpop.f32.mrf.mxu1 }
 0x893   : > { %v11077_v49 = vpop.f32.mrf.mxu1 }
 0x895   : > { %v8801_v20 = vpop.f32.mrf.mxu1 }
 0x897   : > { %v11079_v34 = vpop.f32.mrf.mxu1 }
 0x899   : > { %v11081_v40 = vpop.f32.mrf.mxu1 }
 0x89b   : > { %v11089_v54 = vpop.f32.mrf.mxu1 }
 0x89c   : > { %12195 = vst [vmem:[#allocation49_spill] sm:$0xff] %v11089_v54 }
 0x89d   : > { %v11095_v55 = vpop.f32.mrf.mxu1 }
 0x89f   : > { %v11103_v1 = vpop.f32.mrf.mxu1 }
 0x8a1   : > { %v11109_v26 = vpop.f32.mrf.mxu1 }
 0x8a3   : > { %v11111_v50 = vpop.f32.mrf.mxu1 }
 0x8a5   : > { %v8809_v12 = vpop.f32.mrf.mxu1 }
 0x8a7   : > { %v4537_v7 = vpop.f32.mrf.mxu1 }
 0x8f5   : > { %v8836_v18 = vpop.f32.mrf.mxu0 }
 0x8f6   : > { %v11085_v37 = vadd.f32 %v8836_v18, %v8788_v36 }
 0x8f7   : > { %v11083_v52 = vpop.f32.mrf.mxu0 }
 0x8f8   : > { %12192 = vst [vmem:[#allocation46_spill] sm:$0xff] %v11083_v52  ;;  %12193 = vst [vmem:[#allocation47_spill] sm:$0xff] %v11085_v37 }
 0x8f9   : > { %v8837_v24 = vpop.f32.mrf.mxu0 }
 0x8fa   : > { %v11087_v39 = vadd.f32 %v8837_v24, %v8789_v29  ;;  %v8812_v29 = vpop.f32.mrf.mxu1 }
 0x8fb   : > { %v11091_v5 = vpop.f32.mrf.mxu0 }
 0x8fc   : > { %12194 = vst [vmem:[#allocation48_spill] sm:$0xff] %v11087_v39  ;;  %12196 = vst [vmem:[#allocation50_spill] sm:$0xff] %v11091_v5  ;;  %v4550_v18 = vpop.f32.mrf.mxu1 }
 0x8fd   : > { %v8840_v0 = vpop.f32.mrf.mxu0 }
 0x8fe   : > { %v11099_v22 = vadd.f32 %v8840_v0, %v8792_v23 }
 0x8ff   : > { %v11097_v6 = vpop.f32.mrf.mxu0 }
 0x901   : > { %v8841_v17 = vpop.f32.mrf.mxu0 }
 0x902   : > { %v11101_v13 = vadd.f32 %v8841_v17, %v8793_v48  ;;  %v8813_v17 = vpop.f32.mrf.mxu1 }
 0x903   : > { %v11105_v19 = vpop.f32.mrf.mxu0 }
 0x904   : > { %v4553_v14 = vpop.f32.mrf.mxu1 }
 0x905   : > { %v8844_v4 = vpop.f32.mrf.mxu0 }
 0x906   : > { %v8816_v57 = vpop.f32.mrf.mxu1 }
 0x907   : > { %v4695_v15 = vpop.f32.mrf.mxu0 }
 0x908   : > { %v4566_v53 = vpop.f32.mrf.mxu1 }
 0x909   : > { %v8845_v25 = vpop.f32.mrf.mxu0 }
 0x90a   : > { %v8817_v41 = vpop.f32.mrf.mxu1 }
 0x90b   : > { %v4698_v11 = vpop.f32.mrf.mxu0 }
 0x90c   : > { %v4569_v32 = vpop.f32.mrf.mxu1 }
 0x90d   : > { %v8848_v30 = vpop.f32.mrf.mxu0 }
 0x90e   : > { %v4720_v56 = vadd.f32 %v8848_v30, %v8800_v8  ;;  %v9474_v30 = vld [vmem:[%s10248_s30 + $0x50] ss:$8 sps:$4 sm:$0xff]  }
 0x90f   : > { %v4711_v43 = vpop.f32.mrf.mxu0 }
 0x910   : > { %v4712_v54 = vadd.f32 %v4711_v43, %v11077_v49  ;;  %v12201_v49 = vld [vmem:[#allocation49_spill] sm:$0xff] }
 0x911   : > { %v8849_v16 = vpop.f32.mrf.mxu0  ;;  %v9476_v43 = vld [vmem:[%s10248_s30 + $0x60] ss:$8 sps:$4 sm:$0xff]  }
 0x912   : > { %v4723_v9 = vadd.f32 %v8849_v16, %v8801_v20  ;;  %v9477_v16 = vld [vmem:[%s10248_s30 + $0x74] ss:$8 sps:$4 sm:$0xff]  }
 0x913   : > { %v4714_v62 = vpop.f32.mrf.mxu0 }
 0x914   : > { %v4797_v42 = vpack.c.bf16 %v4723_v9, %v4720_v56  ;;  %v4715_v5 = vadd.f32 %v4714_v62, %v11079_v34  ;;  %v12203_v34 = vld [vmem:[#allocation45_spill] sm:$0xff] }
 0x915   : > { %v11113_v36 = vpop.f32.mrf.mxu0  ;;  %v9479_v62 = vld [vmem:[%s9844_s28] sm:$0xff]  }
 0x917   : > { %v11115_v23 = vpop.f32.mrf.mxu0 }
 0x918   : > { %12197 = vst [vmem:[#allocation51_spill] sm:$0xff] %v11115_v23 }
 0x919   : > { %v8853_v48 = vpop.f32.mrf.mxu0 }
 0x91b   : > { %v11117_v24 = vpop.f32.mrf.mxu0 }
 0x91c   : > { %12198 = vst [vmem:[#allocation52_spill] sm:$0xff] %v11117_v24 }
 0x91d   : > { %v8856_v0 = vpop.f32.mrf.mxu0 }
 0x91f   : > { %v4743_v47 = vpop.f32.mrf.mxu0  ;;  %v12202_v20 = vld [vmem:[#allocation51_spill] sm:$0xff] }
 0x921   : > { %v8857_v38 = vpop.f32.mrf.mxu0 }
 0x922   : > { %v4755_v56 = vadd.f32 %v8857_v38, %v8809_v12  ;;  %v9467_v38 = vld [vmem:[%s10248_s30 + $0x24] ss:$8 sps:$4 sm:$0xff]  }
 0x923   : > { %v4746_v45 = vpop.f32.mrf.mxu0  ;;  %v9475_v12 = vld [vmem:[%s10248_s30 + $0x64] ss:$8 sps:$4 sm:$0xff]  }
 0x925   : > { %v8860_v59 = vpop.f32.mrf.mxu0 }
 0x926   : > { %v4768_v24 = vadd.f32 %v8860_v59, %v8812_v29 }
 0x927   : > { %v4759_v51 = vpop.f32.mrf.mxu0 }
 0x929   : > { %v8861_v2 = vpop.f32.mrf.mxu0 }
 0x92a   : > { %v4771_v60 = vadd.f32 %v8861_v2, %v8813_v17 }
 0x92b   : > { %v4762_v28 = vpop.f32.mrf.mxu0 }
 0x92d   : > { %v8864_v35 = vpop.f32.mrf.mxu0 }
 0x92e   : > { %v4784_v3 = vadd.f32 %v8864_v35, %v8816_v57  ;;  %v4707_v35 = vadd.f32 %v8845_v25, %v11073_v27  ;;  %v4763_v57 = vadd.f32 %v4762_v28, %v4553_v14  ;;  %v4744_v14 = vadd.f32 %v4743_v47, %v11111_v50  ;;  %v12207_v47 = vld [vmem:[#allocation48_spill] sm:$0xff]  ;;  %v9471_v25 = vld [vmem:[%s10248_s30 + $0x44] ss:$8 sps:$4 sm:$0xff]   ;;  %v9472_v50 = vld [vmem:[%s10248_s30 + $0x40] ss:$8 sps:$4 sm:$0xff]  }
 0x92f   : > { %v4775_v33 = vpop.f32.mrf.mxu0  ;;  %v4739_v28 = vadd.f32 %v8853_v48, %v11095_v55  ;;  %v12208_v55 = vld [vmem:[#allocation47_spill] sm:$0xff] }
 0x930   : > { %v4776_v37 = vadd.f32 %v4775_v33, %v4566_v53  ;;  %v4704_v33 = vadd.f32 %v8844_v4, %v11069_v44  ;;  %v4752_v53 = vadd.f32 %v8856_v0, %v11109_v26  ;;  %v4680_v44 = vadd.f32 %v11097_v6, %v11065_v46  ;;  %v9468_v4 = vld [vmem:[%s10248_s30 + $0x20] ss:$8 sps:$4 sm:$0xff]   ;;  %v9469_v26 = vld [vmem:[%s10248_s30 + $0x34] ss:$8 sps:$4 sm:$0xff]  }
 0x931   : > { %v8865_v61 = vpop.f32.mrf.mxu0  ;;  %v4728_v46 = vadd.f32 %v12202_v20, %v12201_v49  ;;  %v12209_v6 = vpack.c.bf16 %v12207_v47, %v12208_v55 }
 0x932   : > { %v4787_v10 = vadd.f32 %v8865_v61, %v8817_v41  ;;  %v4796_v61 = vpack.c.bf16 %v4715_v5, %v4712_v54  ;;  %v4803_v41 = vpack.c.bf16 %v4771_v60, %v4768_v24  ;;  %v4795_v9 = vpack.c.bf16 %v4707_v35, %v4704_v33  ;;  %v12206_v54 = vld [vmem:[#allocation46_spill] sm:$0xff] }
 0x933   : > { %v4778_v31 = vpop.f32.mrf.mxu0  ;;  %v4801_v2 = vpack.c.bf16 %v4755_v56, %v4752_v53 }
 0x934   : > { %v4805_v39 = vpack.c.bf16 %v4787_v10, %v4784_v3  ;;  %v4779_v52 = vadd.f32 %v4778_v31, %v4569_v32  ;;  %v4760_v31 = vadd.f32 %v4759_v51, %v4550_v18  ;;  %v4699_v32 = vadd.f32 %v4698_v11, %v11075_v63  ;;  %v9473_v11 = vld [vmem:[%s10248_s30 + $0x54] ss:$8 sps:$4 sm:$0xff]  }
 0x935   : > { %v4696_v10 = vadd.f32 %v4695_v15, %v11071_v58  ;;  %v4683_v51 = vadd.f32 %v11105_v19, %v11067_v21  ;;  %v12199_v58 = vpack.c.bf16 %v11101_v13, %v11099_v22  ;;  %v12200_v21 = vld [vmem:[#allocation52_spill] sm:$0xff]  ;;  %v9464_v13 = vld [vmem:[%s10248_s30] ss:$8 sps:$4 sm:$0xff]   ;;  %v11166_v48 = vpop.f32.mrf.mxu0 }
 0x936   : > { %v4804_v23 = vpack.c.bf16 %v4779_v52, %v4776_v37  ;;  %8102 = vmatprep.subr.bf16.mxu1 %v4805_v39  ;;  %v4802_v3 = vpack.c.bf16 %v4763_v57, %v4760_v31  ;;  %v4731_v8 = vadd.f32 %v12200_v21, %v11103_v1  ;;  %v12204_v52 = vld [vmem:[#allocation50_spill] sm:$0xff]  ;;  %v9465_v1 = vld [vmem:[%s10248_s30 + $0x14] ss:$8 sps:$4 sm:$0xff]   ;;  %v9466_v19 = vld [vmem:[%s10248_s30 + $0x10] ss:$8 sps:$4 sm:$0xff]  }
 0x937   : > { %8103 = vmatpush3.bf16.msra.mxu1 %v4797_v42  ;;  %v4794_v59 = vpack.c.bf16 %v4699_v32, %v4696_v10  ;;  %v4747_v42 = vadd.f32 %v4746_v45, %v4537_v7  ;;  %v4736_v45 = vadd.f32 %v11113_v36, %v11081_v40  ;;  %v4792_v27 = vpack.c.bf16 %v4683_v51, %v4680_v44  ;;  %v12205_v40 = vld [vmem:[#allocation44_spill] sm:$0xff]  ;;  %v11172_v0 = vpop.f32.mrf.mxu0 }
 0x938   : > { %8104 = vmatprep.subr.bf16.mxu1 %v4804_v23  ;;  %v4667_v37 = vadd.f32 %v12204_v52, %v12203_v34  ;;  %v4798_v39 = vpack.c.bf16 %v4731_v8, %v4728_v46  ;;  %v4664_v5 = vadd.f32 %v12206_v54, %v12205_v40  ;;  %v9470_v15 = vld [vmem:[%s10248_s30 + $0x30] ss:$8 sps:$4 sm:$0xff]  }
 0x939   : > { %v4800_v60 = vpack.c.bf16 %v4747_v42, %v4744_v14  ;;  %v4799_v63 = vpack.c.bf16 %v4739_v28, %v4736_v45  ;;  %v9478_v7 = vld [vmem:[%s10248_s30 + $0x70] ss:$8 sps:$4 sm:$0xff]  }
 0x93a   : > { %v4790_v22 = vpack.c.bf16 %v4667_v37, %v4664_v5 }
 0x93b   : > { %8105 = vmatpush3.bf16.msra.mxu1 %v4796_v61 }
 0x93c   : > { %8106 = vmatprep.subr.bf16.mxu1 %v4803_v41  ;;  %v11176_v41 = vpop.f32.mrf.mxu0 }
 0x93e   : > { %v11182_v31 = vpop.f32.mrf.mxu0 }
 0x93f   : > { %8107 = vmatpush3.bf16.msra.mxu1 %v4795_v9 }
 0x940   : > { %8108 = vmatprep.subr.bf16.mxu1 %v4802_v3  ;;  %v11184_v56 = vpop.f32.mrf.mxu0 }
 0x942   : > { %v11190_v53 = vpop.f32.mrf.mxu0 }
 0x943   : > { %8109 = vmatpush3.bf16.msra.mxu1 %v4794_v59 }
 0x944   : > { %8110 = vmatprep.subr.bf16.mxu1 %v4801_v2  ;;  %v11192_v42 = vpop.f32.mrf.mxu0 }
 0x946   : > { %v11194_v28 = vpop.f32.mrf.mxu0 }
 0x947   : > { %8111 = vmatpush3.bf16.msra.mxu1 %v12199_v58 }
 0x948   : > { %8112 = vmatprep.subr.bf16.mxu1 %v4800_v60  ;;  %v8878_v58 = vpop.f32.mrf.mxu0 }
 0x94b   : > { %8113 = vmatpush3.bf16.msra.mxu1 %v4792_v27 }
 0x94c   : > { %8114 = vmatprep.subr.bf16.mxu1 %v4799_v63  ;;  %v5014_v63 = vpop.f32.mrf.mxu0 }
 0x94e   : > { %v8879_v49 = vpop.f32.mrf.mxu0 }
 0x94f   : > { %8115 = vmatpush3.bf16.msra.mxu1 %v12209_v6 }
 0x950   : > { %8116 = vmatprep.subr.bf16.mxu1 %v4798_v39  ;;  %v5017_v34 = vpop.f32.mrf.mxu0 }
 0x952   : > { %v8882_v39 = vpop.f32.mrf.mxu0 }
 0x953   : > { %8117 = vmatpush3.bf16.msra.mxu1 %v4790_v22  ;;  %v12210_v22 = vld [vmem:[#allocation19_spill] sm:$0xff] }
 0x954   : > { %v5030_v47 = vpop.f32.mrf.mxu0 }
 0x956   : > { %4839 = vmatmul.mubr.bf16.vlgmr.msra.gmra.mxu1 %v9464_v13 }
 0x957   : > { %4846 = vmatprep.mubr.bf16.mxu1 %v9465_v1 }
 0x95e   : > { %4847 = vmatmul.mubr.bf16.gmra.mxu1 %v9466_v19 }
 0x95f   : > { %4854 = vmatprep.mubr.bf16.mxu1 %v9467_v38 }
 0x966   : > { %4855 = vmatmul.mubr.bf16.gmra.mxu1 %v9468_v4  ;;  %v8883_v4 = vpop.f32.mrf.mxu0 }
 0x967   : > { %4862 = vmatprep.mubr.bf16.mxu1 %v9469_v26 }
 0x96e   : > { %4863 = vmatmul.mubr.bf16.gmra.mxu1 %v9470_v15  ;;  %v12211_v15 = vld [vmem:[#allocation18_spill] sm:$0xff] }
 0x96f   : > { %4870 = vmatprep.mubr.bf16.mxu1 %v9471_v25 }
 0x976   : > { %4871 = vmatmul.mubr.bf16.gmra.mxu1 %v9472_v50 }
 0x977   : > { %4878 = vmatprep.mubr.bf16.mxu1 %v9473_v11 }
 0x97e   : > { %4879 = vmatmul.mubr.bf16.gmra.mxu1 %v9474_v30 }
 0x97f   : > { %4886 = vmatprep.mubr.bf16.mxu1 %v9475_v12  ;;  %v12212_v12 = vld [vmem:[#allocation13_spill] sm:$0xff] }
 0x986   : > { %4887 = vmatmul.mubr.bf16.gmra.mxu1 %v9476_v43 }
 0x987   : > { %4894 = vmatprep.mubr.bf16.mxu1 %v9477_v16  ;;  %v12213_v16 = vld [vmem:[#allocation16_spill] sm:$0xff] }
 0x98e   : > { %4895 = vmatmul.mubr.bf16.gmra.mxu1 %v9478_v7 }
 0x98f   : > { %8934 = vmatprep.mubr.bf16.mxu1 %v9479_v62 }
 0xa16   : > { %v8118_v36 = vpop.f32.mrf.mxu1 }
 0xa18   : > { %v8119_v29 = vpop.f32.mrf.mxu1 }
 0xa19   : > { %v11164_v23 = vadd.f32 %v8119_v29, %v8118_v36 }
 0xa1a   : > { %v11168_v18 = vpop.f32.mrf.mxu1 }
 0xa1c   : > { %v11170_v24 = vpop.f32.mrf.mxu1 }
 0xa1e   : > { %v8124_v17 = vpop.f32.mrf.mxu1 }
 0xa20   : > { %v8125_v35 = vpop.f32.mrf.mxu1 }
 0xa21   : > { %v11174_v61 = vadd.f32 %v8125_v35, %v8124_v17  ;;  %v5033_v35 = vpop.f32.mrf.mxu0 }
 0xa22   : > { %v11178_v57 = vpop.f32.mrf.mxu1 }
 0xa24   : > { %v11180_v33 = vpop.f32.mrf.mxu1 }
 0xa26   : > { %v8130_v9 = vpop.f32.mrf.mxu1 }
 0xa28   : > { %v8131_v32 = vpop.f32.mrf.mxu1 }
 0xa2a   : > { %v11186_v3 = vpop.f32.mrf.mxu1 }
 0xa2c   : > { %v11188_v10 = vpop.f32.mrf.mxu1 }
 0xa2e   : > { %v8136_v59 = vpop.f32.mrf.mxu1 }
 0xa30   : > { %v8137_v2 = vpop.f32.mrf.mxu1 }
 0xa31   : > { %v8138_v36 = vadd.f32 %v8137_v2, %v8136_v59  ;;  %v12216_v59 = vld [vmem:[#allocation17_spill] sm:$0xff] }
 0xa32   : > { %v8139_v14 = vpop.f32.mrf.mxu1 }
 0xa34   : > { %v8140_v51 = vpop.f32.mrf.mxu1 }
 0xa36   : > { %v8142_v60 = vpop.f32.mrf.mxu1 }
 0xa38   : > { %v8143_v44 = vpop.f32.mrf.mxu1 }
 0xa39   : > { %v8144_v26 = vadd.f32 %v8143_v44, %v8142_v60  ;;  %v12214_v60 = vld [vmem:[#allocation14_spill] sm:$0xff] }
 0xa3a   : > { %v8145_v45 = vpop.f32.mrf.mxu1 }
 0xa3b   : > { %v4911_v44 = vmul.f32 %v8144_v26, %v12214_v60 }
 0xa3c   : > { %v8146_v27 = vpop.f32.mrf.mxu1 }
 0xa3e   : > { %v8148_v21 = vpop.f32.mrf.mxu1 }
 0xa40   : > { %v8149_v8 = vpop.f32.mrf.mxu1 }
 0xa41   : > { %v8150_v55 = vadd.f32 %v8149_v8, %v8148_v21  ;;  %v11203_v21 = vld [vmem:[%s12034_s15 + $0x1] ss:$0 sm:$0xff]  ;;  %v8147_v8 = vadd.f32 %v8146_v27, %v8145_v45  ;;  %v12220_v45 = vld [vmem:[#allocation15_spill] sm:$0xff] }
 0xa42   : > { %v8151_v20 = vpop.f32.mrf.mxu1 }
 0xa43   : > { %v4913_v25 = vmul.f32 %v8150_v55, %v12211_v15  ;;  %v8141_v55 = vadd.f32 %v8140_v51, %v8139_v14  ;;  %v12223_v14 = vld [vmem:[#allocation24_spill] sm:$0xff] }
 0xa44   : > { %v8152_v46 = vpop.f32.mrf.mxu1 }
 0xa45   : > { %v8153_v50 = vadd.f32 %v8152_v46, %v8151_v20  ;;  %v5055_v20 = vadd.f32 %v8878_v58, %v4913_v25  ;;  %v12215_v46 = vld [vmem:[#allocation12_spill] sm:$0xff]  ;;  %v4912_v58 = vmul.f32 %v8147_v8, %v12220_v45 }
 0xa46   : > { %v8154_v52 = vpop.f32.mrf.mxu1 }
 0xa47   : > { %v5079_v27 = vadd.f32 %v11203_v21, %v5055_v20 }
 0xa48   : > { %v8155_v37 = vpop.f32.mrf.mxu1 }
 0xa49   : > { %v8156_v54 = vadd.f32 %v8155_v37, %v8154_v52  ;;  %v4914_v52 = vmul.f32 %v8153_v50, %v12215_v46  ;;  %v12221_v50 = vld [vmem:[#allocation28_spill] sm:$0xff] }
 0xa4a   : > { %v8157_v40 = vpop.f32.mrf.mxu1 }
 0xa4b   : > { %v4915_v13 = vmul.f32 %v8156_v54, %v12210_v22 }
 0xa4c   : > { %v8158_v5 = vpop.f32.mrf.mxu1 }
 0xa4d   : > { %v8159_v1 = vadd.f32 %v8158_v5, %v8157_v40  ;;  %v5057_v30 = vadd.f32 %v5030_v47, %v4915_v13  ;;  %v12217_v5 = vld [vmem:[#allocation21_spill] sm:$0xff]  ;;  %v12218_v13 = vld [vmem:[#allocation23_spill] sm:$0xff] }
 0xa4e   : > { %v8160_v6 = vpop.f32.mrf.mxu1  ;;  %v4909_v47 = vmul.f32 %v8138_v36, %v12217_v5  ;;  %v12227_v36 = vld [vmem:[#allocation32_spill] sm:$0xff] }
 0xa4f   : > { %v4916_v43 = vmul.f32 %v8159_v1, %v12212_v12  ;;  %v5081_v37 = vadd.f32 %v11203_v21, %v5057_v30  ;;  %v12226_v30 = vld [vmem:[#allocation20_spill] sm:$0xff] }
 0xa50   : > { %v8161_v19 = vpop.f32.mrf.mxu1 }
 0xa51   : > { %v8162_v38 = vadd.f32 %v8161_v19, %v8160_v6  ;;  %v5058_v40 = vadd.f32 %v5033_v35, %v4916_v43  ;;  %v5053_v19 = vadd.f32 %v5014_v63, %v4911_v44  ;;  %v8135_v63 = vadd.f32 %v11188_v10, %v11186_v3  ;;  %v12229_v3 = vld [vmem:[#allocation25_spill] sm:$0xff]  ;;  %v12231_v44 = vld [vmem:[#allocation30_spill] sm:$0xff] }
 0xa52   : > { %v8163_v11 = vpop.f32.mrf.mxu1  ;;  %v4910_v43 = vmul.f32 %v8141_v55, %v12226_v30  ;;  %v4905_v8 = vmul.f32 %v11174_v61, %v12231_v44  ;;  %v12235_v55 = vld [vmem:[#allocation29_spill] sm:$0xff] }
 0xa53   : > { %v4917_v7 = vmul.f32 %v8162_v38, %v12213_v16  ;;  %v5056_v38 = vadd.f32 %v8879_v49, %v4914_v52  ;;  %v12232_v52 = vld [vmem:[#allocation22_spill] sm:$0xff] }
 0xa54   : > { %v8164_v62 = vpop.f32.mrf.mxu1 }
 0xa55   : > { %v5059_v29 = vadd.f32 %v8882_v39, %v4917_v7  ;;  %v8165_v17 = vadd.f32 %v8164_v62, %v8163_v11  ;;  %v8132_v39 = vadd.f32 %v8131_v32, %v8130_v9  ;;  %v11220_v9 = vadd.f32 %v5081_v37, %v12221_v50  ;;  %v12224_v11 = vld [vmem:[#allocation27_spill] sm:$0xff] }
 0xa56   : > { %v5082_v32 = vadd.f32 %v11203_v21, %v5058_v40  ;;  %v5077_v7 = vadd.f32 %v11203_v21, %v5053_v19  ;;  %v5054_v62 = vadd.f32 %v5017_v34, %v4912_v58  ;;  %v8129_v34 = vadd.f32 %v11180_v33, %v11178_v57  ;;  %v12237_v33 = vld [vmem:[#allocation34_spill] sm:$0xff] }
 0xa57   : > { %v5083_v54 = vadd.f32 %v11203_v21, %v5059_v29  ;;  %v4918_v2 = vmul.f32 %v8165_v17, %v12216_v59  ;;  %12222 = vst [vmem:[#allocation49_spill] sm:$0xff] %v11220_v9  ;;  %v4907_v51 = vmul.f32 %v8132_v39, %v12223_v14  ;;  %v11233_v29 = vadd.f32 %v5079_v27, %v12227_v36  ;;  %v12238_v19 = vld [vmem:[#allocation26_spill] sm:$0xff]  ;;  %v12246_v36 = vld [vmem:[#allocation36_spill] sm:$0xff] }
 0xa58   : > { %v5137_v35 = vsel %vm821_vm0, %v11220_v9, 0.0  ;;  %v11240_v10 = vadd.f32 %v5082_v32, %v12229_v3  ;;  %v4908_v37 = vmul.f32 %v8135_v63, %v12232_v52  ;;  %v5078_v57 = vadd.f32 %v11203_v21, %v5054_v62  ;;  %v12241_v32 = vld [vmem:[#allocation33_spill] sm:$0xff] }
 0xa59   : > { %v5060_v6 = vadd.f32 %v8883_v4, %v4918_v2  ;;  %v11212_v1 = vadd.f32 %v5083_v54, %v12218_v13  ;;  %v5051_v4 = vadd.f32 %v11184_v56, %v4909_v47  ;;  %12228 = vst [vmem:[#allocation45_spill] sm:$0xff] %v11233_v29  ;;  %v5080_v56 = vadd.f32 %v11203_v21, %v5056_v38  ;;  %v12233_v2 = vld [vmem:[#allocation35_spill] sm:$0xff]  ;;  %v12248_v3 = vld [vmem:[#allocation41_spill] sm:$0xff] }
 0xa5a   : > { %12230 = vst [vmem:[#allocation50_spill] sm:$0xff] %v11240_v10  ;;  %v5049_v20 = vadd.f32 %v11190_v53, %v4907_v51  ;;  %v5052_v54 = vadd.f32 %v11192_v42, %v4910_v43  ;;  %v11252_v39 = vadd.f32 %v5077_v7, %v12233_v2  ;;  %v5140_v47 = vsel %vm821_vm0, %v11240_v10, 0.0 }
 0xa5b   : > { %12219 = vst [vmem:[#allocation52_spill] sm:$0xff] %v11212_v1  ;;  %v5143_v26 = vsel %vm821_vm0, %v11212_v1, 0.0  ;;  %v5084_v25 = vadd.f32 %v11203_v21, %v5060_v6  ;;  %v5075_v40 = vadd.f32 %v11203_v21, %v5051_v4  ;;  %v5131_v61 = vsel %vm821_vm0, %v11233_v29, 0.0 }
 0xa5c   : > { %5144 = vadd.xlane.f32.xlu0 %v5143_v26  ;;  %12234 = vst [vmem:[#allocation44_spill] sm:$0xff] %v11252_v39  ;;  %v11259_v6 = vadd.f32 %v5080_v56, %v12235_v55  ;;  %v4903_v53 = vmul.f32 %v11164_v23, %v12237_v33  ;;  %v8123_v42 = vadd.f32 %v11170_v24, %v11168_v18  ;;  %v12239_v26 = vld [vmem:[#allocation37_spill] sm:$0xff]  ;;  %v5125_v23 = vsel %vm821_vm0, %v11252_v39, 0.0  ;;  %v12243_v24 = vld [vmem:[#allocation31_spill] sm:$0xff]  ;;  %v12254_v55 = vld [vmem:[#allocation40_spill] sm:$0xff] }
 0xa5d   : > { %v11228_v49 = vadd.f32 %v5084_v25, %v12224_v11  ;;  %v5047_v13 = vadd.f32 %v11166_v48, %v4905_v8  ;;  %v4906_v58 = vmul.f32 %v8129_v34, %v12238_v19  ;;  %v5073_v27 = vadd.f32 %v11203_v21, %v5049_v20  ;;  %v12244_v11 = vld [vmem:[#allocation39_spill] sm:$0xff] }
 0xa5e   : > { %12236 = vst [vmem:[#allocation46_spill] sm:$0xff] %v11259_v6  ;;  %v5050_v38 = vadd.f32 %v11194_v28, %v4908_v37  ;;  %v11271_v25 = vadd.f32 %v5075_v40, %v12239_v26  ;;  %v5134_v50 = vsel %vm821_vm0, %v11259_v6, 0.0  ;;  %v11278_v51 = vadd.f32 %v5078_v57, %v12241_v32  ;;  %v12250_v37 = vld [vmem:[#allocation38_spill] sm:$0xff]  ;;  %v9480_v26 = vld [vmem:[%s12025_s6] sm:$0xff]   ;;  %v9483_v32 = vld [vmem:[%s9810_s26 + $0x18] sm:$0xff]  }
 0xa5f   : > { %12225 = vst [vmem:[#allocation51_spill] sm:$0xff] %v11228_v49  ;;  %v5146_v17 = vsel %vm821_vm0, %v11228_v49, 0.0  ;;  %v5076_v48 = vadd.f32 %v11203_v21, %v5052_v54  ;;  %v5045_v18 = vadd.f32 %v11172_v0, %v4903_v53  ;;  %v4904_v28 = vmul.f32 %v8123_v42, %v12243_v24  ;;  %v12252_v54 = vld [vmem:[#allocation43_spill] sm:$0xff] }
 0xa60   : > { %5147 = vadd.xlane.f32.xlu1 %v5146_v17  ;;  %5138 = vadd.xlane.f32.xlu0 %v5137_v35  ;;  %12240 = vst [vmem:[#allocation48_spill] sm:$0xff] %v11271_v25  ;;  %12242 = vst [vmem:[#allocation47_spill] sm:$0xff] %v11278_v51  ;;  %v5071_v63 = vadd.f32 %v11203_v21, %v5047_v13  ;;  %v5048_v4 = vadd.f32 %v11176_v41, %v4906_v58  ;;  %v5128_v7 = vsel %vm821_vm0, %v11278_v51, 0.0 }
 0xa61   : > { %v11286_v43 = vadd.f32 %v5073_v27, %v12244_v11  ;;  %v5119_v62 = vsel %vm821_vm0, %v11271_v25, 0.0  ;;  %v11293_v17 = vadd.f32 %v5076_v48, %v12246_v36  ;;  %v5074_v0 = vadd.f32 %v11203_v21, %v5050_v38  ;;  %v7674_v27 = vld [vmem:[%s12029_s10 + $0x8] sm:$0xf]  ;;  %v9484_v48 = vld [vmem:[%s9810_s26 + $0x20] sm:$0xff]  }
 0xa62   : > { %v5069_v35 = vadd.f32 %v11203_v21, %v5045_v18  ;;  %v5046_v41 = vadd.f32 %v11182_v31, %v4904_v28  ;;  %v11299_v56 = vadd.f32 %v5071_v63, %v12248_v3  ;;  %v5072_v8 = vadd.f32 %v11203_v21, %v5048_v4  ;;  %9186 = vmatprep.subr.msk.bf16.mxu0 %vm1269_vm1, %v7674_v27  ;;  %v9485_v18 = vld [vmem:[%s9810_s26 + $0x28] sm:$0xff]   ;;  %v9486_v28 = vld [vmem:[%s9810_s26 + $0x30] sm:$0xff]   ;;  %v9487_v63 = vld [vmem:[%s9810_s26 + $0x38] sm:$0xff]  }
 0xa63   : > { %12245 = vst [vmem:[#allocation23_spill] sm:$0xff] %v11286_v43  ;;  %12247 = vst [vmem:[#allocation28_spill] sm:$0xff] %v11293_v17  ;;  %v5122_v34 = vsel %vm821_vm0, %v11293_v17, 0.0  ;;  %v5113_v20 = vsel %vm821_vm0, %v11286_v43, 0.0  ;;  %v11307_v40 = vadd.f32 %v5074_v0, %v12250_v37  ;;  %v5424_v38 = vsel %vm1269_vm1, %v7674_v27, 0  ;;  %v9488_v4 = vld [vmem:[%s9810_s26 + $0x40] sm:$0xff]  }
 0xa64   : > { %5141 = vadd.xlane.f32.xlu1 %v5140_v47  ;;  %5132 = vadd.xlane.f32.xlu0 %v5131_v61  ;;  %12249 = vst [vmem:[#allocation27_spill] sm:$0xff] %v11299_v56  ;;  %v11310_v2 = vadd.f32 %v5069_v35, %v12252_v54  ;;  %v5070_v31 = vadd.f32 %v11203_v21, %v5046_v41  ;;  %v5107_v61 = vsel %vm821_vm0, %v11299_v56, 0.0  ;;  %v12256_v21 = vld [vmem:[#allocation42_spill] sm:$0xff]  ;;  %v9492_v36 = vld [vmem:[%s9810_s26 + $0x60] sm:$0xff]   ;;  %v9494_v35 = vld [vmem:[%s9810_s26 + $0x70] sm:$0xff]  }
 0xa65   : > { %12251 = vst [vmem:[#allocation32_spill] sm:$0xff] %v11307_v40  ;;  %v5116_v47 = vsel %vm821_vm0, %v11307_v40, 0.0  ;;  %v11318_v57 = vadd.f32 %v5072_v8, %v12254_v55  ;;  %8885 = vmatpush3.bf16.msra.mxu0 %v5424_v38  ;;  %v9489_v11 = vld [vmem:[%s9810_s26 + $0x48] sm:$0xff]   ;;  %v9495_v41 = vld [vmem:[%s9810_s26 + $0x78] sm:$0xff]  }
 0xa66   : > { %12253 = vst [vmem:[#allocation25_spill] sm:$0xff] %v11310_v2  ;;  %v5101_v42 = vsel %vm821_vm0, %v11310_v2, 0.0  ;;  %v11325_v13 = vadd.f32 %v5070_v31, %v12256_v21  ;;  %8966 = vmatprep.subr.bf16.mxu0 %v9480_v26  ;;  %v9493_v0 = vld [vmem:[%s9810_s26 + $0x68] sm:$0xff]  }
 0xa67   : > { %12255 = vst [vmem:[#allocation35_spill] sm:$0xff] %v11318_v57  ;;  %v5110_v53 = vsel %vm821_vm0, %v11318_v57, 0.0 }
 0xa68   : > { %5135 = vadd.xlane.f32.xlu1 %v5134_v50  ;;  %5126 = vadd.xlane.f32.xlu0 %v5125_v23  ;;  %12257 = vst [vmem:[#allocation29_spill] sm:$0xff] %v11325_v13  ;;  %v5104_v58 = vsel %vm821_vm0, %v11325_v13, 0.0  ;;  %v9481_v50 = vld [vmem:[%s9810_s26 + $0x8] sm:$0xff]   ;;  %v9482_v23 = vld [vmem:[%s9810_s26 + $0x10] sm:$0xff]  }
 0xa69   : > { %8887 = vmatmul.mubr.msk.bf16.vlgmr.msra.gmra.mxu0 %vm821_vm0, %v9481_v50 }
 0xa6a   : > { %8890 = vmatprep.mubr.msk.bf16.mxu0 %vm821_vm0, %v9482_v23  ;;  %8967 = vmatpush3.bf16.msra.mxu0 %v9480_v26 }
 0xa6c   : > { %5129 = vadd.xlane.f32.xlu1 %v5128_v7  ;;  %5120 = vadd.xlane.f32.xlu0 %v5119_v62  ;;  %v9490_v7 = vld [vmem:[%s9810_s26 + $0x50] sm:$0xff]   ;;  %v9491_v62 = vld [vmem:[%s9810_s26 + $0x58] sm:$0xff]  }
 0xa70   : > { %5123 = vadd.xlane.f32.xlu1 %v5122_v34  ;;  %5114 = vadd.xlane.f32.xlu0 %v5113_v20 }
 0xa71   : > { %8891 = vmatmul.mubr.msk.bf16.gmra.mxu0 %vm821_vm0, %v9483_v32 }
 0xa72   : > { %8894 = vmatprep.mubr.msk.bf16.mxu0 %vm821_vm0, %v9484_v48 }
 0xa74   : > { %5117 = vadd.xlane.f32.xlu1 %v5116_v47  ;;  %5108 = vadd.xlane.f32.xlu0 %v5107_v61 }
 0xa78   : > { %5111 = vadd.xlane.f32.xlu1 %v5110_v53  ;;  %5102 = vadd.xlane.f32.xlu0 %v5101_v42 }
 0xa79   : > { %8895 = vmatmul.mubr.msk.bf16.gmra.mxu0 %vm821_vm0, %v9485_v18 }
 0xa7a   : > { %8898 = vmatprep.mubr.msk.bf16.mxu0 %vm821_vm0, %v9486_v28 }
 0xa7c   : > { %5105 = vadd.xlane.f32.xlu1 %v5104_v58 }
 0xa81   : > { %8899 = vmatmul.mubr.msk.bf16.gmra.mxu0 %vm821_vm0, %v9487_v63 }
 0xa82   : > { %8902 = vmatprep.mubr.msk.bf16.mxu0 %vm821_vm0, %v9488_v4 }
 0xa89   : > { %8903 = vmatmul.mubr.msk.bf16.gmra.mxu0 %vm821_vm0, %v9489_v11 }
 0xa8a   : > { %8906 = vmatprep.mubr.msk.bf16.mxu0 %vm821_vm0, %v9490_v7 }
 0xa91   : > { %8907 = vmatmul.mubr.msk.bf16.gmra.mxu0 %vm821_vm0, %v9491_v62 }
 0xa92   : > { %8910 = vmatprep.mubr.msk.bf16.mxu0 %vm821_vm0, %v9492_v36 }
 0xa99   : > { %8911 = vmatmul.mubr.msk.bf16.gmra.mxu0 %vm821_vm0, %v9493_v0 }
 0xa9a   : > { %8914 = vmatprep.mubr.msk.bf16.mxu0 %vm821_vm0, %v9494_v35 }
 0xaa1   : > { %8915 = vmatmul.mubr.msk.bf16.gmra.mxu0 %vm821_vm0, %v9495_v41 }
 0xae5   : > { %v5145_v3 = vpop.xlane.xlu0 %5144 }
 0xae6   : > { %v5163_v8 = vmul.f32 0.125, %v5145_v3 }
 0xae8   : > { %v11368_v34 = vsub.f32 %v11212_v1, %v5163_v8 }
 0xae9   : > { %v5148_v20 = vpop.xlane.xlu1 %5147  ;;  %v5139_v37 = vpop.xlane.xlu0 %5138 }
 0xaea   : > { %v5164_v54 = vmul.f32 0.125, %v5148_v20  ;;  %v5161_v31 = vmul.f32 0.125, %v5139_v37  ;;  %v5195_v47 = vmul.f32 %v11368_v34, %v11368_v34 }
 0xaec   : > { %v11373_v61 = vsub.f32 %v11228_v49, %v5164_v54  ;;  %v11376_v55 = vsub.f32 %v11220_v9, %v5161_v31  ;;  %v5239_v53 = vsel %vm821_vm0, %v5195_v47, 0.0 }
 0xaed   : > { %v5142_v42 = vpop.xlane.xlu1 %5141  ;;  %v5133_v21 = vpop.xlane.xlu0 %5132  ;;  %5240 = vadd.xlane.f32.xlu0 %v5239_v53 }
 0xaee   : > { %v5162_v58 = vmul.f32 0.125, %v5142_v42  ;;  %v5159_v27 = vmul.f32 0.125, %v5133_v21  ;;  %v5196_v38 = vmul.f32 %v11373_v61, %v11373_v61  ;;  %v5193_v26 = vmul.f32 %v11376_v55, %v11376_v55 }
 0xaf0   : > { %v11384_v50 = vsub.f32 %v11240_v10, %v5162_v58  ;;  %v11387_v23 = vsub.f32 %v11233_v29, %v5159_v27  ;;  %v5242_v32 = vsel %vm821_vm0, %v5196_v38, 0.0  ;;  %v5233_v48 = vsel %vm821_vm0, %v5193_v26, 0.0 }
 0xaf1   : > { %v5136_v18 = vpop.xlane.xlu1 %5135  ;;  %v5127_v28 = vpop.xlane.xlu0 %5126  ;;  %5243 = vadd.xlane.f32.xlu1 %v5242_v32  ;;  %5234 = vadd.xlane.f32.xlu0 %v5233_v48 }
 0xaf2   : > { %v5160_v63 = vmul.f32 0.125, %v5136_v18  ;;  %v5157_v4 = vmul.f32 0.125, %v5127_v28  ;;  %v5194_v11 = vmul.f32 %v11384_v50, %v11384_v50  ;;  %v5191_v7 = vmul.f32 %v11387_v23, %v11387_v23 }
 0xaf4   : > { %v11396_v62 = vsub.f32 %v11259_v6, %v5160_v63  ;;  %v11399_v36 = vsub.f32 %v11252_v39, %v5157_v4  ;;  %v5236_v0 = vsel %vm821_vm0, %v5194_v11, 0.0  ;;  %v5227_v35 = vsel %vm821_vm0, %v5191_v7, 0.0 }
 0xaf5   : > { %v5130_v41 = vpop.xlane.xlu1 %5129  ;;  %v5121_v3 = vpop.xlane.xlu0 %5120  ;;  %5237 = vadd.xlane.f32.xlu1 %v5236_v0  ;;  %5228 = vadd.xlane.f32.xlu0 %v5227_v35 }
 0xaf6   : > { %v5158_v8 = vmul.f32 0.125, %v5130_v41  ;;  %v5155_v20 = vmul.f32 0.125, %v5121_v3  ;;  %v5192_v37 = vmul.f32 %v11396_v62, %v11396_v62  ;;  %v5189_v54 = vmul.f32 %v11399_v36, %v11399_v36 }
 0xaf8   : > { %v11408_v31 = vsub.f32 %v11278_v51, %v5158_v8  ;;  %v11411_v47 = vsub.f32 %v11271_v25, %v5155_v20  ;;  %v5230_v53 = vsel %vm821_vm0, %v5192_v37, 0.0  ;;  %v5221_v42 = vsel %vm821_vm0, %v5189_v54, 0.0 }
 0xaf9   : > { %v5124_v21 = vpop.xlane.xlu1 %5123  ;;  %v5115_v58 = vpop.xlane.xlu0 %5114  ;;  %5231 = vadd.xlane.f32.xlu1 %v5230_v53  ;;  %5222 = vadd.xlane.f32.xlu0 %v5221_v42 }
 0xafa   : > { %v5156_v27 = vmul.f32 0.125, %v5124_v21  ;;  %v5153_v38 = vmul.f32 0.125, %v5115_v58  ;;  %v5190_v26 = vmul.f32 %v11408_v31, %v11408_v31  ;;  %v5187_v32 = vmul.f32 %v11411_v47, %v11411_v47 }
 0xafc   : > { %v11420_v48 = vsub.f32 %v11293_v17, %v5156_v27  ;;  %v11423_v18 = vsub.f32 %v11286_v43, %v5153_v38  ;;  %v5224_v28 = vsel %vm821_vm0, %v5190_v26, 0.0  ;;  %v5215_v63 = vsel %vm821_vm0, %v5187_v32, 0.0 }
 0xafd   : > { %v5118_v4 = vpop.xlane.xlu1 %5117  ;;  %v5109_v11 = vpop.xlane.xlu0 %5108  ;;  %5225 = vadd.xlane.f32.xlu1 %v5224_v28  ;;  %5216 = vadd.xlane.f32.xlu0 %v5215_v63 }
 0xafe   : > { %v5154_v7 = vmul.f32 0.125, %v5118_v4  ;;  %v5151_v0 = vmul.f32 0.125, %v5109_v11  ;;  %v5188_v35 = vmul.f32 %v11420_v48, %v11420_v48  ;;  %v5185_v41 = vmul.f32 %v11423_v18, %v11423_v18 }
 0xb00   : > { %v11432_v3 = vsub.f32 %v11307_v40, %v5154_v7  ;;  %v11435_v8 = vsub.f32 %v11299_v56, %v5151_v0  ;;  %v5218_v20 = vsel %vm821_vm0, %v5188_v35, 0.0  ;;  %v5209_v37 = vsel %vm821_vm0, %v5185_v41, 0.0 }
 0xb01   : > { %v5112_v54 = vpop.xlane.xlu1 %5111  ;;  %5219 = vadd.xlane.f32.xlu1 %v5218_v20  ;;  %5210 = vadd.xlane.f32.xlu0 %v5209_v37  ;;  %v5103_v53 = vpop.xlane.xlu0 %5102 }
 0xb02   : > { %v5152_v42 = vmul.f32 0.125, %v5112_v54  ;;  %v5149_v21 = vmul.f32 0.125, %v5103_v53  ;;  %v5186_v58 = vmul.f32 %v11432_v3, %v11432_v3  ;;  %v5183_v27 = vmul.f32 %v11435_v8, %v11435_v8  ;;  %v11466_v53 = vld [vmem:[%s12030_s11 + $0x2] ss:$0 sm:$0xff] }
 0xb04   : > { %v11444_v38 = vsub.f32 %v11318_v57, %v5152_v42  ;;  %v11447_v26 = vsub.f32 %v11310_v2, %v5149_v21  ;;  %v5212_v32 = vsel %vm821_vm0, %v5186_v58, 0.0  ;;  %v5203_v28 = vsel %vm821_vm0, %v5183_v27, 0.0 }
 0xb05   : > { %5213 = vadd.xlane.f32.xlu1 %v5212_v32  ;;  %v5106_v63 = vpop.xlane.xlu1 %5105  ;;  %5204 = vadd.xlane.f32.xlu0 %v5203_v28 }
 0xb06   : > { %v5150_v4 = vmul.f32 0.125, %v5106_v63  ;;  %v5184_v11 = vmul.f32 %v11444_v38, %v11444_v38  ;;  %v5181_v7 = vmul.f32 %v11447_v26, %v11447_v26 }
 0xb08   : > { %v11456_v0 = vsub.f32 %v11325_v13, %v5150_v4  ;;  %v5206_v35 = vsel %vm821_vm0, %v5184_v11, 0.0  ;;  %v5197_v41 = vsel %vm821_vm0, %v5181_v7, 0.0 }
 0xb09   : > { %5207 = vadd.xlane.f32.xlu1 %v5206_v35  ;;  %5198 = vadd.xlane.f32.xlu0 %v5197_v41 }
 0xb0a   : > { %v5182_v20 = vmul.f32 %v11456_v0, %v11456_v0 }
 0xb0c   : > { %v5200_v37 = vsel %vm821_vm0, %v5182_v20, 0.0 }
 0xb0d   : > { %5201 = vadd.xlane.f32.xlu1 %v5200_v37 }
 0xb29   : > { %v8888_v54 = vpop.f32.mrf.mxu0 }
 0xb2a   : > { %v5469_v42 = vadd.f32 %v8888_v54, %v11466_v53 }
 0xb2b   : > { %v5460_v21 = vpop.f32.mrf.mxu0 }
 0xb2c   : > { %v5461_v58 = vadd.f32 %v11466_v53, %v5460_v21  ;;  %v5621_v27 = vmul.f32 0.01, %v5469_v42  ;;  %vm5589_vm8 = vcmp.gt.f32.partialorder %v5469_v42, 0.0 }
 0xb2d   : > { %v8889_v32 = vpop.f32.mrf.mxu0 }
 0xb2e   : > { %vm5587_vm9 = vcmp.gt.f32.partialorder %v5461_v58, 0.0  ;;  %v5619_v63 = vmul.f32 0.01, %v5461_v58  ;;  %v5472_v4 = vadd.f32 %v8889_v32, %v11466_v53  ;;  %v5653_v37 = vsel %vm5589_vm8, %v5469_v42, %v5621_v27 }
 0xb2f   : > { %v5463_v7 = vpop.f32.mrf.mxu0 }
 0xb30   : > { %vm5590_vm10 = vcmp.gt.f32.partialorder %v5472_v4, 0.0  ;;  %v5622_v35 = vmul.f32 0.01, %v5472_v4  ;;  %v5464_v41 = vadd.f32 %v11466_v53, %v5463_v7  ;;  %v5651_v54 = vsel %vm5587_vm9, %v5461_v58, %v5619_v63 }
 0xb31   : > { %v8892_v49 = vpop.f32.mrf.mxu0 }
 0xb32   : > { %v5654_v59 = vsel %vm5590_vm10, %v5472_v4, %v5622_v35  ;;  %vm5588_vm11 = vcmp.gt.f32.partialorder %v5464_v41, 0.0  ;;  %v5620_v10 = vmul.f32 0.01, %v5464_v41  ;;  %v5485_v9 = vadd.f32 %v8892_v49, %v11466_v53 }
 0xb33   : > { %v5861_v12 = vpack.c.bf16 %v5654_v59, %v5653_v37 }
 0xb34   : > { %v5652_v6 = vsel %vm5588_vm11, %v5464_v41, %v5620_v10  ;;  %v5625_v22 = vmul.f32 0.01, %v5485_v9  ;;  %vm5593_vm12 = vcmp.gt.f32.partialorder %v5485_v9, 0.0 }
 0xb35   : > { %v5860_v42 = vpack.c.bf16 %v5652_v6, %v5651_v54 }
 0xb37   : > { %8968 = vmatprep.mubr.msk.bf16.mxu0 %vm1827_vm6, %v5860_v42 }
 0xb38   : > { %8969 = vmatmul.mubr.msk.bf16.vlgmr.msra.gmra.mxu0 %vm1827_vm6, %v5861_v12 }
 0xb76   : > { %v5241_v28 = vpop.xlane.xlu0 %5240 }
 0xb77   : > { %v5259_v11 = vmul.f32 0.125, %v5241_v28  ;;  %v5476_v28 = vpop.f32.mrf.mxu0 }
 0xb78   : > { %v5477_v29 = vadd.f32 %v11466_v53, %v5476_v28 }
 0xb79   : > { %v5275_v20 = vadd.f32 1e-05, %v5259_v11  ;;  %v8893_v58 = vpop.f32.mrf.mxu0 }
 0xb7a   : > { %v5244_v1 = vpop.xlane.xlu1 %5243  ;;  %v5235_v21 = vpop.xlane.xlu0 %5234  ;;  %v5488_v4 = vadd.f32 %v8893_v58, %v11466_v53  ;;  %v5623_v59 = vmul.f32 0.01, %v5477_v29  ;;  %vm5591_vm14 = vcmp.gt.f32.partialorder %v5477_v29, 0.0 }
 0xb7b   : > { %9380 = vrsqrt.f32 %v5275_v20  ;;  %v5260_v16 = vmul.f32 0.125, %v5244_v1  ;;  %v5257_v32 = vmul.f32 0.125, %v5235_v21  ;;  %v5479_v1 = vpop.f32.mrf.mxu0  ;;  %v5657_v21 = vsel %vm5593_vm12, %v5485_v9, %v5625_v22 }
 0xb7c   : > { %vm5594_vm13 = vcmp.gt.f32.partialorder %v5488_v4, 0.0  ;;  %v5626_v10 = vmul.f32 0.01, %v5488_v4  ;;  %v5480_v41 = vadd.f32 %v11466_v53, %v5479_v1  ;;  %v5655_v58 = vsel %vm5591_vm14, %v5477_v29, %v5623_v59 }
 0xb7d   : > { %v5276_v7 = vadd.f32 1e-05, %v5260_v16  ;;  %v5273_v11 = vadd.f32 1e-05, %v5257_v32  ;;  %v8896_v20 = vpop.f32.mrf.mxu0 }
 0xb7e   : > { %v5238_v27 = vpop.xlane.xlu1 %5237  ;;  %v5229_v63 = vpop.xlane.xlu0 %5228  ;;  %v5658_v32 = vsel %vm5594_vm13, %v5488_v4, %v5626_v10  ;;  %v5501_v28 = vadd.f32 %v8896_v20, %v11466_v53  ;;  %vm5592_vm15 = vcmp.gt.f32.partialorder %v5480_v41, 0.0  ;;  %v5624_v12 = vmul.f32 0.01, %v5480_v41  ;;  %v11484_v20 = vld [vmem:[%s12027_s8 + $0x2] ss:$0 sm:$0xff] }
 0xb7f   : > { %9382 = vrsqrt.f32 %v5276_v7  ;;  %v5258_v35 = vmul.f32 0.125, %v5238_v27  ;;  %v5255_v49 = vmul.f32 0.125, %v5229_v63  ;;  %v5492_v42 = vpop.f32.mrf.mxu0 }
 0xb80   : > { %9384 = vrsqrt.f32 %v5273_v11  ;;  %v5656_v22 = vsel %vm5592_vm15, %v5480_v41, %v5624_v12  ;;  %vm5597_vm2 = vcmp.gt.f32.partialorder %v5501_v28, 0.0  ;;  %v5629_v9 = vmul.f32 0.01, %v5501_v28 }
 0xb81   : > { %v5274_v16 = vadd.f32 1e-05, %v5258_v35  ;;  %v5271_v6 = vadd.f32 1e-05, %v5255_v49  ;;  %v5863_v35 = vpack.c.bf16 %v5658_v32, %v5657_v21  ;;  %v5493_v49 = vadd.f32 %v11466_v53, %v5492_v42  ;;  %v8897_v1 = vpop.f32.mrf.mxu0 }
 0xb82   : > { %v5232_v37 = vpop.xlane.xlu1 %5231  ;;  %v5223_v54 = vpop.xlane.xlu0 %5222  ;;  %v5504_v4 = vadd.f32 %v8897_v1, %v11466_v53 }
 0xb83   : > { %9386 = vrsqrt.f32 %v5274_v16  ;;  %v5256_v7 = vmul.f32 0.125, %v5232_v37  ;;  %v5253_v11 = vmul.f32 0.125, %v5223_v54  ;;  %v5495_v29 = vpop.f32.mrf.mxu0  ;;  %vm5595_vm3 = vcmp.gt.f32.partialorder %v5493_v49, 0.0 }
 0xb84   : > { %9388 = vrsqrt.f32 %v5271_v6  ;;  %v5862_v6 = vpack.c.bf16 %v5656_v22, %v5655_v58  ;;  %v5627_v37 = vmul.f32 0.01, %v5493_v49  ;;  %vm5598_vm4 = vcmp.gt.f32.partialorder %v5504_v4, 0.0 }
 0xb85   : > { %v5272_v27 = vadd.f32 1e-05, %v5256_v7  ;;  %v5269_v63 = vadd.f32 1e-05, %v5253_v11  ;;  %v11491_v7 = vld [vmem:[%s12028_s9 + $0x2] ss:$0 sm:$0xff]  ;;  %v11494_v11 = vsel %vm5597_vm2, %v5501_v28, %v5629_v9  ;;  %v5496_v12 = vadd.f32 %v11466_v53, %v5495_v29 }
 0xb86   : > { %v5226_v46 = vpop.xlane.xlu1 %5225  ;;  %v5217_v51 = vpop.xlane.xlu0 %5216  ;;  %8972 = vmatprep.mubr.msk.bf16.mxu0 %vm1827_vm6, %v5862_v6  ;;  %v5659_v42 = vsel %vm5595_vm3, %v5493_v49, %v5627_v37  ;;  %v5630_v58 = vmul.f32 0.01, %v5504_v4 }
 0xb87   : > { %9390 = vrsqrt.f32 %v5272_v27  ;;  %v5254_v10 = vmul.f32 0.125, %v5226_v46  ;;  %v5251_v16 = vmul.f32 0.125, %v5217_v51  ;;  %v8900_v46 = vpop.f32.mrf.mxu0  ;;  %8973 = vmatmul.mubr.msk.bf16.gmra.mxu0 %vm1827_vm6, %v5863_v35  ;;  %vm5596_vm5 = vcmp.gt.f32.partialorder %v5496_v12, 0.0 }
 0xb88   : > { %v9381_v59 = vpop.eup %9380  ;;  %9392 = vrsqrt.f32 %v5269_v63  ;;  %v5628_v28 = vmul.f32 0.01, %v5496_v12 }
 0xb89   : > { %v5270_v54 = vadd.f32 1e-05, %v5254_v10  ;;  %v5267_v41 = vadd.f32 1e-05, %v5251_v16  ;;  %v5307_v21 = vmul.f32 %v9381_v59, %v11368_v34  ;;  %v11499_v1 = vpop.f32.mrf.mxu0  ;;  %v5662_v10 = vsel %vm5598_vm4, %v5504_v4, %v5630_v58 }
 0xb8a   : > { %v5220_v51 = vpop.xlane.xlu1 %5219  ;;  %v5211_v32 = vpop.xlane.xlu0 %5210  ;;  %v11509_v4 = vadd.f32 %v8900_v46, %v11466_v53 }
 0xb8b   : > { %9394 = vrsqrt.f32 %v5270_v54  ;;  %v5252_v34 = vmul.f32 0.125, %v5220_v51  ;;  %v5249_v27 = vmul.f32 0.125, %v5211_v32  ;;  %v5331_v63 = vmul.f32 %v11484_v20, %v5307_v21  ;;  %v11504_v29 = vpop.f32.mrf.mxu0 }
 0xb8c   : > { %v9383_v22 = vpop.eup %9382  ;;  %9396 = vrsqrt.f32 %v5267_v41  ;;  %v5865_v21 = vpack.c.bf16 %v5662_v10, %v11494_v11  ;;  %v5660_v41 = vsel %vm5596_vm5, %v5496_v12, %v5628_v28  ;;  %vm5601_vm13 = vcmp.gt.f32.partialorder %v11509_v4, 0.0 }
 0xb8d   : > { %v9385_v9 = vpop.eup %9384  ;;  %v5268_v49 = vadd.f32 1e-05, %v5252_v34  ;;  %v5265_v16 = vadd.f32 1e-05, %v5249_v27  ;;  %v5308_v6 = vmul.f32 %v9383_v22, %v11373_v61  ;;  %v5355_v35 = vadd.f32 %v11491_v7, %v5331_v63  ;;  %v11512_v61 = vpop.f32.mrf.mxu0 }
 0xb8e   : > { %v5214_v59 = vpop.xlane.xlu1 %5213  ;;  %v5205_v37 = vpop.xlane.xlu0 %5204  ;;  %v5305_v54 = vmul.f32 %v9385_v9, %v11376_v55 }
 0xb8f   : > { %9398 = vrsqrt.f32 %v5268_v49  ;;  %v5250_v51 = vmul.f32 0.125, %v5214_v59  ;;  %v5247_v32 = vmul.f32 0.125, %v5205_v37  ;;  %v5332_v58 = vmul.f32 %v11484_v20, %v5308_v6  ;;  %v11517_v10 = vpop.f32.mrf.mxu0 }
 0xb90   : > { %v9387_v34 = vpop.eup %9386  ;;  %9400 = vrsqrt.f32 %v5265_v16  ;;  %vm5371_vm7 = vcmp.gt.f32.partialorder %v5355_v35, 0.0  ;;  %v5387_v27 = vmul.f32 0.01, %v5355_v35  ;;  %v5329_v63 = vmul.f32 %v11484_v20, %v5305_v54 }
 0xb91   : > { %v9389_v55 = vpop.eup %9388  ;;  %v5266_v22 = vadd.f32 1e-05, %v5250_v51  ;;  %v5263_v11 = vadd.f32 1e-05, %v5247_v32  ;;  %v5356_v12 = vadd.f32 %v11491_v7, %v5332_v58  ;;  %v5306_v46 = vmul.f32 %v9387_v34, %v11384_v50  ;;  %v11521_v51 = vpop.f32.mrf.mxu0 }
 0xb92   : > { %v5208_v28 = vpop.xlane.xlu1 %5207  ;;  %v5199_v9 = vpop.xlane.xlu0 %5198  ;;  %v5403_v49 = vsel %vm5371_vm7, %v5355_v35, %v5387_v27  ;;  %v5353_v6 = vadd.f32 %v11491_v7, %v5329_v63  ;;  %v5303_v16 = vmul.f32 %v9389_v55, %v11387_v23  ;;  %v5864_v59 = vpack.c.bf16 %v5660_v41, %v5659_v42 }
 0xb93   : > { %9402 = vrsqrt.f32 %v5266_v22  ;;  %v5248_v37 = vmul.f32 0.125, %v5208_v28  ;;  %v5245_v54 = vmul.f32 0.125, %v5199_v9  ;;  %vm5372_vm8 = vcmp.gt.f32.partialorder %v5356_v12, 0.0  ;;  %v11527_v42 = vpop.f32.mrf.mxu0 }
 0xb94   : > { %v9391_v32 = vpop.eup %9390  ;;  %9404 = vrsqrt.f32 %v5263_v11  ;;  %v5388_v58 = vmul.f32 0.01, %v5356_v12  ;;  %v5330_v50 = vmul.f32 %v11484_v20, %v5306_v46  ;;  %vm5369_vm9 = vcmp.gt.f32.partialorder %v5353_v6, 0.0  ;;  %8976 = vmatprep.mubr.msk.bf16.mxu0 %vm1827_vm6, %v5864_v59 }
 0xb95   : > { %v9393_v35 = vpop.eup %9392  ;;  %v5264_v34 = vadd.f32 1e-05, %v5248_v37  ;;  %v5261_v27 = vadd.f32 1e-05, %v5245_v54  ;;  %v5385_v63 = vmul.f32 0.01, %v5353_v6  ;;  %v5304_v23 = vmul.f32 %v9391_v32, %v11396_v62  ;;  %8977 = vmatmul.mubr.msk.bf16.gmra.mxu0 %vm1827_vm6, %v5865_v21  ;;  %v11536_v62 = vpop.f32.mrf.mxu0 }
 0xb96   : > { %v5202_v41 = vpop.xlane.xlu1 %5201  ;;  %v5404_v55 = vsel %vm5372_vm8, %v5356_v12, %v5388_v58  ;;  %v5354_v22 = vadd.f32 %v11491_v7, %v5330_v50  ;;  %v5327_v11 = vmul.f32 %v11484_v20, %v5303_v16  ;;  %v5301_v46 = vmul.f32 %v9393_v35, %v11399_v36 }
 0xb97   : > { %9406 = vrsqrt.f32 %v5264_v34  ;;  %v5246_v28 = vmul.f32 0.125, %v5202_v41  ;;  %v11533_v9 = vpack.c.bf16 %v5404_v55, %v5403_v49  ;;  %v5401_v59 = vsel %vm5369_vm9, %v5353_v6, %v5385_v63  ;;  %v11543_v58 = vpop.f32.mrf.mxu0 }
 0xb98   : > { %v9395_v21 = vpop.eup %9394  ;;  %9408 = vrsqrt.f32 %v5261_v27  ;;  %vm5370_vm10 = vcmp.gt.f32.partialorder %v5354_v22, 0.0  ;;  %v5386_v37 = vmul.f32 0.01, %v5354_v22  ;;  %v5328_v12 = vmul.f32 %v11484_v20, %v5304_v23 }
 0xb99   : > { %v9397_v54 = vpop.eup %9396  ;;  %v5262_v32 = vadd.f32 1e-05, %v5246_v28  ;;  %8918 = vmatprep.subr.bf16.mxu1 %v11533_v9  ;;  %v5351_v36 = vadd.f32 %v11491_v7, %v5327_v11  ;;  %v5302_v16 = vmul.f32 %v9395_v21, %v11408_v31  ;;  %v5325_v49 = vmul.f32 %v11484_v20, %v5301_v46  ;;  %v11551_v23 = vpop.f32.mrf.mxu0 }
 0xb9a   : > { %8919 = vmatpush3.bf16.msra.mxu1 %v11533_v9  ;;  %v5402_v6 = vsel %vm5370_vm10, %v5354_v22, %v5386_v37  ;;  %v5352_v50 = vadd.f32 %v11491_v7, %v5328_v12  ;;  %v5299_v35 = vmul.f32 %v9397_v54, %v11411_v47  ;;  %v5633_v34 = vmul.f32 0.01, %v11509_v4 }
 0xb9b   : > { %9410 = vrsqrt.f32 %v5262_v32  ;;  %v11549_v27 = vpack.c.bf16 %v5402_v6, %v5401_v59  ;;  %vm5367_vm11 = vcmp.gt.f32.partialorder %v5351_v36, 0.0  ;;  %v5383_v63 = vmul.f32 0.01, %v5351_v36  ;;  %v11559_v59 = vpop.f32.mrf.mxu0 }
 0xb9c   : > { %v9399_v31 = vpop.eup %9398  ;;  %vm5368_vm12 = vcmp.gt.f32.partialorder %v5352_v50, 0.0  ;;  %v5384_v41 = vmul.f32 0.01, %v5352_v50  ;;  %v5326_v55 = vmul.f32 %v11484_v20, %v5302_v16  ;;  %v5349_v22 = vadd.f32 %v11491_v7, %v5325_v49 }
 0xb9d   : > { %v9401_v11 = vpop.eup %9400  ;;  %8920 = vmatprep.subr.bf16.mxu1 %v11549_v27  ;;  %v5399_v47 = vsel %vm5367_vm11, %v5351_v36, %v5383_v63  ;;  %v5300_v46 = vmul.f32 %v9399_v31, %v11420_v48  ;;  %v5323_v28 = vmul.f32 %v11484_v20, %v5299_v35  ;;  %v11568_v16 = vpop.f32.mrf.mxu0  ;;  %v11571_v35 = vsel %vm5601_vm13, %v11509_v4, %v5633_v34 }
 0xb9e   : > { %8921 = vmatpush3.bf16.msra.mxu1 %v11549_v27  ;;  %v5400_v21 = vsel %vm5368_vm12, %v5352_v50, %v5384_v41  ;;  %v5350_v37 = vadd.f32 %v11491_v7, %v5326_v55  ;;  %vm5365_vm14 = vcmp.gt.f32.partialorder %v5349_v22, 0.0  ;;  %v5381_v12 = vmul.f32 0.01, %v5349_v22 }
 0xb9f   : > { %v11563_v54 = vpack.c.bf16 %v5400_v21, %v5399_v47  ;;  %v5324_v32 = vmul.f32 %v11484_v20, %v5300_v46  ;;  %v5347_v36 = vadd.f32 %v11491_v7, %v5323_v28  ;;  %v5297_v48 = vmul.f32 %v9401_v11, %v11423_v18  ;;  %v11578_v11 = vpop.f32.mrf.mxu0 }
 0xba0   : > { %v9403_v49 = vpop.eup %9402  ;;  %vm5366_vm15 = vcmp.gt.f32.partialorder %v5350_v37, 0.0  ;;  %v5382_v6 = vmul.f32 0.01, %v5350_v37  ;;  %v5509_v50 = vadd.f32 %v11466_v53, %v11499_v1  ;;  %v5397_v31 = vsel %vm5365_vm14, %v5349_v22, %v5381_v12 }
 0xba1   : > { %v9405_v63 = vpop.eup %9404  ;;  %8922 = vmatprep.subr.bf16.mxu1 %v11563_v54  ;;  %v5348_v41 = vadd.f32 %v11491_v7, %v5324_v32  ;;  %v5379_v55 = vmul.f32 0.01, %v5347_v36  ;;  %v5298_v18 = vmul.f32 %v9403_v49, %v11432_v3  ;;  %vm5363_vm2 = vcmp.gt.f32.partialorder %v5347_v36, 0.0  ;;  %v11585_v22 = vpop.f32.mrf.mxu0 }
 0xba2   : > { %8923 = vmatpush3.bf16.msra.mxu1 %v11563_v54  ;;  %v5398_v47 = vsel %vm5366_vm15, %v5350_v37, %v5382_v6  ;;  %v5321_v4 = vmul.f32 %v11484_v20, %v5297_v48  ;;  %v5295_v34 = vmul.f32 %v9405_v63, %v11435_v8  ;;  %vm5599_vm4 = vcmp.gt.f32.partialorder %v5509_v50, 0.0 }
 0xba3   : > { %v11583_v1 = vpack.c.bf16 %v5398_v47, %v5397_v31  ;;  %vm5364_vm3 = vcmp.gt.f32.partialorder %v5348_v41, 0.0  ;;  %v5380_v46 = vmul.f32 0.01, %v5348_v41  ;;  %v5322_v3 = vmul.f32 %v11484_v20, %v5298_v18 }
 0xba4   : > { %v9407_v28 = vpop.eup %9406  ;;  %v5345_v21 = vadd.f32 %v11491_v7, %v5321_v4  ;;  %v5319_v12 = vmul.f32 %v11484_v20, %v5295_v34  ;;  %v5631_v37 = vmul.f32 0.01, %v5509_v50  ;;  %v5395_v48 = vsel %vm5363_vm2, %v5347_v36, %v5379_v55 }
 0xba5   : > { %v9409_v32 = vpop.eup %9408  ;;  %8924 = vmatprep.subr.bf16.mxu1 %v11583_v1  ;;  %v5396_v8 = vsel %vm5364_vm3, %v5348_v41, %v5380_v46  ;;  %v5296_v49 = vmul.f32 %v9407_v28, %v11444_v38  ;;  %v5520_v6 = vadd.f32 %v11504_v29, %v11466_v53  ;;  %v5346_v31 = vadd.f32 %v11491_v7, %v5322_v3  ;;  %v11603_v41 = vpop.f32.mrf.mxu0 }
 0xba6   : > { %8925 = vmatpush3.bf16.msra.mxu1 %v11583_v1  ;;  %v11595_v63 = vpack.c.bf16 %v5396_v8, %v5395_v48  ;;  %vm5361_vm5 = vcmp.gt.f32.partialorder %v5345_v21, 0.0  ;;  %v5377_v18 = vmul.f32 0.01, %v5345_v21  ;;  %v5343_v4 = vadd.f32 %v11491_v7, %v5319_v12 }
 0xba7   : > { %v5320_v47 = vmul.f32 %v11484_v20, %v5296_v49  ;;  %v5293_v36 = vmul.f32 %v9409_v32, %v11447_v26  ;;  %v5512_v38 = vadd.f32 %v11466_v53, %v11512_v61  ;;  %vm5362_vm7 = vcmp.gt.f32.partialorder %v5346_v31, 0.0 }
 0xba8   : > { %v9411_v29 = vpop.eup %9410  ;;  %8926 = vmatprep.subr.bf16.mxu1 %v11595_v63  ;;  %v5378_v55 = vmul.f32 0.01, %v5346_v31  ;;  %v5393_v34 = vsel %vm5361_vm5, %v5345_v21, %v5377_v18  ;;  %v5663_v46 = vsel %vm5599_vm4, %v5509_v50, %v5631_v37  ;;  %v5375_v3 = vmul.f32 0.01, %v5343_v4  ;;  %v11613_v21 = vpop.f32.mrf.mxu0 }
 0xba9   : > { %v5344_v28 = vadd.f32 %v11491_v7, %v5320_v47  ;;  %v5294_v12 = vmul.f32 %v9411_v29, %v11456_v0  ;;  %vm5602_vm8 = vcmp.gt.f32.partialorder %v5520_v6, 0.0  ;;  %vm5359_vm9 = vcmp.gt.f32.partialorder %v5343_v4, 0.0 }
 0xbaa   : > { %8927 = vmatpush3.bf16.msra.mxu1 %v11595_v63  ;;  %v5394_v26 = vsel %vm5362_vm7, %v5346_v31, %v5378_v55  ;;  %v5317_v61 = vmul.f32 %v11484_v20, %v5293_v36  ;;  %v5634_v32 = vmul.f32 0.01, %v5520_v6  ;;  %vm5600_vm11 = vcmp.gt.f32.partialorder %v5512_v38, 0.0 }
 0xbab   : > { %v11611_v48 = vpack.c.bf16 %v5394_v26, %v5393_v34  ;;  %vm5360_vm10 = vcmp.gt.f32.partialorder %v5344_v28, 0.0  ;;  %v5376_v8 = vmul.f32 0.01, %v5344_v28  ;;  %v5318_v50 = vmul.f32 %v11484_v20, %v5294_v12 }
 0xbac   : > { %v5341_v37 = vadd.f32 %v11491_v7, %v5317_v61  ;;  %v5666_v0 = vsel %vm5602_vm8, %v5520_v6, %v5634_v32  ;;  %v5632_v49 = vmul.f32 0.01, %v5512_v38  ;;  %v5391_v31 = vsel %vm5359_vm9, %v5343_v4, %v5375_v3 }
 0xbad   : > { %8928 = vmatprep.subr.bf16.mxu1 %v11611_v48  ;;  %v5392_v18 = vsel %vm5360_vm10, %v5344_v28, %v5376_v8  ;;  %v5533_v47 = vadd.f32 %v11517_v10, %v11466_v53  ;;  %v5525_v36 = vadd.f32 %v11466_v53, %v11521_v51  ;;  %v5342_v20 = vadd.f32 %v11491_v7, %v5318_v50  ;;  %v11628_v28 = vpop.f32.mrf.mxu0 }
 0xbae   : > { %8929 = vmatpush3.bf16.msra.mxu1 %v11611_v48  ;;  %v11623_v29 = vpack.c.bf16 %v5392_v18, %v5391_v31  ;;  %vm5357_vm12 = vcmp.gt.f32.partialorder %v5341_v37, 0.0  ;;  %v5373_v55 = vmul.f32 0.01, %v5341_v37  ;;  %v5867_v6 = vpack.c.bf16 %v5666_v0, %v11571_v35 }
 0xbaf   : > { %v5664_v34 = vsel %vm5600_vm11, %v5512_v38, %v5632_v49  ;;  %vm5605_vm13 = vcmp.gt.f32.partialorder %v5533_v47, 0.0  ;;  %v5637_v4 = vmul.f32 0.01, %v5533_v47  ;;  %vm5358_vm14 = vcmp.gt.f32.partialorder %v5342_v20, 0.0 }
 0xbb0   : > { %8930 = vmatprep.subr.bf16.mxu1 %v11623_v29  ;;  %v5374_v10 = vmul.f32 0.01, %v5342_v20  ;;  %v5866_v51 = vpack.c.bf16 %v5664_v34, %v5663_v46  ;;  %vm5603_vm15 = vcmp.gt.f32.partialorder %v5525_v36, 0.0  ;;  %v5389_v3 = vsel %vm5357_vm12, %v5341_v37, %v5373_v55 }
 0xbb1   : > { %v5635_v12 = vmul.f32 0.01, %v5525_v36  ;;  %v5536_v7 = vadd.f32 %v11527_v42, %v11466_v53  ;;  %v5528_v35 = vadd.f32 %v11466_v53, %v11536_v62  ;;  %v5549_v26 = vadd.f32 %v11543_v58, %v11466_v53  ;;  %v5572_v42 = vpop.f32.mrf.mxu0 }
 0xbb2   : > { %8931 = vmatpush3.bf16.msra.mxu1 %v11623_v29  ;;  %v5390_v38 = vsel %vm5358_vm14, %v5342_v20, %v5374_v10  ;;  %8980 = vmatprep.mubr.msk.bf16.mxu0 %vm1827_vm6, %v5866_v51  ;;  %v5541_v46 = vadd.f32 %v11466_v53, %v11551_v23  ;;  %v5669_v62 = vsel %vm5605_vm13, %v5533_v47, %v5637_v4  ;;  %v9496_v20 = vld [vmem:[%s12026_s7] sm:$0xf]  ;;  %v9497_v4 = vld [vmem:[%s9844_s28 + $0x8] sm:$0xff]   ;;  %v9498_v10 = vld [vmem:[%s9844_s28 + $0x10] sm:$0xff]  }
 0xbb3   : > { %v11641_v61 = vpack.c.bf16 %v5390_v38, %v5389_v3  ;;  %vm5606_vm2 = vcmp.gt.f32.partialorder %v5536_v7, 0.0  ;;  %v5638_v32 = vmul.f32 0.01, %v5536_v7  ;;  %8981 = vmatmul.mubr.msk.bf16.gmra.mxu0 %vm1827_vm6, %v5867_v6  ;;  %v5667_v8 = vsel %vm5603_vm15, %v5525_v36, %v5635_v12  ;;  %v12258_v12 = vld [vmem:[#allocation11_spill] sm:$0xff] }
 0xbb4   : > { %vm5604_vm3 = vcmp.gt.f32.partialorder %v5528_v35, 0.0  ;;  %v5636_v50 = vmul.f32 0.01, %v5528_v35  ;;  %vm5607_vm4 = vcmp.gt.f32.partialorder %v5541_v46, 0.0  ;;  %v5639_v58 = vmul.f32 0.01, %v5541_v46 }
 0xbb5   : > { %8932 = vmatprep.subr.bf16.mxu1 %v11641_v61  ;;  %v5670_v37 = vsel %vm5606_vm2, %v5536_v7, %v5638_v32  ;;  %v5552_v23 = vadd.f32 %v11559_v59, %v11466_v53  ;;  %v5641_v49 = vmul.f32 0.01, %v5549_v26  ;;  %v5544_v31 = vadd.f32 %v11466_v53, %v11568_v16  ;;  %v8917_v59 = vpop.f32.mrf.mxu0 }
 0xbb6   : > { %8933 = vmatpush3.bf16.msra.mxu1 %v11641_v61  ;;  %v5668_v0 = vsel %vm5604_vm3, %v5528_v35, %v5636_v50  ;;  %v5869_v18 = vpack.c.bf16 %v5670_v37, %v5669_v62  ;;  %vm5609_vm5 = vcmp.gt.f32.partialorder %v5549_v26, 0.0  ;;  %v5671_v36 = vsel %vm5607_vm4, %v5541_v46, %v5639_v58 }
 0xbb7   : > { %v5868_v47 = vpack.c.bf16 %v5668_v0, %v5667_v8  ;;  %9187 = vmatprep.subr.msk.bf16.mxu1 %vm1269_vm1, %v9496_v20  ;;  %v5642_v55 = vmul.f32 0.01, %v5552_v23  ;;  %vm5608_vm7 = vcmp.gt.f32.partialorder %v5544_v31, 0.0  ;;  %v5640_v6 = vmul.f32 0.01, %v5544_v31  ;;  %v5575_v38 = vpop.f32.mrf.mxu0 }
 0xbb8   : > { %v5557_v34 = vadd.f32 %v11466_v53, %v11585_v22  ;;  %vm5610_vm8 = vcmp.gt.f32.partialorder %v5552_v23, 0.0  ;;  %v5560_v16 = vadd.f32 %v11466_v53, %v11613_v21  ;;  %v5673_v51 = vsel %vm5609_vm5, %v5549_v26, %v5641_v49  ;;  %v9499_v49 = vld [vmem:[%s9844_s28 + $0x18] sm:$0xff]  }
 0xbb9   : > { %8935 = vmatmul.mubr.bf16.vlgmr.msra.gmra.mxu1 %v9497_v4  ;;  %8984 = vmatprep.mubr.msk.bf16.mxu0 %vm1827_vm6, %v5868_v47  ;;  %v5672_v3 = vsel %vm5608_vm7, %v5544_v31, %v5640_v6  ;;  %v5565_v22 = vadd.f32 %v11578_v11, %v11466_v53  ;;  %v5674_v46 = vsel %vm5610_vm8, %v5552_v23, %v5642_v55  ;;  %v9500_v31 = vld [vmem:[%s9844_s28 + $0x20] sm:$0xff]  }
 0xbba   : > { %8938 = vmatprep.mubr.bf16.mxu1 %v9498_v10  ;;  %9001 = vmatpush3.bf16.msra.mxu1 %v12258_v12  ;;  %v5870_v7 = vpack.c.bf16 %v5672_v3, %v5671_v36  ;;  %vm5611_vm9 = vcmp.gt.f32.partialorder %v5557_v34, 0.0  ;;  %v5643_v35 = vmul.f32 0.01, %v5557_v34  ;;  %v5568_v21 = vadd.f32 %v11603_v41, %v11466_v53  ;;  %v9501_v10 = vld [vmem:[%s9844_s28 + $0x28] sm:$0xff]   ;;  %v9503_v3 = vld [vmem:[%s9844_s28 + $0x38] sm:$0xff]   ;;  %v9504_v12 = vld [vmem:[%s9844_s28 + $0x40] sm:$0xff]  }
 0xbbb   : > { %8985 = vmatmul.mubr.msk.bf16.gmra.mxu0 %vm1827_vm6, %v5869_v18  ;;  %vm5612_vm10 = vcmp.gt.f32.partialorder %v5560_v16, 0.0  ;;  %v5644_v32 = vmul.f32 0.01, %v5560_v16  ;;  %v5573_v62 = vadd.f32 %v11466_v53, %v5572_v42  ;;  %v5576_v50 = vadd.f32 %v11466_v53, %v5575_v38  ;;  %v9508_v38 = vld [vmem:[%s9844_s28 + $0x60] sm:$0xff]  }
 0xbbc   : > { %v5675_v26 = vsel %vm5611_vm9, %v5557_v34, %v5643_v35  ;;  %8988 = vmatprep.mubr.msk.bf16.mxu0 %vm1827_vm6, %v5870_v7  ;;  %v5871_v11 = vpack.c.bf16 %v5674_v46, %v5673_v51  ;;  %v5645_v37 = vmul.f32 0.01, %v5565_v22  ;;  %v5646_v58 = vmul.f32 0.01, %v5568_v21  ;;  %v9502_v51 = vld [vmem:[%s9844_s28 + $0x30] sm:$0xff]   ;;  %v9505_v7 = vld [vmem:[%s9844_s28 + $0x48] sm:$0xff]  }
 0xbbd   : > { %v5676_v8 = vsel %vm5612_vm10, %v5560_v16, %v5644_v32  ;;  %vm5613_vm11 = vcmp.gt.f32.partialorder %v5565_v22, 0.0  ;;  %vm5614_vm12 = vcmp.gt.f32.partialorder %v5568_v21, 0.0  ;;  %v5647_v41 = vmul.f32 0.01, %v5573_v62  ;;  %v9507_v35 = vld [vmem:[%s9844_s28 + $0x58] sm:$0xff]   ;;  %v9509_v46 = vld [vmem:[%s9844_s28 + $0x68] sm:$0xff]  }
 0xbbe   : > { %v5872_v0 = vpack.c.bf16 %v5676_v8, %v5675_v26  ;;  %v5648_v23 = vmul.f32 0.01, %v5576_v50  ;;  %vm5615_vm13 = vcmp.gt.f32.partialorder %v5573_v62, 0.0  ;;  %vm5616_vm14 = vcmp.gt.f32.partialorder %v5576_v50, 0.0  ;;  %v9511_v32 = vld [vmem:[%s9844_s28 + $0x78] sm:$0xff]  }
 0xbbf   : > { %v5677_v42 = vsel %vm5613_vm11, %v5565_v22, %v5645_v37  ;;  %v5678_v18 = vsel %vm5614_vm12, %v5568_v21, %v5646_v58  ;;  %v5581_v47 = vadd.f32 %v11628_v28, %v11466_v53  ;;  %v5584_v36 = vadd.f32 %v8917_v59, %v11466_v53  ;;  %v9506_v22 = vld [vmem:[%s9844_s28 + $0x50] sm:$0xff]   ;;  %v7741_v26 = vld [vmem:[%s12032_s13 + $0x8] sm:$0xf]  ;;  %v9308_v8 = vld [vmem:[%s12031_s12 + $0xb8] sm:$0xff]  }
 0xbc0   : > { %v5679_v20 = vsel %vm5615_vm13, %v5573_v62, %v5647_v41  ;;  %v5680_v55 = vsel %vm5616_vm14, %v5576_v50, %v5648_v23  ;;  %v5873_v6 = vpack.c.bf16 %v5678_v18, %v5677_v42  ;;  %v9510_v21 = vld [vmem:[%s9844_s28 + $0x70] sm:$0xff]   ;;  %9188 = vmatprep.subr.msk.bf16.mxu0 %vm1269_vm1, %v7741_v26  ;;  %v6362_v62 = vsel %vm1269_vm1, %v7741_v26, 0  ;;  %9068 = vmatprep.subr.bf16.mxu1 %v9308_v8  ;;  %v9310_v18 = vld [vmem:[%s12031_s12 + $0xa8] sm:$0xff]  }
 0xbc1   : > { %8939 = vmatmul.mubr.bf16.gmra.mxu1 %v9499_v49  ;;  %v5649_v34 = vmul.f32 0.01, %v5581_v47  ;;  %v5650_v4 = vmul.f32 0.01, %v5584_v36  ;;  %v5874_v16 = vpack.c.bf16 %v5680_v55, %v5679_v20  ;;  %vm5617_vm15 = vcmp.gt.f32.partialorder %v5581_v47, 0.0  ;;  %9035 = vmatpush3.bf16.msra.mxu0 %v6362_v62  ;;  %v9309_v23 = vld [vmem:[%s12031_s12 + $0xb0] sm:$0xff]  }
 0xbc2   : > { %8942 = vmatprep.mubr.bf16.mxu1 %v9500_v31  ;;  %vm5618_vm2 = vcmp.gt.f32.partialorder %v5584_v36, 0.0 }
 0xbc3   : > { %8989 = vmatmul.mubr.msk.bf16.gmra.mxu0 %vm1827_vm6, %v5871_v11  ;;  %v5681_v53 = vsel %vm5617_vm15, %v5581_v47, %v5649_v34  ;;  %v5682_v28 = vsel %vm5618_vm2, %v5584_v36, %v5650_v4 }
 0xbc4   : > { %8992 = vmatprep.mubr.msk.bf16.mxu0 %vm1827_vm6, %v5872_v0  ;;  %v5875_v59 = vpack.c.bf16 %v5682_v28, %v5681_v53 }
 0xbc9   : > { %8943 = vmatmul.mubr.bf16.gmra.mxu1 %v9501_v10 }
 0xbca   : > { %8946 = vmatprep.mubr.bf16.mxu1 %v9502_v51 }
 0xbcb   : > { %8993 = vmatmul.mubr.msk.bf16.gmra.mxu0 %vm1827_vm6, %v5873_v6  ;;  %v9311_v6 = vld [vmem:[%s12031_s12 + $0xa0] sm:$0xff]  }
 0xbcc   : > { %8996 = vmatprep.mubr.msk.bf16.mxu0 %vm1827_vm6, %v5874_v16  ;;  %v9312_v16 = vld [vmem:[%s12031_s12 + $0x98] sm:$0xff]  }
 0xbd1   : > { %8947 = vmatmul.mubr.bf16.gmra.mxu1 %v9503_v3 }
 0xbd2   : > { %8950 = vmatprep.mubr.bf16.mxu1 %v9504_v12 }
 0xbd3   : > { %8997 = vmatmul.mubr.msk.bf16.gmra.mxu0 %vm1827_vm6, %v5875_v59  ;;  %vm9592_vm6 = vmmov 0  }
 0xbd9   : > { %8951 = vmatmul.mubr.bf16.gmra.mxu1 %v9505_v7 }
 0xbda   : > { %8954 = vmatprep.mubr.bf16.mxu1 %v9506_v22 }
 0xbe1   : > { %8955 = vmatmul.mubr.bf16.gmra.mxu1 %v9507_v35 }
 0xbe2   : > { %8958 = vmatprep.mubr.bf16.mxu1 %v9508_v38 }
 0xbe9   : > { %8959 = vmatmul.mubr.bf16.gmra.mxu1 %v9509_v46 }
 0xbea   : > { %8962 = vmatprep.mubr.bf16.mxu1 %v9510_v21 }
 0xbf1   : > { %8963 = vmatmul.mubr.bf16.gmra.mxu1 %v9511_v32 }
 0xc79   : > { %v8936_v50 = vpop.f32.mrf.mxu1 }
 0xc7b   : > { %v5717_v11 = vpop.f32.mrf.mxu1 }
 0xc7d   : > { %v8937_v37 = vpop.f32.mrf.mxu1 }
 0xc7e   : > { %v5845_v49 = vpack.c.bf16 %v8937_v37, %v8936_v50 }
 0xc7f   : > { %v5720_v58 = vpop.f32.mrf.mxu1 }
 0xc80   : > { %v5844_v0 = vpack.c.bf16 %v5720_v58, %v5717_v11 }
 0xc81   : > { %v8940_v41 = vpop.f32.mrf.mxu1 }
 0xc82   : > { %9002 = vmatprep.mubr.msk.bf16.mxu1 %vm821_vm0, %v5844_v0  ;;  %9036 = vmatprep.mubr.msk.bf16.mxu0 %vm821_vm0, %v5844_v0 }
 0xc83   : > { %v5733_v31 = vpop.f32.mrf.mxu1  ;;  %9003 = vmatmul.mubr.msk.bf16.vlgmr.msra.gmra.mxu1 %vm821_vm0, %v5845_v49  ;;  %9037 = vmatmul.mubr.msk.bf16.vlgmr.msra.gmra.mxu0 %vm821_vm0, %v5845_v49 }
 0xc84   : > { %9069 = vmatpush3.bf16.msra.mxu1 %v9308_v8 }
 0xc85   : > { %v8941_v42 = vpop.f32.mrf.mxu1  ;;  %9070 = vmatprep.subr.bf16.mxu1 %v9309_v23 }
 0xc86   : > { %v5847_v20 = vpack.c.bf16 %v8941_v42, %v8940_v41 }
 0xc87   : > { %v5736_v47 = vpop.f32.mrf.mxu1 }
 0xc88   : > { %v5846_v36 = vpack.c.bf16 %v5736_v47, %v5733_v31  ;;  %9071 = vmatpush3.bf16.msra.mxu1 %v9309_v23 }
 0xc89   : > { %v8944_v55 = vpop.f32.mrf.mxu1  ;;  %9072 = vmatprep.subr.bf16.mxu1 %v9310_v18 }
 0xc8a   : > { %9006 = vmatprep.mubr.msk.bf16.mxu1 %vm821_vm0, %v5846_v36  ;;  %9040 = vmatprep.mubr.msk.bf16.mxu0 %vm821_vm0, %v5846_v36 }
 0xc8b   : > { %v5749_v34 = vpop.f32.mrf.mxu1  ;;  %9007 = vmatmul.mubr.msk.bf16.gmra.mxu1 %vm821_vm0, %v5847_v20  ;;  %9041 = vmatmul.mubr.msk.bf16.gmra.mxu0 %vm821_vm0, %v5847_v20 }
 0xc8c   : > { %9073 = vmatpush3.bf16.msra.mxu1 %v9310_v18 }
 0xc8d   : > { %v8945_v4 = vpop.f32.mrf.mxu1  ;;  %9074 = vmatprep.subr.bf16.mxu1 %v9311_v6 }
 0xc8e   : > { %v5849_v53 = vpack.c.bf16 %v8945_v4, %v8944_v55  ;;  %v9313_v4 = vld [vmem:[%s12031_s12 + $0x90] sm:$0xff]  }
 0xc8f   : > { %v5752_v10 = vpop.f32.mrf.mxu1 }
 0xc90   : > { %v5848_v51 = vpack.c.bf16 %v5752_v10, %v5749_v34  ;;  %9075 = vmatpush3.bf16.msra.mxu1 %v9311_v6  ;;  %v9512_v34 = vld [vmem:[%s10248_s30 + $0x4] ss:$8 sps:$4 sm:$0xff]  }
 0xc91   : > { %v8948_v28 = vpop.f32.mrf.mxu1  ;;  %9076 = vmatprep.subr.bf16.mxu1 %v9312_v16  ;;  %v9315_v10 = vld [vmem:[%s12031_s12 + $0x80] sm:$0xff]  }
 0xc92   : > { %9010 = vmatprep.mubr.msk.bf16.mxu1 %vm821_vm0, %v5848_v51  ;;  %9044 = vmatprep.mubr.msk.bf16.mxu0 %vm821_vm0, %v5848_v51  ;;  %v8970_v51 = vpop.f32.mrf.mxu0 }
 0xc93   : > { %v5765_v59 = vpop.f32.mrf.mxu1  ;;  %9011 = vmatmul.mubr.msk.bf16.gmra.mxu1 %vm821_vm0, %v5849_v53  ;;  %9045 = vmatmul.mubr.msk.bf16.gmra.mxu0 %vm821_vm0, %v5849_v53  ;;  %v7766_v53 = vld [vmem:[%s12033_s14 + $0x8] sm:$0xf] }
 0xc94   : > { %9077 = vmatpush3.bf16.msra.mxu1 %v9312_v16  ;;  %v9314_v16 = vld [vmem:[%s12031_s12 + $0x88] sm:$0xff]  }
 0xc95   : > { %v8949_v3 = vpop.f32.mrf.mxu1  ;;  %9078 = vmatprep.subr.bf16.mxu1 %v9313_v4 }
 0xc96   : > { %v5851_v22 = vpack.c.bf16 %v8949_v3, %v8948_v28  ;;  %v5958_v28 = vpop.f32.mrf.mxu0 }
 0xc97   : > { %v5768_v12 = vpop.f32.mrf.mxu1 }
 0xc98   : > { %v5850_v7 = vpack.c.bf16 %v5768_v12, %v5765_v59  ;;  %9079 = vmatpush3.bf16.msra.mxu1 %v9313_v4  ;;  %v8971_v59 = vpop.f32.mrf.mxu0 }
 0xc99   : > { %v8952_v35 = vpop.f32.mrf.mxu1  ;;  %9080 = vmatprep.subr.bf16.mxu1 %v9314_v16 }
 0xc9a   : > { %9014 = vmatprep.mubr.msk.bf16.mxu1 %vm821_vm0, %v5850_v7  ;;  %9048 = vmatprep.mubr.msk.bf16.mxu0 %vm821_vm0, %v5850_v7  ;;  %v5961_v3 = vpop.f32.mrf.mxu0 }
 0xc9b   : > { %v5781_v38 = vpop.f32.mrf.mxu1  ;;  %9015 = vmatmul.mubr.msk.bf16.gmra.mxu1 %vm821_vm0, %v5851_v22  ;;  %9049 = vmatmul.mubr.msk.bf16.gmra.mxu0 %vm821_vm0, %v5851_v22 }
 0xc9c   : > { %9081 = vmatpush3.bf16.msra.mxu1 %v9314_v16  ;;  %v8974_v12 = vpop.f32.mrf.mxu0 }
 0xc9d   : > { %v8953_v46 = vpop.f32.mrf.mxu1  ;;  %9082 = vmatprep.subr.bf16.mxu1 %v9315_v10 }
 0xc9e   : > { %v5853_v26 = vpack.c.bf16 %v8953_v46, %v8952_v35  ;;  %v5974_v7 = vpop.f32.mrf.mxu0 }
 0xc9f   : > { %v5784_v21 = vpop.f32.mrf.mxu1 }
 0xca0   : > { %v5852_v32 = vpack.c.bf16 %v5784_v21, %v5781_v38  ;;  %9083 = vmatpush3.bf16.msra.mxu1 %v9315_v10  ;;  %v8975_v22 = vpop.f32.mrf.mxu0 }
 0xca1   : > { %v8956_v62 = vpop.f32.mrf.mxu1  ;;  %9189 = vmatprep.subr.msk.bf16.mxu1 %vm1269_vm1, %v7766_v53 }
 0xca2   : > { %9018 = vmatprep.mubr.msk.bf16.mxu1 %vm821_vm0, %v5852_v32  ;;  %9052 = vmatprep.mubr.msk.bf16.mxu0 %vm821_vm0, %v5852_v32  ;;  %v5977_v35 = vpop.f32.mrf.mxu0 }
 0xca3   : > { %v5797_v8 = vpop.f32.mrf.mxu1  ;;  %9019 = vmatmul.mubr.msk.bf16.gmra.mxu1 %vm821_vm0, %v5853_v26  ;;  %9053 = vmatmul.mubr.msk.bf16.gmra.mxu0 %vm821_vm0, %v5853_v26 }
 0xca4   : > { %v8978_v38 = vpop.f32.mrf.mxu0 }
 0xca5   : > { %v8957_v50 = vpop.f32.mrf.mxu1 }
 0xca6   : > { %v5855_v58 = vpack.c.bf16 %v8957_v50, %v8956_v62  ;;  %v5990_v46 = vpop.f32.mrf.mxu0 }
 0xca7   : > { %v5800_v11 = vpop.f32.mrf.mxu1 }
 0xca8   : > { %v5854_v37 = vpack.c.bf16 %v5800_v11, %v5797_v8  ;;  %v8979_v21 = vpop.f32.mrf.mxu0 }
 0xca9   : > { %v8960_v0 = vpop.f32.mrf.mxu1 }
 0xcaa   : > { %9022 = vmatprep.mubr.msk.bf16.mxu1 %vm821_vm0, %v5854_v37  ;;  %9056 = vmatprep.mubr.msk.bf16.mxu0 %vm821_vm0, %v5854_v37  ;;  %v5993_v32 = vpop.f32.mrf.mxu0 }
 0xcab   : > { %v5813_v49 = vpop.f32.mrf.mxu1  ;;  %9023 = vmatmul.mubr.msk.bf16.gmra.mxu1 %vm821_vm0, %v5855_v58  ;;  %9057 = vmatmul.mubr.msk.bf16.gmra.mxu0 %vm821_vm0, %v5855_v58 }
 0xcac   : > { %v8982_v26 = vpop.f32.mrf.mxu0 }
 0xcad   : > { %v8961_v41 = vpop.f32.mrf.mxu1 }
 0xcae   : > { %v5857_v42 = vpack.c.bf16 %v8961_v41, %v8960_v0  ;;  %v6006_v62 = vpop.f32.mrf.mxu0 }
 0xcaf   : > { %v5816_v23 = vpop.f32.mrf.mxu1 }
 0xcb0   : > { %v5856_v31 = vpack.c.bf16 %v5816_v23, %v5813_v49  ;;  %v8983_v8 = vpop.f32.mrf.mxu0 }
 0xcb1   : > { %v8964_v18 = vpop.f32.mrf.mxu1 }
 0xcb2   : > { %9026 = vmatprep.mubr.msk.bf16.mxu1 %vm821_vm0, %v5856_v31  ;;  %9060 = vmatprep.mubr.msk.bf16.mxu0 %vm821_vm0, %v5856_v31  ;;  %v6009_v50 = vpop.f32.mrf.mxu0 }
 0xcb3   : > { %v5829_v47 = vpop.f32.mrf.mxu1  ;;  %9027 = vmatmul.mubr.msk.bf16.gmra.mxu1 %vm821_vm0, %v5857_v42  ;;  %9061 = vmatmul.mubr.msk.bf16.gmra.mxu0 %vm821_vm0, %v5857_v42 }
 0xcb4   : > { %v11760_v37 = vpop.f32.mrf.mxu0 }
 0xcb5   : > { %v8965_v36 = vpop.f32.mrf.mxu1 }
 0xcb6   : > { %v5859_v6 = vpack.c.bf16 %v8965_v36, %v8964_v18  ;;  %v6022_v49 = vpop.f32.mrf.mxu0 }
 0xcb7   : > { %v5832_v20 = vpop.f32.mrf.mxu1 }
 0xcb8   : > { %v5858_v55 = vpack.c.bf16 %v5832_v20, %v5829_v47  ;;  %v8987_v20 = vpop.f32.mrf.mxu0 }
 0xcba   : > { %9030 = vmatprep.mubr.msk.bf16.mxu1 %vm821_vm0, %v5858_v55  ;;  %9064 = vmatprep.mubr.msk.bf16.mxu0 %vm821_vm0, %v5858_v55  ;;  %v6025_v16 = vpop.f32.mrf.mxu0 }
 0xcbb   : > { %9031 = vmatmul.mubr.msk.bf16.gmra.mxu1 %vm821_vm0, %v5859_v6  ;;  %9065 = vmatmul.mubr.msk.bf16.gmra.mxu0 %vm821_vm0, %v5859_v6 }
 0xcbc   : > { %6782 = vmatprep.mubr.bf16.mxu0 %v9512_v34  ;;  %v6890_v34 = vsel %vm1269_vm1, %v7766_v53, 0 }
 0xd43   : > { %v9004_v11 = vpop.f32.mrf.mxu1 }
 0xd44   : > { %v6296_v18 = vmul.f32 %v9004_v11, %v8970_v51  ;;  %v8990_v51 = vpop.f32.mrf.mxu0 }
 0xd45   : > { %v6167_v58 = vpop.f32.mrf.mxu1 }
 0xd46   : > { %v6294_v31 = vmul.f32 %v6167_v58, %v5958_v28 }
 0xd47   : > { %v9005_v0 = vpop.f32.mrf.mxu1 }
 0xd48   : > { %v6297_v41 = vmul.f32 %v9005_v0, %v8971_v59 }
 0xd49   : > { %v6170_v23 = vpop.f32.mrf.mxu1 }
 0xd4a   : > { %v6295_v42 = vmul.f32 %v6170_v23, %v5961_v3  ;;  %v6327_v55 = vpack.c.bf16 %v6297_v41, %v6296_v18  ;;  %v6038_v23 = vpop.f32.mrf.mxu0 }
 0xd4b   : > { %v9008_v47 = vpop.f32.mrf.mxu1 }
 0xd4c   : > { %v6326_v36 = vpack.c.bf16 %v6295_v42, %v6294_v31  ;;  %v6300_v0 = vmul.f32 %v9008_v47, %v8974_v12 }
 0xd4d   : > { %v6183_v6 = vpop.f32.mrf.mxu1 }
 0xd4e   : > { %9084 = vmatprep.mubr.bf16.mxu1 %v6326_v36  ;;  %v6298_v15 = vmul.f32 %v6183_v6, %v5974_v7 }
 0xd4f   : > { %v9009_v4 = vpop.f32.mrf.mxu1  ;;  %9085 = vmatmul.mubr.bf16.vlgmr.msra.gmra.mxu1 %v6327_v55 }
 0xd50   : > { %9117 = vmatpush3.bf16.msra.mxu1 %v6890_v34  ;;  %v6301_v10 = vmul.f32 %v9009_v4, %v8975_v22  ;;  %v8991_v34 = vpop.f32.mrf.mxu0 }
 0xd51   : > { %v6186_v39 = vpop.f32.mrf.mxu1 }
 0xd52   : > { %v6299_v59 = vmul.f32 %v6186_v39, %v5977_v35  ;;  %v6329_v11 = vpack.c.bf16 %v6301_v10, %v6300_v0 }
 0xd53   : > { %v9012_v28 = vpop.f32.mrf.mxu1 }
 0xd54   : > { %v6328_v3 = vpack.c.bf16 %v6299_v59, %v6298_v15  ;;  %v6304_v36 = vmul.f32 %v9012_v28, %v8978_v38  ;;  %v6041_v15 = vpop.f32.mrf.mxu0 }
 0xd55   : > { %v6199_v58 = vpop.f32.mrf.mxu1 }
 0xd56   : > { %9088 = vmatprep.mubr.bf16.mxu1 %v6328_v3  ;;  %v6302_v42 = vmul.f32 %v6199_v58, %v5990_v46  ;;  %v8994_v0 = vpop.f32.mrf.mxu0 }
 0xd57   : > { %v9013_v41 = vpop.f32.mrf.mxu1  ;;  %9089 = vmatmul.mubr.bf16.gmra.mxu1 %v6329_v11 }
 0xd58   : > { %v6305_v53 = vmul.f32 %v9013_v41, %v8979_v21  ;;  %v6054_v28 = vpop.f32.mrf.mxu0 }
 0xd59   : > { %v6202_v31 = vpop.f32.mrf.mxu1 }
 0xd5a   : > { %v6303_v18 = vmul.f32 %v6202_v31, %v5993_v32  ;;  %v6331_v7 = vpack.c.bf16 %v6305_v53, %v6304_v36 }
 0xd5b   : > { %v9016_v55 = vpop.f32.mrf.mxu1 }
 0xd5c   : > { %v6330_v22 = vpack.c.bf16 %v6303_v18, %v6302_v42  ;;  %v6308_v10 = vmul.f32 %v9016_v55, %v8982_v26 }
 0xd5d   : > { %v6215_v39 = vpop.f32.mrf.mxu1 }
 0xd5e   : > { %9092 = vmatprep.mubr.bf16.mxu1 %v6330_v22  ;;  %v6306_v6 = vmul.f32 %v6215_v39, %v6006_v62  ;;  %v8995_v62 = vpop.f32.mrf.mxu0 }
 0xd5f   : > { %v9017_v12 = vpop.f32.mrf.mxu1  ;;  %9093 = vmatmul.mubr.bf16.gmra.mxu1 %v6331_v7 }
 0xd60   : > { %v6309_v35 = vmul.f32 %v9017_v12, %v8983_v8  ;;  %v6057_v18 = vpop.f32.mrf.mxu0 }
 0xd61   : > { %v6218_v47 = vpop.f32.mrf.mxu1 }
 0xd62   : > { %v6307_v4 = vmul.f32 %v6218_v47, %v6009_v50  ;;  %v6333_v46 = vpack.c.bf16 %v6309_v35, %v6308_v10 }
 0xd63   : > { %v9020_v59 = vpop.f32.mrf.mxu1 }
 0xd64   : > { %v6332_v21 = vpack.c.bf16 %v6307_v4, %v6306_v6  ;;  %v6312_v53 = vmul.f32 %v9020_v59, %v11760_v37 }
 0xd65   : > { %v6231_v32 = vpop.f32.mrf.mxu1 }
 0xd66   : > { %9096 = vmatprep.mubr.bf16.mxu1 %v6332_v21  ;;  %v6310_v58 = vmul.f32 %v6231_v32, %v6022_v49  ;;  %v8998_v49 = vpop.f32.mrf.mxu0 }
 0xd67   : > { %v9021_v38 = vpop.f32.mrf.mxu1  ;;  %9097 = vmatmul.mubr.bf16.gmra.mxu1 %v6333_v46 }
 0xd68   : > { %v6313_v3 = vmul.f32 %v9021_v38, %v8987_v20  ;;  %v6070_v47 = vpop.f32.mrf.mxu0 }
 0xd69   : > { %v6234_v11 = vpop.f32.mrf.mxu1 }
 0xd6a   : > { %v6311_v41 = vmul.f32 %v6234_v11, %v6025_v16  ;;  %v6335_v50 = vpack.c.bf16 %v6313_v3, %v6312_v53  ;;  %v8999_v32 = vpop.f32.mrf.mxu0 }
 0xd6b   : > { %v9024_v8 = vpop.f32.mrf.mxu1 }
 0xd6c   : > { %v6334_v31 = vpack.c.bf16 %v6311_v41, %v6310_v58  ;;  %v6316_v39 = vmul.f32 %v9024_v8, %v8990_v51  ;;  %v6073_v38 = vpop.f32.mrf.mxu0 }
 0xd6d   : > { %v6247_v26 = vpop.f32.mrf.mxu1 }
 0xd6e   : > { %9100 = vmatprep.mubr.bf16.mxu1 %v6334_v31  ;;  %v6314_v22 = vmul.f32 %v6247_v26, %v6038_v23 }
 0xd6f   : > { %v9025_v42 = vpop.f32.mrf.mxu1  ;;  %9101 = vmatmul.mubr.bf16.gmra.mxu1 %v6335_v50 }
 0xd70   : > { %v6317_v36 = vmul.f32 %v9025_v42, %v8991_v34 }
 0xd71   : > { %v6250_v55 = vpop.f32.mrf.mxu1 }
 0xd72   : > { %v6315_v7 = vmul.f32 %v6250_v55, %v6041_v15  ;;  %v6337_v16 = vpack.c.bf16 %v6317_v36, %v6316_v39 }
 0xd73   : > { %v9028_v20 = vpop.f32.mrf.mxu1 }
 0xd74   : > { %v6336_v12 = vpack.c.bf16 %v6315_v7, %v6314_v22  ;;  %v6320_v21 = vmul.f32 %v9028_v20, %v8994_v0 }
 0xd75   : > { %v6263_v35 = vpop.f32.mrf.mxu1 }
 0xd76   : > { %9104 = vmatprep.mubr.bf16.mxu1 %v6336_v12  ;;  %v6318_v10 = vmul.f32 %v6263_v35, %v6054_v28 }
 0xd77   : > { %v9029_v37 = vpop.f32.mrf.mxu1  ;;  %9105 = vmatmul.mubr.bf16.gmra.mxu1 %v6337_v16 }
 0xd78   : > { %v6321_v6 = vmul.f32 %v9029_v37, %v8995_v62 }
 0xd79   : > { %v6266_v4 = vpop.f32.mrf.mxu1 }
 0xd7a   : > { %v6319_v59 = vmul.f32 %v6266_v4, %v6057_v18  ;;  %v6339_v23 = vpack.c.bf16 %v6321_v6, %v6320_v21 }
 0xd7b   : > { %v9032_v46 = vpop.f32.mrf.mxu1 }
 0xd7c   : > { %v6338_v34 = vpack.c.bf16 %v6319_v59, %v6318_v10  ;;  %v6324_v53 = vmul.f32 %v9032_v46, %v8998_v49 }
 0xd7d   : > { %v6279_v15 = vpop.f32.mrf.mxu1 }
 0xd7e   : > { %9108 = vmatprep.mubr.bf16.mxu1 %v6338_v34  ;;  %v6322_v58 = vmul.f32 %v6279_v15, %v6070_v47 }
 0xd7f   : > { %v9033_v51 = vpop.f32.mrf.mxu1  ;;  %9109 = vmatmul.mubr.bf16.gmra.mxu1 %v6339_v23 }
 0xd80   : > { %v6325_v3 = vmul.f32 %v9033_v51, %v8999_v32 }
 0xd81   : > { %v6282_v11 = vpop.f32.mrf.mxu1 }
 0xd82   : > { %v6323_v41 = vmul.f32 %v6282_v11, %v6073_v38  ;;  %v6341_v31 = vpack.c.bf16 %v6325_v3, %v6324_v53 }
 0xd84   : > { %v6340_v8 = vpack.c.bf16 %v6323_v41, %v6322_v58 }
 0xd86   : > { %9112 = vmatprep.mubr.bf16.mxu1 %v6340_v8 }
 0xd87   : > { %9113 = vmatmul.mubr.bf16.gmra.mxu1 %v6341_v31 }
 0xd88   : > { %9118 = vmatprep.mubr.msk.bf16.mxu1 %vm821_vm0, %v11641_v61  ;;  %v9038_v61 = vpop.f32.mrf.mxu0 }
 0xd8f   : > { %9119 = vmatmul.mubr.msk.bf16.vlgmr.msra.gmra.mxu1 %vm821_vm0, %v11623_v29  ;;  %v6398_v29 = vpop.f32.mrf.mxu0 }
 0xd90   : > { %9122 = vmatprep.mubr.msk.bf16.mxu1 %vm821_vm0, %v11611_v48 }
 0xd91   : > { %v9039_v0 = vpop.f32.mrf.mxu0 }
 0xd93   : > { %v6401_v28 = vpop.f32.mrf.mxu0 }
 0xd95   : > { %v9042_v48 = vpop.f32.mrf.mxu0 }
 0xd97   : > { %9123 = vmatmul.mubr.msk.bf16.gmra.mxu1 %vm821_vm0, %v11595_v63  ;;  %v6414_v62 = vpop.f32.mrf.mxu0 }
 0xd98   : > { %9126 = vmatprep.mubr.msk.bf16.mxu1 %vm821_vm0, %v11583_v1 }
 0xd99   : > { %v9043_v50 = vpop.f32.mrf.mxu0 }
 0xd9b   : > { %v6417_v63 = vpop.f32.mrf.mxu0 }
 0xd9d   : > { %v11780_v26 = vpop.f32.mrf.mxu0 }
 0xd9f   : > { %9127 = vmatmul.mubr.msk.bf16.gmra.mxu1 %vm821_vm0, %v11563_v54  ;;  %v11782_v1 = vpop.f32.mrf.mxu0 }
 0xda0   : > { %9130 = vmatprep.mubr.msk.bf16.mxu1 %vm821_vm0, %v11549_v27 }
 0xda1   : > { %v11784_v42 = vpop.f32.mrf.mxu0 }
 0xda3   : > { %v11786_v54 = vpop.f32.mrf.mxu0 }
 0xda5   : > { %v11788_v27 = vpop.f32.mrf.mxu0 }
 0xda7   : > { %9131 = vmatmul.mubr.msk.bf16.gmra.mxu1 %vm821_vm0, %v11533_v9  ;;  %v11790_v18 = vpop.f32.mrf.mxu0 }
 0xda9   : > { %v9051_v9 = vpop.f32.mrf.mxu0 }
 0xdab   : > { %v11792_v36 = vpop.f32.mrf.mxu0 }
 0xdad   : > { %v11794_v22 = vpop.f32.mrf.mxu0 }
 0xdaf   : > { %v11800_v49 = vpop.f32.mrf.mxu0 }
 0xdb1   : > { %v11810_v10 = vpop.f32.mrf.mxu0 }
 0xdb3   : > { %v11816_v32 = vpop.f32.mrf.mxu0 }
 0xdb5   : > { %v11826_v58 = vpop.f32.mrf.mxu0 }
 0xdb7   : > { %v11828_v8 = vpop.f32.mrf.mxu0 }
 0xe0f   : > { %v9086_v55 = vpop.f32.mrf.mxu1 }
 0xe10   : > { %v11796_v20 = vadd.f32 %v9086_v55, %v9038_v61 }
 0xe11   : > { %v6607_v7 = vpop.f32.mrf.mxu1 }
 0xe12   : > { %12259 = vst [vmem:[#allocation37_spill] sm:$0xff] %v11796_v20  ;;  %v11802_v35 = vadd.f32 %v6607_v7, %v6398_v29  ;;  %v9059_v29 = vpop.f32.mrf.mxu0 }
 0xe13   : > { %v9087_v39 = vpop.f32.mrf.mxu1 }
 0xe14   : > { %v11798_v12 = vadd.f32 %v9087_v39, %v9039_v0  ;;  %12261 = vst [vmem:[#allocation39_spill] sm:$0xff] %v11802_v35 }
 0xe15   : > { %v6610_v16 = vpop.f32.mrf.mxu1 }
 0xe16   : > { %12260 = vst [vmem:[#allocation33_spill] sm:$0xff] %v11798_v12  ;;  %v11806_v47 = vadd.f32 %v6610_v16, %v6401_v28 }
 0xe17   : > { %v9090_v6 = vpop.f32.mrf.mxu1 }
 0xe18   : > { %12262 = vst [vmem:[#allocation36_spill] sm:$0xff] %v11806_v47  ;;  %v11812_v46 = vadd.f32 %v9090_v6, %v9042_v48  ;;  %v6481_v48 = vpop.f32.mrf.mxu0 }
 0xe19   : > { %v6623_v59 = vpop.f32.mrf.mxu1 }
 0xe1a   : > { %v11818_v15 = vadd.f32 %v6623_v59, %v6414_v62 }
 0xe1b   : > { %v9091_v21 = vpop.f32.mrf.mxu1 }
 0xe1c   : > { %v11814_v34 = vadd.f32 %v9091_v21, %v9043_v50 }
 0xe1d   : > { %v6626_v23 = vpop.f32.mrf.mxu1 }
 0xe1e   : > { %v11822_v38 = vadd.f32 %v6626_v23, %v6417_v63  ;;  %v9062_v63 = vpop.f32.mrf.mxu0 }
 0xe1f   : > { %v9094_v3 = vpop.f32.mrf.mxu1 }
 0xe20   : > { %v6494_v39 = vpop.f32.mrf.mxu0 }
 0xe21   : > { %v6639_v41 = vpop.f32.mrf.mxu1 }
 0xe22   : > { %v9063_v59 = vpop.f32.mrf.mxu0 }
 0xe23   : > { %v9095_v53 = vpop.f32.mrf.mxu1 }
 0xe24   : > { %v6497_v4 = vpop.f32.mrf.mxu0 }
 0xe25   : > { %v6642_v31 = vpop.f32.mrf.mxu1 }
 0xe26   : > { %v9066_v51 = vpop.f32.mrf.mxu0 }
 0xe27   : > { %v9098_v61 = vpop.f32.mrf.mxu1 }
 0xe28   : > { %v6510_v25 = vpop.f32.mrf.mxu0  ;;  %v6664_v19 = vadd.f32 %v9098_v61, %v11788_v27 }
 0xe29   : > { %v6655_v0 = vpop.f32.mrf.mxu1 }
 0xe2a   : > { %v9067_v40 = vpop.f32.mrf.mxu0  ;;  %v6656_v12 = vadd.f32 %v6655_v0, %v11790_v18 }
 0xe2b   : > { %v9099_v28 = vpop.f32.mrf.mxu1 }
 0xe2c   : > { %v6667_v5 = vadd.f32 %v9099_v28, %v9051_v9  ;;  %v6513_v14 = vpop.f32.mrf.mxu0 }
 0xe2d   : > { %v6658_v62 = vpop.f32.mrf.mxu1 }
 0xe2e   : > { %v6741_v33 = vpack.c.bf16 %v6667_v5, %v6664_v19  ;;  %v6659_v35 = vadd.f32 %v6658_v62, %v11792_v36  ;;  %v6643_v19 = vadd.f32 %v6642_v31, %v11786_v54  ;;  %v12264_v54 = vpack.c.bf16 %v11822_v38, %v11818_v15  ;;  %v9519_v15 = vld [vmem:[%s10248_s30 + $0x30] ss:$8 sps:$4 sm:$0xff]   ;;  %v9521_v38 = vld [vmem:[%s10248_s30 + $0x40] ss:$8 sps:$4 sm:$0xff]  }
 0xe2f   : > { %v11830_v50 = vpop.f32.mrf.mxu1  ;;  %v7053_v31 = vld [vmem:[%s12035_s16] sm:$0xf] }
 0xe30   : > { %9190 = vmatprep.subr.msk.bf16.mxu1 %vm1269_vm1, %v7053_v31  ;;  %v7086_v61 = vsel %vm1269_vm1, %v7053_v31, 0 }
 0xe31   : > { %v11832_v55 = vpop.f32.mrf.mxu1  ;;  %9135 = vmatpush3.bf16.msra.mxu1 %v7086_v61 }
 0xe32   : > { %v6672_v18 = vadd.f32 %v11832_v55, %v11800_v49  ;;  %v9515_v49 = vld [vmem:[%s10248_s30 + $0x10] ss:$8 sps:$4 sm:$0xff]  }
 0xe33   : > { %v9103_v7 = vpop.f32.mrf.mxu1 }
 0xe35   : > { %v11834_v16 = vpop.f32.mrf.mxu1 }
 0xe37   : > { %v9106_v6 = vpop.f32.mrf.mxu1 }
 0xe39   : > { %v6687_v21 = vpop.f32.mrf.mxu1 }
 0xe3b   : > { %v9107_v23 = vpop.f32.mrf.mxu1 }
 0xe3d   : > { %v6690_v37 = vpop.f32.mrf.mxu1 }
 0xe3f   : > { %v9110_v11 = vpop.f32.mrf.mxu1 }
 0xe40   : > { %v6712_v9 = vadd.f32 %v9110_v11, %v9062_v63  ;;  %v9523_v11 = vld [vmem:[%s10248_s30 + $0x50] ss:$8 sps:$4 sm:$0xff]   ;;  %v12271_v63 = vld [vmem:[#allocation34_spill] sm:$0xff] }
 0xe41   : > { %v6703_v45 = vpop.f32.mrf.mxu1 }
 0xe43   : > { %v9111_v17 = vpop.f32.mrf.mxu1 }
 0xe44   : > { %v6715_v47 = vadd.f32 %v9111_v17, %v9063_v59  ;;  %v11888_v59 = vld [vmem:[%s12034_s15 + $0x2] ss:$0 sm:$0xff] }
 0xe45   : > { %v6706_v60 = vpop.f32.mrf.mxu1 }
 0xe46   : > { %v6707_v27 = vadd.f32 %v6706_v60, %v6497_v4  ;;  %v6688_v60 = vadd.f32 %v6687_v21, %v11828_v8  ;;  %v9513_v4 = vld [vmem:[%s10248_s30] ss:$8 sps:$4 sm:$0xff]   ;;  %v9527_v8 = vld [vmem:[%s10248_s30 + $0x70] ss:$8 sps:$4 sm:$0xff]  }
 0xe47   : > { %v9114_v30 = vpop.f32.mrf.mxu1 }
 0xe48   : > { %v6728_v57 = vadd.f32 %v9114_v30, %v9066_v51  ;;  %v6651_v30 = vadd.f32 %v9095_v53, %v11784_v42  ;;  %v6675_v42 = vadd.f32 %v11834_v16, %v11816_v32  ;;  %v9518_v32 = vld [vmem:[%s10248_s30 + $0x34] ss:$8 sps:$4 sm:$0xff]   ;;  %v9520_v51 = vld [vmem:[%s10248_s30 + $0x44] ss:$8 sps:$4 sm:$0xff]  }
 0xe49   : > { %v6719_v43 = vpop.f32.mrf.mxu1  ;;  %v9526_v53 = vld [vmem:[%s10248_s30 + $0x74] ss:$8 sps:$4 sm:$0xff]  }
 0xe4a   : > { %v6720_v2 = vadd.f32 %v6719_v43, %v6510_v25  ;;  %v6648_v25 = vadd.f32 %v9094_v3, %v11780_v26  ;;  %v6640_v43 = vadd.f32 %v6639_v41, %v11782_v1  ;;  %v6680_v26 = vadd.f32 %v11830_v50, %v11794_v22  ;;  %v9522_v3 = vld [vmem:[%s10248_s30 + $0x54] ss:$8 sps:$4 sm:$0xff]   ;;  %v9525_v41 = vld [vmem:[%s10248_s30 + $0x60] ss:$8 sps:$4 sm:$0xff]  }
 0xe4b   : > { %v9115_v52 = vpop.f32.mrf.mxu1  ;;  %v6742_v36 = vpack.c.bf16 %v6675_v42, %v6672_v18 }
 0xe4c   : > { %v6731_v56 = vadd.f32 %v9115_v52, %v9067_v40  ;;  %v6740_v52 = vpack.c.bf16 %v6659_v35, %v6656_v12  ;;  %v6747_v40 = vpack.c.bf16 %v6715_v47, %v6712_v9  ;;  %v6739_v5 = vpack.c.bf16 %v6651_v30, %v6648_v25  ;;  %v12266_v12 = vld [vmem:[#allocation37_spill] sm:$0xff]  ;;  %v12268_v35 = vld [vmem:[#allocation36_spill] sm:$0xff] }
 0xe4d   : > { %v6722_v13 = vpop.f32.mrf.mxu1  ;;  %v6738_v17 = vpack.c.bf16 %v6643_v19, %v6640_v43  ;;  %v12273_v19 = vld [vmem:[#allocation30_spill] sm:$0xff] }
 0xe4e   : > { %v6749_v44 = vpack.c.bf16 %v6731_v56, %v6728_v57  ;;  %v6723_v24 = vadd.f32 %v6722_v13, %v6513_v14  ;;  %v6704_v14 = vadd.f32 %v6703_v45, %v6494_v39  ;;  %v6683_v45 = vadd.f32 %v9103_v7, %v11810_v10  ;;  %v9514_v10 = vld [vmem:[%s10248_s30 + $0x14] ss:$8 sps:$4 sm:$0xff]  }
 0xe4f   : > { %v12263_v13 = vpack.c.bf16 %v11814_v34, %v11812_v46  ;;  %v9516_v46 = vld [vmem:[%s10248_s30 + $0x24] ss:$8 sps:$4 sm:$0xff]   ;;  %v9517_v34 = vld [vmem:[%s10248_s30 + $0x20] ss:$8 sps:$4 sm:$0xff]  }
 0xe50   : > { %v6748_v20 = vpack.c.bf16 %v6723_v24, %v6720_v2  ;;  %8291 = vmatprep.subr.bf16.mxu0 %v6749_v44  ;;  %v6699_v24 = vadd.f32 %v9107_v23, %v9059_v29  ;;  %v6746_v44 = vpack.c.bf16 %v6707_v27, %v6704_v14  ;;  %v6691_v2 = vadd.f32 %v6690_v37, %v6481_v48  ;;  %v12269_v37 = vld [vmem:[#allocation39_spill] sm:$0xff]  ;;  %v9120_v29 = vpop.f32.mrf.mxu1 }
 0xe51   : > { %8292 = vmatpush3.bf16.msra.mxu0 %v6741_v33  ;;  %v6696_v33 = vadd.f32 %v9106_v6, %v11826_v58  ;;  %v6743_v1 = vpack.c.bf16 %v6683_v45, %v6680_v26  ;;  %v12270_v47 = vpack.c.bf16 %v12268_v35, %v12269_v37  ;;  %v9524_v58 = vld [vmem:[%s10248_s30 + $0x64] ss:$8 sps:$4 sm:$0xff]   ;;  %v12272_v23 = vld [vmem:[#allocation31_spill] sm:$0xff]  ;;  %v12277_v35 = vld [vmem:[#allocation24_spill] sm:$0xff]  ;;  %s7789_s30 = sshll.u32 %s9720_s2, 7  ;;  %s9528_s2 = scalar_lea.vmem %s11979_s29, 128 }
 0xe52   : > { %8293 = vmatprep.subr.bf16.mxu0 %v6748_v20  ;;  %v6744_v57 = vpack.c.bf16 %v6691_v2, %v6688_v60  ;;  %v12265_v20 = vld [vmem:[#allocation33_spill] sm:$0xff]  ;;  %v6926_v28 = vpop.f32.mrf.mxu1  ;;  %s11977_s28 = scalar_lea.hbm %s12039_s20, %s7789_s30  ;;  %p9529_p11 = scmp.ne.s32.totalorder %s11979_s29, %s9528_s2 }
 0xe53   : > { %v6745_v56 = vpack.c.bf16 %v6699_v24, %v6696_v33  ;;  %v12267_v22 = vpack.c.bf16 %v12265_v20, %v12266_v12  ;;  %v12274_v33 = vld [vmem:[#allocation25_spill] sm:$0xff]  ;;  %p9536_p1 = scmp.lt.s32.totalorder %s9534_s0, %s9528_s2 }
 0xe54   : > { %v9121_v7 = vpop.f32.mrf.mxu1  ;;  %p9530_p12 = pnand %p9529_p11, %p9737_p5 }
 0xe55   : > { %8294 = vmatpush3.bf16.msra.mxu0 %v6740_v52  ;;  %p9537_p2 = por %p9536_p1, %p9535_p0 }
 0xe56   : > { %8295 = vmatprep.subr.bf16.mxu0 %v6747_v40  ;;  %v6929_v30 = vpop.f32.mrf.mxu1  ;;  %p9531_p13 = pneg %p9530_p12 }
 0xe58   : > { %p9538_p3 = pnand %p9537_p2, %p9531_p13 }
 0xe59   : > { %8296 = vmatpush3.bf16.msra.mxu0 %v6739_v5 }
 0xe5a   : > { %8297 = vmatprep.subr.bf16.mxu0 %v6746_v44  ;;  %v9124_v44 = vpop.f32.mrf.mxu1 }
 0xe5c   : > { %v6942_v42 = vpop.f32.mrf.mxu1 }
 0xe5d   : > { %8298 = vmatpush3.bf16.msra.mxu0 %v6738_v17 }
 0xe5e   : > { %8299 = vmatprep.subr.bf16.mxu0 %v6745_v56  ;;  %v12275_v56 = vld [vmem:[#allocation29_spill] sm:$0xff] }
 0xe61   : > { %8300 = vmatpush3.bf16.msra.mxu0 %v12263_v13  ;;  %v12276_v13 = vld [vmem:[#allocation26_spill] sm:$0xff] }
 0xe62   : > { %8301 = vmatprep.subr.bf16.mxu0 %v6744_v57 }
 0xe65   : > { %8302 = vmatpush3.bf16.msra.mxu0 %v12264_v54 }
 0xe66   : > { %8303 = vmatprep.subr.bf16.mxu0 %v6743_v1 }
 0xe69   : > { %8304 = vmatpush3.bf16.msra.mxu0 %v12267_v22 }
 0xe6a   : > { %8305 = vmatprep.subr.bf16.mxu0 %v6742_v36 }
 0xe6d   : > { %8306 = vmatpush3.bf16.msra.mxu0 %v12270_v47  ;;  %v9125_v47 = vpop.f32.mrf.mxu1 }
 0xe70   : > { %6783 = vmatmul.mubr.bf16.vlgmr.msra.gmra.mxu0 %v9513_v4 }
 0xe71   : > { %6790 = vmatprep.mubr.bf16.mxu0 %v9514_v10  ;;  %v12278_v10 = vld [vmem:[#allocation27_spill] sm:$0xff] }
 0xe78   : > { %6791 = vmatmul.mubr.bf16.gmra.mxu0 %v9515_v49 }
 0xe79   : > { %6798 = vmatprep.mubr.bf16.mxu0 %v9516_v46  ;;  %v12279_v46 = vld [vmem:[#allocation35_spill] sm:$0xff] }
 0xe80   : > { %6799 = vmatmul.mubr.bf16.gmra.mxu0 %v9517_v34 }
 0xe81   : > { %6806 = vmatprep.mubr.bf16.mxu0 %v9518_v32 }
 0xe88   : > { %6807 = vmatmul.mubr.bf16.gmra.mxu0 %v9519_v15 }
 0xe89   : > { %6814 = vmatprep.mubr.bf16.mxu0 %v9520_v51 }
 0xe90   : > { %6815 = vmatmul.mubr.bf16.gmra.mxu0 %v9521_v38 }
 0xe91   : > { %6822 = vmatprep.mubr.bf16.mxu0 %v9522_v3  ;;  %v12280_v3 = vld [vmem:[#allocation22_spill] sm:$0xff] }
 0xe98   : > { %6823 = vmatmul.mubr.bf16.gmra.mxu0 %v9523_v11 }
 0xe99   : > { %6830 = vmatprep.mubr.bf16.mxu0 %v9524_v58  ;;  %v6945_v58 = vpop.f32.mrf.mxu1 }
 0xea0   : > { %6831 = vmatmul.mubr.bf16.gmra.mxu0 %v9525_v41 }
 0xea1   : > { %6838 = vmatprep.mubr.bf16.mxu0 %v9526_v53 }
 0xea8   : > { %6839 = vmatmul.mubr.bf16.gmra.mxu0 %v9527_v8 }
 0xf30   : > { %v8307_v0 = vpop.f32.mrf.mxu0 }
 0xf32   : > { %v8308_v48 = vpop.f32.mrf.mxu0 }
 0xf33   : > { %v8309_v62 = vadd.f32 %v8308_v48, %v8307_v0  ;;  %v12281_v0 = vld [vmem:[#allocation21_spill] sm:$0xff]  ;;  %v9128_v48 = vpop.f32.mrf.mxu1 }
 0xf34   : > { %v8310_v50 = vpop.f32.mrf.mxu0 }
 0xf35   : > { %v6847_v55 = vmul.f32 %v8309_v62, %v12271_v63 }
 0xf36   : > { %v8311_v39 = vpop.f32.mrf.mxu0 }
 0xf37   : > { %v6989_v16 = vadd.f32 %v6926_v28, %v6847_v55  ;;  %v8312_v6 = vadd.f32 %v8311_v39, %v8310_v50  ;;  %v12282_v50 = vld [vmem:[#allocation23_spill] sm:$0xff]  ;;  %v12283_v55 = vld [vmem:[#allocation32_spill] sm:$0xff] }
 0xf38   : > { %v8313_v21 = vpop.f32.mrf.mxu0 }
 0xf39   : > { %v6848_v9 = vmul.f32 %v8312_v6, %v12272_v23  ;;  %v7013_v40 = vadd.f32 %v11888_v59, %v6989_v16 }
 0xf3a   : > { %v8314_v52 = vpop.f32.mrf.mxu0 }
 0xf3b   : > { %v6990_v27 = vadd.f32 %v6929_v30, %v6848_v9  ;;  %v8315_v25 = vadd.f32 %v8314_v52, %v8313_v21  ;;  %v7029_v17 = vadd.f32 %v7013_v40, %v12274_v33  ;;  %v12284_v21 = vld [vmem:[#allocation20_spill] sm:$0xff]  ;;  %v6958_v30 = vpop.f32.mrf.mxu1 }
 0xf3c   : > { %v8316_v14 = vpop.f32.mrf.mxu0  ;;  %v12286_v33 = vld [vmem:[#allocation48_spill] sm:$0xff] }
 0xf3d   : > { %v7014_v5 = vadd.f32 %v11888_v59, %v6990_v27  ;;  %v6849_v24 = vmul.f32 %v8315_v25, %v12273_v19  ;;  %v12285_v19 = vld [vmem:[#allocation14_spill] sm:$0xff] }
 0xf3e   : > { %v8317_v43 = vpop.f32.mrf.mxu0 }
 0xf3f   : > { %v7030_v2 = vadd.f32 %v7014_v5, %v12275_v56  ;;  %v6991_v60 = vadd.f32 %v9120_v29, %v6849_v24  ;;  %v8318_v45 = vadd.f32 %v8317_v43, %v8316_v14  ;;  %v9129_v43 = vpop.f32.mrf.mxu1  ;;  %v12287_v56 = vld [vmem:[#allocation28_spill] sm:$0xff] }
 0xf40   : > { %v8319_v57 = vpop.f32.mrf.mxu0 }
 0xf41   : > { %v6850_v26 = vmul.f32 %v8318_v45, %v12276_v13  ;;  %v7045_v1 = vpack.c.bf16 %v7030_v2, %v7029_v17  ;;  %v7015_v18 = vadd.f32 %v11888_v59, %v6991_v60 }
 0xf42   : > { %v8320_v54 = vpop.f32.mrf.mxu0 }
 0xf43   : > { %v6992_v36 = vadd.f32 %v9121_v7, %v6850_v26  ;;  %v8321_v20 = vadd.f32 %v8320_v54, %v8319_v57  ;;  %9136 = vmatprep.mubr.msk.bf16.mxu1 %vm821_vm0, %v7045_v1  ;;  %v7031_v49 = vadd.f32 %v7015_v18, %v12278_v10  ;;  %v12288_v26 = vld [vmem:[#allocation15_spill] sm:$0xff]  ;;  %v12290_v10 = vld [vmem:[#allocation44_spill] sm:$0xff] }
 0xf44   : > { %v8322_v12 = vpop.f32.mrf.mxu0 }
 0xf45   : > { %v7016_v22 = vadd.f32 %v11888_v59, %v6992_v36  ;;  %v6851_v37 = vmul.f32 %v8321_v20, %v12277_v35  ;;  %v12289_v35 = vld [vmem:[#allocation18_spill] sm:$0xff] }
 0xf46   : > { %v8323_v4 = vpop.f32.mrf.mxu0 }
 0xf47   : > { %v7032_v34 = vadd.f32 %v7016_v22, %v12279_v46  ;;  %v6993_v32 = vadd.f32 %v6942_v42, %v6851_v37  ;;  %v8324_v15 = vadd.f32 %v8323_v4, %v8322_v12  ;;  %v6961_v42 = vpop.f32.mrf.mxu1  ;;  %v12291_v46 = vld [vmem:[#allocation47_spill] sm:$0xff] }
 0xf48   : > { %v8325_v51 = vpop.f32.mrf.mxu0 }
 0xf49   : > { %v7046_v38 = vpack.c.bf16 %v7032_v34, %v7031_v49  ;;  %v6852_v11 = vmul.f32 %v8324_v15, %v12280_v3  ;;  %v7017_v53 = vadd.f32 %v11888_v59, %v6993_v32 }
 0xf4a   : > { %v8326_v41 = vpop.f32.mrf.mxu0 }
 0xf4b   : > { %v6994_v8 = vadd.f32 %v6945_v58, %v6852_v11  ;;  %v8327_v31 = vadd.f32 %v8326_v41, %v8325_v51  ;;  %9137 = vmatmul.mubr.msk.bf16.vlgmr.msra.gmra.mxu1 %vm821_vm0, %v7046_v38  ;;  %v7033_v63 = vadd.f32 %v7017_v53, %v12282_v50  ;;  %v12292_v38 = vld [vmem:[#allocation12_spill] sm:$0xff]  ;;  %v12294_v50 = vld [vmem:[#allocation45_spill] sm:$0xff] }
 0xf4c   : > { %v8328_v61 = vpop.f32.mrf.mxu0 }
 0xf4d   : > { %v7018_v29 = vadd.f32 %v11888_v59, %v6994_v8  ;;  %v6853_v28 = vmul.f32 %v8327_v31, %v12281_v0  ;;  %v12293_v0 = vld [vmem:[#allocation19_spill] sm:$0xff] }
 0xf4e   : > { %v8329_v62 = vpop.f32.mrf.mxu0 }
 0xf4f   : > { %v7034_v7 = vadd.f32 %v7018_v29, %v12283_v55  ;;  %v6995_v39 = vadd.f32 %v9124_v44, %v6853_v28  ;;  %v8330_v16 = vadd.f32 %v8329_v62, %v8328_v61  ;;  %v12295_v55 = vld [vmem:[#allocation46_spill] sm:$0xff] }
 0xf50   : > { %v8331_v6 = vpop.f32.mrf.mxu0 }
 0xf51   : > { %v6854_v23 = vmul.f32 %v8330_v16, %v12284_v21  ;;  %v7047_v9 = vpack.c.bf16 %v7034_v7, %v7033_v63  ;;  %v7019_v40 = vadd.f32 %v11888_v59, %v6995_v39 }
 0xf52   : > { %v8332_v52 = vpop.f32.mrf.mxu0 }
 0xf53   : > { %v6996_v27 = vadd.f32 %v9125_v47, %v6854_v23  ;;  %v8333_v25 = vadd.f32 %v8332_v52, %v8331_v6  ;;  %9140 = vmatprep.mubr.msk.bf16.mxu1 %vm821_vm0, %v7047_v9  ;;  %v7035_v17 = vadd.f32 %v7019_v40, %v12286_v33  ;;  %v9132_v47 = vpop.f32.mrf.mxu1  ;;  %v12296_v23 = vld [vmem:[#allocation13_spill] sm:$0xff] }
 0xf54   : > { %v8334_v14 = vpop.f32.mrf.mxu0 }
 0xf55   : > { %v7020_v5 = vadd.f32 %v11888_v59, %v6996_v27  ;;  %v6855_v24 = vmul.f32 %v8333_v25, %v12285_v19  ;;  %v6974_v58 = vpop.f32.mrf.mxu1  ;;  %v12297_v19 = vld [vmem:[#allocation16_spill] sm:$0xff] }
 0xf56   : > { %v8335_v44 = vpop.f32.mrf.mxu0 }
 0xf57   : > { %v7036_v2 = vadd.f32 %v7020_v5, %v12287_v56  ;;  %v6997_v60 = vadd.f32 %v6958_v30, %v6855_v24  ;;  %v8336_v45 = vadd.f32 %v8335_v44, %v8334_v14  ;;  %v9133_v62 = vpop.f32.mrf.mxu1  ;;  %v12298_v44 = vld [vmem:[#allocation49_spill] sm:$0xff] }
 0xf58   : > { %v8337_v57 = vpop.f32.mrf.mxu0 }
 0xf59   : > { %v7048_v13 = vpack.c.bf16 %v7036_v2, %v7035_v17  ;;  %v6856_v1 = vmul.f32 %v8336_v45, %v12288_v26  ;;  %v7021_v18 = vadd.f32 %v11888_v59, %v6997_v60  ;;  %v6977_v30 = vpop.f32.mrf.mxu1  ;;  %v12299_v17 = vld [vmem:[#allocation50_spill] sm:$0xff]  ;;  %v12300_v45 = vld [vmem:[#allocation17_spill] sm:$0xff] }
 0xf5a   : > { %v8338_v54 = vpop.f32.mrf.mxu0 }
 0xf5b   : > { %v6998_v36 = vadd.f32 %v6961_v42, %v6856_v1  ;;  %v8339_v20 = vadd.f32 %v8338_v54, %v8337_v57  ;;  %9141 = vmatmul.mubr.msk.bf16.gmra.mxu1 %vm821_vm0, %v7048_v13  ;;  %v7037_v49 = vadd.f32 %v7021_v18, %v12290_v10  ;;  %v12301_v54 = vld [vmem:[#allocation52_spill] sm:$0xff] }
 0xf5c   : > { %v8340_v12 = vpop.f32.mrf.mxu0 }
 0xf5d   : > { %v7022_v22 = vadd.f32 %v11888_v59, %v6998_v36  ;;  %v6857_v37 = vmul.f32 %v8339_v20, %v12289_v35  ;;  %v12302_v36 = vld [vmem:[#allocation51_spill] sm:$0xff] }
 0xf5e   : > { %v8341_v4 = vpop.f32.mrf.mxu0 }
 0xf5f   : > { %v7038_v34 = vadd.f32 %v7022_v22, %v12291_v46  ;;  %v6999_v32 = vadd.f32 %v9128_v48, %v6857_v37  ;;  %v8342_v15 = vadd.f32 %v8341_v4, %v8340_v12  ;;  %v9591_v22 = vmov 0.0  }
 0xf60   : > { %v8343_v51 = vpop.f32.mrf.mxu0  ;;  %9152 = vmatprep.subr.bf16.mxu0 %v9591_v22  ;;  %9168 = vmatprep.mubr.msk.bf16.mxu0 %vm9592_vm6, %v9591_v22 }
 0xf61   : > { %v6858_v3 = vmul.f32 %v8342_v15, %v12292_v38  ;;  %v7049_v11 = vpack.c.bf16 %v7038_v34, %v7037_v49  ;;  %v7023_v53 = vadd.f32 %v11888_v59, %v6999_v32 }
 0xf62   : > { %v8344_v41 = vpop.f32.mrf.mxu0 }
 0xf63   : > { %v7000_v8 = vadd.f32 %v9129_v43, %v6858_v3  ;;  %v8345_v31 = vadd.f32 %v8344_v41, %v8343_v51  ;;  %9144 = vmatprep.mubr.msk.bf16.mxu1 %vm821_vm0, %v7049_v11  ;;  %v7039_v63 = vadd.f32 %v7023_v53, %v12294_v50  ;;  %v7777_v11 = vld [vmem:[%s12036_s17] ss:$0 sm:$0xff] }
 0xf64   : > { %v8346_v61 = vpop.f32.mrf.mxu0 }
 0xf65   : > { %v7024_v29 = vadd.f32 %v11888_v59, %v7000_v8  ;;  %v6859_v28 = vmul.f32 %v8345_v31, %v12293_v0 }
 0xf66   : > { %v8347_v48 = vpop.f32.mrf.mxu0 }
 0xf67   : > { %v7040_v7 = vadd.f32 %v7024_v29, %v12295_v55  ;;  %v7001_v39 = vadd.f32 %v6974_v58, %v6859_v28  ;;  %v8348_v16 = vadd.f32 %v8347_v48, %v8346_v61 }
 0xf68   : > { %v8349_v6 = vpop.f32.mrf.mxu0 }
 0xf69   : > { %v7050_v21 = vpack.c.bf16 %v7040_v7, %v7039_v63  ;;  %v6860_v9 = vmul.f32 %v8348_v16, %v12296_v23  ;;  %v7025_v40 = vadd.f32 %v11888_v59, %v7001_v39 }
 0xf6a   : > { %v8350_v52 = vpop.f32.mrf.mxu0 }
 0xf6b   : > { %v7002_v27 = vadd.f32 %v6977_v30, %v6860_v9  ;;  %v8351_v25 = vadd.f32 %v8350_v52, %v8349_v6  ;;  %9145 = vmatmul.mubr.msk.bf16.gmra.mxu1 %vm821_vm0, %v7050_v21  ;;  %v7041_v33 = vadd.f32 %v7025_v40, %v12298_v44 }
 0xf6c   : > { %v8352_v14 = vpop.f32.mrf.mxu0 }
 0xf6d   : > { %v7026_v5 = vadd.f32 %v11888_v59, %v7002_v27  ;;  %v6861_v24 = vmul.f32 %v8351_v25, %v12297_v19 }
 0xf6e   : > { %v8353_v43 = vpop.f32.mrf.mxu0 }
 0xf6f   : > { %v7042_v56 = vadd.f32 %v7026_v5, %v12299_v17  ;;  %v7003_v2 = vadd.f32 %v9132_v47, %v6861_v24  ;;  %v8354_v60 = vadd.f32 %v8353_v43, %v8352_v14  ;;  %v7185_v14 = vld [vmem:[%s12024_s5] sm:$0xf] }
 0xf70   : > { %v7239_v5 = vld [vmem:[%s12037_s18] sm:$0xf] }
 0xf71   : > { %v6862_v57 = vmul.f32 %v8354_v60, %v12300_v45  ;;  %v7051_v13 = vpack.c.bf16 %v7042_v56, %v7041_v33  ;;  %v7027_v26 = vadd.f32 %v11888_v59, %v7003_v2  ;;  %v7251_v19 = vsel %vm1269_vm1, %v7239_v5, 0  ;;  %v7786_v45 = vld [vmem:[%s12038_s19] ss:$0 sm:$0xff] }
 0xf73   : > { %v7004_v1 = vadd.f32 %v9133_v62, %v6862_v57  ;;  %9148 = vmatprep.mubr.msk.bf16.mxu1 %vm821_vm0, %v7051_v13  ;;  %v7043_v18 = vadd.f32 %v7027_v26, %v12301_v54 }
 0xf75   : > { %v7028_v42 = vadd.f32 %v11888_v59, %v7004_v1 }
 0xf77   : > { %v7044_v20 = vadd.f32 %v7028_v42, %v12302_v36 }
 0xf79   : > { %v7052_v12 = vpack.c.bf16 %v7044_v20, %v7043_v18 }
 0xf7b   : > { %9149 = vmatmul.mubr.msk.bf16.gmra.mxu1 %vm821_vm0, %v7052_v12 }
0x100b   : > { %v9138_v35 = vpop.f32.mrf.mxu1 }
0x100c   : > { %v7131_v30 = vadd.f32 %v9138_v35, %v7777_v11 }
0x100d   : > { %v7122_v37 = vpop.f32.mrf.mxu1 }
0x100e   : > { %v7123_v27 = vadd.f32 %v7777_v11, %v7122_v37 }
0x100f   : > { %v9139_v47 = vpop.f32.mrf.mxu1 }
0x1010   : > { %v7134_v23 = vadd.f32 %v9139_v47, %v7777_v11 }
0x1011   : > { %v7125_v4 = vpop.f32.mrf.mxu1 }
0x1012   : > { %v7187_v52 = vpack.c.bf16 %v7134_v23, %v7131_v30  ;;  %v7126_v40 = vadd.f32 %v7777_v11, %v7125_v4 }
0x1014   : > { %v7186_v25 = vpack.c.bf16 %v7126_v40, %v7123_v27 }
0x101b   : > { %v9142_v10 = vpop.f32.mrf.mxu1 }
0x101c   : > { %v7147_v39 = vadd.f32 %v9142_v10, %v7777_v11 }
0x101d   : > { %v7138_v59 = vpop.f32.mrf.mxu1 }
0x101e   : > { %v7139_v21 = vadd.f32 %v7777_v11, %v7138_v59 }
0x101f   : > { %v9143_v49 = vpop.f32.mrf.mxu1 }
0x1020   : > { %v7150_v55 = vadd.f32 %v9143_v49, %v7777_v11 }
0x1021   : > { %v7141_v46 = vpop.f32.mrf.mxu1 }
0x1022   : > { %v7189_v16 = vpack.c.bf16 %v7150_v55, %v7147_v39  ;;  %v7142_v6 = vadd.f32 %v7777_v11, %v7141_v46 }
0x1024   : > { %v7188_v9 = vpack.c.bf16 %v7142_v6, %v7139_v21 }
0x102b   : > { %v9146_v34 = vpop.f32.mrf.mxu1 }
0x102c   : > { %v7163_v62 = vadd.f32 %v9146_v34, %v7777_v11 }
0x102d   : > { %v7154_v32 = vpop.f32.mrf.mxu1 }
0x102e   : > { %v7155_v63 = vadd.f32 %v7777_v11, %v7154_v32 }
0x102f   : > { %v9147_v15 = vpop.f32.mrf.mxu1 }
0x1030   : > { %v7166_v0 = vadd.f32 %v9147_v15, %v7777_v11 }
0x1031   : > { %v7157_v51 = vpop.f32.mrf.mxu1 }
0x1032   : > { %v7191_v48 = vpack.c.bf16 %v7166_v0, %v7163_v62  ;;  %v7158_v50 = vadd.f32 %v7777_v11, %v7157_v51 }
0x1034   : > { %v7190_v7 = vpack.c.bf16 %v7158_v50, %v7155_v63 }
0x103b   : > { %v9150_v38 = vpop.f32.mrf.mxu1 }
0x103c   : > { %v7179_v41 = vadd.f32 %v9150_v38, %v7777_v11 }
0x103d   : > { %v7170_v3 = vpop.f32.mrf.mxu1 }
0x103e   : > { %v7171_v29 = vadd.f32 %v7777_v11, %v7170_v3 }
0x103f   : > { %v9151_v58 = vpop.f32.mrf.mxu1 }
0x1040   : > { %v7182_v53 = vadd.f32 %v9151_v58, %v7777_v11 }
0x1041   : > { %v7173_v8 = vpop.f32.mrf.mxu1 }
0x1042   : > { %v7193_v31 = vpack.c.bf16 %v7182_v53, %v7179_v41  ;;  %v7174_v61 = vadd.f32 %v7777_v11, %v7173_v8 }
0x1044   : > { %9153 = vmatpush3.bf16.msra.mxu0 %v7193_v31  ;;  %v7192_v28 = vpack.c.bf16 %v7174_v61, %v7171_v29 }
0x1045   : > { %9154 = vmatprep.subr.bf16.mxu0 %v9591_v22 }
0x1048   : > { %9155 = vmatpush3.bf16.msra.mxu0 %v7192_v28 }
0x1049   : > { %9156 = vmatprep.subr.bf16.mxu0 %v9591_v22 }
0x104c   : > { %9157 = vmatpush3.bf16.msra.mxu0 %v7191_v48 }
0x104d   : > { %9158 = vmatprep.subr.bf16.mxu0 %v9591_v22 }
0x1050   : > { %9159 = vmatpush3.bf16.msra.mxu0 %v7190_v7 }
0x1051   : > { %9160 = vmatprep.subr.bf16.mxu0 %v9591_v22 }
0x1054   : > { %9161 = vmatpush3.bf16.msra.mxu0 %v7189_v16 }
0x1055   : > { %9162 = vmatprep.subr.bf16.mxu0 %v9591_v22 }
0x1058   : > { %9163 = vmatpush3.bf16.msra.mxu0 %v7188_v9 }
0x1059   : > { %9164 = vmatprep.subr.bf16.mxu0 %v9591_v22 }
0x105c   : > { %9165 = vmatpush3.bf16.msra.mxu0 %v7187_v52 }
0x105d   : > { %9166 = vmatprep.subr.bf16.mxu0 %v9591_v22 }
0x1060   : > { %9167 = vmatpush3.bf16.msra.mxu0 %v7186_v25 }
0x1061   : > { %9172 = vmatprep.subr.bf16.mxu0 %v9591_v22 }
0x1063   : > { %9169 = vmatmul.mubr.bf16.vlgmr.msra.gmra.mxu0 %v7185_v14 }
0x1064   : > { %9174 = vmatprep.mubr.msk.bf16.mxu0 %vm9592_vm6, %v9591_v22  ;;  %9173 = vmatpush3.bf16.msra.mxu0 %v7251_v19 }
0x1123   : > { %v7228_v24 = vpop.f32.mrf.mxu0 }
0x1124   : > { %v7234_v43 = vmul.f32 0.0625, %v7228_v24 }
0x1125   : > { %v9170_v44 = vpop.f32.mrf.mxu0 }
0x1126   : > { %vm7235_vm3 = vcmp.gt.f32.partialorder %v7234_v43, 0.0  ;;  %v7236_v33 = vmul.f32 0.01, %v7234_v43 }
0x1127   : > { %v7231_v17 = vpop.f32.mrf.mxu0 }
0x1128   : > { %v7237_v56 = vsel %vm7235_vm3, %v7234_v43, %v7236_v33 }
0x1129   : > { %v7238_v2 = vpack.c.bf16 %v7237_v56, %v7237_v56  ;;  %v9171_v60 = vpop.f32.mrf.mxu0 }
0x112b   : > { %9175 = vmatmul.mubr.msk.bf16.vlgmr.msra.gmra.mxu0 %vm821_vm0, %v7238_v2 }
0x11eb   : > { %v7287_v57 = vpop.f32.mrf.mxu0 }
0x11ec   : > { %v7288_v13 = vadd.f32 %v7786_v45, %v7287_v57 }
0x11ed   : > { %v9176_v26 = vpop.f32.mrf.mxu0 }
0x11ee   : > { %7293 = vst.msk [vmem:[%s682_s24] sm:$0xff] %vm821_vm0, %v7288_v13 }
0x11ef   : > { %v7290_v1 = vpop.f32.mrf.mxu0 }
0x11f0   : > { %9541 = shalt.err (!%p9538_p3)
}
0x11f1   : > { %s9542_s1 = scalar_lea.hbm %s11977_s28, 128  ;;  %s9546_s24 = scalar_lea.hbm %s12039_s20, 256 }
0x11f2   : > { %p9543_p4 = scmp.ne.s32.totalorder %s11977_s28, %s9542_s1  ;;  %p9547_p9 = scmp.lt.s32.totalorder %s11977_s28, %s12039_s20 }
0x11f3   : > { %p9548_p10 = scmp.lt.s32.totalorder %s9546_s24, %s9542_s1 }
0x11f4   : > { %p9544_p7 = pnand %p9543_p4, %p9737_p5 }
0x11f5   : > { %p9549_p11 = por %p9548_p10, %p9547_p9 }
0x11f6   : > { %p9545_p8 = pneg %p9544_p7 }
0x11f8   : > { %p9550_p12 = pnand %p9549_p11, %p9545_p8 }
0x11fa   : > { %9553 = shalt.err (!%p9550_p12)
}
0x11fb   : > { %9191 = dma.vmem_to_hbm [thread:$0]  (%p9737_p5), %s11979_s29, 128, %s11977_s28, %s7295_s21   ;;  %v9177_v42 = vpop.f32.mrf.mxu0 }
0x11fc PF: > { %s12303_s2 = sld [smem:[#allocation7_spill]] }
0x11fd   : > { %s12304_s25 = sld [smem:[#allocation5_spill]] }
0x1202   : > { %p9197_p13 = scmp.ge.s32.totalorder %s12303_s2, 2 }
0x1203   : > { %s7320_s0 = sand.u32 1, %s12304_s25  }
0x1204   : > { %p9194_p0 = pnand %p9197_p13, %p9741_p6  ;;  %s7321_s23 = scalar_lea.sflag [#allocation3], %s7320_s0 }
0x1206   : > { %p9195_p1 = pneg %p9194_p0 }
0x1208   : > { %9571 = dma.done.wait (%p9195_p1), %s7321_s23, 128  }
0x1209   : > { %9573 = vsyncadd (%p9195_p1), %s7321_s23, 4294967168  ;;  %s12306_s24 = sld [smem:[#allocation8_spill]]  ;;  %s12309_s1 = smov %s9580_s22 }
0x120a   : > { %s12307_s30 = sld [smem:[#allocation6_spill]] }
0x120b   : > { %s12308_s23 = sld [smem:[#allocation9_spill]] }
0x120f   : > { %p30_p2 = scmp.ge.s32.totalorder %s12306_s24, 4  }
0x1210   : > { %s12310_s22 = smov %s12307_s30 }
0x1211   :  { %32 = sbr.rel (!%p30_p2) target bundleno = 9 (0x9), region = 163 }
0x1216   :  { %7326 = vsyncpa [#allocation3], 1 }
0x1217   :  { %7328 = vsyncpa [#allocation3 + $0x1], 1 }

</bundles_post_ra>
